<compile_context>
chip_gen: v6e
topology: v6e:2x2x1
jax: 0.10.0
libtpu: 0.0.40
codegen_flags: <defaults>
</compile_context>

<pallas_src>
import functools

import jax
import jax.numpy as jnp
from jax import lax
from jax.experimental import pallas as pl
from jax.experimental.pallas import tpu as pltpu

WARMUP = 5  # reference: `if t < 5: net = frames[:, t]`


# ----------------------------------------------------------------------------
# Fused Pallas kernel: all layers + all gates + conv_last for one (b, t) step
# ----------------------------------------------------------------------------
def _make_fused_kernel(num_layers, layer_dims, H, W, C):
    """Builds the fused per-(batch, time-step) kernel.

    layer_dims: tuple of (Cin_l, Ch_l) per layer.
    Refs (in order):
      inputs : frame (1,1,H,W,C) f32, mask (1,1,H,W,C) f32,
               per-layer stacked weights (9, Ch_l+Cin_l, 4*Ch_l) bf16,
               w_last (Ch_last, C) bf16
      output : next_frame (1,1,H,W,C) f32
      scratch: per-layer padded concat(h, x) buffer (H+2, W+2, Ch_l+Cin_l) f32,
               per-layer cell state (H*W, Ch_l) f32,
               x_gen carry (H, W, C) f32
    """

    def kernel(*refs):
        frame_ref = refs[0]
        mask_ref = refs[1]
        w_refs = refs[2:2 + num_layers]
        w_last_ref = refs[2 + num_layers]
        out_ref = refs[3 + num_layers]
        scratch = refs[4 + num_layers:]
        pad_refs = scratch[:num_layers]
        c_refs = scratch[num_layers:2 * num_layers]
        xgen_ref = scratch[2 * num_layers]

        t = pl.program_id(1)

        # Reset recurrent state at the start of every sequence (every batch
        # element starts again at t == 0).  The zero border of the padded
        # buffers is the conv halo and is never written afterwards.
        @pl.when(t == 0)
        def _init():
            for l in range(num_layers):
                pad_refs[l][...] = jnp.zeros_like(pad_refs[l])
                c_refs[l][...] = jnp.zeros_like(c_refs[l])
            xgen_ref[...] = jnp.zeros_like(xgen_ref)

        # Scheduled-sampling input mix (reference: t < 5 -> ground truth).
        fr = frame_ref[0, 0]                         # (H, W, C) f32
        m = mask_ref[0, 0]                           # (H, W, C) f32
        use_frame = (t < WARMUP).astype(jnp.float32)
        mixed = m * fr + (1.0 - m) * xgen_ref[...]
        x_in = use_frame * fr + (1.0 - use_frame) * mixed

        # Stacked ConvLSTM cells; h/c stay resident in VMEM across time.
        for l in range(num_layers):
            c_in, c_h = layer_dims[l]
            c_cat = c_h + c_in
            pad = pad_refs[l]

            # Channel layout of `pad`: [0:c_h] = h_l (previous step),
            # [c_h:c_h+c_in] = this step's input.  Write the new input; the
            # conv below must still see the *old* h_l.
            pad[1:H + 1, 1:W + 1, c_h:c_h + c_in] = x_in

            # 3x3 "same" conv of concat(h, x): 9 shifted matmuls on the MXU
            # (bf16 operands, f32 accumulation).
            acc = None
            for k in range(9):
                dy, dx = k // 3, k % 3
                patch = pad[dy:dy + H, dx:dx + W, :].reshape(H * W, c_cat)
                part = jnp.dot(patch.astype(jnp.bfloat16), w_refs[l][k],
                               preferred_element_type=jnp.float32)
                acc = part if acc is None else acc + part

            # Gate order follows torch.split(..., num_hidden, dim=1): i,f,g,o.
            i_t = jax.nn.sigmoid(acc[:, 0 * c_h:1 * c_h])
            f_t = jax.nn.sigmoid(acc[:, 1 * c_h:2 * c_h])
            g_t = jnp.tanh(acc[:, 2 * c_h:3 * c_h])
            o_t = jax.nn.sigmoid(acc[:, 3 * c_h:4 * c_h])

            c_new = f_t * c_refs[l][...] + i_t * g_t
            h_new = o_t * g_t   # NOTE: matches the reference (o*g, not o*tanh(c))
            c_refs[l][...] = c_new

            h_img = h_new.reshape(H, W, c_h)
            pad[1:H + 1, 1:W + 1, 0:c_h] = h_img   # becomes h_{t} for step t+1
            x_in = h_img                           # feeds the next layer

        # Fused 1x1 output projection (model-level conv_last).
        c_h_last = layer_dims[-1][1]
        x_gen = jnp.dot(x_in.reshape(H * W, c_h_last).astype(jnp.bfloat16),
                        w_last_ref[...], preferred_element_type=jnp.float32)
        x_gen = x_gen.reshape(H, W, C)
        xgen_ref[...] = x_gen        # carried to t+1 for the t >= WARMUP mix
        out_ref[0, 0] = x_gen

    return kernel


# ----------------------------------------------------------------------------
# Public forward: one pallas_call for the whole sequence
# ----------------------------------------------------------------------------
def convlstm_forward(params, frames, mask_true, num_hidden, total_length=6):
    """frames: [B, T, C, H, W]; mask_true: [B, Tm, C, H, W].

    Returns next_frames: [B, total_length-1, C, H, W], matching the PyTorch
    module's torch.stack(next_frames, dim=1).
    """
    num_layers = len(num_hidden)
    B, _, C, H, W = frames.shape
    t_out = total_length - 1

    frames_nhwc = jnp.transpose(frames, (0, 1, 3, 4, 2)).astype(jnp.float32)
    mask_nhwc = jnp.transpose(mask_true, (0, 1, 3, 4, 2)).astype(jnp.float32)
    # Prepend WARMUP dummy mask frames so the kernel can index mask[t] directly
    # (mask only participates for t >= WARMUP, exactly as in the reference).
    mask_pad = jnp.concatenate(
        [jnp.zeros((B, WARMUP, H, W, C), jnp.float32), mask_nhwc], axis=1)

    layer_dims = []
    w_layers = []
    for l in range(num_layers):
        c_in = C if l == 0 else num_hidden[l - 1]
        c_h = num_hidden[l]
        layer_dims.append((c_in, c_h))
        # Stack conv_h and conv_x into one (3,3,Ch+Cin,4Ch) weight (channel
        # order [h, x] matches the padded buffer), flatten the 3x3 taps.
        w = jnp.concatenate([params["wh"][l], params["wx"][l]], axis=2)
        w_layers.append(w.reshape(9, c_h + c_in, 4 * c_h).astype(jnp.bfloat16))
    w_last = params["w_last"].astype(jnp.bfloat16)

    kernel = _make_fused_kernel(num_layers, tuple(layer_dims), H, W, C)

    in_specs = [
        pl.BlockSpec((1, 1, H, W, C), lambda b, t: (b, t, 0, 0, 0)),   # frame
        pl.BlockSpec((1, 1, H, W, C), lambda b, t: (b, t, 0, 0, 0)),   # mask
    ]
    for c_in, c_h in layer_dims:
        in_specs.append(
            pl.BlockSpec((9, c_h + c_in, 4 * c_h), lambda b, t: (0, 0, 0)))
    in_specs.append(pl.BlockSpec((num_hidden[-1], C), lambda b, t: (0, 0)))

    scratch_shapes = (
        [pltpu.VMEM((H + 2, W + 2, c_h + c_in), jnp.float32)
         for c_in, c_h in layer_dims]
        + [pltpu.VMEM((H * W, c_h), jnp.float32) for _, c_h in layer_dims]
        + [pltpu.VMEM((H, W, C), jnp.float32)]
    )

    out = pl.pallas_call(
        kernel,
        out_shape=jax.ShapeDtypeStruct((B, t_out, H, W, C), jnp.float32),
        grid_spec=pltpu.PrefetchScalarGridSpec(
            num_scalar_prefetch=0,
            grid=(B, t_out),
            in_specs=in_specs,
            out_specs=pl.BlockSpec((1, 1, H, W, C),
                                   lambda b, t: (b, t, 0, 0, 0)),
            scratch_shapes=scratch_shapes),
        compiler_params=pltpu.CompilerParams(
            dimension_semantics=("parallel", "arbitrary")),
    )(frames_nhwc, mask_pad, *w_layers, w_last)

    return jnp.transpose(out, (0, 1, 4, 2, 3))   # -> [B, T-1, C, H, W]


# ----------------------------------------------------------------------------
# Parameter init + pure-JAX reference (for a numerical sanity check)
# ----------------------------------------------------------------------------
def init_params(key, num_hidden, img_ch):
    """Deterministic synthetic weights matching the module's shapes (HWIO)."""
    num_layers = len(num_hidden)
    params = {"wx": [], "wh": []}
    keys = jax.random.split(key, 2 * num_layers + 1)
    for i in range(num_layers):
        in_ch = img_ch if i == 0 else num_hidden[i - 1]
        nh = num_hidden[i]
        params["wx"].append(
            0.1 * jax.random.normal(keys[2 * i], (3, 3, in_ch, 4 * nh),
                                    jnp.float32))
        params["wh"].append(
            0.1 * jax.random.normal(keys[2 * i + 1], (3, 3, nh, 4 * nh),
                                    jnp.float32))
    params["w_last"] = 0.1 * jax.random.normal(
        keys[-1], (num_hidden[-1], img_ch), jnp.float32)
    return params


def _convlstm_forward_ref(params, frames, mask_true, num_hidden,
                          total_length=6):
    """Pure-JAX (XLA) reference mirroring the PyTorch forward, full f32."""
    num_layers = len(num_hidden)
    B, _, C, H, W = frames.shape
    frames_nhwc = jnp.transpose(frames, (0, 1, 3, 4, 2)).astype(jnp.float32)
    mask_nhwc = jnp.transpose(mask_true, (0, 1, 3, 4, 2)).astype(jnp.float32)
    dn = ("NHWC", "HWIO", "NHWC")

    h_t = [jnp.zeros((B, H, W, num_hidden[i]), jnp.float32)
           for i in range(num_layers)]
    c_t = [jnp.zeros((B, H, W, num_hidden[i]), jnp.float32)
           for i in range(num_layers)]
    x_gen = jnp.zeros((B, H, W, C), jnp.float32)

    outs = []
    for t in range(total_length - 1):
        if t < WARMUP:
            net = frames_nhwc[:, t]
        else:
            m = mask_nhwc[:, t - WARMUP]
            net = m * frames_nhwc[:, t] + (1.0 - m) * x_gen
        x_in = net
        for l in range(num_layers):
            nh = num_hidden[l]
            xc = lax.conv_general_dilated(x_in, params["wx"][l], (1, 1),
                                          "SAME", dimension_numbers=dn)
            hc = lax.conv_general_dilated(h_t[l], params["wh"][l], (1, 1),
                                          "SAME", dimension_numbers=dn)
            acc = xc + hc
            i_t = jax.nn.sigmoid(acc[..., 0 * nh:1 * nh])
            f_t = jax.nn.sigmoid(acc[..., 1 * nh:2 * nh])
            g_t = jnp.tanh(acc[..., 2 * nh:3 * nh])
            o_t = jax.nn.sigmoid(acc[..., 3 * nh:4 * nh])
            c_t[l] = f_t * c_t[l] + i_t * g_t
            h_t[l] = o_t * g_t
            x_in = h_t[l]
        x_gen = jnp.einsum("bhwk,kc->bhwc", h_t[-1], params["w_last"])
        outs.append(x_gen)
    out = jnp.stack(outs, axis=1)
    return jnp.transpose(out, (0, 1, 4, 2, 3))


# ----------------------------------------------------------------------------
# Demo
# ----------------------------------------------------------------------------
if __name__ == "__main__":
    num_hidden = (32, 32)
    img_ch = 4
    img_size = 16
    batch = 2
    total_length = 6

    key = jax.random.PRNGKey(0)
    k_param, k_frames, k_mask = jax.random.split(key, 3)

    params = init_params(k_param, num_hidden, img_ch)
    frames = jax.random.normal(
        k_frames, (batch, total_length, img_ch, img_size, img_size),
        jnp.float32)
    # mask_true only participates for t >= 5; with total_length=6 it is unused
    # but still passed to preserve the interface.
    mask_true = jax.random.uniform(
        k_mask, (batch, 1, img_ch, img_size, img_size), jnp.float32)

    fwd = jax.jit(functools.partial(convlstm_forward,
                                    num_hidden=num_hidden,
                                    total_length=total_length))
    out = fwd(params, frames, mask_true)
    jax.block_until_ready(out)

    expected = (batch, total_length - 1, img_ch, img_size, img_size)
    assert out.shape == expected, (out.shape, expected)
    assert bool(jnp.all(jnp.isfinite(out)))

    # Numerical check against the pure-JAX f32 reference (kernel uses bf16
    # matmul operands with f32 accumulation -> small expected deviation).
    out_ref = _convlstm_forward_ref(params, frames, mask_true, num_hidden,
                                    total_length)
    err = float(jnp.max(jnp.abs(out - out_ref)))
    assert err < 1e-1, f"max abs error vs reference too large: {err}"

    print("KERNEL_OK")
</pallas_src>

<mosaic_0001>
module attributes {stable_mosaic.version = 11 : i64} {
  func.func @kernel(%arg0: i32, %arg1: i32, %arg2: memref<1x1x16x16x4xf32, #tpu.memory_space<vmem>>, %arg3: memref<1x1x16x16x4xf32, #tpu.memory_space<vmem>>, %arg4: memref<9x36x128xbf16, #tpu.memory_space<vmem>>, %arg5: memref<9x64x128xbf16, #tpu.memory_space<vmem>>, %arg6: memref<32x4xbf16, #tpu.memory_space<vmem>>, %arg7: memref<1x1x16x16x4xf32, #tpu.memory_space<vmem>>, %arg8: memref<18x18x36xf32, #tpu.memory_space<vmem>>, %arg9: memref<18x18x64xf32, #tpu.memory_space<vmem>>, %arg10: memref<256x32xf32, #tpu.memory_space<vmem>>, %arg11: memref<256x32xf32, #tpu.memory_space<vmem>>, %arg12: memref<16x16x4xf32, #tpu.memory_space<vmem>>) attributes {dimension_semantics = [#tpu.dimension_semantics<parallel>, #tpu.dimension_semantics<arbitrary>], iteration_bounds = array<i64: 2, 5>, scalar_prefetch = 0 : i64, scratch_operands = 5 : i64, tpu.core_type = #tpu.core_type<tc>, window_params = [{transform_indices = @transform_0, window_bounds = array<i64: 1, 1, 16, 16, 4>}, {transform_indices = @transform_1, window_bounds = array<i64: 1, 1, 16, 16, 4>}, {pipeline_mode = #tpu.pipeline_mode<synchronous>, transform_indices = @transform_2, window_bounds = array<i64: 9, 36, 128>}, {pipeline_mode = #tpu.pipeline_mode<synchronous>, transform_indices = @transform_3, window_bounds = array<i64: 9, 64, 128>}, {pipeline_mode = #tpu.pipeline_mode<synchronous>, transform_indices = @transform_4, window_bounds = array<i64: 32, 4>}, {transform_indices = @transform_5, window_bounds = array<i64: 1, 1, 16, 16, 4>}]} {
    %c0_i32 = arith.constant 0 : i32
    %0 = arith.cmpi eq, %arg1, %c0_i32 : i32
    %1 = arith.extui %0 : i1 to i32
    %c0_i32_0 = arith.constant 0 : i32
    %2 = arith.cmpi ne, %1, %c0_i32_0 : i32
    scf.if %2 {
      %cst_168 = arith.constant 0.000000e+00 : f32
      %213 = vector.broadcast %cst_168 : f32 to vector<18x18x36xf32>
      %c0_169 = arith.constant 0 : index
      %c0_170 = arith.constant 0 : index
      %c0_171 = arith.constant 0 : index
      %214 = vector.load %arg8[%c0_169, %c0_170, %c0_171] : memref<18x18x36xf32, #tpu.memory_space<vmem>>, vector<18x18x36xf32>
      tpu.vector_store %arg8[%c0_169, %c0_170, %c0_171], %213 {strides = array<i32>} : memref<18x18x36xf32, #tpu.memory_space<vmem>>, vector<18x18x36xf32>,
      %cst_172 = arith.constant 0.000000e+00 : f32
      %215 = vector.broadcast %cst_172 : f32 to vector<256x32xf32>
      %c0_173 = arith.constant 0 : index
      %c0_174 = arith.constant 0 : index
      %216 = vector.load %arg10[%c0_173, %c0_174] : memref<256x32xf32, #tpu.memory_space<vmem>>, vector<256x32xf32>
      tpu.vector_store %arg10[%c0_173, %c0_174], %215 {strides = array<i32>} : memref<256x32xf32, #tpu.memory_space<vmem>>, vector<256x32xf32>,
      %cst_175 = arith.constant 0.000000e+00 : f32
      %217 = vector.broadcast %cst_175 : f32 to vector<18x18x64xf32>
      %c0_176 = arith.constant 0 : index
      %c0_177 = arith.constant 0 : index
      %c0_178 = arith.constant 0 : index
      %218 = vector.load %arg9[%c0_176, %c0_177, %c0_178] : memref<18x18x64xf32, #tpu.memory_space<vmem>>, vector<18x18x64xf32>
      tpu.vector_store %arg9[%c0_176, %c0_177, %c0_178], %217 {strides = array<i32>} : memref<18x18x64xf32, #tpu.memory_space<vmem>>, vector<18x18x64xf32>,
      %cst_179 = arith.constant 0.000000e+00 : f32
      %219 = vector.broadcast %cst_179 : f32 to vector<256x32xf32>
      %c0_180 = arith.constant 0 : index
      %c0_181 = arith.constant 0 : index
      %220 = vector.load %arg11[%c0_180, %c0_181] : memref<256x32xf32, #tpu.memory_space<vmem>>, vector<256x32xf32>
      tpu.vector_store %arg11[%c0_180, %c0_181], %219 {strides = array<i32>} : memref<256x32xf32, #tpu.memory_space<vmem>>, vector<256x32xf32>,
      %cst_182 = arith.constant 0.000000e+00 : f32
      %221 = vector.broadcast %cst_182 : f32 to vector<16x16x4xf32>
      %c0_183 = arith.constant 0 : index
      %c0_184 = arith.constant 0 : index
      %c0_185 = arith.constant 0 : index
      %222 = vector.load %arg12[%c0_183, %c0_184, %c0_185] : memref<16x16x4xf32, #tpu.memory_space<vmem>>, vector<16x16x4xf32>
      tpu.vector_store %arg12[%c0_183, %c0_184, %c0_185], %221 {strides = array<i32>} : memref<16x16x4xf32, #tpu.memory_space<vmem>>, vector<16x16x4xf32>,
    } else {
    }
    %c0 = arith.constant 0 : index
    %c0_1 = arith.constant 0 : index
    %c0_2 = arith.constant 0 : index
    %c0_3 = arith.constant 0 : index
    %c0_4 = arith.constant 0 : index
    %3 = vector.load %arg2[%c0, %c0_1, %c0_2, %c0_3, %c0_4] : memref<1x1x16x16x4xf32, #tpu.memory_space<vmem>>, vector<1x1x16x16x4xf32>
    %4 = vector.shape_cast %3 : vector<1x1x16x16x4xf32> to vector<16x16x4xf32>
    %c0_5 = arith.constant 0 : index
    %c0_6 = arith.constant 0 : index
    %c0_7 = arith.constant 0 : index
    %c0_8 = arith.constant 0 : index
    %c0_9 = arith.constant 0 : index
    %5 = vector.load %arg3[%c0_5, %c0_6, %c0_7, %c0_8, %c0_9] : memref<1x1x16x16x4xf32, #tpu.memory_space<vmem>>, vector<1x1x16x16x4xf32>
    %6 = vector.shape_cast %5 : vector<1x1x16x16x4xf32> to vector<16x16x4xf32>
    %c5_i32 = arith.constant 5 : i32
    %7 = arith.cmpi slt, %arg1, %c5_i32 : i32
    %8 = arith.extui %7 : i1 to i32
    %9 = arith.sitofp %8 : i32 to f32
    %10 = arith.mulf %6, %4 : vector<16x16x4xf32>
    %cst = arith.constant 1.000000e+00 : f32
    %11 = vector.broadcast %cst : f32 to vector<16x16x4xf32>
    %12 = arith.subf %11, %6 : vector<16x16x4xf32>
    %c0_10 = arith.constant 0 : index
    %c0_11 = arith.constant 0 : index
    %c0_12 = arith.constant 0 : index
    %13 = vector.load %arg12[%c0_10, %c0_11, %c0_12] : memref<16x16x4xf32, #tpu.memory_space<vmem>>, vector<16x16x4xf32>
    %14 = arith.mulf %12, %13 : vector<16x16x4xf32>
    %15 = arith.addf %10, %14 : vector<16x16x4xf32>
    %16 = vector.broadcast %9 : f32 to vector<16x16x4xf32>
    %17 = arith.mulf %16, %4 : vector<16x16x4xf32>
    %cst_13 = arith.constant 1.000000e+00 : f32
    %18 = arith.subf %cst_13, %9 : f32
    %19 = vector.broadcast %18 : f32 to vector<16x16x4xf32>
    %20 = arith.mulf %19, %15 : vector<16x16x4xf32>
    %21 = arith.addf %17, %20 : vector<16x16x4xf32>
    %c1 = arith.constant 1 : index
    %c1_14 = arith.constant 1 : index
    %c32 = arith.constant 32 : index
    %22 = vector.load %arg8[%c1, %c1_14, %c32] : memref<18x18x36xf32, #tpu.memory_space<vmem>>, vector<16x16x4xf32>
    tpu.vector_store %arg8[%c1, %c1_14, %c32], %21 {strides = array<i32>} : memref<18x18x36xf32, #tpu.memory_space<vmem>>, vector<16x16x4xf32>,
    %c0_15 = arith.constant 0 : index
    %c0_16 = arith.constant 0 : index
    %c0_17 = arith.constant 0 : index
    %23 = vector.load %arg8[%c0_15, %c0_16, %c0_17] : memref<18x18x36xf32, #tpu.memory_space<vmem>>, vector<16x16x36xf32>
    %24 = vector.shape_cast %23 : vector<16x16x36xf32> to vector<256x36xf32>
    %25 = arith.truncf %24 : vector<256x36xf32> to vector<256x36xbf16>
    %c0_18 = arith.constant 0 : index
    %c0_19 = arith.constant 0 : index
    %c0_20 = arith.constant 0 : index
    %26 = vector.load %arg4[%c0_18, %c0_19, %c0_20] : memref<9x36x128xbf16, #tpu.memory_space<vmem>>, vector<1x36x128xbf16>
    %27 = vector.shape_cast %26 : vector<1x36x128xbf16> to vector<36x128xbf16>
    %cst_21 = arith.constant dense<0.000000e+00> : vector<256x128xf32>
    %28 = tpu.matmul %25, %27, %cst_21 {dimension_numbers = #tpu.dot_dimension_numbers<[1], [0], [0], [1], [0, 0, 1, 1], [], []>} : vector<256x36xbf16>, vector<36x128xbf16>, vector<256x128xf32> -> vector<256x128xf32>
    %c0_22 = arith.constant 0 : index
    %c1_23 = arith.constant 1 : index
    %c0_24 = arith.constant 0 : index
    %29 = vector.load %arg8[%c0_22, %c1_23, %c0_24] : memref<18x18x36xf32, #tpu.memory_space<vmem>>, vector<16x16x36xf32>
    %30 = vector.shape_cast %29 : vector<16x16x36xf32> to vector<256x36xf32>
    %31 = arith.truncf %30 : vector<256x36xf32> to vector<256x36xbf16>
    %c1_25 = arith.constant 1 : index
    %c0_26 = arith.constant 0 : index
    %c0_27 = arith.constant 0 : index
    %32 = vector.load %arg4[%c1_25, %c0_26, %c0_27] : memref<9x36x128xbf16, #tpu.memory_space<vmem>>, vector<1x36x128xbf16>
    %33 = vector.shape_cast %32 : vector<1x36x128xbf16> to vector<36x128xbf16>
    %cst_28 = arith.constant dense<0.000000e+00> : vector<256x128xf32>
    %34 = tpu.matmul %31, %33, %cst_28 {dimension_numbers = #tpu.dot_dimension_numbers<[1], [0], [0], [1], [0, 0, 1, 1], [], []>} : vector<256x36xbf16>, vector<36x128xbf16>, vector<256x128xf32> -> vector<256x128xf32>
    %35 = arith.addf %28, %34 : vector<256x128xf32>
    %c0_29 = arith.constant 0 : index
    %c2 = arith.constant 2 : index
    %c0_30 = arith.constant 0 : index
    %36 = vector.load %arg8[%c0_29, %c2, %c0_30] : memref<18x18x36xf32, #tpu.memory_space<vmem>>, vector<16x16x36xf32>
    %37 = vector.shape_cast %36 : vector<16x16x36xf32> to vector<256x36xf32>
    %38 = arith.truncf %37 : vector<256x36xf32> to vector<256x36xbf16>
    %c2_31 = arith.constant 2 : index
    %c0_32 = arith.constant 0 : index
    %c0_33 = arith.constant 0 : index
    %39 = vector.load %arg4[%c2_31, %c0_32, %c0_33] : memref<9x36x128xbf16, #tpu.memory_space<vmem>>, vector<1x36x128xbf16>
    %40 = vector.shape_cast %39 : vector<1x36x128xbf16> to vector<36x128xbf16>
    %cst_34 = arith.constant dense<0.000000e+00> : vector<256x128xf32>
    %41 = tpu.matmul %38, %40, %cst_34 {dimension_numbers = #tpu.dot_dimension_numbers<[1], [0], [0], [1], [0, 0, 1, 1], [], []>} : vector<256x36xbf16>, vector<36x128xbf16>, vector<256x128xf32> -> vector<256x128xf32>
    %42 = arith.addf %35, %41 : vector<256x128xf32>
    %c1_35 = arith.constant 1 : index
    %c0_36 = arith.constant 0 : index
    %c0_37 = arith.constant 0 : index
    %43 = vector.load %arg8[%c1_35, %c0_36, %c0_37] : memref<18x18x36xf32, #tpu.memory_space<vmem>>, vector<16x16x36xf32>
    %44 = vector.shape_cast %43 : vector<16x16x36xf32> to vector<256x36xf32>
    %45 = arith.truncf %44 : vector<256x36xf32> to vector<256x36xbf16>
    %c3 = arith.constant 3 : index
    %c0_38 = arith.constant 0 : index
    %c0_39 = arith.constant 0 : index
    %46 = vector.load %arg4[%c3, %c0_38, %c0_39] : memref<9x36x128xbf16, #tpu.memory_space<vmem>>, vector<1x36x128xbf16>
    %47 = vector.shape_cast %46 : vector<1x36x128xbf16> to vector<36x128xbf16>
    %cst_40 = arith.constant dense<0.000000e+00> : vector<256x128xf32>
    %48 = tpu.matmul %45, %47, %cst_40 {dimension_numbers = #tpu.dot_dimension_numbers<[1], [0], [0], [1], [0, 0, 1, 1], [], []>} : vector<256x36xbf16>, vector<36x128xbf16>, vector<256x128xf32> -> vector<256x128xf32>
    %49 = arith.addf %42, %48 : vector<256x128xf32>
    %c1_41 = arith.constant 1 : index
    %c1_42 = arith.constant 1 : index
    %c0_43 = arith.constant 0 : index
    %50 = vector.load %arg8[%c1_41, %c1_42, %c0_43] : memref<18x18x36xf32, #tpu.memory_space<vmem>>, vector<16x16x36xf32>
    %51 = vector.shape_cast %50 : vector<16x16x36xf32> to vector<256x36xf32>
    %52 = arith.truncf %51 : vector<256x36xf32> to vector<256x36xbf16>
    %c4 = arith.constant 4 : index
    %c0_44 = arith.constant 0 : index
    %c0_45 = arith.constant 0 : index
    %53 = vector.load %arg4[%c4, %c0_44, %c0_45] : memref<9x36x128xbf16, #tpu.memory_space<vmem>>, vector<1x36x128xbf16>
    %54 = vector.shape_cast %53 : vector<1x36x128xbf16> to vector<36x128xbf16>
    %cst_46 = arith.constant dense<0.000000e+00> : vector<256x128xf32>
    %55 = tpu.matmul %52, %54, %cst_46 {dimension_numbers = #tpu.dot_dimension_numbers<[1], [0], [0], [1], [0, 0, 1, 1], [], []>} : vector<256x36xbf16>, vector<36x128xbf16>, vector<256x128xf32> -> vector<256x128xf32>
    %56 = arith.addf %49, %55 : vector<256x128xf32>
    %c1_47 = arith.constant 1 : index
    %c2_48 = arith.constant 2 : index
    %c0_49 = arith.constant 0 : index
    %57 = vector.load %arg8[%c1_47, %c2_48, %c0_49] : memref<18x18x36xf32, #tpu.memory_space<vmem>>, vector<16x16x36xf32>
    %58 = vector.shape_cast %57 : vector<16x16x36xf32> to vector<256x36xf32>
    %59 = arith.truncf %58 : vector<256x36xf32> to vector<256x36xbf16>
    %c5 = arith.constant 5 : index
    %c0_50 = arith.constant 0 : index
    %c0_51 = arith.constant 0 : index
    %60 = vector.load %arg4[%c5, %c0_50, %c0_51] : memref<9x36x128xbf16, #tpu.memory_space<vmem>>, vector<1x36x128xbf16>
    %61 = vector.shape_cast %60 : vector<1x36x128xbf16> to vector<36x128xbf16>
    %cst_52 = arith.constant dense<0.000000e+00> : vector<256x128xf32>
    %62 = tpu.matmul %59, %61, %cst_52 {dimension_numbers = #tpu.dot_dimension_numbers<[1], [0], [0], [1], [0, 0, 1, 1], [], []>} : vector<256x36xbf16>, vector<36x128xbf16>, vector<256x128xf32> -> vector<256x128xf32>
    %63 = arith.addf %56, %62 : vector<256x128xf32>
    %c2_53 = arith.constant 2 : index
    %c0_54 = arith.constant 0 : index
    %c0_55 = arith.constant 0 : index
    %64 = vector.load %arg8[%c2_53, %c0_54, %c0_55] : memref<18x18x36xf32, #tpu.memory_space<vmem>>, vector<16x16x36xf32>
    %65 = vector.shape_cast %64 : vector<16x16x36xf32> to vector<256x36xf32>
    %66 = arith.truncf %65 : vector<256x36xf32> to vector<256x36xbf16>
    %c6 = arith.constant 6 : index
    %c0_56 = arith.constant 0 : index
    %c0_57 = arith.constant 0 : index
    %67 = vector.load %arg4[%c6, %c0_56, %c0_57] : memref<9x36x128xbf16, #tpu.memory_space<vmem>>, vector<1x36x128xbf16>
    %68 = vector.shape_cast %67 : vector<1x36x128xbf16> to vector<36x128xbf16>
    %cst_58 = arith.constant dense<0.000000e+00> : vector<256x128xf32>
    %69 = tpu.matmul %66, %68, %cst_58 {dimension_numbers = #tpu.dot_dimension_numbers<[1], [0], [0], [1], [0, 0, 1, 1], [], []>} : vector<256x36xbf16>, vector<36x128xbf16>, vector<256x128xf32> -> vector<256x128xf32>
    %70 = arith.addf %63, %69 : vector<256x128xf32>
    %c2_59 = arith.constant 2 : index
    %c1_60 = arith.constant 1 : index
    %c0_61 = arith.constant 0 : index
    %71 = vector.load %arg8[%c2_59, %c1_60, %c0_61] : memref<18x18x36xf32, #tpu.memory_space<vmem>>, vector<16x16x36xf32>
    %72 = vector.shape_cast %71 : vector<16x16x36xf32> to vector<256x36xf32>
    %73 = arith.truncf %72 : vector<256x36xf32> to vector<256x36xbf16>
    %c7 = arith.constant 7 : index
    %c0_62 = arith.constant 0 : index
    %c0_63 = arith.constant 0 : index
    %74 = vector.load %arg4[%c7, %c0_62, %c0_63] : memref<9x36x128xbf16, #tpu.memory_space<vmem>>, vector<1x36x128xbf16>
    %75 = vector.shape_cast %74 : vector<1x36x128xbf16> to vector<36x128xbf16>
    %cst_64 = arith.constant dense<0.000000e+00> : vector<256x128xf32>
    %76 = tpu.matmul %73, %75, %cst_64 {dimension_numbers = #tpu.dot_dimension_numbers<[1], [0], [0], [1], [0, 0, 1, 1], [], []>} : vector<256x36xbf16>, vector<36x128xbf16>, vector<256x128xf32> -> vector<256x128xf32>
    %77 = arith.addf %70, %76 : vector<256x128xf32>
    %c2_65 = arith.constant 2 : index
    %c2_66 = arith.constant 2 : index
    %c0_67 = arith.constant 0 : index
    %78 = vector.load %arg8[%c2_65, %c2_66, %c0_67] : memref<18x18x36xf32, #tpu.memory_space<vmem>>, vector<16x16x36xf32>
    %79 = vector.shape_cast %78 : vector<16x16x36xf32> to vector<256x36xf32>
    %80 = arith.truncf %79 : vector<256x36xf32> to vector<256x36xbf16>
    %c8 = arith.constant 8 : index
    %c0_68 = arith.constant 0 : index
    %c0_69 = arith.constant 0 : index
    %81 = vector.load %arg4[%c8, %c0_68, %c0_69] : memref<9x36x128xbf16, #tpu.memory_space<vmem>>, vector<1x36x128xbf16>
    %82 = vector.shape_cast %81 : vector<1x36x128xbf16> to vector<36x128xbf16>
    %cst_70 = arith.constant dense<0.000000e+00> : vector<256x128xf32>
    %83 = tpu.matmul %80, %82, %cst_70 {dimension_numbers = #tpu.dot_dimension_numbers<[1], [0], [0], [1], [0, 0, 1, 1], [], []>} : vector<256x36xbf16>, vector<36x128xbf16>, vector<256x128xf32> -> vector<256x128xf32>
    %84 = arith.addf %77, %83 : vector<256x128xf32>
    %85 = vector.extract_strided_slice %84 {offsets = [0, 0], sizes = [256, 32], strides = [1, 1]} : vector<256x128xf32> to vector<256x32xf32>
    %86 = arith.negf %85 : vector<256x32xf32>
    %87 = math.exp %86 : vector<256x32xf32>
    %cst_71 = arith.constant 1.000000e+00 : f32
    %88 = vector.broadcast %cst_71 : f32 to vector<256x32xf32>
    %89 = arith.addf %88, %87 : vector<256x32xf32>
    %90 = arith.divf %88, %89 : vector<256x32xf32>
    %91 = vector.extract_strided_slice %84 {offsets = [0, 32], sizes = [256, 32], strides = [1, 1]} : vector<256x128xf32> to vector<256x32xf32>
    %92 = arith.negf %91 : vector<256x32xf32>
    %93 = math.exp %92 : vector<256x32xf32>
    %cst_72 = arith.constant 1.000000e+00 : f32
    %94 = vector.broadcast %cst_72 : f32 to vector<256x32xf32>
    %95 = arith.addf %94, %93 : vector<256x32xf32>
    %96 = arith.divf %94, %95 : vector<256x32xf32>
    %97 = vector.extract_strided_slice %84 {offsets = [0, 64], sizes = [256, 32], strides = [1, 1]} : vector<256x128xf32> to vector<256x32xf32>
    %98 = math.tanh %97 : vector<256x32xf32>
    %99 = vector.extract_strided_slice %84 {offsets = [0, 96], sizes = [256, 32], strides = [1, 1]} : vector<256x128xf32> to vector<256x32xf32>
    %100 = arith.negf %99 : vector<256x32xf32>
    %101 = math.exp %100 : vector<256x32xf32>
    %cst_73 = arith.constant 1.000000e+00 : f32
    %102 = vector.broadcast %cst_73 : f32 to vector<256x32xf32>
    %103 = arith.addf %102, %101 : vector<256x32xf32>
    %104 = arith.divf %102, %103 : vector<256x32xf32>
    %c0_74 = arith.constant 0 : index
    %c0_75 = arith.constant 0 : index
    %105 = vector.load %arg10[%c0_74, %c0_75] : memref<256x32xf32, #tpu.memory_space<vmem>>, vector<256x32xf32>
    %106 = arith.mulf %96, %105 : vector<256x32xf32>
    %107 = arith.mulf %90, %98 : vector<256x32xf32>
    %108 = arith.addf %106, %107 : vector<256x32xf32>
    %109 = arith.mulf %104, %98 : vector<256x32xf32>
    %c0_76 = arith.constant 0 : index
    %c0_77 = arith.constant 0 : index
    %110 = vector.load %arg10[%c0_76, %c0_77] : memref<256x32xf32, #tpu.memory_space<vmem>>, vector<256x32xf32>
    tpu.vector_store %arg10[%c0_76, %c0_77], %108 {strides = array<i32>} : memref<256x32xf32, #tpu.memory_space<vmem>>, vector<256x32xf32>,
    %111 = vector.shape_cast %109 : vector<256x32xf32> to vector<16x16x32xf32>
    %c1_78 = arith.constant 1 : index
    %c1_79 = arith.constant 1 : index
    %c0_80 = arith.constant 0 : index
    %112 = vector.load %arg8[%c1_78, %c1_79, %c0_80] : memref<18x18x36xf32, #tpu.memory_space<vmem>>, vector<16x16x32xf32>
    tpu.vector_store %arg8[%c1_78, %c1_79, %c0_80], %111 {strides = array<i32>} : memref<18x18x36xf32, #tpu.memory_space<vmem>>, vector<16x16x32xf32>,
    %c1_81 = arith.constant 1 : index
    %c1_82 = arith.constant 1 : index
    %c32_83 = arith.constant 32 : index
    %113 = vector.load %arg9[%c1_81, %c1_82, %c32_83] : memref<18x18x64xf32, #tpu.memory_space<vmem>>, vector<16x16x32xf32>
    tpu.vector_store %arg9[%c1_81, %c1_82, %c32_83], %111 {strides = array<i32>} : memref<18x18x64xf32, #tpu.memory_space<vmem>>, vector<16x16x32xf32>,
    %c0_84 = arith.constant 0 : index
    %c0_85 = arith.constant 0 : index
    %c0_86 = arith.constant 0 : index
    %114 = vector.load %arg9[%c0_84, %c0_85, %c0_86] : memref<18x18x64xf32, #tpu.memory_space<vmem>>, vector<16x16x64xf32>
    %115 = vector.shape_cast %114 : vector<16x16x64xf32> to vector<256x64xf32>
    %116 = arith.truncf %115 : vector<256x64xf32> to vector<256x64xbf16>
    %c0_87 = arith.constant 0 : index
    %c0_88 = arith.constant 0 : index
    %c0_89 = arith.constant 0 : index
    %117 = vector.load %arg5[%c0_87, %c0_88, %c0_89] : memref<9x64x128xbf16, #tpu.memory_space<vmem>>, vector<1x64x128xbf16>
    %118 = vector.shape_cast %117 : vector<1x64x128xbf16> to vector<64x128xbf16>
    %cst_90 = arith.constant dense<0.000000e+00> : vector<256x128xf32>
    %119 = tpu.matmul %116, %118, %cst_90 {dimension_numbers = #tpu.dot_dimension_numbers<[1], [0], [0], [1], [0, 0, 1, 1], [], []>} : vector<256x64xbf16>, vector<64x128xbf16>, vector<256x128xf32> -> vector<256x128xf32>
    %c0_91 = arith.constant 0 : index
    %c1_92 = arith.constant 1 : index
    %c0_93 = arith.constant 0 : index
    %120 = vector.load %arg9[%c0_91, %c1_92, %c0_93] : memref<18x18x64xf32, #tpu.memory_space<vmem>>, vector<16x16x64xf32>
    %121 = vector.shape_cast %120 : vector<16x16x64xf32> to vector<256x64xf32>
    %122 = arith.truncf %121 : vector<256x64xf32> to vector<256x64xbf16>
    %c1_94 = arith.constant 1 : index
    %c0_95 = arith.constant 0 : index
    %c0_96 = arith.constant 0 : index
    %123 = vector.load %arg5[%c1_94, %c0_95, %c0_96] : memref<9x64x128xbf16, #tpu.memory_space<vmem>>, vector<1x64x128xbf16>
    %124 = vector.shape_cast %123 : vector<1x64x128xbf16> to vector<64x128xbf16>
    %cst_97 = arith.constant dense<0.000000e+00> : vector<256x128xf32>
    %125 = tpu.matmul %122, %124, %cst_97 {dimension_numbers = #tpu.dot_dimension_numbers<[1], [0], [0], [1], [0, 0, 1, 1], [], []>} : vector<256x64xbf16>, vector<64x128xbf16>, vector<256x128xf32> -> vector<256x128xf32>
    %126 = arith.addf %119, %125 : vector<256x128xf32>
    %c0_98 = arith.constant 0 : index
    %c2_99 = arith.constant 2 : index
    %c0_100 = arith.constant 0 : index
    %127 = vector.load %arg9[%c0_98, %c2_99, %c0_100] : memref<18x18x64xf32, #tpu.memory_space<vmem>>, vector<16x16x64xf32>
    %128 = vector.shape_cast %127 : vector<16x16x64xf32> to vector<256x64xf32>
    %129 = arith.truncf %128 : vector<256x64xf32> to vector<256x64xbf16>
    %c2_101 = arith.constant 2 : index
    %c0_102 = arith.constant 0 : index
    %c0_103 = arith.constant 0 : index
    %130 = vector.load %arg5[%c2_101, %c0_102, %c0_103] : memref<9x64x128xbf16, #tpu.memory_space<vmem>>, vector<1x64x128xbf16>
    %131 = vector.shape_cast %130 : vector<1x64x128xbf16> to vector<64x128xbf16>
    %cst_104 = arith.constant dense<0.000000e+00> : vector<256x128xf32>
    %132 = tpu.matmul %129, %131, %cst_104 {dimension_numbers = #tpu.dot_dimension_numbers<[1], [0], [0], [1], [0, 0, 1, 1], [], []>} : vector<256x64xbf16>, vector<64x128xbf16>, vector<256x128xf32> -> vector<256x128xf32>
    %133 = arith.addf %126, %132 : vector<256x128xf32>
    %c1_105 = arith.constant 1 : index
    %c0_106 = arith.constant 0 : index
    %c0_107 = arith.constant 0 : index
    %134 = vector.load %arg9[%c1_105, %c0_106, %c0_107] : memref<18x18x64xf32, #tpu.memory_space<vmem>>, vector<16x16x64xf32>
    %135 = vector.shape_cast %134 : vector<16x16x64xf32> to vector<256x64xf32>
    %136 = arith.truncf %135 : vector<256x64xf32> to vector<256x64xbf16>
    %c3_108 = arith.constant 3 : index
    %c0_109 = arith.constant 0 : index
    %c0_110 = arith.constant 0 : index
    %137 = vector.load %arg5[%c3_108, %c0_109, %c0_110] : memref<9x64x128xbf16, #tpu.memory_space<vmem>>, vector<1x64x128xbf16>
    %138 = vector.shape_cast %137 : vector<1x64x128xbf16> to vector<64x128xbf16>
    %cst_111 = arith.constant dense<0.000000e+00> : vector<256x128xf32>
    %139 = tpu.matmul %136, %138, %cst_111 {dimension_numbers = #tpu.dot_dimension_numbers<[1], [0], [0], [1], [0, 0, 1, 1], [], []>} : vector<256x64xbf16>, vector<64x128xbf16>, vector<256x128xf32> -> vector<256x128xf32>
    %140 = arith.addf %133, %139 : vector<256x128xf32>
    %c1_112 = arith.constant 1 : index
    %c1_113 = arith.constant 1 : index
    %c0_114 = arith.constant 0 : index
    %141 = vector.load %arg9[%c1_112, %c1_113, %c0_114] : memref<18x18x64xf32, #tpu.memory_space<vmem>>, vector<16x16x64xf32>
    %142 = vector.shape_cast %141 : vector<16x16x64xf32> to vector<256x64xf32>
    %143 = arith.truncf %142 : vector<256x64xf32> to vector<256x64xbf16>
    %c4_115 = arith.constant 4 : index
    %c0_116 = arith.constant 0 : index
    %c0_117 = arith.constant 0 : index
    %144 = vector.load %arg5[%c4_115, %c0_116, %c0_117] : memref<9x64x128xbf16, #tpu.memory_space<vmem>>, vector<1x64x128xbf16>
    %145 = vector.shape_cast %144 : vector<1x64x128xbf16> to vector<64x128xbf16>
    %cst_118 = arith.constant dense<0.000000e+00> : vector<256x128xf32>
    %146 = tpu.matmul %143, %145, %cst_118 {dimension_numbers = #tpu.dot_dimension_numbers<[1], [0], [0], [1], [0, 0, 1, 1], [], []>} : vector<256x64xbf16>, vector<64x128xbf16>, vector<256x128xf32> -> vector<256x128xf32>
    %147 = arith.addf %140, %146 : vector<256x128xf32>
    %c1_119 = arith.constant 1 : index
    %c2_120 = arith.constant 2 : index
    %c0_121 = arith.constant 0 : index
    %148 = vector.load %arg9[%c1_119, %c2_120, %c0_121] : memref<18x18x64xf32, #tpu.memory_space<vmem>>, vector<16x16x64xf32>
    %149 = vector.shape_cast %148 : vector<16x16x64xf32> to vector<256x64xf32>
    %150 = arith.truncf %149 : vector<256x64xf32> to vector<256x64xbf16>
    %c5_122 = arith.constant 5 : index
    %c0_123 = arith.constant 0 : index
    %c0_124 = arith.constant 0 : index
    %151 = vector.load %arg5[%c5_122, %c0_123, %c0_124] : memref<9x64x128xbf16, #tpu.memory_space<vmem>>, vector<1x64x128xbf16>
    %152 = vector.shape_cast %151 : vector<1x64x128xbf16> to vector<64x128xbf16>
    %cst_125 = arith.constant dense<0.000000e+00> : vector<256x128xf32>
    %153 = tpu.matmul %150, %152, %cst_125 {dimension_numbers = #tpu.dot_dimension_numbers<[1], [0], [0], [1], [0, 0, 1, 1], [], []>} : vector<256x64xbf16>, vector<64x128xbf16>, vector<256x128xf32> -> vector<256x128xf32>
    %154 = arith.addf %147, %153 : vector<256x128xf32>
    %c2_126 = arith.constant 2 : index
    %c0_127 = arith.constant 0 : index
    %c0_128 = arith.constant 0 : index
    %155 = vector.load %arg9[%c2_126, %c0_127, %c0_128] : memref<18x18x64xf32, #tpu.memory_space<vmem>>, vector<16x16x64xf32>
    %156 = vector.shape_cast %155 : vector<16x16x64xf32> to vector<256x64xf32>
    %157 = arith.truncf %156 : vector<256x64xf32> to vector<256x64xbf16>
    %c6_129 = arith.constant 6 : index
    %c0_130 = arith.constant 0 : index
    %c0_131 = arith.constant 0 : index
    %158 = vector.load %arg5[%c6_129, %c0_130, %c0_131] : memref<9x64x128xbf16, #tpu.memory_space<vmem>>, vector<1x64x128xbf16>
    %159 = vector.shape_cast %158 : vector<1x64x128xbf16> to vector<64x128xbf16>
    %cst_132 = arith.constant dense<0.000000e+00> : vector<256x128xf32>
    %160 = tpu.matmul %157, %159, %cst_132 {dimension_numbers = #tpu.dot_dimension_numbers<[1], [0], [0], [1], [0, 0, 1, 1], [], []>} : vector<256x64xbf16>, vector<64x128xbf16>, vector<256x128xf32> -> vector<256x128xf32>
    %161 = arith.addf %154, %160 : vector<256x128xf32>
    %c2_133 = arith.constant 2 : index
    %c1_134 = arith.constant 1 : index
    %c0_135 = arith.constant 0 : index
    %162 = vector.load %arg9[%c2_133, %c1_134, %c0_135] : memref<18x18x64xf32, #tpu.memory_space<vmem>>, vector<16x16x64xf32>
    %163 = vector.shape_cast %162 : vector<16x16x64xf32> to vector<256x64xf32>
    %164 = arith.truncf %163 : vector<256x64xf32> to vector<256x64xbf16>
    %c7_136 = arith.constant 7 : index
    %c0_137 = arith.constant 0 : index
    %c0_138 = arith.constant 0 : index
    %165 = vector.load %arg5[%c7_136, %c0_137, %c0_138] : memref<9x64x128xbf16, #tpu.memory_space<vmem>>, vector<1x64x128xbf16>
    %166 = vector.shape_cast %165 : vector<1x64x128xbf16> to vector<64x128xbf16>
    %cst_139 = arith.constant dense<0.000000e+00> : vector<256x128xf32>
    %167 = tpu.matmul %164, %166, %cst_139 {dimension_numbers = #tpu.dot_dimension_numbers<[1], [0], [0], [1], [0, 0, 1, 1], [], []>} : vector<256x64xbf16>, vector<64x128xbf16>, vector<256x128xf32> -> vector<256x128xf32>
    %168 = arith.addf %161, %167 : vector<256x128xf32>
    %c2_140 = arith.constant 2 : index
    %c2_141 = arith.constant 2 : index
    %c0_142 = arith.constant 0 : index
    %169 = vector.load %arg9[%c2_140, %c2_141, %c0_142] : memref<18x18x64xf32, #tpu.memory_space<vmem>>, vector<16x16x64xf32>
    %170 = vector.shape_cast %169 : vector<16x16x64xf32> to vector<256x64xf32>
    %171 = arith.truncf %170 : vector<256x64xf32> to vector<256x64xbf16>
    %c8_143 = arith.constant 8 : index
    %c0_144 = arith.constant 0 : index
    %c0_145 = arith.constant 0 : index
    %172 = vector.load %arg5[%c8_143, %c0_144, %c0_145] : memref<9x64x128xbf16, #tpu.memory_space<vmem>>, vector<1x64x128xbf16>
    %173 = vector.shape_cast %172 : vector<1x64x128xbf16> to vector<64x128xbf16>
    %cst_146 = arith.constant dense<0.000000e+00> : vector<256x128xf32>
    %174 = tpu.matmul %171, %173, %cst_146 {dimension_numbers = #tpu.dot_dimension_numbers<[1], [0], [0], [1], [0, 0, 1, 1], [], []>} : vector<256x64xbf16>, vector<64x128xbf16>, vector<256x128xf32> -> vector<256x128xf32>
    %175 = arith.addf %168, %174 : vector<256x128xf32>
    %176 = vector.extract_strided_slice %175 {offsets = [0, 0], sizes = [256, 32], strides = [1, 1]} : vector<256x128xf32> to vector<256x32xf32>
    %177 = arith.negf %176 : vector<256x32xf32>
    %178 = math.exp %177 : vector<256x32xf32>
    %cst_147 = arith.constant 1.000000e+00 : f32
    %179 = vector.broadcast %cst_147 : f32 to vector<256x32xf32>
    %180 = arith.addf %179, %178 : vector<256x32xf32>
    %181 = arith.divf %179, %180 : vector<256x32xf32>
    %182 = vector.extract_strided_slice %175 {offsets = [0, 32], sizes = [256, 32], strides = [1, 1]} : vector<256x128xf32> to vector<256x32xf32>
    %183 = arith.negf %182 : vector<256x32xf32>
    %184 = math.exp %183 : vector<256x32xf32>
    %cst_148 = arith.constant 1.000000e+00 : f32
    %185 = vector.broadcast %cst_148 : f32 to vector<256x32xf32>
    %186 = arith.addf %185, %184 : vector<256x32xf32>
    %187 = arith.divf %185, %186 : vector<256x32xf32>
    %188 = vector.extract_strided_slice %175 {offsets = [0, 64], sizes = [256, 32], strides = [1, 1]} : vector<256x128xf32> to vector<256x32xf32>
    %189 = math.tanh %188 : vector<256x32xf32>
    %190 = vector.extract_strided_slice %175 {offsets = [0, 96], sizes = [256, 32], strides = [1, 1]} : vector<256x128xf32> to vector<256x32xf32>
    %191 = arith.negf %190 : vector<256x32xf32>
    %192 = math.exp %191 : vector<256x32xf32>
    %cst_149 = arith.constant 1.000000e+00 : f32
    %193 = vector.broadcast %cst_149 : f32 to vector<256x32xf32>
    %194 = arith.addf %193, %192 : vector<256x32xf32>
    %195 = arith.divf %193, %194 : vector<256x32xf32>
    %c0_150 = arith.constant 0 : index
    %c0_151 = arith.constant 0 : index
    %196 = vector.load %arg11[%c0_150, %c0_151] : memref<256x32xf32, #tpu.memory_space<vmem>>, vector<256x32xf32>
    %197 = arith.mulf %187, %196 : vector<256x32xf32>
    %198 = arith.mulf %181, %189 : vector<256x32xf32>
    %199 = arith.addf %197, %198 : vector<256x32xf32>
    %200 = arith.mulf %195, %189 : vector<256x32xf32>
    %c0_152 = arith.constant 0 : index
    %c0_153 = arith.constant 0 : index
    %201 = vector.load %arg11[%c0_152, %c0_153] : memref<256x32xf32, #tpu.memory_space<vmem>>, vector<256x32xf32>
    tpu.vector_store %arg11[%c0_152, %c0_153], %199 {strides = array<i32>} : memref<256x32xf32, #tpu.memory_space<vmem>>, vector<256x32xf32>,
    %202 = vector.shape_cast %200 : vector<256x32xf32> to vector<16x16x32xf32>
    %c1_154 = arith.constant 1 : index
    %c1_155 = arith.constant 1 : index
    %c0_156 = arith.constant 0 : index
    %203 = vector.load %arg9[%c1_154, %c1_155, %c0_156] : memref<18x18x64xf32, #tpu.memory_space<vmem>>, vector<16x16x32xf32>
    tpu.vector_store %arg9[%c1_154, %c1_155, %c0_156], %202 {strides = array<i32>} : memref<18x18x64xf32, #tpu.memory_space<vmem>>, vector<16x16x32xf32>,
    %204 = vector.shape_cast %202 : vector<16x16x32xf32> to vector<256x32xf32>
    %205 = arith.truncf %204 : vector<256x32xf32> to vector<256x32xbf16>
    %c0_157 = arith.constant 0 : index
    %c0_158 = arith.constant 0 : index
    %206 = vector.load %arg6[%c0_157, %c0_158] : memref<32x4xbf16, #tpu.memory_space<vmem>>, vector<32x4xbf16>
    %cst_159 = arith.constant dense<0.000000e+00> : vector<256x4xf32>
    %207 = tpu.matmul %205, %206, %cst_159 {dimension_numbers = #tpu.dot_dimension_numbers<[1], [0], [0], [1], [0, 0, 1, 1], [], []>} : vector<256x32xbf16>, vector<32x4xbf16>, vector<256x4xf32> -> vector<256x4xf32>
    %208 = vector.shape_cast %207 : vector<256x4xf32> to vector<16x16x4xf32>
    %c0_160 = arith.constant 0 : index
    %c0_161 = arith.constant 0 : index
    %c0_162 = arith.constant 0 : index
    %209 = vector.load %arg12[%c0_160, %c0_161, %c0_162] : memref<16x16x4xf32, #tpu.memory_space<vmem>>, vector<16x16x4xf32>
    tpu.vector_store %arg12[%c0_160, %c0_161, %c0_162], %208 {strides = array<i32>} : memref<16x16x4xf32, #tpu.memory_space<vmem>>, vector<16x16x4xf32>,
    %c0_163 = arith.constant 0 : index
    %c0_164 = arith.constant 0 : index
    %c0_165 = arith.constant 0 : index
    %c0_166 = arith.constant 0 : index
    %c0_167 = arith.constant 0 : index
    %210 = vector.load %arg7[%c0_163, %c0_164, %c0_165, %c0_166, %c0_167] : memref<1x1x16x16x4xf32, #tpu.memory_space<vmem>>, vector<1x1x16x16x4xf32>
    %211 = vector.shape_cast %210 : vector<1x1x16x16x4xf32> to vector<16x16x4xf32>
    %212 = vector.shape_cast %208 : vector<16x16x4xf32> to vector<1x1x16x16x4xf32>
    tpu.vector_store %arg7[%c0_163, %c0_164, %c0_165, %c0_166, %c0_167], %212 {strides = array<i32>} : memref<1x1x16x16x4xf32, #tpu.memory_space<vmem>>, vector<1x1x16x16x4xf32>,
    return
  }
  func.func @transform_0(%arg0: i32, %arg1: i32) -> (i32, i32, i32, i32, i32) {
    %c0_i32 = arith.constant 0 : i32
    %c0_i32_0 = arith.constant 0 : i32
    %c0_i32_1 = arith.constant 0 : i32
    %c0_i32_2 = arith.constant 0 : i32
    return %arg0, %arg1, %c0_i32, %c0_i32_0, %c0_i32_1 : i32, i32, i32, i32, i32
  }
  func.func @transform_1(%arg0: i32, %arg1: i32) -> (i32, i32, i32, i32, i32) {
    %c0_i32 = arith.constant 0 : i32
    %c0_i32_0 = arith.constant 0 : i32
    %c0_i32_1 = arith.constant 0 : i32
    %c0_i32_2 = arith.constant 0 : i32
    return %arg0, %arg1, %c0_i32, %c0_i32_0, %c0_i32_1 : i32, i32, i32, i32, i32
  }
  func.func @transform_2(%arg0: i32, %arg1: i32) -> (i32, i32, i32) {
    %c0_i32 = arith.constant 0 : i32
    %c0_i32_0 = arith.constant 0 : i32
    %c0_i32_1 = arith.constant 0 : i32
    %c0_i32_2 = arith.constant 0 : i32
    return %c0_i32, %c0_i32_0, %c0_i32_1 : i32, i32, i32
  }
  func.func @transform_3(%arg0: i32, %arg1: i32) -> (i32, i32, i32) {
    %c0_i32 = arith.constant 0 : i32
    %c0_i32_0 = arith.constant 0 : i32
    %c0_i32_1 = arith.constant 0 : i32
    %c0_i32_2 = arith.constant 0 : i32
    return %c0_i32, %c0_i32_0, %c0_i32_1 : i32, i32, i32
  }
  func.func @transform_4(%arg0: i32, %arg1: i32) -> (i32, i32) {
    %c0_i32 = arith.constant 0 : i32
    %c0_i32_0 = arith.constant 0 : i32
    %c0_i32_1 = arith.constant 0 : i32
    return %c0_i32, %c0_i32_0 : i32, i32
  }
  func.func @transform_5(%arg0: i32, %arg1: i32) -> (i32, i32, i32, i32, i32) {
    %c0_i32 = arith.constant 0 : i32
    %c0_i32_0 = arith.constant 0 : i32
    %c0_i32_1 = arith.constant 0 : i32
    %c0_i32_2 = arith.constant 0 : i32
    return %arg0, %arg1, %c0_i32, %c0_i32_0, %c0_i32_1 : i32, i32, i32, i32, i32
  }
}

</mosaic_0001>

<bundles_post_ra>
// kernel: convlstm_forward.1
= control target key start
LH: loop header
LB: loop body
LE: loop exit
PB: predicated region body
PF: predicated region fallthrough
CT: control target
= control target key end

     0   :  { %s11800_s18 = smov 0   ;;  %s11802_s19 = smov 0   ;;  %s16589_s0 = inlined_call_operand.vmem [shape: f32[2,6,16,16,4], index: 0, kind: input, shape index: {}]   ;;  %s16590_s1 = inlined_call_operand.vmem [shape: f32[2,6,16,16,4], index: 1, kind: input, shape index: {}]   ;;  %s16591_s2 = inlined_call_operand.vmem [shape: bf16[9,36,128], index: 2, kind: input, shape index: {}]   ;;  %s16592_s3 = inlined_call_operand.vmem [shape: bf16[9,64,128], index: 3, kind: input, shape index: {}]   ;;  %s16593_s4 = inlined_call_operand.vmem [shape: bf16[32,4], index: 4, kind: input, shape index: {}]   ;;  %s16594_s5 = inlined_call_operand.vmem [shape: f32[2,5,16,16,4], index: 5, kind: output, shape index: {}]  }
   0x1   :  { %s11804_s20 = smov 0   ;;  %s11806_s21 = smov 0  }
   0x2   :  { %s11808_s22 = smov 0  }
   0x3 LB: > { %s24_s23 = sadd.s32 1, %s11756_s20  ;;  %s27_s24 = sadd.s32 1, %s11760_s21  ;;  %s11764_s22 = sphi %s11808_s22, %s15_s22   ;;  %s11760_s21 = sphi %s11806_s21, %s17186_s21   ;;  %s11756_s20 = sphi %s11804_s20, %s17185_s20   ;;  %s11752_s19 = sphi %s11802_s19, %s17184_s19   ;;  %s11748_s18 = sphi %s11800_s18, %s17183_s18  }
   0x4   : > { %p25_p0 = scmp.ge.s32.totalorder %s24_s23, 5  ;;  %p9561_p1 = scmp.ge.s32.totalorder %s11764_s22, 1 }
   0x5   : > { %p223_p2 = scmp.lt.s32.totalorder %s11764_s22, 11 }
   0x6   : > { %s17188_s23 = smov (%p25_p0, %s24_s23), 0  ;;  %s17190_s24 = smov (!%p25_p0, %s27_s24), %s11760_s21 }
   0x7   : > { %p224_p3 = pnand %p9561_p1, %p223_p2  ;;  %p29_p4 = scmp.ge.s32.totalorder %s17190_s24, 2 }
   0x9   : > { %s17192_s24 = smov (%p29_p4, %s17190_s24), 0  ;;  %227 = sbr.rel (%p224_p3) target bundleno = 2110 (0x83e), region = 40 }
   0xe   : > { %p268_p5 = scmp.lt.s32.totalorder %s11752_s19, 1  ;;  %p270_p6 = scmp.lt.s32.totalorder %s11748_s18, 5 }
   0xf   : > { %p288_p7 = scmp.lt.s32.totalorder %s11748_s18, 4  ;;  %p9568_p8 = scmp.ne.s32.totalorder %s11748_s18, 0 }
  0x10   : > { %s17194_s19 = smov (!%p268_p5, %s11752_s19), 1 }
  0x11   : > { %s271_s25 = scalar_select %p270_p6, %s11748_s18, 5 }
  0x12   : > { %s11231_s26 = smul.u32 192, %s17194_s19 }
  0x13   : > { %s9562_s27 = sshll.u32 %s271_s25, 5  ;;  %s11232_s30 = smul.u32 160, %s17194_s19 }
  0x14   : > { %s274_s28 = sadd.s32 %s11231_s26, %s9562_s27 }
  0x15   : > { %s9563_s29 = sshll.u32 %s274_s28, 3 }
  0x16   : > { %s11840_s8 = scalar_lea.vmem %s16589_s0, %s9563_s29  ;;  %s11845_s11 = scalar_lea.vmem %s16590_s1, %s9563_s29 }
  0x17   : > { %s289_s12 = scalar_select %p288_p7, %s11748_s18, 4 }
  0x18   : > { %299 = sbr.rel (%p9568_p8) target bundleno = 132 (0x84), region = 44 }
  0x19   : > { %s9566_s13 = sshll.u32 %s289_s12, 5 }
  0x1a   : > { %s292_s14 = sadd.s32 %s11232_s30, %s9566_s13 }
  0x1b   : > { %s9567_s15 = sshll.u32 %s292_s14, 3 }
  0x1c   : > { %s11851_s25 = scalar_lea.vmem %s16594_s5, %s9567_s15 }
  0x1d   : > { %vm300_vm0 = vcmask 293888   ;;  %vm303_vm1 = vcmask 287744   ;;  %vm356_vm2 = vcmask 261120   ;;  %v11766_v0 = vmov 0.0  }
  0x1e   : > { %301 = vst.msk [vmem:[#allocation2] sm:$0xff] %vm300_vm0, %v11766_v0  ;;  %302 = vst.msk [vmem:[#allocation2 + $0x8] sm:$0xff] %vm300_vm0, %v11766_v0  ;;  %vm389_vm3 = vcmask 523264   ;;  %vm392_vm4 = vcmask 517120   ;;  %vm477_vm5 = vcmask 31744  }
  0x1f   : > { %305 = vst.msk [vmem:[#allocation2 + $0x18] sm:$0xff] %vm300_vm0, %v11766_v0  ;;  %306 = vst.msk [vmem:[#allocation2 + $0x20] sm:$0xff] %vm300_vm0, %v11766_v0 }
  0x20   : > { %308 = vst.msk [vmem:[#allocation2 + $0x30] sm:$0xff] %vm300_vm0, %v11766_v0  ;;  %309 = vst.msk [vmem:[#allocation2 + $0x38] sm:$0xff] %vm300_vm0, %v11766_v0 }
  0x21   : > { %311 = vst.msk [vmem:[#allocation2 + $0x48] sm:$0xff] %vm300_vm0, %v11766_v0  ;;  %312 = vst.msk [vmem:[#allocation2 + $0x50] sm:$0xff] %vm300_vm0, %v11766_v0 }
  0x22   : > { %314 = vst.msk [vmem:[#allocation2 + $0x60] sm:$0xff] %vm300_vm0, %v11766_v0  ;;  %315 = vst.msk [vmem:[#allocation2 + $0x68] sm:$0xff] %vm300_vm0, %v11766_v0 }
  0x23   : > { %317 = vst.msk [vmem:[#allocation2 + $0x78] sm:$0xff] %vm300_vm0, %v11766_v0  ;;  %318 = vst.msk [vmem:[#allocation2 + $0x80] sm:$0xff] %vm300_vm0, %v11766_v0 }
  0x24   : > { %320 = vst.msk [vmem:[#allocation2 + $0x90] sm:$0xff] %vm300_vm0, %v11766_v0  ;;  %321 = vst.msk [vmem:[#allocation2 + $0x98] sm:$0xff] %vm300_vm0, %v11766_v0 }
  0x25   : > { %323 = vst.msk [vmem:[#allocation2 + $0xa8] sm:$0xff] %vm300_vm0, %v11766_v0  ;;  %324 = vst.msk [vmem:[#allocation2 + $0xb0] sm:$0xff] %vm300_vm0, %v11766_v0 }
  0x26   : > { %326 = vst.msk [vmem:[#allocation2 + $0xc0] sm:$0xff] %vm300_vm0, %v11766_v0  ;;  %327 = vst.msk [vmem:[#allocation2 + $0xc8] sm:$0xff] %vm300_vm0, %v11766_v0 }
  0x27   : > { %329 = vst.msk [vmem:[#allocation2 + $0xd8] sm:$0xff] %vm300_vm0, %v11766_v0  ;;  %330 = vst.msk [vmem:[#allocation2 + $0xe0] sm:$0xff] %vm300_vm0, %v11766_v0 }
  0x28   : > { %332 = vst.msk [vmem:[#allocation2 + $0xf0] sm:$0xff] %vm300_vm0, %v11766_v0  ;;  %333 = vst.msk [vmem:[#allocation2 + $0xf8] sm:$0xff] %vm300_vm0, %v11766_v0 }
  0x29   : > { %335 = vst.msk [vmem:[#allocation2 + $0x108] sm:$0xff] %vm300_vm0, %v11766_v0  ;;  %336 = vst.msk [vmem:[#allocation2 + $0x110] sm:$0xff] %vm300_vm0, %v11766_v0 }
  0x2a   : > { %338 = vst.msk [vmem:[#allocation2 + $0x120] sm:$0xff] %vm300_vm0, %v11766_v0  ;;  %339 = vst.msk [vmem:[#allocation2 + $0x128] sm:$0xff] %vm300_vm0, %v11766_v0 }
  0x2b   : > { %341 = vst.msk [vmem:[#allocation2 + $0x138] sm:$0xff] %vm300_vm0, %v11766_v0  ;;  %342 = vst.msk [vmem:[#allocation2 + $0x140] sm:$0xff] %vm300_vm0, %v11766_v0 }
  0x2c   : > { %344 = vst.msk [vmem:[#allocation2 + $0x150] sm:$0xff] %vm300_vm0, %v11766_v0  ;;  %345 = vst.msk [vmem:[#allocation2 + $0x158] sm:$0xff] %vm300_vm0, %v11766_v0 }
  0x2d   : > { %347 = vst.msk [vmem:[#allocation2 + $0x168] sm:$0xff] %vm300_vm0, %v11766_v0  ;;  %348 = vst.msk [vmem:[#allocation2 + $0x170] sm:$0xff] %vm300_vm0, %v11766_v0 }
  0x2e   : > { %350 = vst.msk [vmem:[#allocation2 + $0x180] sm:$0xff] %vm300_vm0, %v11766_v0  ;;  %351 = vst.msk [vmem:[#allocation2 + $0x188] sm:$0xff] %vm300_vm0, %v11766_v0 }
  0x2f   : > { %353 = vst.msk [vmem:[#allocation2 + $0x198] sm:$0xff] %vm300_vm0, %v11766_v0  ;;  %354 = vst.msk [vmem:[#allocation2 + $0x1a0] sm:$0xff] %vm300_vm0, %v11766_v0 }
  0x30   : > { %304 = vst.msk [vmem:[#allocation2 + $0x10] sm:$0x3] %vm303_vm1, %v11766_v0  ;;  %307 = vst.msk [vmem:[#allocation2 + $0x28] sm:$0x3] %vm303_vm1, %v11766_v0 }
  0x31   : > { %310 = vst.msk [vmem:[#allocation2 + $0x40] sm:$0x3] %vm303_vm1, %v11766_v0  ;;  %313 = vst.msk [vmem:[#allocation2 + $0x58] sm:$0x3] %vm303_vm1, %v11766_v0 }
  0x32   : > { %316 = vst.msk [vmem:[#allocation2 + $0x70] sm:$0x3] %vm303_vm1, %v11766_v0  ;;  %319 = vst.msk [vmem:[#allocation2 + $0x88] sm:$0x3] %vm303_vm1, %v11766_v0 }
  0x33   : > { %322 = vst.msk [vmem:[#allocation2 + $0xa0] sm:$0x3] %vm303_vm1, %v11766_v0  ;;  %325 = vst.msk [vmem:[#allocation2 + $0xb8] sm:$0x3] %vm303_vm1, %v11766_v0 }
  0x34   : > { %328 = vst.msk [vmem:[#allocation2 + $0xd0] sm:$0x3] %vm303_vm1, %v11766_v0  ;;  %331 = vst.msk [vmem:[#allocation2 + $0xe8] sm:$0x3] %vm303_vm1, %v11766_v0 }
  0x35   : > { %334 = vst.msk [vmem:[#allocation2 + $0x100] sm:$0x3] %vm303_vm1, %v11766_v0  ;;  %337 = vst.msk [vmem:[#allocation2 + $0x118] sm:$0x3] %vm303_vm1, %v11766_v0 }
  0x36   : > { %340 = vst.msk [vmem:[#allocation2 + $0x130] sm:$0x3] %vm303_vm1, %v11766_v0  ;;  %343 = vst.msk [vmem:[#allocation2 + $0x148] sm:$0x3] %vm303_vm1, %v11766_v0 }
  0x37   : > { %346 = vst.msk [vmem:[#allocation2 + $0x160] sm:$0x3] %vm303_vm1, %v11766_v0  ;;  %349 = vst.msk [vmem:[#allocation2 + $0x178] sm:$0x3] %vm303_vm1, %v11766_v0 }
  0x38   : > { %352 = vst.msk [vmem:[#allocation2 + $0x190] sm:$0x3] %vm303_vm1, %v11766_v0  ;;  %355 = vst.msk [vmem:[#allocation2 + $0x1a8] sm:$0x3] %vm303_vm1, %v11766_v0 }
  0x39   : > { %357 = vst.msk [vmem:[#allocation4] sm:$0xff] %vm356_vm2, %v11766_v0  ;;  %358 = vst.msk [vmem:[#allocation4 + $0x8] sm:$0xff] %vm356_vm2, %v11766_v0 }
  0x3a   : > { %359 = vst.msk [vmem:[#allocation4 + $0x10] sm:$0xff] %vm356_vm2, %v11766_v0  ;;  %360 = vst.msk [vmem:[#allocation4 + $0x18] sm:$0xff] %vm356_vm2, %v11766_v0 }
  0x3b   : > { %361 = vst.msk [vmem:[#allocation4 + $0x20] sm:$0xff] %vm356_vm2, %v11766_v0  ;;  %362 = vst.msk [vmem:[#allocation4 + $0x28] sm:$0xff] %vm356_vm2, %v11766_v0 }
  0x3c   : > { %363 = vst.msk [vmem:[#allocation4 + $0x30] sm:$0xff] %vm356_vm2, %v11766_v0  ;;  %364 = vst.msk [vmem:[#allocation4 + $0x38] sm:$0xff] %vm356_vm2, %v11766_v0 }
  0x3d   : > { %365 = vst.msk [vmem:[#allocation4 + $0x40] sm:$0xff] %vm356_vm2, %v11766_v0  ;;  %366 = vst.msk [vmem:[#allocation4 + $0x48] sm:$0xff] %vm356_vm2, %v11766_v0 }
  0x3e   : > { %367 = vst.msk [vmem:[#allocation4 + $0x50] sm:$0xff] %vm356_vm2, %v11766_v0  ;;  %368 = vst.msk [vmem:[#allocation4 + $0x58] sm:$0xff] %vm356_vm2, %v11766_v0 }
  0x3f   : > { %369 = vst.msk [vmem:[#allocation4 + $0x60] sm:$0xff] %vm356_vm2, %v11766_v0  ;;  %370 = vst.msk [vmem:[#allocation4 + $0x68] sm:$0xff] %vm356_vm2, %v11766_v0 }
  0x40   : > { %371 = vst.msk [vmem:[#allocation4 + $0x70] sm:$0xff] %vm356_vm2, %v11766_v0  ;;  %372 = vst.msk [vmem:[#allocation4 + $0x78] sm:$0xff] %vm356_vm2, %v11766_v0 }
  0x41   : > { %373 = vst.msk [vmem:[#allocation4 + $0x80] sm:$0xff] %vm356_vm2, %v11766_v0  ;;  %374 = vst.msk [vmem:[#allocation4 + $0x88] sm:$0xff] %vm356_vm2, %v11766_v0 }
  0x42   : > { %375 = vst.msk [vmem:[#allocation4 + $0x90] sm:$0xff] %vm356_vm2, %v11766_v0  ;;  %376 = vst.msk [vmem:[#allocation4 + $0x98] sm:$0xff] %vm356_vm2, %v11766_v0 }
  0x43   : > { %377 = vst.msk [vmem:[#allocation4 + $0xa0] sm:$0xff] %vm356_vm2, %v11766_v0  ;;  %378 = vst.msk [vmem:[#allocation4 + $0xa8] sm:$0xff] %vm356_vm2, %v11766_v0 }
  0x44   : > { %379 = vst.msk [vmem:[#allocation4 + $0xb0] sm:$0xff] %vm356_vm2, %v11766_v0  ;;  %380 = vst.msk [vmem:[#allocation4 + $0xb8] sm:$0xff] %vm356_vm2, %v11766_v0 }
  0x45   : > { %381 = vst.msk [vmem:[#allocation4 + $0xc0] sm:$0xff] %vm356_vm2, %v11766_v0  ;;  %382 = vst.msk [vmem:[#allocation4 + $0xc8] sm:$0xff] %vm356_vm2, %v11766_v0 }
  0x46   : > { %383 = vst.msk [vmem:[#allocation4 + $0xd0] sm:$0xff] %vm356_vm2, %v11766_v0  ;;  %384 = vst.msk [vmem:[#allocation4 + $0xd8] sm:$0xff] %vm356_vm2, %v11766_v0 }
  0x47   : > { %385 = vst.msk [vmem:[#allocation4 + $0xe0] sm:$0xff] %vm356_vm2, %v11766_v0  ;;  %386 = vst.msk [vmem:[#allocation4 + $0xe8] sm:$0xff] %vm356_vm2, %v11766_v0 }
  0x48   : > { %387 = vst.msk [vmem:[#allocation4 + $0xf0] sm:$0xff] %vm356_vm2, %v11766_v0  ;;  %388 = vst.msk [vmem:[#allocation4 + $0xf8] sm:$0xff] %vm356_vm2, %v11766_v0 }
  0x49   : > { %445 = vst.msk [vmem:[#allocation5] sm:$0xff] %vm356_vm2, %v11766_v0  ;;  %446 = vst.msk [vmem:[#allocation5 + $0x8] sm:$0xff] %vm356_vm2, %v11766_v0 }
  0x4a   : > { %447 = vst.msk [vmem:[#allocation5 + $0x10] sm:$0xff] %vm356_vm2, %v11766_v0  ;;  %448 = vst.msk [vmem:[#allocation5 + $0x18] sm:$0xff] %vm356_vm2, %v11766_v0 }
  0x4b   : > { %449 = vst.msk [vmem:[#allocation5 + $0x20] sm:$0xff] %vm356_vm2, %v11766_v0  ;;  %450 = vst.msk [vmem:[#allocation5 + $0x28] sm:$0xff] %vm356_vm2, %v11766_v0 }
  0x4c   : > { %451 = vst.msk [vmem:[#allocation5 + $0x30] sm:$0xff] %vm356_vm2, %v11766_v0  ;;  %452 = vst.msk [vmem:[#allocation5 + $0x38] sm:$0xff] %vm356_vm2, %v11766_v0 }
  0x4d   : > { %453 = vst.msk [vmem:[#allocation5 + $0x40] sm:$0xff] %vm356_vm2, %v11766_v0  ;;  %454 = vst.msk [vmem:[#allocation5 + $0x48] sm:$0xff] %vm356_vm2, %v11766_v0 }
  0x4e   : > { %455 = vst.msk [vmem:[#allocation5 + $0x50] sm:$0xff] %vm356_vm2, %v11766_v0  ;;  %456 = vst.msk [vmem:[#allocation5 + $0x58] sm:$0xff] %vm356_vm2, %v11766_v0 }
  0x4f   : > { %457 = vst.msk [vmem:[#allocation5 + $0x60] sm:$0xff] %vm356_vm2, %v11766_v0  ;;  %458 = vst.msk [vmem:[#allocation5 + $0x68] sm:$0xff] %vm356_vm2, %v11766_v0 }
  0x50   : > { %459 = vst.msk [vmem:[#allocation5 + $0x70] sm:$0xff] %vm356_vm2, %v11766_v0  ;;  %460 = vst.msk [vmem:[#allocation5 + $0x78] sm:$0xff] %vm356_vm2, %v11766_v0 }
  0x51   : > { %461 = vst.msk [vmem:[#allocation5 + $0x80] sm:$0xff] %vm356_vm2, %v11766_v0  ;;  %462 = vst.msk [vmem:[#allocation5 + $0x88] sm:$0xff] %vm356_vm2, %v11766_v0 }
  0x52   : > { %463 = vst.msk [vmem:[#allocation5 + $0x90] sm:$0xff] %vm356_vm2, %v11766_v0  ;;  %464 = vst.msk [vmem:[#allocation5 + $0x98] sm:$0xff] %vm356_vm2, %v11766_v0 }
  0x53   : > { %465 = vst.msk [vmem:[#allocation5 + $0xa0] sm:$0xff] %vm356_vm2, %v11766_v0  ;;  %466 = vst.msk [vmem:[#allocation5 + $0xa8] sm:$0xff] %vm356_vm2, %v11766_v0 }
  0x54   : > { %467 = vst.msk [vmem:[#allocation5 + $0xb0] sm:$0xff] %vm356_vm2, %v11766_v0  ;;  %468 = vst.msk [vmem:[#allocation5 + $0xb8] sm:$0xff] %vm356_vm2, %v11766_v0 }
  0x55   : > { %469 = vst.msk [vmem:[#allocation5 + $0xc0] sm:$0xff] %vm356_vm2, %v11766_v0  ;;  %470 = vst.msk [vmem:[#allocation5 + $0xc8] sm:$0xff] %vm356_vm2, %v11766_v0 }
  0x56   : > { %471 = vst.msk [vmem:[#allocation5 + $0xd0] sm:$0xff] %vm356_vm2, %v11766_v0  ;;  %472 = vst.msk [vmem:[#allocation5 + $0xd8] sm:$0xff] %vm356_vm2, %v11766_v0 }
  0x57   : > { %473 = vst.msk [vmem:[#allocation5 + $0xe0] sm:$0xff] %vm356_vm2, %v11766_v0  ;;  %474 = vst.msk [vmem:[#allocation5 + $0xe8] sm:$0xff] %vm356_vm2, %v11766_v0 }
  0x58   : > { %475 = vst.msk [vmem:[#allocation5 + $0xf0] sm:$0xff] %vm356_vm2, %v11766_v0  ;;  %476 = vst.msk [vmem:[#allocation5 + $0xf8] sm:$0xff] %vm356_vm2, %v11766_v0 }
  0x59   : > { %390 = vst.msk [vmem:[#allocation3] sm:$0xff] %vm389_vm3, %v11766_v0  ;;  %391 = vst.msk [vmem:[#allocation3 + $0x8] sm:$0xff] %vm389_vm3, %v11766_v0 }
  0x5a   : > { %394 = vst.msk [vmem:[#allocation3 + $0x18] sm:$0xff] %vm389_vm3, %v11766_v0  ;;  %395 = vst.msk [vmem:[#allocation3 + $0x20] sm:$0xff] %vm389_vm3, %v11766_v0 }
  0x5b   : > { %397 = vst.msk [vmem:[#allocation3 + $0x30] sm:$0xff] %vm389_vm3, %v11766_v0  ;;  %398 = vst.msk [vmem:[#allocation3 + $0x38] sm:$0xff] %vm389_vm3, %v11766_v0 }
  0x5c   : > { %400 = vst.msk [vmem:[#allocation3 + $0x48] sm:$0xff] %vm389_vm3, %v11766_v0  ;;  %401 = vst.msk [vmem:[#allocation3 + $0x50] sm:$0xff] %vm389_vm3, %v11766_v0 }
  0x5d   : > { %403 = vst.msk [vmem:[#allocation3 + $0x60] sm:$0xff] %vm389_vm3, %v11766_v0  ;;  %404 = vst.msk [vmem:[#allocation3 + $0x68] sm:$0xff] %vm389_vm3, %v11766_v0 }
  0x5e   : > { %406 = vst.msk [vmem:[#allocation3 + $0x78] sm:$0xff] %vm389_vm3, %v11766_v0  ;;  %407 = vst.msk [vmem:[#allocation3 + $0x80] sm:$0xff] %vm389_vm3, %v11766_v0 }
  0x5f   : > { %409 = vst.msk [vmem:[#allocation3 + $0x90] sm:$0xff] %vm389_vm3, %v11766_v0  ;;  %410 = vst.msk [vmem:[#allocation3 + $0x98] sm:$0xff] %vm389_vm3, %v11766_v0 }
  0x60   : > { %412 = vst.msk [vmem:[#allocation3 + $0xa8] sm:$0xff] %vm389_vm3, %v11766_v0  ;;  %413 = vst.msk [vmem:[#allocation3 + $0xb0] sm:$0xff] %vm389_vm3, %v11766_v0 }
  0x61   : > { %415 = vst.msk [vmem:[#allocation3 + $0xc0] sm:$0xff] %vm389_vm3, %v11766_v0  ;;  %416 = vst.msk [vmem:[#allocation3 + $0xc8] sm:$0xff] %vm389_vm3, %v11766_v0 }
  0x62   : > { %418 = vst.msk [vmem:[#allocation3 + $0xd8] sm:$0xff] %vm389_vm3, %v11766_v0  ;;  %419 = vst.msk [vmem:[#allocation3 + $0xe0] sm:$0xff] %vm389_vm3, %v11766_v0 }
  0x63   : > { %421 = vst.msk [vmem:[#allocation3 + $0xf0] sm:$0xff] %vm389_vm3, %v11766_v0  ;;  %422 = vst.msk [vmem:[#allocation3 + $0xf8] sm:$0xff] %vm389_vm3, %v11766_v0 }
  0x64   : > { %424 = vst.msk [vmem:[#allocation3 + $0x108] sm:$0xff] %vm389_vm3, %v11766_v0  ;;  %425 = vst.msk [vmem:[#allocation3 + $0x110] sm:$0xff] %vm389_vm3, %v11766_v0 }
  0x65   : > { %427 = vst.msk [vmem:[#allocation3 + $0x120] sm:$0xff] %vm389_vm3, %v11766_v0  ;;  %428 = vst.msk [vmem:[#allocation3 + $0x128] sm:$0xff] %vm389_vm3, %v11766_v0 }
  0x66   : > { %430 = vst.msk [vmem:[#allocation3 + $0x138] sm:$0xff] %vm389_vm3, %v11766_v0  ;;  %431 = vst.msk [vmem:[#allocation3 + $0x140] sm:$0xff] %vm389_vm3, %v11766_v0 }
  0x67   : > { %433 = vst.msk [vmem:[#allocation3 + $0x150] sm:$0xff] %vm389_vm3, %v11766_v0  ;;  %434 = vst.msk [vmem:[#allocation3 + $0x158] sm:$0xff] %vm389_vm3, %v11766_v0 }
  0x68   : > { %436 = vst.msk [vmem:[#allocation3 + $0x168] sm:$0xff] %vm389_vm3, %v11766_v0  ;;  %437 = vst.msk [vmem:[#allocation3 + $0x170] sm:$0xff] %vm389_vm3, %v11766_v0 }
  0x69   : > { %439 = vst.msk [vmem:[#allocation3 + $0x180] sm:$0xff] %vm389_vm3, %v11766_v0  ;;  %440 = vst.msk [vmem:[#allocation3 + $0x188] sm:$0xff] %vm389_vm3, %v11766_v0 }
  0x6a   : > { %442 = vst.msk [vmem:[#allocation3 + $0x198] sm:$0xff] %vm389_vm3, %v11766_v0  ;;  %443 = vst.msk [vmem:[#allocation3 + $0x1a0] sm:$0xff] %vm389_vm3, %v11766_v0 }
  0x6b   : > { %393 = vst.msk [vmem:[#allocation3 + $0x10] sm:$0x3] %vm392_vm4, %v11766_v0  ;;  %396 = vst.msk [vmem:[#allocation3 + $0x28] sm:$0x3] %vm392_vm4, %v11766_v0 }
  0x6c   : > { %399 = vst.msk [vmem:[#allocation3 + $0x40] sm:$0x3] %vm392_vm4, %v11766_v0  ;;  %402 = vst.msk [vmem:[#allocation3 + $0x58] sm:$0x3] %vm392_vm4, %v11766_v0 }
  0x6d   : > { %405 = vst.msk [vmem:[#allocation3 + $0x70] sm:$0x3] %vm392_vm4, %v11766_v0  ;;  %408 = vst.msk [vmem:[#allocation3 + $0x88] sm:$0x3] %vm392_vm4, %v11766_v0 }
  0x6e   : > { %411 = vst.msk [vmem:[#allocation3 + $0xa0] sm:$0x3] %vm392_vm4, %v11766_v0  ;;  %414 = vst.msk [vmem:[#allocation3 + $0xb8] sm:$0x3] %vm392_vm4, %v11766_v0 }
  0x6f   : > { %417 = vst.msk [vmem:[#allocation3 + $0xd0] sm:$0x3] %vm392_vm4, %v11766_v0  ;;  %420 = vst.msk [vmem:[#allocation3 + $0xe8] sm:$0x3] %vm392_vm4, %v11766_v0 }
  0x70   : > { %423 = vst.msk [vmem:[#allocation3 + $0x100] sm:$0x3] %vm392_vm4, %v11766_v0  ;;  %426 = vst.msk [vmem:[#allocation3 + $0x118] sm:$0x3] %vm392_vm4, %v11766_v0 }
  0x71   : > { %429 = vst.msk [vmem:[#allocation3 + $0x130] sm:$0x3] %vm392_vm4, %v11766_v0  ;;  %432 = vst.msk [vmem:[#allocation3 + $0x148] sm:$0x3] %vm392_vm4, %v11766_v0 }
  0x72   : > { %435 = vst.msk [vmem:[#allocation3 + $0x160] sm:$0x3] %vm392_vm4, %v11766_v0  ;;  %438 = vst.msk [vmem:[#allocation3 + $0x178] sm:$0x3] %vm392_vm4, %v11766_v0 }
  0x73   : > { %441 = vst.msk [vmem:[#allocation3 + $0x190] sm:$0x3] %vm392_vm4, %v11766_v0  ;;  %444 = vst.msk [vmem:[#allocation3 + $0x1a8] sm:$0x3] %vm392_vm4, %v11766_v0 }
  0x74   : > { %478 = vst.msk [vmem:[#allocation6] sm:$0xff] %vm477_vm5, %v11766_v0  ;;  %479 = vst.msk [vmem:[#allocation6 + $0x8] sm:$0xff] %vm477_vm5, %v11766_v0 }
  0x75   : > { %480 = vst.msk [vmem:[#allocation6 + $0x10] sm:$0xff] %vm477_vm5, %v11766_v0  ;;  %481 = vst.msk [vmem:[#allocation6 + $0x18] sm:$0xff] %vm477_vm5, %v11766_v0 }
  0x76   : > { %482 = vst.msk [vmem:[#allocation6 + $0x20] sm:$0xff] %vm477_vm5, %v11766_v0  ;;  %483 = vst.msk [vmem:[#allocation6 + $0x28] sm:$0xff] %vm477_vm5, %v11766_v0 }
  0x77   : > { %484 = vst.msk [vmem:[#allocation6 + $0x30] sm:$0xff] %vm477_vm5, %v11766_v0  ;;  %485 = vst.msk [vmem:[#allocation6 + $0x38] sm:$0xff] %vm477_vm5, %v11766_v0 }
  0x78   : > { %486 = vst.msk [vmem:[#allocation6 + $0x40] sm:$0xff] %vm477_vm5, %v11766_v0  ;;  %487 = vst.msk [vmem:[#allocation6 + $0x48] sm:$0xff] %vm477_vm5, %v11766_v0 }
  0x79   : > { %488 = vst.msk [vmem:[#allocation6 + $0x50] sm:$0xff] %vm477_vm5, %v11766_v0  ;;  %489 = vst.msk [vmem:[#allocation6 + $0x58] sm:$0xff] %vm477_vm5, %v11766_v0 }
  0x7a   : > { %490 = vst.msk [vmem:[#allocation6 + $0x60] sm:$0xff] %vm477_vm5, %v11766_v0  ;;  %491 = vst.msk [vmem:[#allocation6 + $0x68] sm:$0xff] %vm477_vm5, %v11766_v0 }
  0x7b   : > { %492 = vst.msk [vmem:[#allocation6 + $0x70] sm:$0xff] %vm477_vm5, %v11766_v0  ;;  %493 = vst.msk [vmem:[#allocation6 + $0x78] sm:$0xff] %vm477_vm5, %v11766_v0 }
  0x7c   : > { %494 = vst.msk [vmem:[#allocation6 + $0x80] sm:$0xff] %vm477_vm5, %v11766_v0  ;;  %495 = vst.msk [vmem:[#allocation6 + $0x88] sm:$0xff] %vm477_vm5, %v11766_v0 }
  0x7d   : > { %496 = vst.msk [vmem:[#allocation6 + $0x90] sm:$0xff] %vm477_vm5, %v11766_v0  ;;  %497 = vst.msk [vmem:[#allocation6 + $0x98] sm:$0xff] %vm477_vm5, %v11766_v0 }
  0x7e   : > { %498 = vst.msk [vmem:[#allocation6 + $0xa0] sm:$0xff] %vm477_vm5, %v11766_v0  ;;  %499 = vst.msk [vmem:[#allocation6 + $0xa8] sm:$0xff] %vm477_vm5, %v11766_v0 }
  0x7f   : > { %500 = vst.msk [vmem:[#allocation6 + $0xb0] sm:$0xff] %vm477_vm5, %v11766_v0  ;;  %501 = vst.msk [vmem:[#allocation6 + $0xb8] sm:$0xff] %vm477_vm5, %v11766_v0 }
  0x80   : > { %502 = vst.msk [vmem:[#allocation6 + $0xc0] sm:$0xff] %vm477_vm5, %v11766_v0  ;;  %503 = vst.msk [vmem:[#allocation6 + $0xc8] sm:$0xff] %vm477_vm5, %v11766_v0 }
  0x81   : > { %504 = vst.msk [vmem:[#allocation6 + $0xd0] sm:$0xff] %vm477_vm5, %v11766_v0  ;;  %505 = vst.msk [vmem:[#allocation6 + $0xd8] sm:$0xff] %vm477_vm5, %v11766_v0 }
  0x82   : > { %506 = vst.msk [vmem:[#allocation6 + $0xe0] sm:$0xff] %vm477_vm5, %v11766_v0  ;;  %507 = vst.msk [vmem:[#allocation6 + $0xe8] sm:$0xff] %vm477_vm5, %v11766_v0 }
  0x83   : > { %508 = vst.msk [vmem:[#allocation6 + $0xf0] sm:$0xff] %vm477_vm5, %v11766_v0  ;;  %509 = vst.msk [vmem:[#allocation6 + $0xf8] sm:$0xff] %vm477_vm5, %v11766_v0 }
  0x84 PF: > { %v526_v1 = vld [vmem:[%s11840_s8 + $0x80] sm:$0xff]  ;;  %s575_s19 = scalar_select %p270_p6, 1, 0  ;;  %v524_v6 = vld [vmem:[%s11840_s8 + $0x70] sm:$0xff]  ;;  %v527_v11 = vld [vmem:[%s11840_s8 + $0x88] sm:$0xff]  ;;  %vm1169_vm6 = vcmask 1041408  }
  0x85   : > { %v558_v2 = vld [vmem:[%s11845_s11 + $0x80] sm:$0xff]  ;;  %v556_v7 = vld [vmem:[%s11845_s11 + $0x70] sm:$0xff]  ;;  %v559_v12 = vld [vmem:[%s11845_s11 + $0x88] sm:$0xff]  ;;  %s11767_s27 = smov 32   ;;  %vm1120_vm7 = vcmask 293888   ;;  %vm965_vm8 = vcmask 294144  }
  0x86   : > { %v657_v3 = vld [vmem:[#allocation6 + $0x80] sm:$0xff]  ;;  %v593_v4 = vmul.f32 %v558_v2, %v526_v1  ;;  %v625_v5 = vsub.f32 1.0, %v558_v2  ;;  %v655_v8 = vld [vmem:[#allocation6 + $0x70] sm:$0xff]  ;;  %s576_s26 = scvt.s32.f32 %s575_s19  ;;  %v591_v9 = vmul.f32 %v556_v7, %v524_v6  ;;  %v623_v10 = vsub.f32 1.0, %v556_v7  ;;  %v658_v13 = vld [vmem:[#allocation6 + $0x88] sm:$0xff]  ;;  %s11769_s7 = smov 96  }
  0x87   : > { %v594_v15 = vmul.f32 %v559_v12, %v527_v11  ;;  %v626_v16 = vsub.f32 1.0, %v559_v12  ;;  %v525_v17 = vld [vmem:[%s11840_s8 + $0x78] sm:$0xff]  ;;  %v511_v27 = vld [vmem:[%s11840_s8 + $0x8] sm:$0xff]  ;;  %v510_v33 = vld [vmem:[%s11840_s8] sm:$0xff]  ;;  %vm5205_vm9 = vcmask 523264   ;;  %vm5035_vm10 = vcmask 523520  }
  0x88   : > { %v689_v14 = vmul.f32 %v657_v3, %v625_v5  ;;  %v557_v18 = vld [vmem:[%s11845_s11 + $0x78] sm:$0xff]  ;;  %v12272_v20 = vstv %s576_s26  ;;  %s770_s18 = ssub.f32 1.0, %s576_s26  ;;  %v687_v21 = vmul.f32 %v655_v8, %v623_v10  ;;  %v543_v28 = vld [vmem:[%s11845_s11 + $0x8] sm:$0xff]  ;;  %v542_v34 = vld [vmem:[%s11845_s11] sm:$0xff]  ;;  %s11768_s26 = smov 64   ;;  %vm4745_vm11 = vcmask 261120  }
  0x89   : > { %v656_v19 = vld [vmem:[#allocation6 + $0x78] sm:$0xff]  ;;  %v592_v22 = vmul.f32 %v557_v18, %v525_v17  ;;  %v624_v23 = vsub.f32 1.0, %v557_v18  ;;  %v754_v25 = vmul.f32 %v12272_v20, %v526_v1  ;;  %v690_v26 = vmul.f32 %v658_v13, %v626_v16  ;;  %v642_v39 = vld [vmem:[#allocation6 + $0x8] sm:$0xff]  ;;  %v641_v44 = vld [vmem:[#allocation6] sm:$0xff] }
  0x8a   : > { %v721_v24 = vadd.f32 %v689_v14, %v593_v4  ;;  %v12277_v29 = vstv %s770_s18  ;;  %v719_v30 = vadd.f32 %v687_v21, %v591_v9  ;;  %v752_v31 = vmul.f32 %v12272_v20, %v524_v6  ;;  %v529_v45 = vld [vmem:[%s11840_s8 + $0x98] sm:$0xff]  ;;  %v528_v55 = vld [vmem:[%s11840_s8 + $0x90] sm:$0xff]  ;;  %v531_v61 = vld [vmem:[%s11840_s8 + $0xa8] sm:$0xff] }
  0x8b   : > { %v688_v32 = vmul.f32 %v656_v19, %v624_v23  ;;  %v722_v36 = vadd.f32 %v690_v26, %v594_v15  ;;  %v755_v37 = vmul.f32 %v12272_v20, %v527_v11  ;;  %v753_v38 = vmul.f32 %v12272_v20, %v525_v17  ;;  %v561_v46 = vld [vmem:[%s11845_s11 + $0x98] sm:$0xff]  ;;  %v560_v56 = vld [vmem:[%s11845_s11 + $0x90] sm:$0xff]  ;;  %v563_v62 = vld [vmem:[%s11845_s11 + $0xa8] sm:$0xff] }
  0x8c   : > { %v788_v35 = vmul.f32 %v12277_v29, %v721_v24  ;;  %v786_v40 = vmul.f32 %v12277_v29, %v719_v30  ;;  %v578_v42 = vmul.f32 %v543_v28, %v511_v27  ;;  %v610_v43 = vsub.f32 1.0, %v543_v28  ;;  %v660_v54 = vld [vmem:[#allocation6 + $0x98] sm:$0xff]  ;;  %v659_v3 = vld [vmem:[#allocation6 + $0x90] sm:$0xff]  ;;  %v662_v8 = vld [vmem:[#allocation6 + $0xa8] sm:$0xff] }
  0x8d   : > { %v720_v41 = vadd.f32 %v688_v32, %v592_v22  ;;  %v789_v48 = vmul.f32 %v12277_v29, %v722_v36  ;;  %v577_v49 = vmul.f32 %v542_v34, %v510_v33  ;;  %v609_v50 = vsub.f32 1.0, %v542_v34  ;;  %v530_v9 = vld [vmem:[%s11840_s8 + $0xa0] sm:$0xff]  ;;  %v513_v21 = vld [vmem:[%s11840_s8 + $0x18] sm:$0xff]  ;;  %v544_v28 = vld [vmem:[%s11845_s11 + $0x10] sm:$0xff] }
  0x8e   : > { %v820_v47 = vadd.f32 %v788_v35, %v754_v25  ;;  %v818_v51 = vadd.f32 %v786_v40, %v752_v31  ;;  %v674_v53 = vmul.f32 %v642_v39, %v610_v43  ;;  %v596_v59 = vmul.f32 %v561_v46, %v529_v45  ;;  %v562_v10 = vld [vmem:[%s11845_s11 + $0xa0] sm:$0xff]  ;;  %v545_v22 = vld [vmem:[%s11845_s11 + $0x18] sm:$0xff]  ;;  %v643_v39 = vld [vmem:[#allocation6 + $0x10] sm:$0xff] }
  0x8f   : > { %v787_v52 = vmul.f32 %v12277_v29, %v720_v41  ;;  %v821_v57 = vadd.f32 %v789_v48, %v755_v37  ;;  %v673_v58 = vmul.f32 %v641_v44, %v609_v50  ;;  %v628_v60 = vsub.f32 1.0, %v561_v46  ;;  %v661_v19 = vld [vmem:[#allocation6 + $0xa0] sm:$0xff]  ;;  %v644_v34 = vld [vmem:[#allocation6 + $0x18] sm:$0xff]  ;;  %v515_v40 = vld [vmem:[%s11840_s8 + $0x28] sm:$0xff] }
  0x90   : > { %900 = vrot.lane.b32.xlu1 %v820_v47, %s11767_s27  ;;  %896 = vrot.lane.b32.xlu0 %v818_v51, %s11767_s27  ;;  %v706_v0 = vadd.f32 %v674_v53, %v578_v42  ;;  %v739_v1 = vmul.f32 %v12272_v20, %v511_v27  ;;  %v738_v2 = vmul.f32 %v12272_v20, %v510_v33  ;;  %v627_v7 = vsub.f32 1.0, %v560_v56  ;;  %v512_v27 = vld [vmem:[%s11840_s8 + $0x10] sm:$0xff]  ;;  %v547_v41 = vld [vmem:[%s11845_s11 + $0x28] sm:$0xff] }
  0x91   : > { %v819_v63 = vadd.f32 %v787_v52, %v753_v38  ;;  %v705_v4 = vadd.f32 %v673_v58, %v577_v49  ;;  %v692_v5 = vmul.f32 %v660_v54, %v628_v60  ;;  %v595_v6 = vmul.f32 %v560_v56, %v528_v55  ;;  %v646_v50 = vld [vmem:[#allocation6 + $0x28] sm:$0xff]  ;;  %v514_v51 = vld [vmem:[%s11840_s8 + $0x20] sm:$0xff] }
  0x92   : > { %v773_v11 = vmul.f32 %v12277_v29, %v706_v0  ;;  %v757_v12 = vmul.f32 %v12272_v20, %v529_v45  ;;  %v598_v13 = vmul.f32 %v563_v62, %v531_v61  ;;  %v630_v14 = vsub.f32 1.0, %v563_v62  ;;  %v546_v52 = vld [vmem:[%s11845_s11 + $0x20] sm:$0xff] }
  0x93   : > { %v772_v15 = vmul.f32 %v12277_v29, %v705_v4  ;;  %v724_v16 = vadd.f32 %v692_v5, %v596_v59  ;;  %v691_v17 = vmul.f32 %v659_v3, %v627_v7  ;;  %v756_v18 = vmul.f32 %v12272_v20, %v528_v55  ;;  %v645_v62 = vld [vmem:[#allocation6 + $0x20] sm:$0xff]  ;;  %v532_v4 = vld [vmem:[%s11840_s8 + $0xb0] sm:$0xff] }
  0x94   : > { %902 = vrot.lane.b32.xlu1 %v821_v57, %s11767_s27  ;;  %898 = vrot.lane.b32.xlu0 %v819_v63, %s11767_s27  ;;  %v805_v23 = vadd.f32 %v773_v11, %v739_v1  ;;  %v694_v24 = vmul.f32 %v662_v8, %v630_v14  ;;  %v597_v25 = vmul.f32 %v562_v10, %v530_v9  ;;  %v629_v26 = vsub.f32 1.0, %v562_v10  ;;  %v533_v57 = vld [vmem:[%s11840_s8 + $0xb8] sm:$0xff]  ;;  %v564_v5 = vld [vmem:[%s11845_s11 + $0xb0] sm:$0xff] }
  0x95   : > { %v804_v30 = vadd.f32 %v772_v15, %v738_v2  ;;  %v791_v31 = vmul.f32 %v12277_v29, %v724_v16  ;;  %v723_v32 = vadd.f32 %v691_v17, %v595_v6  ;;  %v759_v33 = vmul.f32 %v12272_v20, %v531_v61  ;;  %v565_v63 = vld [vmem:[%s11845_s11 + $0xb8] sm:$0xff]  ;;  %v663_v15 = vld [vmem:[#allocation6 + $0xb0] sm:$0xff]  ;;  %v535_v16 = vld [vmem:[%s11840_s8 + $0xc8] sm:$0xff] }
  0x96   : > { %v726_v35 = vadd.f32 %v694_v24, %v598_v13  ;;  %v693_v36 = vmul.f32 %v661_v19, %v629_v26  ;;  %v580_v37 = vmul.f32 %v545_v22, %v513_v21  ;;  %v612_v38 = vsub.f32 1.0, %v545_v22  ;;  %v664_v10 = vld [vmem:[#allocation6 + $0xb8] sm:$0xff]  ;;  %v567_v17 = vld [vmem:[%s11845_s11 + $0xc8] sm:$0xff] }
  0x97   : > { %v823_v42 = vadd.f32 %v791_v31, %v757_v12  ;;  %v790_v43 = vmul.f32 %v12277_v29, %v723_v32  ;;  %v579_v44 = vmul.f32 %v544_v28, %v512_v27  ;;  %v611_v45 = vsub.f32 1.0, %v544_v28  ;;  %v534_v28 = vld [vmem:[%s11840_s8 + $0xc0] sm:$0xff] }
  0x98   : > { %870 = vrot.lane.b32.xlu1 %v805_v23, %s11767_s27  ;;  %868 = vrot.lane.b32.xlu0 %v804_v30, %s11767_s27  ;;  %v793_v46 = vmul.f32 %v12277_v29, %v726_v35  ;;  %v725_v47 = vadd.f32 %v693_v36, %v597_v25  ;;  %v758_v48 = vmul.f32 %v12272_v20, %v530_v9  ;;  %v614_v56 = vsub.f32 1.0, %v547_v41  ;;  %v566_v30 = vld [vmem:[%s11845_s11 + $0xc0] sm:$0xff]  ;;  %v517_v36 = vld [vmem:[%s11840_s8 + $0x38] sm:$0xff] }
  0x99   : > { %v676_v49 = vmul.f32 %v644_v34, %v612_v38  ;;  %v822_v53 = vadd.f32 %v790_v43, %v756_v18  ;;  %v675_v54 = vmul.f32 %v643_v39, %v611_v45  ;;  %v582_v55 = vmul.f32 %v547_v41, %v515_v40  ;;  %v665_v35 = vld [vmem:[#allocation6 + $0xc0] sm:$0xff]  ;;  %v516_v43 = vld [vmem:[%s11840_s8 + $0x30] sm:$0xff] }
  0x9a   : > { %v825_v58 = vadd.f32 %v793_v46, %v759_v33  ;;  %v792_v59 = vmul.f32 %v12277_v29, %v725_v47  ;;  %v741_v61 = vmul.f32 %v12272_v20, %v513_v21  ;;  %v678_v1 = vmul.f32 %v646_v50, %v614_v56  ;;  %v12349_v50 = vld [vmem:[%s11840_s8 + $0x48] sm:$0xff] }
  0x9b   : > { %v708_v60 = vadd.f32 %v676_v49, %v580_v37  ;;  %v707_v0 = vadd.f32 %v675_v54, %v579_v44  ;;  %v581_v2 = vmul.f32 %v546_v52, %v514_v51  ;;  %v613_v3 = vsub.f32 1.0, %v546_v52  ;;  %v549_v37 = vld [vmem:[%s11845_s11 + $0x38] sm:$0xff]  ;;  %v548_v44 = vld [vmem:[%s11845_s11 + $0x30] sm:$0xff]  ;;  %v551_v56 = vld [vmem:[%s11845_s11 + $0x48] sm:$0xff] }
  0x9c   : > { %906 = vrot.lane.b32.xlu1 %v823_v42, %s11767_s27  ;;  %904 = vrot.lane.b32.xlu0 %v822_v53, %s11767_s27  ;;  %v824_v6 = vadd.f32 %v792_v59, %v758_v48  ;;  %v740_v8 = vmul.f32 %v12272_v20, %v512_v27  ;;  %v600_v9 = vmul.f32 %v565_v63, %v533_v57  ;;  %v632_v14 = vsub.f32 1.0, %v565_v63  ;;  %v666_v27 = vld [vmem:[#allocation6 + $0xc8] sm:$0xff]  ;;  %v648_v42 = vld [vmem:[#allocation6 + $0x38] sm:$0xff]  ;;  %v647_v49 = vld [vmem:[#allocation6 + $0x30] sm:$0xff] }
  0x9d   : > { %v775_v7 = vmul.f32 %v12277_v29, %v708_v60  ;;  %v774_v11 = vmul.f32 %v12277_v29, %v707_v0  ;;  %v710_v12 = vadd.f32 %v678_v1, %v582_v55  ;;  %v677_v13 = vmul.f32 %v645_v62, %v613_v3  ;;  %v518_v62 = vld [vmem:[%s11840_s8 + $0x40] sm:$0xff]  ;;  %v12367_v3 = vld [vmem:[%s11840_s8 + $0xd8] sm:$0xff] }
  0x9e   : > { %v743_v18 = vmul.f32 %v12272_v20, %v515_v40  ;;  %v742_v19 = vmul.f32 %v12272_v20, %v514_v51  ;;  %v599_v21 = vmul.f32 %v564_v5, %v532_v4  ;;  %v631_v22 = vsub.f32 1.0, %v564_v5  ;;  %v12354_v51 = vld [vmem:[%s16591_s2 + $0x24] ss:$0 sps:$4 sm:$0x33]  }
  0x9f   : > { %v807_v23 = vadd.f32 %v775_v7, %v741_v61  ;;  %v777_v24 = vmul.f32 %v12277_v29, %v710_v12  ;;  %v709_v25 = vadd.f32 %v677_v13, %v581_v2  ;;  %v696_v26 = vmul.f32 %v664_v10, %v632_v14  ;;  %v650_v61 = vld [vmem:[#allocation6 + $0x48] sm:$0xff]  ;;  %11222 = vmatprep.subr.msk.bf16.mxu1 %vm1169_vm6, %v12354_v51  ;;  %v550_v2 = vld [vmem:[%s11845_s11 + $0x40] sm:$0xff]  ;;  %v536_v14 = vld [vmem:[%s11840_s8 + $0xd0] sm:$0xff] }
  0xa0   : > { %910 = vrot.lane.b32.xlu1 %v825_v58, %s11767_s27  ;;  %908 = vrot.lane.b32.xlu0 %v824_v6, %s11767_s27  ;;  %v806_v31 = vadd.f32 %v774_v11, %v740_v8  ;;  %v695_v32 = vmul.f32 %v663_v15, %v631_v22  ;;  %v602_v33 = vmul.f32 %v567_v17, %v535_v16  ;;  %v634_v34 = vsub.f32 1.0, %v567_v17  ;;  %v649_v8 = vld [vmem:[#allocation6 + $0x40] sm:$0xff]  ;;  %v568_v15 = vld [vmem:[%s11845_s11 + $0xd0] sm:$0xff] }
  0xa1   : > { %v776_v38 = vmul.f32 %v12277_v29, %v709_v25  ;;  %v728_v39 = vadd.f32 %v696_v26, %v600_v9  ;;  %v761_v40 = vmul.f32 %v12272_v20, %v533_v57  ;;  %v760_v41 = vmul.f32 %v12272_v20, %v532_v4  ;;  %11221 = vmatprep.subr.msk.bf16.mxu0 %vm1169_vm6, %v12354_v51  ;;  %v569_v9 = vld [vmem:[%s11845_s11 + $0xd8] sm:$0xff]  ;;  %v667_v26 = vld [vmem:[#allocation6 + $0xd0] sm:$0xff] }
  0xa2   : > { %v727_v45 = vadd.f32 %v695_v32, %v599_v21  ;;  %v698_v46 = vmul.f32 %v666_v27, %v634_v34  ;;  %v601_v47 = vmul.f32 %v566_v30, %v534_v28  ;;  %v633_v48 = vsub.f32 1.0, %v566_v30  ;;  %v668_v21 = vld [vmem:[#allocation6 + $0xd8] sm:$0xff]  ;;  %v539_v27 = vld [vmem:[%s11840_s8 + $0xe8] sm:$0xff] }
  0xa3   : > { %v809_v52 = vadd.f32 %v777_v24, %v743_v18  ;;  %v808_v53 = vadd.f32 %v776_v38, %v742_v19  ;;  %v795_v54 = vmul.f32 %v12277_v29, %v728_v39  ;;  %v584_v55 = vmul.f32 %v549_v37, %v517_v36  ;;  %v670_v38 = vld [vmem:[#allocation6 + $0xe8] sm:$0xff]  ;;  %v538_v39 = vld [vmem:[%s11840_s8 + $0xe0] sm:$0xff] }
  0xa4   : > { %874 = vrot.lane.b32.xlu1 %v807_v23, %s11767_s27  ;;  %872 = vrot.lane.b32.xlu0 %v806_v31, %s11767_s27  ;;  %v794_v57 = vmul.f32 %v12277_v29, %v727_v45  ;;  %v730_v58 = vadd.f32 %v698_v46, %v602_v33  ;;  %v697_v59 = vmul.f32 %v665_v35, %v633_v48  ;;  %v616_v60 = vsub.f32 1.0, %v549_v37  ;;  %v669_v48 = vld [vmem:[#allocation6 + $0xe0] sm:$0xff] }
  0xa5   : > { %v763_v63 = vmul.f32 %v12272_v20, %v535_v16  ;;  %v583_v0 = vmul.f32 %v548_v44, %v516_v43  ;;  %v615_v1 = vsub.f32 1.0, %v548_v44  ;;  %v762_v6 = vmul.f32 %v12272_v20, %v534_v28  ;;  %v571_v28 = vld [vmem:[%s11845_s11 + $0xe8] sm:$0xff] }
  0xa6   : > { %v797_v4 = vmul.f32 %v12277_v29, %v730_v58  ;;  %v729_v5 = vadd.f32 %v697_v59, %v601_v47  ;;  %v680_v7 = vmul.f32 %v648_v42, %v616_v60  ;;  %v827_v10 = vadd.f32 %v795_v54, %v761_v40  ;;  %v552_v58 = vld [vmem:[%s11845_s11 + $0x50] sm:$0xff] }
  0xa7   : > { %v679_v11 = vmul.f32 %v647_v49, %v615_v1  ;;  %v586_v12 = vmul.f32 %v551_v56, %v12349_v50  ;;  %v618_v13 = vsub.f32 1.0, %v551_v56  ;;  %v826_v16 = vadd.f32 %v794_v57, %v760_v41  ;;  %v12395_v49 = vld [vmem:[%s11840_s8 + $0x58] sm:$0xff]  ;;  %v520_v57 = vld [vmem:[%s11840_s8 + $0x50] sm:$0xff] }
  0xa8   : > { %878 = vrot.lane.b32.xlu1 %v809_v52, %s11767_s27  ;;  %876 = vrot.lane.b32.xlu0 %v808_v53, %s11767_s27  ;;  %v796_v17 = vmul.f32 %v12277_v29, %v729_v5  ;;  %v712_v18 = vadd.f32 %v680_v7, %v584_v55  ;;  %v745_v19 = vmul.f32 %v12272_v20, %v517_v36  ;;  %v617_v25 = vsub.f32 1.0, %v550_v2  ;;  %v553_v52 = vld [vmem:[%s11845_s11 + $0x58] sm:$0xff]  ;;  %v555_v5 = vld [vmem:[%s11845_s11 + $0x68] sm:$0xff] }
  0xa9   : > { %v711_v22 = vadd.f32 %v679_v11, %v583_v0  ;;  %v682_v23 = vmul.f32 %v650_v61, %v618_v13  ;;  %v585_v24 = vmul.f32 %v550_v2, %v518_v62  ;;  %v829_v30 = vadd.f32 %v797_v4, %v763_v63  ;;  %v651_v4 = vld [vmem:[#allocation6 + $0x50] sm:$0xff] }
  0xaa   : > { %v779_v31 = vmul.f32 %v12277_v29, %v712_v18  ;;  %v744_v32 = vmul.f32 %v12272_v20, %v516_v43  ;;  %v604_v33 = vmul.f32 %v569_v9, %v12367_v3  ;;  %v681_v36 = vmul.f32 %v649_v8, %v617_v25  ;;  %v570_v43 = vld [vmem:[%s11845_s11 + $0xe0] sm:$0xff] }
  0xab   : > { %v778_v34 = vmul.f32 %v12277_v29, %v711_v22  ;;  %v714_v35 = vadd.f32 %v682_v23, %v586_v12  ;;  %v636_v37 = vsub.f32 1.0, %v569_v9  ;;  %v828_v40 = vadd.f32 %v796_v17, %v762_v6  ;;  %v12410_v9 = vld [vmem:[%s11840_s8 + $0x68] sm:$0xff] }
  0xac   : > { %914 = vrot.lane.b32.xlu1 %v827_v10, %s11767_s27  ;;  %912 = vrot.lane.b32.xlu0 %v826_v16, %s11767_s27  ;;  %v603_v41 = vmul.f32 %v568_v15, %v536_v14  ;;  %v635_v42 = vsub.f32 1.0, %v568_v15  ;;  %v747_v44 = vmul.f32 %v12272_v20, %v12349_v50  ;;  %v713_v45 = vadd.f32 %v681_v36, %v585_v24  ;;  %v654_v15 = vld [vmem:[#allocation6 + $0x68] sm:$0xff]  ;;  %v12414_v16 = vld [vmem:[%s11840_s8 + $0x60] sm:$0xff] }
  0xad   : > { %v746_v46 = vmul.f32 %v12272_v20, %v518_v62  ;;  %v700_v47 = vmul.f32 %v668_v21, %v636_v37  ;;  %v811_v53 = vadd.f32 %v779_v31, %v745_v19  ;;  %v606_v55 = vmul.f32 %v571_v28, %v539_v27  ;;  %v652_v62 = vld [vmem:[#allocation6 + $0x58] sm:$0xff]  ;;  %v554_v21 = vld [vmem:[%s11845_s11 + $0x60] sm:$0xff] }
  0xae   : > { %v699_v54 = vmul.f32 %v667_v26, %v635_v42  ;;  %v638_v56 = vsub.f32 1.0, %v571_v28  ;;  %v810_v59 = vadd.f32 %v778_v34, %v744_v32  ;;  %v781_v50 = vmul.f32 %v12277_v29, %v714_v35  ;;  %v653_v31 = vld [vmem:[#allocation6 + $0x60] sm:$0xff]  ;;  %v573_v42 = vld [vmem:[%s11845_s11 + $0xf8] sm:$0xff] }
  0xaf   : > { %v780_v60 = vmul.f32 %v12277_v29, %v713_v45  ;;  %v732_v61 = vadd.f32 %v700_v47, %v604_v33  ;;  %v605_v1 = vmul.f32 %v570_v43, %v538_v39  ;;  %v637_v2 = vsub.f32 1.0, %v570_v43  ;;  %v11279_v45 = vld [vmem:[%s16591_s2 + $0x14] sm:$0xff]  }
  0xb0   : > { %918 = vrot.lane.b32.xlu1 %v829_v30, %s11767_s27  ;;  %916 = vrot.lane.b32.xlu0 %v828_v40, %s11767_s27  ;;  %v731_v63 = vadd.f32 %v699_v54, %v603_v41  ;;  %v702_v0 = vmul.f32 %v670_v38, %v638_v56  ;;  %v765_v6 = vmul.f32 %v12272_v20, %v12367_v3  ;;  %v620_v13 = vsub.f32 1.0, %v553_v52  ;;  %v1051_v40 = vld [vmem:[#allocation2 + $0x1] sm:$0xff]  ;;  %v1052_v41 = vld [vmem:[#allocation2 + $0x9] sm:$0xff]  ;;  %v672_v54 = vld [vmem:[#allocation6 + $0xf8] sm:$0xff] }
  0xb1   : > { %v799_v7 = vmul.f32 %v12277_v29, %v732_v61  ;;  %v764_v8 = vmul.f32 %v12272_v20, %v536_v14  ;;  %v701_v11 = vmul.f32 %v669_v48, %v637_v2  ;;  %v588_v12 = vmul.f32 %v553_v52, %v12395_v49  ;;  %v572_v47 = vld [vmem:[%s11845_s11 + $0xf0] sm:$0xff] }
  0xb2   : > { %v734_v10 = vadd.f32 %v702_v0, %v606_v55  ;;  %v813_v17 = vadd.f32 %v781_v50, %v747_v44  ;;  %v767_v18 = vmul.f32 %v12272_v20, %v539_v27  ;;  %v587_v3 = vmul.f32 %v552_v58, %v520_v57  ;;  %v11278_v27 = vld [vmem:[%s16591_s2 + $0x1c] sm:$0xff]   ;;  %v540_v55 = vld [vmem:[%s11840_s8 + $0xf0] sm:$0xff] }
  0xb3   : > { %v619_v19 = vsub.f32 1.0, %v552_v58  ;;  %v812_v14 = vadd.f32 %v780_v60, %v746_v46  ;;  %v798_v22 = vmul.f32 %v12277_v29, %v731_v63  ;;  %v733_v23 = vadd.f32 %v701_v11, %v605_v1  ;;  %v541_v46 = vld [vmem:[%s11840_s8 + $0xf8] sm:$0xff]  ;;  %v12451_v61 = vld [vmem:[%s16591_s2 + $0x10] ss:$0 sps:$4 sm:$0x33]  }
  0xb4   : > { %882 = vrot.lane.b32.xlu1 %v811_v53, %s11767_s27  ;;  %880 = vrot.lane.b32.xlu0 %v810_v59, %s11767_s27  ;;  %v684_v24 = vmul.f32 %v652_v62, %v620_v13  ;;  %v831_v25 = vadd.f32 %v799_v7, %v765_v6  ;;  %v766_v26 = vmul.f32 %v12272_v20, %v538_v39  ;;  %v622_v30 = vsub.f32 1.0, %v555_v5  ;;  %v671_v59 = vld [vmem:[#allocation6 + $0xf0] sm:$0xff]  ;;  %v12456_v62 = vld [vmem:[%s16591_s2 + $0x38] ss:$0 sps:$4 sm:$0x33]  }
  0xb5   : > { %v683_v28 = vmul.f32 %v651_v4, %v619_v19  ;;  %v801_v32 = vmul.f32 %v12277_v29, %v734_v10  ;;  %v800_v33 = vmul.f32 %v12277_v29, %v733_v23  ;;  %v590_v35 = vmul.f32 %v555_v5, %v12410_v9 }
  0xb6   : > { %v716_v34 = vadd.f32 %v684_v24, %v588_v12  ;;  %v686_v37 = vmul.f32 %v654_v15, %v622_v30  ;;  %v589_v38 = vmul.f32 %v554_v21, %v12414_v16  ;;  %v621_v39 = vsub.f32 1.0, %v554_v21 }
  0xb7   : > { %v715_v36 = vadd.f32 %v683_v28, %v587_v3  ;;  %v830_v43 = vadd.f32 %v798_v22, %v764_v8  ;;  %v1171_v44 = vsel %vm1169_vm6, %v12354_v51, 0  ;;  %v749_v48 = vmul.f32 %v12272_v20, %v12395_v49 }
  0xb8   : > { %886 = vrot.lane.b32.xlu1 %v813_v17, %s11767_s27  ;;  %884 = vrot.lane.b32.xlu0 %v812_v14, %s11767_s27  ;;  %v748_v52 = vmul.f32 %v12272_v20, %v520_v57  ;;  %v685_v53 = vmul.f32 %v653_v31, %v621_v39  ;;  %v833_v56 = vadd.f32 %v801_v32, %v767_v18  ;;  %v640_v0 = vsub.f32 1.0, %v573_v42 }
  0xb9   : > { %11218 = vmatpush3.bf16.msra.mxu1 %v1171_v44  ;;  %10478 = vmatpush3.bf16.msra.mxu0 %v1171_v44  ;;  %v832_v58 = vadd.f32 %v800_v33, %v766_v26  ;;  %v1083_v51 = vpack.c.bf16 %v1052_v41, %v1051_v40  ;;  %v783_v50 = vmul.f32 %v12277_v29, %v716_v34  ;;  %v639_v2 = vsub.f32 1.0, %v572_v47  ;;  %v11284_v44 = vld [vmem:[%s16591_s2] sm:$0xff]  }
  0xba   : > { %11216 = vmatprep.subr.bf16.mxu1 %v11278_v27  ;;  %10479 = vmatprep.subr.bf16.mxu0 %v11278_v27  ;;  %v782_v49 = vmul.f32 %v12277_v29, %v715_v36  ;;  %v718_v60 = vadd.f32 %v686_v37, %v590_v35  ;;  %v717_v57 = vadd.f32 %v685_v53, %v589_v38  ;;  %v1398_v35 = vsel %vm1169_vm6, %v12451_v61, 0  ;;  %v11282_v36 = vld [vmem:[%s16591_s2 + $0x8] sm:$0xff]  }
  0xbb   : > { %10483 = vmatprep.mubr.msk.bf16.mxu0 %vm1120_vm7, %v1083_v51  ;;  %v608_v63 = vmul.f32 %v573_v42, %v541_v46  ;;  %v607_v1 = vmul.f32 %v572_v47, %v540_v55  ;;  %v704_v4 = vmul.f32 %v672_v54, %v640_v0  ;;  %v703_v5 = vmul.f32 %v671_v59, %v639_v2  ;;  %v11285_v53 = vld [vmem:[%s16591_s2 + $0x28] sm:$0xff]  }
  0xbc   : > { %922 = vrot.lane.b32.xlu1 %v831_v25, %s11767_s27  ;;  %920 = vrot.lane.b32.xlu0 %v830_v43, %s11767_s27  ;;  %v815_v6 = vadd.f32 %v783_v50, %v749_v48  ;;  %v751_v7 = vmul.f32 %v12272_v20, %v12410_v9  ;;  %v785_v8 = vmul.f32 %v12277_v29, %v718_v60  ;;  %v1679_v42 = vsel %vm1169_vm6, %v12456_v62, 0  ;;  %v11283_v43 = vld [vmem:[%s16591_s2 + $0x30] sm:$0xff]   ;;  %v12525_v54 = vld [vmem:[%s16591_s2 + $0x4c] ss:$0 sps:$4 sm:$0x33]  }
  0xbd   : > { %11219 = vmatpush3.bf16.msra.mxu1 %v11278_v27  ;;  %10480 = vmatpush3.bf16.msra.mxu0 %v11278_v27  ;;  %v750_v10 = vmul.f32 %v12272_v20, %v12414_v16  ;;  %v814_v11 = vadd.f32 %v782_v49, %v748_v52  ;;  %v784_v12 = vmul.f32 %v12277_v29, %v717_v57  ;;  %v12536_v50 = vld [vmem:[%s16591_s2 + $0x60] ss:$0 sps:$4 sm:$0x33]   ;;  %vm9376_vm12 = vcmask 31744  }
  0xbe   : > { %11217 = vmatprep.subr.bf16.mxu1 %v11279_v45  ;;  %10481 = vmatprep.subr.bf16.mxu0 %v11279_v45  ;;  %v736_v13 = vadd.f32 %v704_v4, %v608_v63  ;;  %v735_v15 = vadd.f32 %v703_v5, %v607_v1  ;;  %v817_v9 = vadd.f32 %v785_v8, %v751_v7 }
  0xbf   : > { %v769_v16 = vmul.f32 %v12272_v20, %v541_v46  ;;  %v816_v18 = vadd.f32 %v784_v12, %v750_v10  ;;  %v768_v3 = vmul.f32 %v12272_v20, %v540_v55 }
  0xc0   : > { %926 = vrot.lane.b32.xlu1 %v833_v56, %s11767_s27  ;;  %924 = vrot.lane.b32.xlu0 %v832_v58, %s11767_s27  ;;  %v803_v17 = vmul.f32 %v12277_v29, %v736_v13  ;;  %v802_v19 = vmul.f32 %v12277_v29, %v735_v15 }
  0xc1   : > { %11220 = vmatpush3.bf16.msra.mxu1 %v11279_v45  ;;  %10482 = vmatpush3.bf16.msra.mxu0 %v11279_v45 }
  0xc2   : > { %11223 = vmatprep.subr.msk.bf16.mxu1 %vm1169_vm6, %v12451_v61  ;;  %11224 = vmatprep.subr.msk.bf16.mxu0 %vm1169_vm6, %v12456_v62  ;;  %v835_v21 = vadd.f32 %v803_v17, %v769_v16  ;;  %v834_v14 = vadd.f32 %v802_v19, %v768_v3 }
  0xc4   : > { %890 = vrot.lane.b32.xlu1 %v815_v6, %s11767_s27  ;;  %888 = vrot.lane.b32.xlu0 %v814_v11, %s11767_s27 }
  0xc8   : > { %894 = vrot.lane.b32.xlu1 %v817_v9, %s11767_s27  ;;  %892 = vrot.lane.b32.xlu0 %v816_v18, %s11767_s27 }
  0xcc   : > { %930 = vrot.lane.b32.xlu1 %v835_v21, %s11767_s27  ;;  %928 = vrot.lane.b32.xlu0 %v834_v14, %s11767_s27 }
 0x102   : > { %v901_v22 = vpop.permute.xlu1 %900  ;;  %v897_v23 = vpop.permute.xlu0 %896 }
 0x103   : > { %982 = vst.msk [vmem:[#allocation2 + $0xd9] sm:$0xff] %vm965_vm8, %v901_v22  ;;  %980 = vst.msk [vmem:[#allocation2 + $0xc1] sm:$0xff] %vm965_vm8, %v897_v23 }
 0x106   : > { %v903_v20 = vpop.permute.xlu1 %902  ;;  %v899_v29 = vpop.permute.xlu0 %898 }
 0x107   : > { %983 = vst.msk [vmem:[#allocation2 + $0xe1] sm:$0xff] %vm965_vm8, %v903_v20  ;;  %981 = vst.msk [vmem:[#allocation2 + $0xc9] sm:$0xff] %vm965_vm8, %v899_v29 }
 0x10a   : > { %v871_v24 = vpop.permute.xlu1 %870  ;;  %v869_v25 = vpop.permute.xlu0 %868  ;;  %v1069_v28 = vld [vmem:[#allocation2 + $0xd9] sm:$0xff]  ;;  %v1067_v27 = vld [vmem:[#allocation2 + $0xc1] sm:$0xff] }
 0x10b   : > { %967 = vst.msk [vmem:[#allocation2 + $0x21] sm:$0xff] %vm965_vm8, %v871_v24  ;;  %966 = vst.msk [vmem:[#allocation2 + $0x19] sm:$0xff] %vm965_vm8, %v869_v25 }
 0x10e   : > { %v907_v26 = vpop.permute.xlu1 %906  ;;  %v1070_v30 = vld [vmem:[#allocation2 + $0xe1] sm:$0xff]  ;;  %v905_v31 = vpop.permute.xlu0 %904  ;;  %v1068_v32 = vld [vmem:[#allocation2 + $0xc9] sm:$0xff] }
 0x10f   : > { %985 = vst.msk [vmem:[#allocation2 + $0xf9] sm:$0xff] %vm965_vm8, %v907_v26  ;;  %v12487_v33 = vpack.c.bf16 %v1070_v30, %v1069_v28  ;;  %984 = vst.msk [vmem:[#allocation2 + $0xf1] sm:$0xff] %vm965_vm8, %v905_v31  ;;  %v12490_v34 = vpack.c.bf16 %v1068_v32, %v1067_v27  ;;  %v998_v30 = vld [vmem:[#allocation2] sm:$0xff]  ;;  %v999_v31 = vld [vmem:[#allocation2 + $0x8] sm:$0xff] }
 0x111   : > { %10499 = vmatprep.mubr.msk.bf16.mxu1 %vm1120_vm7, %v12490_v34 }
 0x112   : > { %v911_v37 = vpop.permute.xlu1 %910  ;;  %v1054_v38 = vld [vmem:[#allocation2 + $0x21] sm:$0xff]  ;;  %10500 = vmatmul.mubr.msk.bf16.vlgmr.msra.gmra.mxu1 %vm1120_vm7, %v12487_v33  ;;  %v909_v39 = vpop.permute.xlu0 %908  ;;  %v1053_v40 = vld [vmem:[#allocation2 + $0x19] sm:$0xff] }
 0x113   : > { %987 = vst.msk [vmem:[#allocation2 + $0x111] sm:$0xff] %vm965_vm8, %v911_v37  ;;  %986 = vst.msk [vmem:[#allocation2 + $0x109] sm:$0xff] %vm965_vm8, %v909_v39  ;;  %v12503_v41 = vpack.c.bf16 %v1054_v38, %v1053_v40  ;;  %10516 = vmatpush3.bf16.msra.mxu1 %v1398_v35  ;;  %v1030_v37 = vpack.c.bf16 %v999_v31, %v998_v30 }
 0x114   : > { %10517 = vmatprep.subr.bf16.mxu1 %v11282_v36 }
 0x115   : > { %10484 = vmatmul.mubr.msk.bf16.vlgmr.msra.gmra.mxu0 %vm1120_vm7, %v12503_v41 }
 0x116   : > { %v875_v45 = vpop.permute.xlu1 %874  ;;  %v1072_v46 = vld [vmem:[#allocation2 + $0xf9] sm:$0xff]  ;;  %v873_v47 = vpop.permute.xlu0 %872  ;;  %v1071_v48 = vld [vmem:[#allocation2 + $0xf1] sm:$0xff]  ;;  %10554 = vmatpush3.bf16.msra.mxu0 %v1679_v42 }
 0x117   : > { %969 = vst.msk [vmem:[#allocation2 + $0x39] sm:$0xff] %vm965_vm8, %v875_v45  ;;  %968 = vst.msk [vmem:[#allocation2 + $0x31] sm:$0xff] %vm965_vm8, %v873_v47  ;;  %v12517_v52 = vpack.c.bf16 %v1072_v46, %v1071_v48  ;;  %10518 = vmatpush3.bf16.msra.mxu1 %v11282_v36  ;;  %10555 = vmatprep.subr.bf16.mxu0 %v11283_v43  ;;  %v1561_v45 = vld [vmem:[#allocation2 + $0x2] sm:$0xff]  ;;  %v1000_v46 = vld [vmem:[#allocation2 + $0x18] sm:$0xff] }
 0x118   : > { %10519 = vmatprep.subr.bf16.mxu1 %v11284_v44  ;;  %v1001_v47 = vld [vmem:[#allocation2 + $0x20] sm:$0xff]  ;;  %v1562_v48 = vld [vmem:[#allocation2 + $0xa] sm:$0xff] }
 0x119   : > { %10503 = vmatprep.mubr.msk.bf16.mxu1 %vm1120_vm7, %v12517_v52 }
 0x11a   : > { %v879_v55 = vpop.permute.xlu1 %878  ;;  %v1074_v56 = vld [vmem:[#allocation2 + $0x111] sm:$0xff]  ;;  %v877_v58 = vpop.permute.xlu0 %876  ;;  %v1073_v51 = vld [vmem:[#allocation2 + $0x109] sm:$0xff]  ;;  %10556 = vmatpush3.bf16.msra.mxu0 %v11283_v43 }
 0x11b   : > { %971 = vst.msk [vmem:[#allocation2 + $0x51] sm:$0xff] %vm965_vm8, %v879_v55  ;;  %970 = vst.msk [vmem:[#allocation2 + $0x49] sm:$0xff] %vm965_vm8, %v877_v58  ;;  %v12531_v59 = vpack.c.bf16 %v1074_v56, %v1073_v51  ;;  %10520 = vmatpush3.bf16.msra.mxu1 %v11284_v44  ;;  %10557 = vmatprep.subr.bf16.mxu0 %v11285_v53 }
 0x11c   : > { %11225 = vmatprep.subr.msk.bf16.mxu1 %vm1169_vm6, %v12525_v54 }
 0x11d   : > { %10504 = vmatmul.mubr.msk.bf16.gmra.mxu1 %vm1120_vm7, %v12531_v59 }
 0x11e   : > { %v915_v49 = vpop.permute.xlu1 %914  ;;  %v1056_v60 = vld [vmem:[#allocation2 + $0x39] sm:$0xff]  ;;  %v913_v57 = vpop.permute.xlu0 %912  ;;  %v1055_v61 = vld [vmem:[#allocation2 + $0x31] sm:$0xff]  ;;  %10558 = vmatpush3.bf16.msra.mxu0 %v11285_v53 }
 0x11f   : > { %989 = vst.msk [vmem:[#allocation2 + $0x129] sm:$0xff] %vm965_vm8, %v915_v49  ;;  %988 = vst.msk [vmem:[#allocation2 + $0x121] sm:$0xff] %vm965_vm8, %v913_v57  ;;  %v12544_v62 = vpack.c.bf16 %v1056_v60, %v1055_v61  ;;  %11226 = vmatprep.subr.msk.bf16.mxu0 %vm1169_vm6, %v12536_v50  ;;  %v1002_v55 = vld [vmem:[#allocation2 + $0x30] sm:$0xff]  ;;  %v1003_v56 = vld [vmem:[#allocation2 + $0x38] sm:$0xff]  ;;  %v12601_v49 = vpack.c.bf16 %v1001_v47, %v1000_v46  ;;  %v1992_v60 = vsel %vm1169_vm6, %v12525_v54, 0 }
 0x120   : > { %v1593_v57 = vpack.c.bf16 %v1562_v48, %v1561_v45  ;;  %v11288_v61 = vld [vmem:[%s16591_s2 + $0x44] sm:$0xff]  }
 0x121   : > { %10487 = vmatprep.mubr.msk.bf16.mxu0 %vm1120_vm7, %v12544_v62  ;;  %v1564_v54 = vld [vmem:[#allocation2 + $0x22] sm:$0xff] }
 0x122   : > { %v919_v63 = vpop.permute.xlu1 %918  ;;  %v1058_v0 = vld [vmem:[#allocation2 + $0x51] sm:$0xff]  ;;  %v917_v1 = vpop.permute.xlu0 %916  ;;  %v1057_v2 = vld [vmem:[#allocation2 + $0x49] sm:$0xff]  ;;  %v1014_v48 = vld [vmem:[#allocation2 + $0xc0] sm:$0xff] }
 0x123   : > { %991 = vst.msk [vmem:[#allocation2 + $0x141] sm:$0xff] %vm965_vm8, %v919_v63  ;;  %990 = vst.msk [vmem:[#allocation2 + $0x139] sm:$0xff] %vm965_vm8, %v917_v1  ;;  %v12552_v4 = vpack.c.bf16 %v1058_v0, %v1057_v2  ;;  %v12608_v63 = vpack.c.bf16 %v1003_v56, %v1002_v55  ;;  %v11290_v0 = vld [vmem:[%s16591_s2 + $0x3c] sm:$0xff]   ;;  %v1004_v1 = vld [vmem:[#allocation2 + $0x48] sm:$0xff] }
 0x124   : > { %v1005_v2 = vld [vmem:[#allocation2 + $0x50] sm:$0xff]  ;;  %v1017_v56 = vld [vmem:[#allocation2 + $0xe0] sm:$0xff] }
 0x125   : > { %10488 = vmatmul.mubr.msk.bf16.gmra.mxu0 %vm1120_vm7, %v12552_v4 }
 0x126   : > { %v883_v5 = vpop.permute.xlu1 %882  ;;  %v1076_v6 = vld [vmem:[#allocation2 + $0x129] sm:$0xff]  ;;  %v881_v7 = vpop.permute.xlu0 %880  ;;  %v1075_v8 = vld [vmem:[#allocation2 + $0x121] sm:$0xff] }
 0x127   : > { %973 = vst.msk [vmem:[#allocation2 + $0x69] sm:$0xff] %vm965_vm8, %v883_v5  ;;  %972 = vst.msk [vmem:[#allocation2 + $0x61] sm:$0xff] %vm965_vm8, %v881_v7  ;;  %v12558_v10 = vpack.c.bf16 %v1076_v6, %v1075_v8  ;;  %v1563_v5 = vld [vmem:[#allocation2 + $0x1a] sm:$0xff]  ;;  %v1565_v8 = vld [vmem:[#allocation2 + $0x32] sm:$0xff] }
 0x129   : > { %10507 = vmatprep.mubr.msk.bf16.mxu1 %vm1120_vm7, %v12558_v10 }
 0x12a   : > { %v887_v11 = vpop.permute.xlu1 %886  ;;  %v1078_v12 = vld [vmem:[#allocation2 + $0x141] sm:$0xff]  ;;  %v885_v13 = vpop.permute.xlu0 %884  ;;  %v1077_v15 = vld [vmem:[#allocation2 + $0x139] sm:$0xff] }
 0x12b   : > { %975 = vst.msk [vmem:[#allocation2 + $0x81] sm:$0xff] %vm965_vm8, %v887_v11  ;;  %974 = vst.msk [vmem:[#allocation2 + $0x79] sm:$0xff] %vm965_vm8, %v885_v13  ;;  %v12564_v9 = vpack.c.bf16 %v1078_v12, %v1077_v15  ;;  %v1566_v11 = vld [vmem:[#allocation2 + $0x3a] sm:$0xff]  ;;  %v12620_v12 = vpack.c.bf16 %v1005_v2, %v1004_v1  ;;  %v12622_v13 = vpack.c.bf16 %v1564_v54, %v1563_v5  ;;  %v2305_v15 = vsel %vm1169_vm6, %v12536_v50, 0  ;;  %v1567_v50 = vld [vmem:[#allocation2 + $0x4a] sm:$0xff] }
 0x12c   : > { %v1019_v54 = vld [vmem:[#allocation2 + $0xf8] sm:$0xff] }
 0x12d   : > { %10508 = vmatmul.mubr.msk.bf16.gmra.mxu1 %vm1120_vm7, %v12564_v9  ;;  %v1016_v1 = vld [vmem:[#allocation2 + $0xd8] sm:$0xff] }
 0x12e   : > { %v923_v16 = vpop.permute.xlu1 %922  ;;  %v1060_v17 = vld [vmem:[#allocation2 + $0x69] sm:$0xff]  ;;  %v921_v18 = vpop.permute.xlu0 %920  ;;  %v1059_v3 = vld [vmem:[#allocation2 + $0x61] sm:$0xff]  ;;  %v12690_v2 = vpack.c.bf16 %v1017_v56, %v1016_v1 }
 0x12f   : > { %993 = vst.msk [vmem:[#allocation2 + $0x159] sm:$0xff] %vm965_vm8, %v923_v16  ;;  %992 = vst.msk [vmem:[#allocation2 + $0x151] sm:$0xff] %vm965_vm8, %v921_v18  ;;  %v12570_v19 = vpack.c.bf16 %v1060_v17, %v1059_v3  ;;  %v1006_v6 = vld [vmem:[#allocation2 + $0x60] sm:$0xff]  ;;  %v1007_v7 = vld [vmem:[#allocation2 + $0x68] sm:$0xff]  ;;  %v12635_v18 = vpack.c.bf16 %v1566_v11, %v1565_v8 }
 0x130   : > { %v11289_v16 = vld [vmem:[%s16591_s2 + $0x58] sm:$0xff]   ;;  %v12629_v17 = vpack.c.bf16 %v1007_v7, %v1006_v6  ;;  %v12640_v3 = vld [vmem:[%s16591_s2 + $0x74] ss:$0 sps:$4 sm:$0x33]   ;;  %v1580_v11 = vld [vmem:[#allocation2 + $0xe2] sm:$0xff] }
 0x131   : > { %10491 = vmatprep.mubr.msk.bf16.mxu0 %vm1120_vm7, %v12570_v19  ;;  %v1579_v8 = vld [vmem:[#allocation2 + $0xda] sm:$0xff] }
 0x132   : > { %v927_v21 = vpop.permute.xlu1 %926  ;;  %v1062_v14 = vld [vmem:[#allocation2 + $0x81] sm:$0xff]  ;;  %v925_v22 = vpop.permute.xlu0 %924  ;;  %v1061_v23 = vld [vmem:[#allocation2 + $0x79] sm:$0xff] }
 0x133   : > { %995 = vst.msk [vmem:[#allocation2 + $0x171] sm:$0xff] %vm965_vm8, %v927_v21  ;;  %994 = vst.msk [vmem:[#allocation2 + $0x169] sm:$0xff] %vm965_vm8, %v925_v22  ;;  %v12576_v20 = vpack.c.bf16 %v1062_v14, %v1061_v23  ;;  %v1568_v21 = vld [vmem:[#allocation2 + $0x52] sm:$0xff]  ;;  %v1009_v23 = vld [vmem:[#allocation2 + $0x80] sm:$0xff] }
 0x134   : > { %v11291_v14 = vld [vmem:[%s16591_s2 + $0x50] sm:$0xff]   ;;  %v1008_v22 = vld [vmem:[#allocation2 + $0x78] sm:$0xff]  ;;  %v12653_v31 = vpack.c.bf16 %v1568_v21, %v1567_v50  ;;  %v1022_v21 = vld [vmem:[#allocation2 + $0x120] sm:$0xff] }
 0x135   : > { %10492 = vmatmul.mubr.msk.bf16.gmra.mxu0 %vm1120_vm7, %v12576_v20  ;;  %v12651_v30 = vpack.c.bf16 %v1009_v23, %v1008_v22  ;;  %v1582_v50 = vld [vmem:[#allocation2 + $0xfa] sm:$0xff]  ;;  %v1581_v22 = vld [vmem:[#allocation2 + $0xf2] sm:$0xff] }
 0x136   : > { %v891_v29 = vpop.permute.xlu1 %890  ;;  %v1080_v24 = vld [vmem:[#allocation2 + $0x159] sm:$0xff]  ;;  %v889_v25 = vpop.permute.xlu0 %888  ;;  %v1079_v26 = vld [vmem:[#allocation2 + $0x151] sm:$0xff] }
 0x137   : > { %977 = vst.msk [vmem:[#allocation2 + $0x99] sm:$0xff] %vm965_vm8, %v891_v29  ;;  %976 = vst.msk [vmem:[#allocation2 + $0x91] sm:$0xff] %vm965_vm8, %v889_v25  ;;  %v12582_v28 = vpack.c.bf16 %v1080_v24, %v1079_v26  ;;  %v1570_v29 = vld [vmem:[#allocation2 + $0x6a] sm:$0xff]  ;;  %v1569_v26 = vld [vmem:[#allocation2 + $0x62] sm:$0xff] }
 0x138   : > { %v1589_v1 = vld [vmem:[#allocation2 + $0x152] sm:$0xff] }
 0x139   : > { %10511 = vmatprep.mubr.msk.bf16.mxu1 %vm1120_vm7, %v12582_v28 }
 0x13a   : > { %v895_v27 = vpop.permute.xlu1 %894  ;;  %v1082_v32 = vld [vmem:[#allocation2 + $0x171] sm:$0xff]  ;;  %v893_v35 = vpop.permute.xlu0 %892  ;;  %v1081_v36 = vld [vmem:[#allocation2 + $0x169] sm:$0xff] }
 0x13b   : > { %979 = vst.msk [vmem:[#allocation2 + $0xb1] sm:$0xff] %vm965_vm8, %v895_v27  ;;  %978 = vst.msk [vmem:[#allocation2 + $0xa9] sm:$0xff] %vm965_vm8, %v893_v35  ;;  %v12588_v38 = vpack.c.bf16 %v1082_v32, %v1081_v36  ;;  %v12657_v32 = vpack.c.bf16 %v1570_v29, %v1569_v26  ;;  %v12662_v35 = vld [vmem:[%s16591_s2 + $0x88] ss:$0 sps:$4 sm:$0x33]   ;;  %v12708_v29 = vpack.c.bf16 %v1580_v11, %v1579_v8  ;;  %v1583_v26 = vld [vmem:[#allocation2 + $0x10a] sm:$0xff] }
 0x13c   : > { %v1572_v36 = vld [vmem:[#allocation2 + $0x82] sm:$0xff]  ;;  %v1590_v8 = vld [vmem:[#allocation2 + $0x15a] sm:$0xff] }
 0x13d   : > { %10512 = vmatmul.mubr.msk.bf16.gmra.mxu1 %vm1120_vm7, %v12588_v38 }
 0x13e   : > { %v1064_v39 = vld [vmem:[#allocation2 + $0x99] sm:$0xff]  ;;  %v931_v40 = vpop.permute.xlu1 %930  ;;  %v1063_v42 = vld [vmem:[#allocation2 + $0x91] sm:$0xff]  ;;  %10521 = vmatprep.mubr.msk.bf16.mxu1 %vm1120_vm7, %v1030_v37  ;;  %v929_v43 = vpop.permute.xlu0 %928 }
 0x13f   : > { %997 = vst.msk [vmem:[#allocation2 + $0x189] sm:$0xff] %vm965_vm8, %v931_v40  ;;  %v12594_v44 = vpack.c.bf16 %v1064_v39, %v1063_v42  ;;  %996 = vst.msk [vmem:[#allocation2 + $0x181] sm:$0xff] %vm965_vm8, %v929_v43  ;;  %v1010_v24 = vld [vmem:[#allocation2 + $0x90] sm:$0xff]  ;;  %v1011_v25 = vld [vmem:[#allocation2 + $0x98] sm:$0xff] }
 0x140   : > { %v12655_v27 = vpack.c.bf16 %v1011_v25, %v1010_v24  ;;  %v1571_v40 = vld [vmem:[#allocation2 + $0x7a] sm:$0xff]  ;;  %v1015_v42 = vld [vmem:[#allocation2 + $0xc8] sm:$0xff]  ;;  %v1573_v43 = vld [vmem:[#allocation2 + $0x92] sm:$0xff]  ;;  %v12712_v25 = vpack.c.bf16 %v1582_v50, %v1581_v22  ;;  %v2618_v22 = vsel %vm1169_vm6, %v12640_v3, 0 }
 0x141   : > { %10495 = vmatprep.mubr.msk.bf16.mxu0 %vm1120_vm7, %v12594_v44  ;;  %v1574_v45 = vld [vmem:[#allocation2 + $0x9a] sm:$0xff]  ;;  %v12676_v47 = vpack.c.bf16 %v1572_v36, %v1571_v40  ;;  %v1584_v36 = vld [vmem:[#allocation2 + $0x112] sm:$0xff]  ;;  %v1586_v40 = vld [vmem:[#allocation2 + $0x12a] sm:$0xff] }
 0x142   : > { %v1066_v53 = vld [vmem:[#allocation2 + $0xb1] sm:$0xff]  ;;  %v1065_v58 = vld [vmem:[#allocation2 + $0xa9] sm:$0xff]  ;;  %v12680_v55 = vpack.c.bf16 %v1574_v45, %v1573_v43  ;;  %v12724_v56 = vpack.c.bf16 %v1584_v36, %v1583_v26  ;;  %v11295_v36 = vld [vmem:[%s16591_s2 + $0x80] sm:$0xff]  }
 0x143   : > { %v12599_v51 = vpack.c.bf16 %v1066_v53, %v1065_v58  ;;  %v1012_v37 = vld [vmem:[#allocation2 + $0xa8] sm:$0xff]  ;;  %v1013_v39 = vld [vmem:[#allocation2 + $0xb0] sm:$0xff]  ;;  %v12678_v53 = vpack.c.bf16 %v1015_v42, %v1014_v48  ;;  %v1027_v43 = vld [vmem:[#allocation2 + $0x158] sm:$0xff] }
 0x144   : > { %v12674_v46 = vpack.c.bf16 %v1013_v39, %v1012_v37  ;;  %v1575_v58 = vld [vmem:[#allocation2 + $0xaa] sm:$0xff]  ;;  %v1024_v37 = vld [vmem:[#allocation2 + $0x138] sm:$0xff]  ;;  %v1025_v39 = vld [vmem:[#allocation2 + $0x140] sm:$0xff] }
 0x145   : > { %10496 = vmatmul.mubr.msk.bf16.gmra.mxu0 %vm1120_vm7, %v12599_v51  ;;  %10522 = vmatmul.mubr.msk.bf16.vlgmr.msra.gmra.mxu1 %vm1120_vm7, %v12601_v49  ;;  %v1026_v42 = vld [vmem:[#allocation2 + $0x150] sm:$0xff]  ;;  %v1585_v45 = vld [vmem:[#allocation2 + $0x122] sm:$0xff]  ;;  %v12722_v48 = vpack.c.bf16 %v1025_v39, %v1024_v37 }
 0x146   : > { %10525 = vmatprep.mubr.msk.bf16.mxu1 %vm1120_vm7, %v12608_v63  ;;  %10592 = vmatpush3.bf16.msra.mxu1 %v1992_v60  ;;  %v1576_v60 = vld [vmem:[#allocation2 + $0xb2] sm:$0xff]  ;;  %v1591_v50 = vld [vmem:[#allocation2 + $0x16a] sm:$0xff] }
 0x147   : > { %10559 = vmatprep.mubr.msk.bf16.mxu0 %vm1120_vm7, %v1593_v57  ;;  %10593 = vmatprep.subr.bf16.mxu1 %v11288_v61  ;;  %v1577_v57 = vld [vmem:[#allocation2 + $0xc2] sm:$0xff]  ;;  %v12692_v5 = vpack.c.bf16 %v1576_v60, %v1575_v58  ;;  %v12726_v58 = vpack.c.bf16 %v1027_v43, %v1026_v42  ;;  %v12728_v60 = vpack.c.bf16 %v1586_v40, %v1585_v45  ;;  %v11294_v26 = vld [vmem:[%s16591_s2 + $0x6c] sm:$0xff]  }
 0x148   : > { %v2530_v42 = vld [vmem:[#allocation2 + $0x182] sm:$0xff]  ;;  %v2531_v43 = vld [vmem:[#allocation2 + $0x18a] sm:$0xff] }
 0x149   : > { %v3127_v45 = vld [vmem:[#allocation2 + $0x31] sm:$0xff] }
 0x14a   : > { %10594 = vmatpush3.bf16.msra.mxu1 %v11288_v61  ;;  %v1018_v61 = vld [vmem:[#allocation2 + $0xf0] sm:$0xff] }
 0x14b   : > { %10595 = vmatprep.subr.bf16.mxu1 %v11290_v0  ;;  %v12694_v6 = vpack.c.bf16 %v1019_v54, %v1018_v61  ;;  %v1028_v61 = vld [vmem:[#allocation2 + $0x168] sm:$0xff]  ;;  %v1029_v54 = vld [vmem:[#allocation2 + $0x170] sm:$0xff] }
 0x14c   : > { %v12738_v11 = vpack.c.bf16 %v1029_v54, %v1028_v61  ;;  %v12960_v61 = vpack.c.bf16 %v2531_v43, %v2530_v42 }
 0x14d   : > { %10526 = vmatmul.mubr.msk.bf16.gmra.mxu1 %vm1120_vm7, %v12620_v12  ;;  %10560 = vmatmul.mubr.msk.bf16.vlgmr.msra.gmra.mxu0 %vm1120_vm7, %v12622_v13 }
 0x14e   : > { %10630 = vmatpush3.bf16.msra.mxu0 %v2305_v15  ;;  %10529 = vmatprep.mubr.msk.bf16.mxu1 %vm1120_vm7, %v12629_v17  ;;  %v1020_v15 = vld [vmem:[#allocation2 + $0x108] sm:$0xff] }
 0x14f   : > { %10563 = vmatprep.mubr.msk.bf16.mxu0 %vm1120_vm7, %v12635_v18  ;;  %10631 = vmatprep.subr.bf16.mxu0 %v11289_v16 }
 0x150   : > { %10596 = vmatpush3.bf16.msra.mxu1 %v11290_v0  ;;  %v1578_v0 = vld [vmem:[#allocation2 + $0xca] sm:$0xff] }
 0x151   : > { %11227 = vmatprep.subr.msk.bf16.mxu1 %vm1169_vm6, %v12640_v3  ;;  %v12696_v7 = vpack.c.bf16 %v1578_v0, %v1577_v57  ;;  %v1588_v57 = vld [vmem:[#allocation2 + $0x142] sm:$0xff]  ;;  %v1587_v0 = vld [vmem:[#allocation2 + $0x13a] sm:$0xff]  ;;  %v2932_v3 = vsel %vm1169_vm6, %v12662_v35, 0 }
 0x152   : > { %10632 = vmatpush3.bf16.msra.mxu0 %v11289_v16  ;;  %v1021_v16 = vld [vmem:[#allocation2 + $0x110] sm:$0xff] }
 0x153   : > { %10633 = vmatprep.subr.bf16.mxu0 %v11291_v14  ;;  %v12706_v23 = vpack.c.bf16 %v1021_v16, %v1020_v15  ;;  %v12740_v15 = vpack.c.bf16 %v1588_v57, %v1587_v0  ;;  %v12742_v16 = vpack.c.bf16 %v1590_v8, %v1589_v1  ;;  %v2845_v0 = vld [vmem:[#allocation2 + $0x1a0] sm:$0xff] }
 0x155   : > { %10530 = vmatmul.mubr.msk.bf16.gmra.mxu1 %vm1120_vm7, %v12651_v30  ;;  %10564 = vmatmul.mubr.msk.bf16.gmra.mxu0 %vm1120_vm7, %v12653_v31 }
 0x156   : > { %10533 = vmatprep.mubr.msk.bf16.mxu1 %vm1120_vm7, %v12655_v27  ;;  %10567 = vmatprep.mubr.msk.bf16.mxu0 %vm1120_vm7, %v12657_v32 }
 0x157   : > { %10634 = vmatpush3.bf16.msra.mxu0 %v11291_v14  ;;  %v1023_v14 = vld [vmem:[#allocation2 + $0x128] sm:$0xff] }
 0x158   : > { %11228 = vmatprep.subr.msk.bf16.mxu0 %vm1169_vm6, %v12662_v35  ;;  %v12710_v24 = vpack.c.bf16 %v1023_v14, %v1022_v21  ;;  %v1592_v21 = vld [vmem:[#allocation2 + $0x172] sm:$0xff] }
 0x159   : > { %v12752_v14 = vpack.c.bf16 %v1592_v21, %v1591_v50  ;;  %v11297_v35 = vld [vmem:[%s16591_s2 + $0x78] sm:$0xff]  }
 0x15d   : > { %10534 = vmatmul.mubr.msk.bf16.gmra.mxu1 %vm1120_vm7, %v12674_v46  ;;  %10568 = vmatmul.mubr.msk.bf16.gmra.mxu0 %vm1120_vm7, %v12676_v47 }
 0x15e   : > { %10537 = vmatprep.mubr.msk.bf16.mxu1 %vm1120_vm7, %v12678_v53  ;;  %10571 = vmatprep.mubr.msk.bf16.mxu0 %vm1120_vm7, %v12680_v55 }
 0x165   : > { %10538 = vmatmul.mubr.msk.bf16.gmra.mxu1 %vm1120_vm7, %v12690_v2  ;;  %10572 = vmatmul.mubr.msk.bf16.gmra.mxu0 %vm1120_vm7, %v12692_v5 }
 0x166   : > { %10541 = vmatprep.mubr.msk.bf16.mxu1 %vm1120_vm7, %v12694_v6  ;;  %10575 = vmatprep.mubr.msk.bf16.mxu0 %vm1120_vm7, %v12696_v7 }
 0x16d   : > { %10542 = vmatmul.mubr.msk.bf16.gmra.mxu1 %vm1120_vm7, %v12706_v23  ;;  %10576 = vmatmul.mubr.msk.bf16.gmra.mxu0 %vm1120_vm7, %v12708_v29 }
 0x16e   : > { %10545 = vmatprep.mubr.msk.bf16.mxu1 %vm1120_vm7, %v12710_v24  ;;  %10579 = vmatprep.mubr.msk.bf16.mxu0 %vm1120_vm7, %v12712_v25 }
 0x175   : > { %10546 = vmatmul.mubr.msk.bf16.gmra.mxu1 %vm1120_vm7, %v12722_v48  ;;  %10580 = vmatmul.mubr.msk.bf16.gmra.mxu0 %vm1120_vm7, %v12724_v56 }
 0x176   : > { %10549 = vmatprep.mubr.msk.bf16.mxu1 %vm1120_vm7, %v12726_v58  ;;  %10583 = vmatprep.mubr.msk.bf16.mxu0 %vm1120_vm7, %v12728_v60 }
 0x17d   : > { %10550 = vmatmul.mubr.msk.bf16.gmra.mxu1 %vm1120_vm7, %v12738_v11  ;;  %10584 = vmatmul.mubr.msk.bf16.gmra.mxu0 %vm1120_vm7, %v12740_v15 }
 0x17e   : > { %10587 = vmatprep.mubr.msk.bf16.mxu0 %vm1120_vm7, %v12742_v16  ;;  %10597 = vmatprep.mubr.msk.bf16.mxu1 %vm1120_vm7, %v12601_v49  ;;  %v11296_v49 = vld [vmem:[%s16591_s2 + $0x64] sm:$0xff]  }
 0x185   : > { %10588 = vmatmul.mubr.msk.bf16.gmra.mxu0 %vm1120_vm7, %v12752_v14  ;;  %10598 = vmatmul.mubr.msk.bf16.vlgmr.msra.gmra.mxu1 %vm1120_vm7, %v12608_v63 }
 0x186   : > { %10601 = vmatprep.mubr.msk.bf16.mxu1 %vm1120_vm7, %v12620_v12  ;;  %10635 = vmatprep.mubr.msk.bf16.mxu0 %vm1120_vm7, %v12503_v41  ;;  %v11298_v41 = vld [vmem:[%s16591_s2 + $0x9c] ss:$0 sps:$4 sm:$0x33]  }
 0x187   : > { %10668 = vmatpush3.bf16.msra.mxu1 %v2618_v22  ;;  %v3132_v22 = vld [vmem:[#allocation2 + $0x69] sm:$0xff] }
 0x188   : > { %10669 = vmatprep.subr.bf16.mxu1 %v11294_v26 }
 0x18b   : > { %10670 = vmatpush3.bf16.msra.mxu1 %v11294_v26 }
 0x18c   : > { %10671 = vmatprep.subr.bf16.mxu1 %v11296_v49 }
 0x18d   : > { %10602 = vmatmul.mubr.msk.bf16.gmra.mxu1 %vm1120_vm7, %v12629_v17  ;;  %10636 = vmatmul.mubr.msk.bf16.vlgmr.msra.gmra.mxu0 %vm1120_vm7, %v12544_v62  ;;  %v11299_v62 = vld [vmem:[%s16591_s2 + $0xb0] ss:$0 sps:$4 sm:$0x33]  }
 0x18e   : > { %10706 = vmatpush3.bf16.msra.mxu0 %v2932_v3  ;;  %10605 = vmatprep.mubr.msk.bf16.mxu1 %vm1120_vm7, %v12651_v30 }
 0x18f   : > { %10639 = vmatprep.mubr.msk.bf16.mxu0 %vm1120_vm7, %v12552_v4  ;;  %10707 = vmatprep.subr.bf16.mxu0 %v11295_v36  ;;  %v2218_v4 = vld [vmem:[#allocation2 + $0x189] sm:$0xff] }
 0x190   : > { %10672 = vmatpush3.bf16.msra.mxu1 %v11296_v49 }
 0x191   : > { %11229 = vmatprep.subr.msk.bf16.mxu1 %vm1169_vm6, %v11298_v41 }
 0x192   : > { %10708 = vmatpush3.bf16.msra.mxu0 %v11295_v36 }
 0x193   : > { %10709 = vmatprep.subr.bf16.mxu0 %v11297_v35 }
 0x195   : > { %10606 = vmatmul.mubr.msk.bf16.gmra.mxu1 %vm1120_vm7, %v12655_v27  ;;  %10640 = vmatmul.mubr.msk.bf16.gmra.mxu0 %vm1120_vm7, %v12570_v19  ;;  %v11300_v19 = vld [vmem:[%s16591_s2 + $0x94] sm:$0xff]  }
 0x196   : > { %10609 = vmatprep.mubr.msk.bf16.mxu1 %vm1120_vm7, %v12674_v46  ;;  %10643 = vmatprep.mubr.msk.bf16.mxu0 %vm1120_vm7, %v12576_v20  ;;  %v11302_v20 = vld [vmem:[%s16591_s2 + $0x8c] sm:$0xff]  }
 0x197   : > { %10710 = vmatpush3.bf16.msra.mxu0 %v11297_v35 }
 0x198   : > { %11230 = vmatprep.subr.msk.bf16.mxu0 %vm1169_vm6, %v11299_v62 }
 0x19d   : > { %10610 = vmatmul.mubr.msk.bf16.gmra.mxu1 %vm1120_vm7, %v12678_v53  ;;  %10644 = vmatmul.mubr.msk.bf16.gmra.mxu0 %vm1120_vm7, %v12594_v44  ;;  %v11303_v44 = vld [vmem:[%s16591_s2 + $0xa0] sm:$0xff]  }
 0x19e   : > { %10613 = vmatprep.mubr.msk.bf16.mxu1 %vm1120_vm7, %v12690_v2  ;;  %10647 = vmatprep.mubr.msk.bf16.mxu0 %vm1120_vm7, %v12599_v51 }
 0x1a5   : > { %10614 = vmatmul.mubr.msk.bf16.gmra.mxu1 %vm1120_vm7, %v12694_v6  ;;  %10648 = vmatmul.mubr.msk.bf16.gmra.mxu0 %vm1120_vm7, %v12490_v34  ;;  %v1905_v34 = vld [vmem:[#allocation2 + $0x188] sm:$0xff] }
 0x1a6   : > { %10617 = vmatprep.mubr.msk.bf16.mxu1 %vm1120_vm7, %v12706_v23  ;;  %10651 = vmatprep.mubr.msk.bf16.mxu0 %vm1120_vm7, %v12487_v33  ;;  %v1904_v33 = vld [vmem:[#allocation2 + $0x180] sm:$0xff] }
 0x1ad   : > { %10618 = vmatmul.mubr.msk.bf16.gmra.mxu1 %vm1120_vm7, %v12710_v24  ;;  %10652 = vmatmul.mubr.msk.bf16.gmra.mxu0 %vm1120_vm7, %v12517_v52  ;;  %v12834_v52 = vpack.c.bf16 %v1905_v34, %v1904_v33 }
 0x1ae   : > { %10621 = vmatprep.mubr.msk.bf16.mxu1 %vm1120_vm7, %v12722_v48  ;;  %10655 = vmatprep.mubr.msk.bf16.mxu0 %vm1120_vm7, %v12531_v59  ;;  %v2217_v59 = vld [vmem:[#allocation2 + $0x181] sm:$0xff] }
 0x1b5   : > { %10622 = vmatmul.mubr.msk.bf16.gmra.mxu1 %vm1120_vm7, %v12726_v58  ;;  %10656 = vmatmul.mubr.msk.bf16.gmra.mxu0 %vm1120_vm7, %v12558_v10  ;;  %v12844_v10 = vpack.c.bf16 %v2218_v4, %v2217_v59  ;;  %v3134_v59 = vld [vmem:[#allocation2 + $0x81] sm:$0xff] }
 0x1b6   : > { %10625 = vmatprep.mubr.msk.bf16.mxu1 %vm1120_vm7, %v12738_v11  ;;  %10659 = vmatprep.mubr.msk.bf16.mxu0 %vm1120_vm7, %v12564_v9  ;;  %v3245_v9 = vsel %vm1169_vm6, %v11298_v41, 0 }
 0x1bd   : > { %10626 = vmatmul.mubr.msk.bf16.gmra.mxu1 %vm1120_vm7, %v12834_v52  ;;  %10660 = vmatmul.mubr.msk.bf16.gmra.mxu0 %vm1120_vm7, %v12582_v28  ;;  %v3558_v28 = vsel %vm1169_vm6, %v11299_v62, 0 }
 0x1be   : > { %10663 = vmatprep.mubr.msk.bf16.mxu0 %vm1120_vm7, %v12588_v38  ;;  %10673 = vmatprep.mubr.msk.bf16.mxu1 %vm1120_vm7, %v12622_v13  ;;  %v11301_v38 = vld [vmem:[%s16591_s2 + $0xa8] sm:$0xff]  }
 0x1c5   : > { %10664 = vmatmul.mubr.msk.bf16.gmra.mxu0 %vm1120_vm7, %v12844_v10  ;;  %10674 = vmatmul.mubr.msk.bf16.vlgmr.msra.gmra.mxu1 %vm1120_vm7, %v12635_v18 }
 0x1c6   : > { %10677 = vmatprep.mubr.msk.bf16.mxu1 %vm1120_vm7, %v12653_v31  ;;  %10711 = vmatprep.mubr.msk.bf16.mxu0 %vm1120_vm7, %v12608_v63 }
 0x1c7   : > { %10744 = vmatpush3.bf16.msra.mxu1 %v3245_v9 }
 0x1c8   : > { %10745 = vmatprep.subr.bf16.mxu1 %v11300_v19 }
 0x1cb   : > { %10746 = vmatpush3.bf16.msra.mxu1 %v11300_v19  ;;  %v3135_v19 = vld [vmem:[#allocation2 + $0x91] sm:$0xff] }
 0x1cc   : > { %10747 = vmatprep.subr.bf16.mxu1 %v11302_v20 }
 0x1cd   : > { %10678 = vmatmul.mubr.msk.bf16.gmra.mxu1 %vm1120_vm7, %v12657_v32  ;;  %10712 = vmatmul.mubr.msk.bf16.vlgmr.msra.gmra.mxu0 %vm1120_vm7, %v12620_v12 }
 0x1ce   : > { %10782 = vmatpush3.bf16.msra.mxu0 %v3558_v28  ;;  %10681 = vmatprep.mubr.msk.bf16.mxu1 %vm1120_vm7, %v12676_v47 }
 0x1cf   : > { %10715 = vmatprep.mubr.msk.bf16.mxu0 %vm1120_vm7, %v12629_v17  ;;  %10783 = vmatprep.subr.bf16.mxu0 %v11301_v38 }
 0x1d0   : > { %10748 = vmatpush3.bf16.msra.mxu1 %v11302_v20  ;;  %v3136_v20 = vld [vmem:[#allocation2 + $0x99] sm:$0xff] }
 0x1d1   : > { %v3163_v42 = vpack.c.bf16 %v3136_v20, %v3135_v19 }
 0x1d2   : > { %10784 = vmatpush3.bf16.msra.mxu0 %v11301_v38  ;;  %v12876_v51 = vpop.f32.mrf.mxu1 }
 0x1d3   : > { %10785 = vmatprep.subr.bf16.mxu0 %v11303_v44 }
 0x1d4   : > { %v12886_v63 = vpop.f32.mrf.mxu1 }
 0x1d5   : > { %10682 = vmatmul.mubr.msk.bf16.gmra.mxu1 %vm1120_vm7, %v12680_v55  ;;  %10716 = vmatmul.mubr.msk.bf16.gmra.mxu0 %vm1120_vm7, %v12651_v30  ;;  %v12888_v12 = vpop.f32.mrf.mxu0 }
 0x1d6   : > { %10685 = vmatprep.mubr.msk.bf16.mxu1 %vm1120_vm7, %v12692_v5  ;;  %10719 = vmatprep.mubr.msk.bf16.mxu0 %vm1120_vm7, %v12655_v27  ;;  %v12890_v13 = vpop.f32.mrf.mxu1 }
 0x1d7   : > { %10786 = vmatpush3.bf16.msra.mxu0 %v11303_v44  ;;  %v12900_v17 = vpop.f32.mrf.mxu0 }
 0x1d8   : > { %v12902_v30 = vpop.f32.mrf.mxu1 }
 0x1d9   : > { %v12906_v5 = vpop.f32.mrf.mxu0 }
 0x1dd   : > { %10686 = vmatmul.mubr.msk.bf16.gmra.mxu1 %vm1120_vm7, %v12696_v7  ;;  %10720 = vmatmul.mubr.msk.bf16.gmra.mxu0 %vm1120_vm7, %v12674_v46  ;;  %v12904_v27 = vpop.f32.mrf.mxu1  ;;  %v12918_v46 = vpop.f32.mrf.mxu0 }
 0x1de   : > { %10689 = vmatprep.mubr.msk.bf16.mxu1 %vm1120_vm7, %v12708_v29  ;;  %10723 = vmatprep.mubr.msk.bf16.mxu0 %vm1120_vm7, %v12678_v53 }
 0x1df   : > { %v12908_v37 = vpop.f32.mrf.mxu1 }
 0x1e1   : > { %v12920_v53 = vpop.f32.mrf.mxu1 }
 0x1e3   : > { %v12924_v29 = vpop.f32.mrf.mxu1 }
 0x1e4   : > { %16728 = vst [vmem:[#allocation7_spill] sm:$0xff] %v12924_v29 }
 0x1e5   : > { %10690 = vmatmul.mubr.msk.bf16.gmra.mxu1 %vm1120_vm7, %v12712_v25  ;;  %10724 = vmatmul.mubr.msk.bf16.gmra.mxu0 %vm1120_vm7, %v12690_v2  ;;  %v12922_v7 = vpop.f32.mrf.mxu0 }
 0x1e6   : > { %10693 = vmatprep.mubr.msk.bf16.mxu1 %vm1120_vm7, %v12724_v56  ;;  %10727 = vmatprep.mubr.msk.bf16.mxu0 %vm1120_vm7, %v12694_v6  ;;  %v3128_v56 = vld [vmem:[#allocation2 + $0x39] sm:$0xff] }
 0x1e7   : > { %v12926_v39 = vpop.f32.mrf.mxu0 }
 0x1e9   : > { %v12938_v6 = vpop.f32.mrf.mxu0 }
 0x1eb   : > { %v12942_v40 = vpop.f32.mrf.mxu0 }
 0x1ed   : > { %10694 = vmatmul.mubr.msk.bf16.gmra.mxu1 %vm1120_vm7, %v12728_v60  ;;  %10728 = vmatmul.mubr.msk.bf16.gmra.mxu0 %vm1120_vm7, %v12706_v23  ;;  %v12936_v2 = vpop.f32.mrf.mxu1 }
 0x1ee   : > { %10697 = vmatprep.mubr.msk.bf16.mxu1 %vm1120_vm7, %v12740_v15  ;;  %10731 = vmatprep.mubr.msk.bf16.mxu0 %vm1120_vm7, %v12710_v24  ;;  %v3129_v15 = vld [vmem:[#allocation2 + $0x49] sm:$0xff] }
 0x1ef   : > { %v12940_v25 = vpop.f32.mrf.mxu1 }
 0x1f1   : > { %v12952_v23 = vpop.f32.mrf.mxu1 }
 0x1f3   : > { %v12956_v60 = vpop.f32.mrf.mxu1 }
 0x1f4   : > { %16729 = vst [vmem:[#allocation8_spill] sm:$0xff] %v12956_v60 }
 0x1f5   : > { %10698 = vmatmul.mubr.msk.bf16.gmra.mxu1 %vm1120_vm7, %v12742_v16  ;;  %10732 = vmatmul.mubr.msk.bf16.gmra.mxu0 %vm1120_vm7, %v12722_v48  ;;  %v12954_v24 = vpop.f32.mrf.mxu0  ;;  %v3159_v48 = vpack.c.bf16 %v3128_v56, %v3127_v45  ;;  %v3130_v16 = vld [vmem:[#allocation2 + $0x51] sm:$0xff] }
 0x1f6   : > { %10701 = vmatprep.mubr.msk.bf16.mxu1 %vm1120_vm7, %v12752_v14  ;;  %10735 = vmatprep.mubr.msk.bf16.mxu0 %vm1120_vm7, %v12726_v58  ;;  %v2844_v58 = vld [vmem:[#allocation2 + $0x198] sm:$0xff]  ;;  %v3131_v14 = vld [vmem:[#allocation2 + $0x61] sm:$0xff]  ;;  %v3160_v49 = vpack.c.bf16 %v3130_v16, %v3129_v15 }
 0x1f7   : > { %v12958_v57 = vpop.f32.mrf.mxu0  ;;  %v2861_v21 = vpack.c.bf16 %v2845_v0, %v2844_v58  ;;  %v3161_v3 = vpack.c.bf16 %v3132_v22, %v3131_v14  ;;  %v3137_v0 = vld [vmem:[#allocation2 + $0xa9] sm:$0xff]  ;;  %v3138_v15 = vld [vmem:[#allocation2 + $0xb1] sm:$0xff] }
 0x1f9   : > { %v12971_v1 = vpop.f32.mrf.mxu0 }
 0x1fb   : > { %v12977_v26 = vpop.f32.mrf.mxu0 }
 0x1fd   : > { %v12962_v54 = vpop.f32.mrf.mxu1  ;;  %10702 = vmatmul.mubr.msk.bf16.gmra.mxu1 %vm1120_vm7, %v12960_v61  ;;  %10736 = vmatmul.mubr.msk.bf16.gmra.mxu0 %vm1120_vm7, %v12738_v11 }
 0x1fe   : > { %10739 = vmatprep.mubr.msk.bf16.mxu0 %vm1120_vm7, %v12834_v52  ;;  %10749 = vmatprep.mubr.msk.bf16.mxu1 %vm1120_vm7, %v3159_v48  ;;  %v3133_v52 = vld [vmem:[#allocation2 + $0x79] sm:$0xff] }
 0x1ff   : > { %v12973_v8 = vpop.f32.mrf.mxu1 }
 0x201   : > { %v12975_v50 = vpop.f32.mrf.mxu1 }
 0x203   : > { %v12979_v11 = vpop.f32.mrf.mxu1 }
 0x204   : > { %16730 = vst [vmem:[#allocation9_spill] sm:$0xff] %v12979_v11 }
 0x205   : > { %v12981_v36 = vpop.f32.mrf.mxu0  ;;  %v10523_v41 = vpop.f32.mrf.mxu1  ;;  %10740 = vmatmul.mubr.msk.bf16.gmra.mxu0 %vm1120_vm7, %v2861_v21  ;;  %10750 = vmatmul.mubr.msk.bf16.vlgmr.msra.gmra.mxu1 %vm1120_vm7, %v3160_v49 }
 0x206   : > { %v1443_v35 = vadd.f32 %v10523_v41, %v12888_v12  ;;  %10753 = vmatprep.mubr.msk.bf16.mxu1 %vm1120_vm7, %v3161_v3  ;;  %10787 = vmatprep.mubr.msk.bf16.mxu0 %vm1120_vm7, %v12635_v18  ;;  %v3162_v12 = vpack.c.bf16 %v3134_v59, %v3133_v52  ;;  %v3164_v3 = vpack.c.bf16 %v3138_v15, %v3137_v0  ;;  %v3139_v41 = vld [vmem:[#allocation2 + $0xc1] sm:$0xff] }
 0x207   : > { %v12989_v62 = vpop.f32.mrf.mxu0  ;;  %v1434_v33 = vpop.f32.mrf.mxu1 }
 0x208   : > { %v1435_v34 = vadd.f32 %v1434_v33, %v12900_v17 }
 0x209   : > { %v12992_v4 = vpop.f32.mrf.mxu0  ;;  %v10524_v9 = vpop.f32.mrf.mxu1 }
 0x20a   : > { %v1446_v28 = vadd.f32 %v10524_v9, %v12906_v5  ;;  %v3142_v9 = vld [vmem:[#allocation2 + $0xe1] sm:$0xff] }
 0x20b   : > { %v12995_v38 = vpop.f32.mrf.mxu0  ;;  %v1437_v44 = vpop.f32.mrf.mxu1 }
 0x20c   : > { %v1438_v18 = vadd.f32 %v1437_v44, %v12918_v46  ;;  %v3451_v44 = vld [vmem:[#allocation2 + $0xb2] sm:$0xff] }
 0x20d   : > { %v10527_v43 = vpop.f32.mrf.mxu1  ;;  %v10561_v45 = vpop.f32.mrf.mxu0  ;;  %10754 = vmatmul.mubr.msk.bf16.gmra.mxu1 %vm1120_vm7, %v3162_v12  ;;  %10788 = vmatmul.mubr.msk.bf16.vlgmr.msra.gmra.mxu0 %vm1120_vm7, %v12653_v31  ;;  %v3140_v31 = vld [vmem:[#allocation2 + $0xc9] sm:$0xff] }
 0x20e   : > { %v1459_v17 = vadd.f32 %v10527_v43, %v12922_v7  ;;  %v13002_v56 = vadd.f32 %v10561_v45, %v1443_v35  ;;  %10757 = vmatprep.mubr.msk.bf16.mxu1 %vm1120_vm7, %v3163_v42  ;;  %10791 = vmatprep.mubr.msk.bf16.mxu0 %vm1120_vm7, %v12657_v32  ;;  %v3452_v12 = vld [vmem:[#allocation2 + $0xc2] sm:$0xff]  ;;  %v3144_v42 = vld [vmem:[#allocation2 + $0xf9] sm:$0xff]  ;;  %v3453_v43 = vld [vmem:[#allocation2 + $0xca] sm:$0xff] }
 0x20f   : > { %v1450_v5 = vpop.f32.mrf.mxu1  ;;  %v1715_v48 = vpop.f32.mrf.mxu0 }
 0x210   : > { %v1451_v46 = vadd.f32 %v1450_v5, %v12926_v39  ;;  %v13008_v58 = vadd.f32 %v1715_v48, %v1435_v34  ;;  %v3165_v39 = vpack.c.bf16 %v3140_v31, %v3139_v41  ;;  %v3455_v41 = vld [vmem:[#allocation2 + $0xe2] sm:$0xff] }
 0x211   : > { %v10528_v16 = vpop.f32.mrf.mxu1  ;;  %v10562_v21 = vpop.f32.mrf.mxu0 }
 0x212   : > { %v1462_v7 = vadd.f32 %v10528_v16, %v12938_v6  ;;  %v13011_v14 = vadd.f32 %v10562_v21, %v1446_v28  ;;  %v3450_v28 = vld [vmem:[#allocation2 + $0xaa] sm:$0xff]  ;;  %v3478_v21 = vpack.c.bf16 %v3453_v43, %v3452_v12 }
 0x213   : > { %v1453_v22 = vpop.f32.mrf.mxu1  ;;  %v1718_v49 = vpop.f32.mrf.mxu0  ;;  %v3477_v15 = vpack.c.bf16 %v3451_v44, %v3450_v28  ;;  %v3457_v28 = vld [vmem:[#allocation2 + $0xfa] sm:$0xff] }
 0x214   : > { %v1454_v32 = vadd.f32 %v1453_v22, %v12942_v40  ;;  %v13014_v35 = vadd.f32 %v1718_v49, %v1438_v18 }
 0x215   : > { %v10531_v33 = vpop.f32.mrf.mxu1  ;;  %v10565_v34 = vpop.f32.mrf.mxu0  ;;  %10758 = vmatmul.mubr.msk.bf16.gmra.mxu1 %vm1120_vm7, %v3164_v3  ;;  %10792 = vmatmul.mubr.msk.bf16.gmra.mxu0 %vm1120_vm7, %v12676_v47  ;;  %v3454_v3 = vld [vmem:[#allocation2 + $0xda] sm:$0xff] }
 0x216   : > { %v1475_v6 = vadd.f32 %v10531_v33, %v12954_v24  ;;  %v13020_v52 = vadd.f32 %v10565_v34, %v1459_v17  ;;  %10761 = vmatprep.mubr.msk.bf16.mxu1 %vm1120_vm7, %v3165_v39  ;;  %10795 = vmatprep.mubr.msk.bf16.mxu0 %vm1120_vm7, %v12680_v55  ;;  %v3143_v24 = vld [vmem:[#allocation2 + $0xf1] sm:$0xff]  ;;  %v3141_v55 = vld [vmem:[#allocation2 + $0xd9] sm:$0xff]  ;;  %v3145_v33 = vld [vmem:[#allocation2 + $0x109] sm:$0xff] }
 0x217   : > { %v1466_v40 = vpop.f32.mrf.mxu1  ;;  %v1731_v59 = vpop.f32.mrf.mxu0  ;;  %v3166_v0 = vpack.c.bf16 %v3142_v9, %v3141_v55  ;;  %v3167_v16 = vpack.c.bf16 %v3144_v42, %v3143_v24  ;;  %v3146_v34 = vld [vmem:[#allocation2 + $0x111] sm:$0xff]  ;;  %v3479_v42 = vpack.c.bf16 %v3455_v41, %v3454_v3  ;;  %v3152_v3 = vld [vmem:[#allocation2 + $0x159] sm:$0xff] }
 0x218   : > { %v1467_v19 = vadd.f32 %v1466_v40, %v12958_v57  ;;  %v13026_v20 = vadd.f32 %v1731_v59, %v1451_v46  ;;  %v3456_v40 = vld [vmem:[#allocation2 + $0xf2] sm:$0xff]  ;;  %v3168_v24 = vpack.c.bf16 %v3146_v34, %v3145_v33  ;;  %v3461_v41 = vld [vmem:[#allocation2 + $0x12a] sm:$0xff] }
 0x219   : > { %v10532_v47 = vpop.f32.mrf.mxu1  ;;  %v10566_v18 = vpop.f32.mrf.mxu0  ;;  %v3480_v55 = vpack.c.bf16 %v3457_v28, %v3456_v40 }
 0x21a   : > { %v1478_v45 = vadd.f32 %v10532_v47, %v12971_v1  ;;  %v13029_v17 = vadd.f32 %v10566_v18, %v1462_v7 }
 0x21b   : > { %v1469_v5 = vpop.f32.mrf.mxu1  ;;  %v1734_v48 = vpop.f32.mrf.mxu0 }
 0x21c   : > { %v1470_v57 = vadd.f32 %v1469_v5, %v12977_v26  ;;  %v13032_v46 = vadd.f32 %v1734_v48, %v1454_v32 }
 0x21d   : > { %v10535_v31 = vpop.f32.mrf.mxu1  ;;  %v10569_v22 = vpop.f32.mrf.mxu0  ;;  %10762 = vmatmul.mubr.msk.bf16.gmra.mxu1 %vm1120_vm7, %v3166_v0  ;;  %10796 = vmatmul.mubr.msk.bf16.gmra.mxu0 %vm1120_vm7, %v3477_v15  ;;  %v3458_v15 = vld [vmem:[#allocation2 + $0x10a] sm:$0xff] }
 0x21e   : > { %v1491_v1 = vadd.f32 %v10535_v31, %v12981_v36  ;;  %v13037_v7 = vadd.f32 %v10569_v22, %v1475_v6  ;;  %10765 = vmatprep.mubr.msk.bf16.mxu1 %vm1120_vm7, %v3167_v16  ;;  %10799 = vmatprep.mubr.msk.bf16.mxu0 %vm1120_vm7, %v3478_v21  ;;  %v3147_v36 = vld [vmem:[#allocation2 + $0x121] sm:$0xff]  ;;  %v3148_v6 = vld [vmem:[#allocation2 + $0x129] sm:$0xff]  ;;  %v3149_v16 = vld [vmem:[#allocation2 + $0x139] sm:$0xff] }
 0x21f   : > { %v1482_v49 = vpop.f32.mrf.mxu1  ;;  %v1747_v26 = vpop.f32.mrf.mxu0  ;;  %v3169_v43 = vpack.c.bf16 %v3148_v6, %v3147_v36  ;;  %v3150_v21 = vld [vmem:[#allocation2 + $0x141] sm:$0xff] }
 0x220   : > { %v1483_v32 = vadd.f32 %v1482_v49, %v12989_v62  ;;  %v13042_v39 = vadd.f32 %v1747_v26, %v1467_v19  ;;  %v3460_v31 = vld [vmem:[#allocation2 + $0x122] sm:$0xff]  ;;  %v3151_v26 = vld [vmem:[#allocation2 + $0x151] sm:$0xff]  ;;  %v3170_v40 = vpack.c.bf16 %v3150_v21, %v3149_v16 }
 0x221   : > { %v10536_v59 = vpop.f32.mrf.mxu1  ;;  %v10570_v9 = vpop.f32.mrf.mxu0  ;;  %v3482_v6 = vpack.c.bf16 %v3461_v41, %v3460_v31 }
 0x222   : > { %v1494_v44 = vadd.f32 %v10536_v59, %v12992_v4  ;;  %v13045_v12 = vadd.f32 %v10570_v9, %v1478_v45 }
 0x223   : > { %v1485_v47 = vpop.f32.mrf.mxu1  ;;  %v1750_v18 = vpop.f32.mrf.mxu0 }
 0x224   : > { %v1486_v62 = vadd.f32 %v1485_v47, %v12995_v38  ;;  %v13048_v19 = vadd.f32 %v1750_v18, %v1470_v57  ;;  %v3459_v38 = vld [vmem:[#allocation2 + $0x112] sm:$0xff] }
 0x225   : > { %v10539_v5 = vpop.f32.mrf.mxu1  ;;  %v10573_v48 = vpop.f32.mrf.mxu0  ;;  %10766 = vmatmul.mubr.msk.bf16.gmra.mxu1 %vm1120_vm7, %v3168_v24  ;;  %10800 = vmatmul.mubr.msk.bf16.gmra.mxu0 %vm1120_vm7, %v3479_v42  ;;  %v3481_v59 = vpack.c.bf16 %v3459_v38, %v3458_v15  ;;  %v3462_v42 = vld [vmem:[#allocation2 + $0x13a] sm:$0xff]  ;;  %v3464_v38 = vld [vmem:[#allocation2 + $0x152] sm:$0xff] }
 0x226   : > { %v13052_v0 = vadd.f32 %v10573_v48, %v1491_v1  ;;  %10769 = vmatprep.mubr.msk.bf16.mxu1 %vm1120_vm7, %v3169_v43  ;;  %10803 = vmatprep.mubr.msk.bf16.mxu0 %vm1120_vm7, %v3480_v55  ;;  %v1507_v9 = vadd.f32 %v10539_v5, %v12876_v51  ;;  %v3153_v55 = vld [vmem:[#allocation2 + $0x169] sm:$0xff]  ;;  %v3154_v5 = vld [vmem:[#allocation2 + $0x171] sm:$0xff] }
 0x227   : > { %v1498_v4 = vpop.f32.mrf.mxu1  ;;  %v1763_v45 = vpop.f32.mrf.mxu0  ;;  %v3463_v48 = vld [vmem:[#allocation2 + $0x142] sm:$0xff]  ;;  %v3172_v31 = vpack.c.bf16 %v3154_v5, %v3153_v55 }
 0x228   : > { %v13056_v57 = vadd.f32 %v1763_v45, %v1483_v32  ;;  %v3171_v32 = vpack.c.bf16 %v3152_v3, %v3151_v26 }
 0x229   : > { %v10540_v22 = vpop.f32.mrf.mxu1  ;;  %v10574_v49 = vpop.f32.mrf.mxu0 }
 0x22a   : > { %v13058_v1 = vadd.f32 %v10574_v49, %v1494_v44  ;;  %v1499_v44 = vadd.f32 %v1498_v4, %v12886_v63  ;;  %v3465_v63 = vld [vmem:[#allocation2 + $0x15a] sm:$0xff]  ;;  %v3483_v49 = vpack.c.bf16 %v3463_v48, %v3462_v42 }
 0x22b   : > { %v13060_v33 = vpop.f32.mrf.mxu1  ;;  %v1766_v34 = vpop.f32.mrf.mxu0 }
 0x22c   : > { %v13063_v36 = vadd.f32 %v1766_v34, %v1486_v62  ;;  %v1510_v62 = vadd.f32 %v10540_v22, %v12890_v13  ;;  %v3484_v13 = vpack.c.bf16 %v3465_v63, %v3464_v38  ;;  %v3470_v38 = vld [vmem:[#allocation2 + $0x19a] sm:$0xff]  ;;  %v3471_v63 = vld [vmem:[#allocation2 + $0x1a2] sm:$0xff] }
 0x22d   : > { %v10543_v28 = vpop.f32.mrf.mxu1  ;;  %v10577_v47 = vpop.f32.mrf.mxu0  ;;  %10770 = vmatmul.mubr.msk.bf16.gmra.mxu1 %vm1120_vm7, %v3170_v40  ;;  %10804 = vmatmul.mubr.msk.bf16.gmra.mxu0 %vm1120_vm7, %v3481_v59  ;;  %v3157_v40 = vld [vmem:[#allocation2 + $0x199] sm:$0xff]  ;;  %v3158_v59 = vld [vmem:[#allocation2 + $0x1a1] sm:$0xff] }
 0x22e   : > { %v13068_v18 = vadd.f32 %v10577_v47, %v1507_v9  ;;  %10773 = vmatprep.mubr.msk.bf16.mxu1 %vm1120_vm7, %v3171_v32  ;;  %10807 = vmatprep.mubr.msk.bf16.mxu0 %vm1120_vm7, %v3482_v6  ;;  %v1523_v26 = vadd.f32 %v10543_v28, %v12904_v27  ;;  %v3466_v28 = vld [vmem:[#allocation2 + $0x16a] sm:$0xff]  ;;  %v3467_v47 = vld [vmem:[#allocation2 + $0x172] sm:$0xff] }
 0x22f   : > { %v1514_v24 = vpop.f32.mrf.mxu1  ;;  %v1779_v51 = vpop.f32.mrf.mxu0 }
 0x230   : > { %v13073_v43 = vadd.f32 %v1779_v51, %v1499_v44  ;;  %v1515_v41 = vadd.f32 %v1514_v24, %v12908_v37  ;;  %v3174_v37 = vpack.c.bf16 %v3158_v59, %v3157_v40 }
 0x231   : > { %v10544_v45 = vpop.f32.mrf.mxu1  ;;  %v10578_v15 = vpop.f32.mrf.mxu0 }
 0x232   : > { %v13075_v4 = vadd.f32 %v10578_v15, %v1510_v62  ;;  %v1526_v32 = vadd.f32 %v10544_v45, %v12920_v53  ;;  %v3485_v62 = vpack.c.bf16 %v3467_v47, %v3466_v28 }
 0x233   : > { %v13077_v16 = vpop.f32.mrf.mxu1  ;;  %v13079_v21 = vpop.f32.mrf.mxu0 }
 0x234   : > { %16731 = vst [vmem:[#allocation10_spill] sm:$0xff] %v13077_v16  ;;  %16732 = vst [vmem:[#allocation11_spill] sm:$0xff] %v13079_v21 }
 0x235   : > { %v10547_v22 = vpop.f32.mrf.mxu1  ;;  %v10581_v3 = vpop.f32.mrf.mxu0  ;;  %10774 = vmatmul.mubr.msk.bf16.gmra.mxu1 %vm1120_vm7, %v3172_v31  ;;  %10808 = vmatmul.mubr.msk.bf16.gmra.mxu0 %vm1120_vm7, %v3483_v49 }
 0x236   : > { %v13085_v34 = vadd.f32 %v10581_v3, %v1523_v26  ;;  %10777 = vmatprep.mubr.msk.bf16.mxu1 %vm1120_vm7, %v12844_v10  ;;  %10811 = vmatprep.mubr.msk.bf16.mxu0 %vm1120_vm7, %v3484_v13  ;;  %v1539_v55 = vadd.f32 %v10547_v22, %v12936_v2 }
 0x237   : > { %v1530_v9 = vpop.f32.mrf.mxu1  ;;  %v1795_v27 = vpop.f32.mrf.mxu0 }
 0x238   : > { %v13091_v6 = vadd.f32 %v1795_v27, %v1515_v41  ;;  %v1531_v53 = vadd.f32 %v1530_v9, %v12940_v25  ;;  %v3487_v25 = vpack.c.bf16 %v3471_v63, %v3470_v38 }
 0x239   : > { %v10548_v44 = vpop.f32.mrf.mxu1  ;;  %v10582_v51 = vpop.f32.mrf.mxu0 }
 0x23a   : > { %v13093_v24 = vadd.f32 %v10582_v51, %v1526_v32  ;;  %v1542_v2 = vadd.f32 %v10548_v44, %v12952_v23 }
 0x23b   : > { %v13095_v42 = vpop.f32.mrf.mxu1  ;;  %v13097_v10 = vpop.f32.mrf.mxu0 }
 0x23c   : > { %16733 = vst [vmem:[#allocation12_spill] sm:$0xff] %v13095_v42  ;;  %16734 = vst [vmem:[#allocation13_spill] sm:$0xff] %v13097_v10 }
 0x23d   : > { %v10551_v5 = vpop.f32.mrf.mxu1  ;;  %v10585_v48 = vpop.f32.mrf.mxu0  ;;  %10778 = vmatmul.mubr.msk.bf16.gmra.mxu1 %vm1120_vm7, %v3174_v37  ;;  %10812 = vmatmul.mubr.msk.bf16.gmra.mxu0 %vm1120_vm7, %v3485_v62 }
 0x23e   : > { %v1555_v45 = vadd.f32 %v10551_v5, %v12962_v54  ;;  %v13104_v15 = vadd.f32 %v10585_v48, %v1539_v55  ;;  %10815 = vmatprep.mubr.msk.bf16.mxu0 %vm1120_vm7, %v12960_v61 }
 0x23f   : > { %v1546_v31 = vpop.f32.mrf.mxu1  ;;  %v1811_v49 = vpop.f32.mrf.mxu0 }
 0x240   : > { %v1547_v26 = vadd.f32 %v1546_v31, %v12973_v8  ;;  %v13110_v13 = vadd.f32 %v1811_v49, %v1531_v53 }
 0x241   : > { %v10552_v22 = vpop.f32.mrf.mxu1  ;;  %v10586_v3 = vpop.f32.mrf.mxu0 }
 0x242   : > { %v1558_v54 = vadd.f32 %v10552_v22, %v12975_v50  ;;  %v13113_v41 = vadd.f32 %v10586_v3, %v1542_v2 }
 0x243   : > { %v13115_v40 = vpop.f32.mrf.mxu1  ;;  %v13117_v61 = vpop.f32.mrf.mxu0 }
 0x244   : > { %16735 = vst [vmem:[#allocation14_spill] sm:$0xff] %v13115_v40  ;;  %16736 = vst [vmem:[#allocation15_spill] sm:$0xff] %v13117_v61 }
 0x245   : > { %v10589_v59 = vpop.f32.mrf.mxu0  ;;  %v10599_v9 = vpop.f32.mrf.mxu1  ;;  %10816 = vmatmul.mubr.msk.bf16.gmra.mxu0 %vm1120_vm7, %v3487_v25 }
 0x246   : > { %v13120_v23 = vadd.f32 %v10589_v59, %v1555_v45  ;;  %v2157_v8 = vadd.f32 %v10599_v9, %v13002_v56 }
 0x247   : > { %v1827_v27 = vpop.f32.mrf.mxu0  ;;  %v2028_v32 = vpop.f32.mrf.mxu1 }
 0x248   : > { %v13123_v28 = vadd.f32 %v1827_v27, %v1547_v26  ;;  %v2155_v50 = vadd.f32 %v2028_v32, %v13008_v58 }
 0x249   : > { %v10590_v47 = vpop.f32.mrf.mxu0  ;;  %v10600_v44 = vpop.f32.mrf.mxu1 }
 0x24a   : > { %v13126_v51 = vadd.f32 %v10590_v47, %v1558_v54  ;;  %v2158_v37 = vadd.f32 %v10600_v44, %v13011_v14 }
 0x24b   : > { %v13129_v62 = vpop.f32.mrf.mxu0  ;;  %v13131_v55 = vpop.f32.mrf.mxu1 }
 0x24c   : > { %16737 = vst [vmem:[#allocation16_spill] sm:$0xff] %v13129_v62 }
 0x24d   : > { %v10603_v5 = vpop.f32.mrf.mxu1  ;;  %v10637_v48 = vpop.f32.mrf.mxu0 }
 0x24e   : > { %v2161_v56 = vadd.f32 %v10603_v5, %v13020_v52  ;;  %v13134_v53 = vadd.f32 %v10637_v48, %v2157_v8 }
 0x24f   : > { %v2044_v45 = vpop.f32.mrf.mxu1  ;;  %v2341_v38 = vpop.f32.mrf.mxu0 }
 0x250   : > { %v2159_v58 = vadd.f32 %v2044_v45, %v13026_v20  ;;  %v13137_v63 = vadd.f32 %v2341_v38, %v2155_v50 }
 0x251   : > { %v10604_v31 = vpop.f32.mrf.mxu1  ;;  %v10638_v49 = vpop.f32.mrf.mxu0 }
 0x252   : > { %v2162_v14 = vadd.f32 %v10604_v31, %v13029_v17  ;;  %v13140_v2 = vadd.f32 %v10638_v49, %v2158_v37 }
 0x253   : > { %v13142_v26 = vpop.f32.mrf.mxu1  ;;  %v13144_v22 = vpop.f32.mrf.mxu0 }
 0x255   : > { %v10607_v3 = vpop.f32.mrf.mxu1  ;;  %v10641_v52 = vpop.f32.mrf.mxu0 }
 0x256   : > { %v2165_v25 = vadd.f32 %v10607_v3, %v13037_v7  ;;  %v13147_v54 = vadd.f32 %v10641_v52, %v2161_v56 }
 0x257   : > { %v2060_v59 = vpop.f32.mrf.mxu1  ;;  %v2357_v20 = vpop.f32.mrf.mxu0 }
 0x258   : > { %v2163_v9 = vadd.f32 %v2060_v59, %v13042_v39  ;;  %v13150_v8 = vadd.f32 %v2357_v20, %v2159_v58 }
 0x259   : > { %v10608_v27 = vpop.f32.mrf.mxu1  ;;  %v10642_v17 = vpop.f32.mrf.mxu0 }
 0x25a   : > { %v2166_v32 = vadd.f32 %v10608_v27, %v13045_v12  ;;  %v13153_v50 = vadd.f32 %v10642_v17, %v2162_v14 }
 0x25b   : > { %v13155_v47 = vpop.f32.mrf.mxu1  ;;  %v13157_v44 = vpop.f32.mrf.mxu0 }
 0x25d   : > { %v10611_v37 = vpop.f32.mrf.mxu1  ;;  %v10645_v7 = vpop.f32.mrf.mxu0 }
 0x25e   : > { %v2169_v5 = vadd.f32 %v10611_v37, %v13052_v0  ;;  %v13160_v48 = vadd.f32 %v10645_v7, %v2165_v25 }
 0x25f   : > { %v2076_v56 = vpop.f32.mrf.mxu1  ;;  %v2373_v39 = vpop.f32.mrf.mxu0 }
 0x260   : > { %v2167_v45 = vadd.f32 %v2076_v56, %v13056_v57  ;;  %v13163_v38 = vadd.f32 %v2373_v39, %v2163_v9 }
 0x261   : > { %v10612_v58 = vpop.f32.mrf.mxu1  ;;  %v10646_v12 = vpop.f32.mrf.mxu0 }
 0x262   : > { %v2170_v31 = vadd.f32 %v10612_v58, %v13058_v1  ;;  %v13166_v49 = vadd.f32 %v10646_v12, %v2166_v32 }
 0x263   : > { %v13168_v14 = vpop.f32.mrf.mxu1  ;;  %v13170_v3 = vpop.f32.mrf.mxu0 }
 0x265   : > { %v10615_v52 = vpop.f32.mrf.mxu1  ;;  %v10649_v0 = vpop.f32.mrf.mxu0 }
 0x266   : > { %v2173_v25 = vadd.f32 %v10615_v52, %v13068_v18  ;;  %v13173_v59 = vadd.f32 %v10649_v0, %v2169_v5 }
 0x267   : > { %v2092_v20 = vpop.f32.mrf.mxu1  ;;  %v2389_v57 = vpop.f32.mrf.mxu0 }
 0x268   : > { %v2171_v9 = vadd.f32 %v2092_v20, %v13073_v43  ;;  %v13176_v27 = vadd.f32 %v2389_v57, %v2167_v45 }
 0x269   : > { %v10616_v17 = vpop.f32.mrf.mxu1  ;;  %v10650_v1 = vpop.f32.mrf.mxu0 }
 0x26a   : > { %v2174_v32 = vadd.f32 %v10616_v17, %v13075_v4  ;;  %v13179_v37 = vadd.f32 %v10650_v1, %v2170_v31 }
 0x26b   : > { %v13181_v7 = vpop.f32.mrf.mxu1  ;;  %v13183_v56 = vpop.f32.mrf.mxu0 }
 0x26c   : > { %16738 = vst [vmem:[#allocation17_spill] sm:$0xff] %v13181_v7 }
 0x26d   : > { %v10619_v39 = vpop.f32.mrf.mxu1  ;;  %v10653_v18 = vpop.f32.mrf.mxu0 }
 0x26e   : > { %v2177_v5 = vadd.f32 %v10619_v39, %v13085_v34  ;;  %v13186_v58 = vadd.f32 %v10653_v18, %v2173_v25 }
 0x26f   : > { %v2108_v12 = vpop.f32.mrf.mxu1  ;;  %v2405_v43 = vpop.f32.mrf.mxu0 }
 0x270   : > { %v2175_v45 = vadd.f32 %v2108_v12, %v13091_v6  ;;  %v13189_v52 = vadd.f32 %v2405_v43, %v2171_v9 }
 0x271   : > { %v10620_v0 = vpop.f32.mrf.mxu1  ;;  %v10654_v4 = vpop.f32.mrf.mxu0 }
 0x272   : > { %v2178_v31 = vadd.f32 %v10620_v0, %v13093_v24  ;;  %v13192_v20 = vadd.f32 %v10654_v4, %v2174_v32 }
 0x273   : > { %v13194_v57 = vpop.f32.mrf.mxu1  ;;  %v13196_v17 = vpop.f32.mrf.mxu0 }
 0x274   : > { %16739 = vst [vmem:[#allocation18_spill] sm:$0xff] %v13194_v57  ;;  %16740 = vst [vmem:[#allocation19_spill] sm:$0xff] %v13196_v17 }
 0x275   : > { %v10623_v1 = vpop.f32.mrf.mxu1  ;;  %v10657_v34 = vpop.f32.mrf.mxu0 }
 0x276   : > { %v2181_v25 = vadd.f32 %v10623_v1, %v13104_v15  ;;  %v13199_v39 = vadd.f32 %v10657_v34, %v2177_v5 }
 0x277   : > { %v2124_v18 = vpop.f32.mrf.mxu1  ;;  %v2421_v6 = vpop.f32.mrf.mxu0 }
 0x278   : > { %v2179_v9 = vadd.f32 %v2124_v18, %v13110_v13  ;;  %v13202_v12 = vadd.f32 %v2421_v6, %v2175_v45 }
 0x279   : > { %v10624_v43 = vpop.f32.mrf.mxu1  ;;  %v10658_v24 = vpop.f32.mrf.mxu0 }
 0x27a   : > { %v2182_v32 = vadd.f32 %v10624_v43, %v13113_v41  ;;  %v13205_v0 = vadd.f32 %v10658_v24, %v2178_v31 }
 0x27b   : > { %v13207_v4 = vpop.f32.mrf.mxu1  ;;  %v13209_v62 = vpop.f32.mrf.mxu0 }
 0x27c   : > { %16741 = vst [vmem:[#allocation20_spill] sm:$0xff] %v13207_v4  ;;  %16742 = vst [vmem:[#allocation21_spill] sm:$0xff] %v13209_v62 }
 0x27d   : > { %v10627_v40 = vpop.f32.mrf.mxu1  ;;  %v10661_v15 = vpop.f32.mrf.mxu0 }
 0x27e   : > { %v2185_v5 = vadd.f32 %v10627_v40, %v13120_v23  ;;  %v13212_v1 = vadd.f32 %v10661_v15, %v2181_v25 }
 0x27f   : > { %v2140_v34 = vpop.f32.mrf.mxu1  ;;  %v2437_v13 = vpop.f32.mrf.mxu0 }
 0x280   : > { %v2183_v45 = vadd.f32 %v2140_v34, %v13123_v28  ;;  %v13215_v18 = vadd.f32 %v2437_v13, %v2179_v9 }
 0x281   : > { %v10628_v6 = vpop.f32.mrf.mxu1  ;;  %v10662_v41 = vpop.f32.mrf.mxu0 }
 0x282   : > { %v2186_v31 = vadd.f32 %v10628_v6, %v13126_v51  ;;  %v13218_v43 = vadd.f32 %v10662_v41, %v2182_v32 }
 0x283   : > { %v13220_v24 = vpop.f32.mrf.mxu1  ;;  %v13222_v11 = vpop.f32.mrf.mxu0 }
 0x284   : > { %16743 = vst [vmem:[#allocation22_spill] sm:$0xff] %v13220_v24  ;;  %16744 = vst [vmem:[#allocation23_spill] sm:$0xff] %v13222_v11 }
 0x285   : > { %v10665_v4 = vpop.f32.mrf.mxu0  ;;  %v10675_v40 = vpop.f32.mrf.mxu1 }
 0x286   : > { %v13224_v23 = vadd.f32 %v10665_v4, %v2185_v5  ;;  %v2783_v25 = vadd.f32 %v10675_v40, %v13134_v53 }
 0x287   : > { %v2453_v15 = vpop.f32.mrf.mxu0  ;;  %v13227_v28 = vpop.f32.mrf.mxu1 }
 0x288   : > { %v13229_v9 = vadd.f32 %v2453_v15, %v2183_v45 }
 0x289   : > { %v10666_v34 = vpop.f32.mrf.mxu0  ;;  %v10676_v13 = vpop.f32.mrf.mxu1 }
 0x28a   : > { %v13231_v51 = vadd.f32 %v10666_v34, %v2186_v31  ;;  %v2784_v32 = vadd.f32 %v10676_v13, %v13140_v2 }
 0x28b   : > { %v13234_v6 = vpop.f32.mrf.mxu0  ;;  %v13236_v41 = vpop.f32.mrf.mxu1 }
 0x28c   : > { %16745 = vst [vmem:[#allocation24_spill] sm:$0xff] %v13234_v6 }
 0x28d   : > { %v10679_v24 = vpop.f32.mrf.mxu1  ;;  %v10713_v4 = vpop.f32.mrf.mxu0 }
 0x28e   : > { %v2787_v5 = vadd.f32 %v10679_v24, %v13147_v54  ;;  %v13239_v53 = vadd.f32 %v10713_v4, %v2783_v25 }
 0x28f   : > { %v13241_v40 = vpop.f32.mrf.mxu1  ;;  %v13243_v45 = vpop.f32.mrf.mxu0 }
 0x291   : > { %v10680_v15 = vpop.f32.mrf.mxu1  ;;  %v10714_v11 = vpop.f32.mrf.mxu0 }
 0x292   : > { %v2788_v31 = vadd.f32 %v10680_v15, %v13153_v50  ;;  %v13246_v34 = vadd.f32 %v10714_v11, %v2784_v32 }
 0x293   : > { %v13248_v2 = vpop.f32.mrf.mxu1  ;;  %v13250_v13 = vpop.f32.mrf.mxu0 }
 0x295   : > { %v10683_v6 = vpop.f32.mrf.mxu1  ;;  %v10717_v61 = vpop.f32.mrf.mxu0 }
 0x296   : > { %v2791_v54 = vadd.f32 %v10683_v6, %v13160_v48  ;;  %v13253_v24 = vadd.f32 %v10717_v61, %v2787_v5 }
 0x297   : > { %v2686_v25 = vpop.f32.mrf.mxu1  ;;  %v13255_v4 = vpop.f32.mrf.mxu0 }
 0x298   : > { %v2789_v42 = vadd.f32 %v2686_v25, %v13163_v38 }
 0x299   : > { %v10684_v60 = vpop.f32.mrf.mxu1  ;;  %v10718_v62 = vpop.f32.mrf.mxu0 }
 0x29a   : > { %v2792_v11 = vadd.f32 %v10684_v60, %v13166_v49  ;;  %v13259_v50 = vadd.f32 %v10718_v62, %v2788_v31 }
 0x29b   : > { %v13261_v32 = vpop.f32.mrf.mxu1  ;;  %v13263_v15 = vpop.f32.mrf.mxu0 }
 0x29d   : > { %v10687_v57 = vpop.f32.mrf.mxu1  ;;  %v10721_v10 = vpop.f32.mrf.mxu0 }
 0x29e   : > { %v2795_v61 = vadd.f32 %v10687_v57, %v13173_v59  ;;  %v13266_v48 = vadd.f32 %v10721_v10, %v2791_v54 }
 0x29f   : > { %v2702_v6 = vpop.f32.mrf.mxu1  ;;  %v3000_v5 = vpop.f32.mrf.mxu0 }
 0x2a0   : > { %v2793_v38 = vadd.f32 %v2702_v6, %v13176_v27  ;;  %v13269_v25 = vadd.f32 %v3000_v5, %v2789_v42 }
 0x2a1   : > { %v10688_v16 = vpop.f32.mrf.mxu1  ;;  %v10722_v60 = vpop.f32.mrf.mxu0 }
 0x2a2   : > { %v2796_v62 = vadd.f32 %v10688_v16, %v13179_v37  ;;  %v13272_v49 = vadd.f32 %v10722_v60, %v2792_v11 }
 0x2a3   : > { %v13274_v31 = vpop.f32.mrf.mxu1  ;;  %v13276_v29 = vpop.f32.mrf.mxu0 }
 0x2a5   : > { %v10691_v17 = vpop.f32.mrf.mxu1  ;;  %v10725_v59 = vpop.f32.mrf.mxu0 }
 0x2a6   : > { %v2799_v10 = vadd.f32 %v10691_v17, %v13186_v58  ;;  %v13279_v57 = vadd.f32 %v10725_v59, %v2795_v61 }
 0x2a7   : > { %v2718_v54 = vpop.f32.mrf.mxu1  ;;  %v3016_v27 = vpop.f32.mrf.mxu0 }
 0x2a8   : > { %v2797_v42 = vadd.f32 %v2718_v54, %v13189_v52  ;;  %v13282_v6 = vadd.f32 %v3016_v27, %v2793_v38 }
 0x2a9   : > { %v10692_v5 = vpop.f32.mrf.mxu1  ;;  %v10726_v16 = vpop.f32.mrf.mxu0 }
 0x2aa   : > { %v2800_v37 = vadd.f32 %v10692_v5, %v13192_v20  ;;  %v13285_v11 = vadd.f32 %v10726_v16, %v2796_v62 }
 0x2ab   : > { %v13287_v60 = vpop.f32.mrf.mxu1  ;;  %v13289_v7 = vpop.f32.mrf.mxu0 }
 0x2ac   : > { %16746 = vst [vmem:[#allocation25_spill] sm:$0xff] %v13285_v11  ;;  %16747 = vst [vmem:[#allocation26_spill] sm:$0xff] %v13287_v60 }
 0x2ad   : > { %v10695_v21 = vpop.f32.mrf.mxu1  ;;  %v10729_v58 = vpop.f32.mrf.mxu0 }
 0x2ae   : > { %v2803_v17 = vadd.f32 %v10695_v21, %v13199_v39  ;;  %v13292_v61 = vadd.f32 %v10729_v58, %v2799_v10 }
 0x2af   : > { %v2734_v59 = vpop.f32.mrf.mxu1  ;;  %v3032_v52 = vpop.f32.mrf.mxu0 }
 0x2b0   : > { %v2801_v38 = vadd.f32 %v2734_v59, %v13202_v12  ;;  %v13295_v54 = vadd.f32 %v3032_v52, %v2797_v42 }
 0x2b1   : > { %v10696_v27 = vpop.f32.mrf.mxu1  ;;  %v10730_v20 = vpop.f32.mrf.mxu0 }
 0x2b2   : > { %v2804_v62 = vadd.f32 %v10696_v27, %v13205_v0  ;;  %v13298_v5 = vadd.f32 %v10730_v20, %v2800_v37 }
 0x2b3   : > { %v13300_v16 = vpop.f32.mrf.mxu1  ;;  %v13302_v60 = vpop.f32.mrf.mxu0 }
 0x2b4   : > { %16748 = vst [vmem:[#allocation27_spill] sm:$0xff] %v13298_v5  ;;  %16749 = vst [vmem:[#allocation28_spill] sm:$0xff] %v13300_v16 }
 0x2b5   : > { %v10699_v11 = vpop.f32.mrf.mxu1  ;;  %v10733_v21 = vpop.f32.mrf.mxu0 }
 0x2b6   : > { %v2807_v39 = vadd.f32 %v10699_v11, %v13212_v1  ;;  %v13305_v10 = vadd.f32 %v10733_v21, %v2803_v17 }
 0x2b7   : > { %v2750_v58 = vpop.f32.mrf.mxu1  ;;  %v3048_v12 = vpop.f32.mrf.mxu0 }
 0x2b8   : > { %v2805_v42 = vadd.f32 %v2750_v58, %v13215_v18  ;;  %v13308_v59 = vadd.f32 %v3048_v12, %v2801_v38 }
 0x2b9   : > { %v10700_v52 = vpop.f32.mrf.mxu1  ;;  %v10734_v0 = vpop.f32.mrf.mxu0 }
 0x2ba   : > { %v2808_v37 = vadd.f32 %v10700_v52, %v13218_v43  ;;  %v13311_v27 = vadd.f32 %v10734_v0, %v2804_v62 }
 0x2bb   : > { %v13313_v20 = vpop.f32.mrf.mxu1  ;;  %v13315_v16 = vpop.f32.mrf.mxu0 }
 0x2bc   : > { %16750 = vst [vmem:[#allocation29_spill] sm:$0xff] %v13311_v27  ;;  %16751 = vst [vmem:[#allocation30_spill] sm:$0xff] %v13313_v20 }
 0x2bd   : > { %v10703_v5 = vpop.f32.mrf.mxu1  ;;  %v10737_v1 = vpop.f32.mrf.mxu0 }
 0x2be   : > { %v2811_v11 = vadd.f32 %v10703_v5, %v13224_v23  ;;  %v13318_v17 = vadd.f32 %v10737_v1, %v2807_v39 }
 0x2bf   : > { %v2766_v21 = vpop.f32.mrf.mxu1  ;;  %v3064_v18 = vpop.f32.mrf.mxu0 }
 0x2c0   : > { %16752 = vst [vmem:[#allocation31_spill] sm:$0xff] %v13318_v17  ;;  %v2809_v38 = vadd.f32 %v2766_v21, %v13229_v9  ;;  %v13321_v58 = vadd.f32 %v3064_v18, %v2805_v42  ;;  %v2156_v21 = vadd.f32 %v13131_v55, %v13014_v35 }
 0x2c1   : > { %v10704_v12 = vpop.f32.mrf.mxu1  ;;  %v10738_v43 = vpop.f32.mrf.mxu0 }
 0x2c2   : > { %v2812_v62 = vadd.f32 %v10704_v12, %v13231_v51  ;;  %v13324_v52 = vadd.f32 %v10738_v43, %v2808_v37  ;;  %v2781_v51 = vadd.f32 %v13227_v28, %v13137_v63 }
 0x2c3   : > { %v13326_v0 = vpop.f32.mrf.mxu1  ;;  %v13328_v20 = vpop.f32.mrf.mxu0 }
 0x2c4   : > { %16753 = vst [vmem:[#allocation32_spill] sm:$0xff] %v13324_v52  ;;  %16754 = vst [vmem:[#allocation33_spill] sm:$0xff] %v13326_v0 }
 0x2c5   : > { %v10741_v27 = vpop.f32.mrf.mxu0  ;;  %v10751_v23 = vpop.f32.mrf.mxu1 }
 0x2c6   : > { %v13330_v5 = vadd.f32 %v10741_v27, %v2811_v11  ;;  %v2469_v27 = vadd.f32 %v13144_v22, %v2156_v21  ;;  %v3095_v11 = vadd.f32 %v13243_v45, %v2781_v51  ;;  %v3410_v55 = vadd.f32 %v10751_v23, %v13239_v53 }
 0x2c7   : > { %v3080_v39 = vpop.f32.mrf.mxu0  ;;  %v3281_v1 = vpop.f32.mrf.mxu1  ;;  %v2160_v22 = vadd.f32 %v13142_v26, %v13032_v46  ;;  %v2785_v45 = vadd.f32 %v13241_v40, %v13150_v8 }
 0x2c8   : > { %v13332_v17 = vadd.f32 %v3080_v39, %v2809_v38  ;;  %v2782_v39 = vadd.f32 %v13236_v41, %v2469_v27  ;;  %v3408_v0 = vadd.f32 %v3281_v1, %v3095_v11 }
 0x2c9   : > { %v10742_v9 = vpop.f32.mrf.mxu0  ;;  %v10752_v42 = vpop.f32.mrf.mxu1  ;;  %v3099_v53 = vadd.f32 %v13255_v4, %v2785_v45  ;;  %v2164_v45 = vadd.f32 %v13155_v47, %v13048_v19 }
 0x2ca   : > { %16755 = vst [vmem:[#allocation34_spill] sm:$0xff] %v13332_v17  ;;  %v13338_v37 = vadd.f32 %v10742_v9, %v2812_v62  ;;  %v3096_v35 = vadd.f32 %v13250_v13, %v2782_v39  ;;  %v2473_v13 = vadd.f32 %v13157_v44, %v2160_v22 }
 0x2cb   : > { %v13340_v18 = vpop.f32.mrf.mxu0  ;;  %v3284_v12 = vpop.f32.mrf.mxu1 }
 0x2cc   : > { %v3409_v9 = vadd.f32 %v3284_v12, %v3096_v35  ;;  %v2786_v26 = vadd.f32 %v13248_v2, %v2473_v13 }
 0x2cd   : > { %v10755_v43 = vpop.f32.mrf.mxu1  ;;  %v10789_v38 = vpop.f32.mrf.mxu0 }
 0x2ce   : > { %v13353_v21 = vadd.f32 %v10789_v38, %v3410_v55  ;;  %v3100_v44 = vadd.f32 %v13263_v15, %v2786_v26  ;;  %v3414_v4 = vadd.f32 %v10755_v43, %v13253_v24 }
 0x2cf   : > { %v3297_v17 = vpop.f32.mrf.mxu1  ;;  %v3594_v52 = vpop.f32.mrf.mxu0 }
 0x2d0   : > { %v13347_v63 = vadd.f32 %v3594_v52, %v3408_v0  ;;  %v3411_v52 = vadd.f32 %v10752_v42, %v13246_v34  ;;  %v3412_v8 = vadd.f32 %v3297_v17, %v3099_v53 }
 0x2d1   : > { %v10756_v28 = vpop.f32.mrf.mxu1  ;;  %v10790_v62 = vpop.f32.mrf.mxu0 }
 0x2d2   : > { %11342 = vtanh.f32 %v13347_v63  ;;  %v13363_v40 = vadd.f32 %v10790_v62, %v3411_v52  ;;  %v3415_v35 = vadd.f32 %v10756_v28, %v13259_v50 }
 0x2d3   : > { %v3300_v41 = vpop.f32.mrf.mxu1  ;;  %v3597_v1 = vpop.f32.mrf.mxu0  ;;  %11344 = vtanh.f32 %v13353_v21 }
 0x2d4   : > { %v13359_v0 = vadd.f32 %v3597_v1, %v3409_v9  ;;  %v3413_v2 = vadd.f32 %v3300_v41, %v3100_v44  ;;  %v2477_v1 = vadd.f32 %v13170_v3, %v2164_v45 }
 0x2d5   : > { %v10759_v23 = vpop.f32.mrf.mxu1  ;;  %v10793_v46 = vpop.f32.mrf.mxu0 }
 0x2d6   : > { %11346 = vtanh.f32 %v13359_v0  ;;  %v13371_v11 = vadd.f32 %v10793_v46, %v3414_v4  ;;  %v2790_v19 = vadd.f32 %v13261_v32, %v2477_v1  ;;  %v3418_v47 = vadd.f32 %v10759_v23, %v13266_v48 }
 0x2d7   : > { %v3313_v51 = vpop.f32.mrf.mxu1  ;;  %v3610_v12 = vpop.f32.mrf.mxu0  ;;  %11348 = vtanh.f32 %v13363_v40 }
 0x2d8   : > { %v13368_v34 = vadd.f32 %v3610_v12, %v3412_v8  ;;  %v3416_v9 = vadd.f32 %v3313_v51, %v13269_v25  ;;  %v3104_v8 = vadd.f32 %v13276_v29, %v2790_v19 }
 0x2d9   : > { %v10760_v42 = vpop.f32.mrf.mxu1  ;;  %v10794_v27 = vpop.f32.mrf.mxu0 }
 0x2da   : > { %11350 = vtanh.f32 %v13368_v34  ;;  %v13380_v43 = vadd.f32 %v10794_v27, %v3415_v35 }
 0x2db   : > { %v3316_v17 = vpop.f32.mrf.mxu1  ;;  %v3613_v38 = vpop.f32.mrf.mxu0  ;;  %11352 = vtanh.f32 %v13371_v11 }
 0x2dc   : > { %v13374_v39 = vadd.f32 %v3613_v38, %v3413_v2  ;;  %v3417_v23 = vadd.f32 %v3316_v17, %v3104_v8  ;;  %v2168_v17 = vadd.f32 %v13168_v14, %v13063_v36 }
 0x2dd   : > { %v13377_v15 = vpop.f32.mrf.mxu1  ;;  %v10797_v24 = vpop.f32.mrf.mxu0 }
 0x2de   : > { %11354 = vtanh.f32 %v13374_v39  ;;  %v13411_v51 = vadd.f32 %v10797_v24, %v3418_v47  ;;  %v3419_v24 = vadd.f32 %v10760_v42, %v13272_v49 }
 0x2df   : > { %v3329_v55 = vpop.f32.mrf.mxu1  ;;  %v3626_v62 = vpop.f32.mrf.mxu0  ;;  %11356 = vtanh.f32 %v13380_v43 }
 0x2e0   : > { %v13383_v22 = vpop.eup %11342  ;;  %v13396_v13 = vadd.f32 %v3626_v62, %v3416_v9  ;;  %v2481_v9 = vadd.f32 %v13183_v56, %v2168_v17  ;;  %v3420_v49 = vadd.f32 %v3329_v55, %v13282_v6  ;;  %v3422_v6 = vadd.f32 %v13377_v15, %v13279_v57  ;;  %v16762_v15 = vld [vmem:[#allocation17_spill] sm:$0xff] }
 0x2e1   : > { %4489 = vrot.lane.b32.xlu0 %v13383_v22, %s11767_s27  ;;  %v13390_v50 = vpop.f32.mrf.mxu1  ;;  %v10798_v28 = vpop.f32.mrf.mxu0 }
 0x2e2   : > { %v13392_v41 = vpop.eup %11344  ;;  %11358 = vtanh.f32 %v13396_v13  ;;  %v13441_v1 = vadd.f32 %v10798_v28, %v3419_v24  ;;  %v2794_v42 = vadd.f32 %v13274_v31, %v2481_v9  ;;  %v1502_v31 = vadd.f32 %v13060_v33, %v12902_v30  ;;  %v16760_v24 = vld [vmem:[#allocation11_spill] sm:$0xff] }
 0x2e3   : > { %v3332_v53 = vpop.f32.mrf.mxu1  ;;  %v3629_v52 = vpop.f32.mrf.mxu0  ;;  %11360 = vtanh.f32 %v13411_v51 }
 0x2e4   : > { %v13398_v46 = vpop.eup %11346  ;;  %v13425_v29 = vadd.f32 %v3629_v52, %v3417_v23  ;;  %v3108_v28 = vadd.f32 %v13289_v7, %v2794_v42  ;;  %v1859_v9 = vadd.f32 %v16760_v24, %v1502_v31 }
 0x2e5   : > { %4493 = vrot.lane.b32.xlu0 %v13392_v41, %s11767_s27  ;;  %4491 = vrot.lane.b32.xlu1 %v13398_v46, %s11767_s27  ;;  %v13406_v25 = vpop.f32.mrf.mxu1  ;;  %v10801_v3 = vpop.f32.mrf.mxu0 }
 0x2e6   : > { %v13408_v26 = vpop.eup %11348  ;;  %11362 = vtanh.f32 %v13425_v29  ;;  %v3421_v55 = vadd.f32 %v3332_v53, %v3108_v28  ;;  %v2172_v53 = vadd.f32 %v16762_v15, %v1859_v9  ;;  %v16763_v28 = vld [vmem:[#allocation25_spill] sm:$0xff] }
 0x2e7   : > { %v3345_v32 = vpop.f32.mrf.mxu1  ;;  %v3642_v12 = vpop.f32.mrf.mxu0  ;;  %11364 = vtanh.f32 %v13441_v1 }
 0x2e8   : > { %v13414_v48 = vpop.eup %11350  ;;  %v13454_v56 = vadd.f32 %v3642_v12, %v3420_v49  ;;  %v13473_v49 = vadd.f32 %v10801_v3, %v3422_v6  ;;  %v16764_v6 = vld [vmem:[#allocation19_spill] sm:$0xff] }
 0x2e9   : > { %4495 = vrot.lane.b32.xlu1 %v13408_v26, %s11767_s27  ;;  %4497 = vrot.lane.b32.xlu0 %v13414_v48, %s11767_s27  ;;  %v13420_v44 = vpop.f32.mrf.mxu1  ;;  %v10802_v4 = vpop.f32.mrf.mxu0 }
 0x2ea   : > { %v13422_v27 = vpop.eup %11352  ;;  %11366 = vtanh.f32 %v13454_v56 }
 0x2eb   : > { %16756 = vst [vmem:[#allocation35_spill] sm:$0xff] %v13422_v27  ;;  %v13427_v2 = vpop.f32.mrf.mxu1  ;;  %v3645_v38 = vpop.f32.mrf.mxu0  ;;  %11368 = vtanh.f32 %v13473_v49 }
 0x2ec   : > { %v13429_v35 = vpop.eup %11354  ;;  %v13476_v42 = vadd.f32 %v3645_v38, %v3421_v55  ;;  %v2485_v38 = vadd.f32 %v16764_v6, %v2172_v53  ;;  %v3424_v55 = vadd.f32 %v3345_v32, %v13295_v54  ;;  %v3426_v32 = vadd.f32 %v13406_v25, %v13292_v61 }
 0x2ed   : > { %16757 = vst [vmem:[#allocation36_spill] sm:$0xff] %v13429_v35  ;;  %4501 = vrot.lane.b32.xlu0 %v13422_v27, %s11767_s27  ;;  %4499 = vrot.lane.b32.xlu1 %v13429_v35, %s11767_s27  ;;  %v13438_v62 = vpop.f32.mrf.mxu1  ;;  %v10805_v45 = vpop.f32.mrf.mxu0 }
 0x2ee   : > { %v13446_v14 = vpop.eup %11356  ;;  %11370 = vtanh.f32 %v13476_v42 }
 0x2ef   : > { %v13444_v52 = vpop.f32.mrf.mxu1  ;;  %v3658_v36 = vpop.f32.mrf.mxu0  ;;  %16758 = vst [vmem:[#allocation37_spill] sm:$0xff] %v13446_v14 }
 0x2f0   : > { %v13460_v17 = vpop.eup %11358 }
 0x2f1   : > { %4503 = vrot.lane.b32.xlu1 %v13446_v14, %s11767_s27  ;;  %v13452_v19 = vpop.f32.mrf.mxu1  ;;  %v10806_v47 = vpop.f32.mrf.mxu0  ;;  %16759 = vst [vmem:[#allocation38_spill] sm:$0xff] %v13460_v17  ;;  %4505 = vrot.lane.b32.xlu0 %v13460_v17, %s11767_s27  ;;  %v3423_v14 = vadd.f32 %v13390_v50, %v16763_v28  ;;  %v16766_v28 = vld [vmem:[#allocation26_spill] sm:$0xff]  ;;  %v13502_v17 = vadd.f32 %v3658_v36, %v3424_v55 }
 0x2f2   : > { %v13480_v57 = vpop.eup %11360 }
 0x2f3   : > { %v13458_v8 = vpop.f32.mrf.mxu1  ;;  %v3661_v23 = vpop.f32.mrf.mxu0  ;;  %16761 = vst [vmem:[#allocation11_spill] sm:$0xff] %v13480_v57  ;;  %v13494_v24 = vadd.f32 %v10802_v4, %v3423_v14 }
 0x2f4   : > { %v13499_v15 = vpop.eup %11362 }
 0x2f5   : > { %v13468_v12 = vpop.f32.mrf.mxu1  ;;  %v13470_v7 = vpop.f32.mrf.mxu0  ;;  %4509 = vrot.lane.b32.xlu0 %v13480_v57, %s11767_s27  ;;  %16765 = vst [vmem:[#allocation17_spill] sm:$0xff] %v13499_v15  ;;  %v2798_v57 = vadd.f32 %v16766_v28, %v2485_v38  ;;  %4507 = vrot.lane.b32.xlu1 %v13499_v15, %s11767_s27  ;;  %11372 = vtanh.f32 %v13494_v24  ;;  %v13518_v28 = vadd.f32 %v10805_v45, %v3426_v32  ;;  %v16768_v15 = vld [vmem:[#allocation7_spill] sm:$0xff] }
 0x2f6   : > { %v13515_v36 = vpop.eup %11364  ;;  %11374 = vtanh.f32 %v13502_v17  ;;  %v16771_v32 = vld [vmem:[#allocation27_spill] sm:$0xff] }
 0x2f7   : > { %v13478_v30 = vpop.f32.mrf.mxu1  ;;  %v3674_v33 = vpop.f32.mrf.mxu0  ;;  %v3112_v54 = vadd.f32 %v13302_v60, %v2798_v57  ;;  %16767 = vst [vmem:[#allocation25_spill] sm:$0xff] %v13515_v36  ;;  %v16769_v60 = vld [vmem:[#allocation10_spill] sm:$0xff]  ;;  %v3427_v27 = vadd.f32 %v13420_v44, %v16771_v32  ;;  %11376 = vtanh.f32 %v13518_v28  ;;  %v3428_v44 = vadd.f32 %v13444_v52, %v13308_v59 }
 0x2f8   : > { %v1518_v57 = vadd.f32 %v16769_v60, %v16768_v15  ;;  %v13530_v35 = vpop.eup %11366  ;;  %v16772_v15 = vld [vmem:[#allocation18_spill] sm:$0xff]  ;;  %v3430_v52 = vadd.f32 %v13438_v62, %v13305_v10 }
 0x2f9   : > { %v13487_v31 = vpop.f32.mrf.mxu1  ;;  %v13489_v3 = vpop.f32.mrf.mxu0  ;;  %v3425_v55 = vadd.f32 %v13427_v2, %v3112_v54  ;;  %4511 = vrot.lane.b32.xlu1 %v13515_v36, %s11767_s27  ;;  %v16770_v2 = vld [vmem:[#allocation13_spill] sm:$0xff]  ;;  %4513 = vrot.lane.b32.xlu0 %v13530_v35, %s11767_s27 }
 0x2fa   : > { %v1863_v45 = vadd.f32 %v16770_v2, %v1518_v57  ;;  %v16773_v57 = vld [vmem:[#allocation21_spill] sm:$0xff] }
 0x2fb   : > { %v13497_v9 = vpop.f32.mrf.mxu1  ;;  %v3677_v50 = vpop.f32.mrf.mxu0  ;;  %v13527_v25 = vadd.f32 %v3661_v23, %v3425_v55  ;;  %v13539_v23 = vadd.f32 %v10806_v47, %v3427_v27  ;;  %v13554_v47 = vadd.f32 %v3674_v33, %v3428_v44  ;;  %v16776_v33 = vld [vmem:[#allocation12_spill] sm:$0xff] }
 0x2fc   : > { %v2176_v60 = vadd.f32 %v16772_v15, %v1863_v45  ;;  %v13544_v55 = vpop.eup %11368  ;;  %v16774_v45 = vld [vmem:[#allocation28_spill] sm:$0xff] }
 0x2fd   : > { %v10779_v53 = vpop.f32.mrf.mxu1  ;;  %v13506_v6 = vpop.f32.mrf.mxu0  ;;  %11378 = vtanh.f32 %v13527_v25  ;;  %4517 = vrot.lane.b32.xlu0 %v13544_v55, %s11767_s27 }
 0x2fe   : > { %v3438_v4 = vadd.f32 %v10779_v53, %v13330_v5  ;;  %v13549_v32 = vpop.eup %11370  ;;  %11380 = vtanh.f32 %v13539_v23 }
 0x2ff   : > { %v13513_v14 = vpop.f32.mrf.mxu1  ;;  %v3690_v38 = vpop.f32.mrf.mxu0  ;;  %4515 = vrot.lane.b32.xlu1 %v13549_v32, %s11767_s27  ;;  %11382 = vtanh.f32 %v13554_v47 }
 0x301   : > { %v10780_v61 = vpop.f32.mrf.mxu1  ;;  %v13525_v5 = vpop.f32.mrf.mxu0 }
 0x302   : > { %v3439_v53 = vadd.f32 %v10780_v61, %v13338_v37  ;;  %v2489_v61 = vadd.f32 %v16773_v57, %v2176_v60  ;;  %v13564_v15 = vpop.eup %11372  ;;  %v16775_v57 = vld [vmem:[#allocation8_spill] sm:$0xff] }
 0x303   : > { %v3693_v54 = vpop.f32.mrf.mxu0  ;;  %v13566_v60 = vpop.eup %11374  ;;  %4519 = vrot.lane.b32.xlu1 %v13564_v15, %s11767_s27 }
 0x304   : > { %v2802_v27 = vadd.f32 %v16774_v45, %v2489_v61  ;;  %v1534_v61 = vadd.f32 %v16776_v33, %v16775_v57  ;;  %v13572_v45 = vadd.f32 %v13470_v7, %v3430_v52  ;;  %4521 = vrot.lane.b32.xlu0 %v13566_v60, %s11767_s27  ;;  %v16780_v52 = vld [vmem:[#allocation23_spill] sm:$0xff] }
 0x305   : > { %v10817_v36 = vpop.f32.mrf.mxu0 }
 0x306   : > { %v13542_v37 = vadd.f32 %v10817_v36, %v3438_v4  ;;  %v3116_v59 = vadd.f32 %v13315_v16, %v2802_v27  ;;  %v16777_v16 = vld [vmem:[#allocation15_spill] sm:$0xff]  ;;  %v16778_v27 = vld [vmem:[#allocation20_spill] sm:$0xff]  ;;  %11384 = vtanh.f32 %v13572_v45 }
 0x307   : > { %v3706_v2 = vpop.f32.mrf.mxu0  ;;  %v1867_v10 = vadd.f32 %v16777_v16, %v1534_v61 }
 0x308   : > { %v3429_v44 = vadd.f32 %v13458_v8, %v3116_v59  ;;  %v16779_v8 = vld [vmem:[#allocation29_spill] sm:$0xff] }
 0x309   : > { %v10818_v4 = vpop.f32.mrf.mxu0  ;;  %v3431_v7 = vadd.f32 %v13452_v19, %v16779_v8  ;;  %v16781_v19 = vld [vmem:[#allocation30_spill] sm:$0xff] }
 0x30a   : > { %v13559_v36 = vadd.f32 %v10818_v4, %v3439_v53  ;;  %v13580_v62 = vadd.f32 %v3677_v50, %v3429_v44  ;;  %v13582_v53 = vpop.eup %11376  ;;  %v2180_v4 = vadd.f32 %v16778_v27, %v1867_v10  ;;  %v3432_v50 = vadd.f32 %v13478_v30, %v13321_v58  ;;  %v16782_v27 = vld [vmem:[#allocation31_spill] sm:$0xff]  ;;  %v16783_v58 = vld [vmem:[#allocation9_spill] sm:$0xff]  ;;  %v16784_v30 = vld [vmem:[#allocation14_spill] sm:$0xff] }
 0x30b   : > { %4525 = vrot.lane.b32.xlu0 %v13582_v53, %s11767_s27  ;;  %v13590_v59 = vpop.eup %11378  ;;  %v13596_v33 = vadd.f32 %v13489_v3, %v3431_v7  ;;  %v1550_v3 = vadd.f32 %v16784_v30, %v16783_v58 }
 0x30c   : > { %v2493_v57 = vadd.f32 %v16780_v52, %v2180_v4  ;;  %11386 = vtanh.f32 %v13580_v62  ;;  %4523 = vrot.lane.b32.xlu1 %v13590_v59, %s11767_s27  ;;  %v13602_v44 = vadd.f32 %v3690_v38, %v3432_v50  ;;  %v13604_v16 = vpop.eup %11380  ;;  %v3434_v4 = vadd.f32 %v13468_v12, %v16782_v27  ;;  %v16789_v27 = vld [vmem:[#allocation34_spill] sm:$0xff] }
 0x30d   : > { %11388 = vtanh.f32 %v13596_v33  ;;  %v13619_v7 = vpop.eup %11382 }
 0x30e   : > { %v2806_v61 = vadd.f32 %v16781_v19, %v2493_v57  ;;  %v13616_v38 = vadd.f32 %v13506_v6, %v3434_v4  ;;  %11390 = vtanh.f32 %v13602_v44  ;;  %v16786_v57 = vld [vmem:[#allocation22_spill] sm:$0xff]  ;;  %v16787_v19 = vld [vmem:[#allocation32_spill] sm:$0xff]  ;;  %v3436_v4 = vadd.f32 %v13513_v14, %v16789_v27 }
 0x30f   : > { %4529 = vrot.lane.b32.xlu0 %v13619_v7, %s11767_s27  ;;  %v16788_v6 = vld [vmem:[#allocation24_spill] sm:$0xff]  ;;  %v9781_v27 = vmul.f32 -1.442695, %v13359_v0  ;;  %v9785_v0 = vmul.f32 -1.442695, %v13374_v39 }
 0x310   : > { %v3120_v10 = vadd.f32 %v13328_v20, %v2806_v61  ;;  %4527 = vrot.lane.b32.xlu1 %v13604_v16, %s11767_s27  ;;  %v16785_v20 = vld [vmem:[#allocation16_spill] sm:$0xff]  ;;  %v3435_v61 = vadd.f32 %v13487_v31, %v16787_v19  ;;  %11392 = vtanh.f32 %v13616_v38  ;;  %v16790_v31 = vld [vmem:[#allocation33_spill] sm:$0xff]  ;;  %v9780_v19 = vmul.f32 -1.442695, %v13347_v63 }
 0x311   : > { %v1871_v52 = vadd.f32 %v16785_v20, %v1550_v3  ;;  %v13644_v3 = vadd.f32 %v3706_v2, %v3436_v4  ;;  %v3709_v20 = vpop.f32.mrf.mxu0  ;;  %v9783_v4 = vmul.f32 -1.442695, %v13363_v40  ;;  %v9784_v63 = vmul.f32 -1.442695, %v13368_v34  ;;  %v11305_v40 = vld [vmem:[%s16592_s3 + $0x18] sm:$0xff]  }
 0x312   : > { %v3433_v8 = vadd.f32 %v13497_v9, %v3120_v10  ;;  %10859 = vmatprep.subr.bf16.mxu0 %v11305_v40  ;;  %v9787_v34 = vmul.f32 -1.442695, %v13380_v43  ;;  %v9788_v39 = vmul.f32 -1.442695, %v13396_v13  ;;  %v11306_v43 = vld [vmem:[%s16592_s3 + $0x30] sm:$0xff]  }
 0x313   : > { %v2184_v50 = vadd.f32 %v16786_v57, %v1871_v52  ;;  %v13630_v9 = vpop.eup %11384  ;;  %10860 = vmatpush3.bf16.msra.mxu0 %v11305_v40  ;;  %v11307_v13 = vld [vmem:[%s16592_s3 + $0x10] sm:$0xff]   ;;  %v9791_v40 = vmul.f32 -1.442695, %v13441_v1  ;;  %v9792_v1 = vmul.f32 -1.442695, %v13454_v56 }
 0x314   : > { %v13622_v12 = vadd.f32 %v3693_v54, %v3433_v8  ;;  %v13636_v54 = vadd.f32 %v13525_v5, %v3435_v61  ;;  %4533 = vrot.lane.b32.xlu0 %v13630_v9, %s11767_s27  ;;  %v3396_v8 = vpop.f32.mrf.mxu1  ;;  %10861 = vmatprep.subr.bf16.mxu0 %v11307_v13 }
 0x315   : > { %v2497_v10 = vadd.f32 %v16788_v6, %v2184_v50  ;;  %v9782_v6 = vmul.f32 -1.442695, %v13353_v21  ;;  %v9786_v21 = vmul.f32 -1.442695, %v13371_v11 }
 0x316   : > { %11394 = vtanh.f32 %v13622_v12 }
 0x317   : > { %v2810_v30 = vadd.f32 %v16790_v31, %v2497_v10  ;;  %11396 = vtanh.f32 %v13636_v54  ;;  %10862 = vmatpush3.bf16.msra.mxu0 %v11307_v13  ;;  %v5125_v13 = vld [vmem:[#allocation3 + $0x9] sm:$0xff] }
 0x318   : > { %11398 = vtanh.f32 %v13644_v3 }
 0x319   : > { %v13641_v58 = vpop.eup %11386  ;;  %v3124_v14 = vadd.f32 %v13340_v18, %v2810_v30  ;;  %v11304_v30 = vld [vmem:[%s16592_s3 + $0x38] sm:$0xff]  }
 0x31a   : > { %4531 = vrot.lane.b32.xlu1 %v13641_v58, %s11767_s27  ;;  %v13650_v5 = vpop.eup %11388  ;;  %10819 = vmatprep.subr.bf16.mxu1 %v11304_v30 }
 0x31b   : > { %v3437_v52 = vadd.f32 %v3396_v8, %v3124_v14  ;;  %v13655_v57 = vpop.eup %11390  ;;  %10820 = vmatpush3.bf16.msra.mxu1 %v11304_v30 }
 0x31c   : > { %4537 = vrot.lane.b32.xlu0 %v13655_v57, %s11767_s27  ;;  %10821 = vmatprep.subr.bf16.mxu1 %v11306_v43 }
 0x31d   : > { %v13657_v2 = vadd.f32 %v3709_v20, %v3437_v52  ;;  %v13661_v50 = vpop.eup %11392 }
 0x31e   : > { %4535 = vrot.lane.b32.xlu1 %v13650_v5, %s11767_s27 }
 0x31f   : > { %11400 = vtanh.f32 %v13657_v2  ;;  %10822 = vmatpush3.bf16.msra.mxu1 %v11306_v43  ;;  %v5124_v43 = vld [vmem:[#allocation3 + $0x1] sm:$0xff] }
 0x320   : > { %4541 = vrot.lane.b32.xlu0 %v13661_v50, %s11767_s27  ;;  %11402 = vpow2.f32 %v9780_v19 }
 0x321   : > { %11404 = vpow2.f32 %v9782_v6  ;;  %v9790_v6 = vmul.f32 -1.442695, %v13411_v51  ;;  %v9789_v51 = vmul.f32 -1.442695, %v13425_v29 }
 0x322   : > { %11406 = vpow2.f32 %v9781_v27 }
 0x323   : > { %v13666_v18 = vpop.eup %11394  ;;  %11408 = vpow2.f32 %v9783_v4 }
 0x324   : > { %4539 = vrot.lane.b32.xlu1 %v13666_v18, %s11767_s27  ;;  %v13671_v61 = vpop.eup %11396  ;;  %11410 = vpow2.f32 %v9784_v63 }
 0x325   : > { %v13676_v10 = vpop.eup %11398  ;;  %11412 = vpow2.f32 %v9786_v21 }
 0x326   : > { %4545 = vrot.lane.b32.xlu0 %v13676_v10, %s11767_s27  ;;  %11414 = vpow2.f32 %v9785_v0 }
 0x327   : > { %11416 = vpow2.f32 %v9787_v34 }
 0x328   : > { %4543 = vrot.lane.b32.xlu1 %v13671_v61, %s11767_s27  ;;  %11418 = vpow2.f32 %v9788_v39 }
 0x32c   : > { %v13683_v31 = vpop.eup %11400 }
 0x32d   : > { %16791 = vst [vmem:[#allocation19_spill] sm:$0xff] %v13683_v31  ;;  %4547 = vrot.lane.b32.xlu1 %v13683_v31, %s11767_s27  ;;  %v11403_v11 = vpop.eup %11402 }
 0x32e   : > { %v11405_v8 = vpop.eup %11404  ;;  %v3849_v14 = vadd.f32 1.0, %v11403_v11  ;;  %v11308_v11 = vld [vmem:[%s16592_s3 + $0x28] sm:$0xff]  }
 0x32f   : > { %v11407_v20 = vpop.eup %11406  ;;  %v3851_v52 = vadd.f32 1.0, %v11405_v8  ;;  %v11309_v8 = vld [vmem:[%s16592_s3 + $0x8] sm:$0xff]   ;;  %10823 = vmatprep.subr.bf16.mxu1 %v11308_v11 }
 0x330   : > { %v11409_v19 = vpop.eup %11408  ;;  %11420 = vrcp.f32 %v3849_v14  ;;  %v3850_v4 = vadd.f32 1.0, %v11407_v20  ;;  %10863 = vmatprep.subr.bf16.mxu0 %v11309_v8  ;;  %10824 = vmatpush3.bf16.msra.mxu1 %v11308_v11  ;;  %v11310_v14 = vld [vmem:[%s16592_s3 + $0x20] sm:$0xff]  }
 0x331   : > { %v11411_v27 = vpop.eup %11410  ;;  %11422 = vrcp.f32 %v3851_v52  ;;  %v3852_v63 = vadd.f32 1.0, %v11409_v19  ;;  %10864 = vmatpush3.bf16.msra.mxu0 %v11309_v8  ;;  %v11311_v20 = vld [vmem:[%s16592_s3] sm:$0xff]   ;;  %10825 = vmatprep.subr.bf16.mxu1 %v11310_v14 }
 0x332   : > { %v3853_v21 = vadd.f32 1.0, %v11411_v27  ;;  %11424 = vpow2.f32 %v9790_v6  ;;  %v11413_v0 = vpop.eup %11412  ;;  %10865 = vmatprep.subr.bf16.mxu0 %v11311_v20 }
 0x333   : > { %11426 = vrcp.f32 %v3850_v4  ;;  %v11415_v30 = vpop.eup %11414  ;;  %v3855_v34 = vadd.f32 1.0, %v11413_v0  ;;  %v9794_v4 = vmul.f32 -1.442695, %v13473_v49  ;;  %v5068_v0 = vld [vmem:[#allocation3] sm:$0xff]  ;;  %v5156_v49 = vpack.c.bf16 %v5125_v13, %v5124_v43 }
 0x334   : > { %11428 = vrcp.f32 %v3852_v63  ;;  %v3854_v39 = vadd.f32 1.0, %v11415_v30  ;;  %v11417_v29 = vpop.eup %11416  ;;  %10826 = vmatpush3.bf16.msra.mxu1 %v11310_v14  ;;  %v9793_v30 = vmul.f32 -1.442695, %v13476_v42  ;;  %v9795_v14 = vmul.f32 -1.442695, %v13494_v24 }
 0x335   : > { %11430 = vrcp.f32 %v3853_v21  ;;  %v11419_v52 = vpop.eup %11418  ;;  %v3856_v19 = vadd.f32 1.0, %v11417_v29  ;;  %10866 = vmatpush3.bf16.msra.mxu0 %v11311_v20  ;;  %10827 = vmatprep.mubr.msk.bf16.mxu1 %vm5205_vm9, %v5156_v49 }
 0x336   : > { %11432 = vpow2.f32 %v9789_v51  ;;  %v3857_v21 = vadd.f32 1.0, %v11419_v52 }
 0x337   : > { %11434 = vpow2.f32 %v9791_v40  ;;  %v5069_v40 = vld [vmem:[#allocation3 + $0x8] sm:$0xff] }
 0x338   : > { %11436 = vrcp.f32 %v3855_v34 }
 0x339   : > { %11438 = vrcp.f32 %v3854_v39  ;;  %v5100_v39 = vpack.c.bf16 %v5069_v40, %v5068_v0 }
 0x33a   : > { %11440 = vpow2.f32 %v9792_v1 }
 0x33b   : > { %11442 = vrcp.f32 %v3856_v19  ;;  %10867 = vmatprep.mubr.msk.bf16.mxu0 %vm5205_vm9, %v5100_v39  ;;  %v9797_v39 = vmul.f32 -1.442695, %v13527_v25 }
 0x33c   : > { %11444 = vpow2.f32 %v9794_v4 }
 0x33d   : > { %v13719_v6 = vpop.eup %11420  ;;  %11446 = vrcp.f32 %v3857_v21 }
 0x33e   : > { %16792 = vst [vmem:[#allocation26_spill] sm:$0xff] %v13719_v6  ;;  %v13725_v63 = vpop.eup %11422  ;;  %11448 = vpow2.f32 %v9793_v30  ;;  %v9798_v30 = vmul.f32 -1.442695, %v13518_v28 }
 0x33f   : > { %16794 = vst [vmem:[#allocation10_spill] sm:$0xff] %v13725_v63  ;;  %v11425_v51 = vpop.eup %11424  ;;  %11450 = vpow2.f32 %v9795_v14 }
 0x340   : > { %v13730_v34 = vpop.eup %11426  ;;  %v3859_v52 = vadd.f32 1.0, %v11425_v51 }
 0x341   : > { %16795 = vst [vmem:[#allocation13_spill] sm:$0xff] %v13730_v34  ;;  %v13739_v42 = vpop.eup %11428 }
 0x342   : > { %16798 = vst [vmem:[#allocation21_spill] sm:$0xff] %v13739_v42  ;;  %v13743_v20 = vpop.eup %11430  ;;  %11452 = vrcp.f32 %v3859_v52 }
 0x343   : > { %16799 = vst [vmem:[#allocation28_spill] sm:$0xff] %v13743_v20  ;;  %v11433_v19 = vpop.eup %11432 }
 0x344   : > { %v11435_v13 = vpop.eup %11434  ;;  %v3858_v51 = vadd.f32 1.0, %v11433_v19 }
 0x345   : > { %v13756_v0 = vpop.eup %11436  ;;  %v3860_v52 = vadd.f32 1.0, %v11435_v13 }
 0x346   : > { %16802 = vst [vmem:[#allocation15_spill] sm:$0xff] %v13756_v0 }
 0x353   : > { %v4490_v27 = vpop.permute.xlu0 %4489 }
 0x354   : > { %v13723_v56 = vmul.f32 %v13719_v6, %v4490_v27  ;;  %v9796_v27 = vmul.f32 -1.442695, %v13502_v17  ;;  %v13762_v17 = vpop.eup %11438 }
 0x355   : > { %16803 = vst [vmem:[#allocation20_spill] sm:$0xff] %v13762_v17  ;;  %v11441_v14 = vpop.eup %11440 }
 0x356   : > { %16793 = vst [vmem:[#allocation7_spill] sm:$0xff] %v13723_v56  ;;  %4938 = vrot.lane.b32.xlu0 %v13723_v56, %s11768_s26  ;;  %11454 = vpow2.f32 %v9796_v27  ;;  %v13776_v28 = vpop.eup %11442  ;;  %v9799_v27 = vmul.f32 -1.442695, %v13539_v23  ;;  %v3861_v25 = vadd.f32 1.0, %v11441_v14  ;;  %v9802_v14 = vmul.f32 -1.442695, %v13572_v45 }
 0x357   : > { %v4494_v11 = vpop.permute.xlu0 %4493  ;;  %v4492_v8 = vpop.permute.xlu1 %4491  ;;  %11456 = vrcp.f32 %v3858_v51  ;;  %16806 = vst [vmem:[#allocation30_spill] sm:$0xff] %v13776_v28  ;;  %v3977_v56 = vld [vmem:[#allocation4] sm:$0xff] }
 0x358   : > { %v13733_v29 = vmul.f32 %v13725_v63, %v4494_v11  ;;  %v13736_v1 = vmul.f32 %v13730_v34, %v4492_v8  ;;  %11458 = vpow2.f32 %v9798_v30  ;;  %v9800_v30 = vmul.f32 -1.442695, %v13554_v47 }
 0x359   : > { %11460 = vpow2.f32 %v9797_v39 }
 0x35a   : > { %16796 = vst [vmem:[#allocation27_spill] sm:$0xff] %v13733_v29  ;;  %16797 = vst [vmem:[#allocation18_spill] sm:$0xff] %v13736_v1  ;;  %4942 = vrot.lane.b32.xlu0 %v13733_v29, %s11768_s26  ;;  %4940 = vrot.lane.b32.xlu1 %v13736_v1, %s11768_s26  ;;  %11462 = vrcp.f32 %v3860_v52 }
 0x35b   : > { %v4496_v4 = vpop.permute.xlu1 %4495  ;;  %v4498_v43 = vpop.permute.xlu0 %4497  ;;  %11464 = vpow2.f32 %v9799_v27 }
 0x35c   : > { %v13751_v21 = vmul.f32 %v13739_v42, %v4496_v4  ;;  %v13754_v24 = vmul.f32 %v13743_v20, %v4498_v43  ;;  %v11445_v43 = vpop.eup %11444  ;;  %11466 = vrcp.f32 %v3861_v25 }
 0x35d   : > { %v13782_v13 = vpop.eup %11446  ;;  %v3863_v23 = vadd.f32 1.0, %v11445_v43  ;;  %11468 = vpow2.f32 %v9800_v30  ;;  %v9801_v43 = vmul.f32 -1.442695, %v13580_v62  ;;  %v9803_v30 = vmul.f32 -1.442695, %v13596_v33 }
 0x35e   : > { %16800 = vst [vmem:[#allocation8_spill] sm:$0xff] %v13751_v21  ;;  %16801 = vst [vmem:[#allocation12_spill] sm:$0xff] %v13754_v24  ;;  %4946 = vrot.lane.b32.xlu0 %v13754_v24, %s11768_s26  ;;  %4944 = vrot.lane.b32.xlu1 %v13751_v21, %s11768_s26  ;;  %v11449_v51 = vpop.eup %11448 }
 0x35f   : > { %v4502_v49 = vpop.permute.xlu0 %4501  ;;  %v4500_v40 = vpop.permute.xlu1 %4499  ;;  %16808 = vst [vmem:[#allocation9_spill] sm:$0xff] %v13782_v13  ;;  %11470 = vrcp.f32 %v3863_v23 }
 0x360   : > { %v13766_v11 = vmul.f32 %v13756_v0, %v4502_v49  ;;  %v13769_v8 = vmul.f32 %v13762_v17, %v4500_v40 }
 0x362   : > { %16804 = vst [vmem:[#allocation29_spill] sm:$0xff] %v13766_v11  ;;  %16805 = vst [vmem:[#allocation23_spill] sm:$0xff] %v13769_v8  ;;  %4950 = vrot.lane.b32.xlu0 %v13766_v11, %s11768_s26  ;;  %4948 = vrot.lane.b32.xlu1 %v13769_v8, %s11768_s26  ;;  %v3862_v8 = vadd.f32 1.0, %v11449_v51 }
 0x363   : > { %v4504_v19 = vpop.permute.xlu1 %4503  ;;  %v4506_v49 = vpop.permute.xlu0 %4505 }
 0x364   : > { %v13780_v4 = vmul.f32 %v13776_v28, %v4504_v19  ;;  %v13788_v40 = vmul.f32 %v13782_v13, %v4506_v49  ;;  %v11451_v19 = vpop.eup %11450  ;;  %11472 = vrcp.f32 %v3862_v8 }
 0x365   : > { %v13792_v39 = vpop.eup %11452  ;;  %v3864_v47 = vadd.f32 1.0, %v11451_v19  ;;  %11474 = vpow2.f32 %v9802_v14 }
 0x366   : > { %16807 = vst [vmem:[#allocation31_spill] sm:$0xff] %v13780_v4  ;;  %4952 = vrot.lane.b32.xlu1 %v13780_v4, %s11768_s26  ;;  %16809 = vst [vmem:[#allocation14_spill] sm:$0xff] %v13788_v40  ;;  %4954 = vrot.lane.b32.xlu0 %v13788_v40, %s11768_s26  ;;  %v11455_v4 = vpop.eup %11454 }
 0x367   : > { %16810 = vst [vmem:[#allocation16_spill] sm:$0xff] %v13792_v39  ;;  %v4510_v52 = vpop.permute.xlu0 %4509  ;;  %v13801_v25 = vpop.eup %11456  ;;  %v3865_v51 = vadd.f32 1.0, %v11455_v4  ;;  %11476 = vrcp.f32 %v3864_v47  ;;  %v9804_v4 = vmul.f32 -1.442695, %v13602_v44 }
 0x368   : > { %v13796_v27 = vmul.f32 %v13792_v39, %v4510_v52  ;;  %16812 = vst [vmem:[#allocation32_spill] sm:$0xff] %v13801_v25  ;;  %v4508_v49 = vpop.permute.xlu1 %4507  ;;  %v11459_v45 = vpop.eup %11458  ;;  %11478 = vpow2.f32 %v9801_v43 }
 0x369   : > { %v13804_v40 = vmul.f32 %v13801_v25, %v4508_v49  ;;  %v11461_v23 = vpop.eup %11460  ;;  %v3867_v8 = vadd.f32 1.0, %v11459_v45  ;;  %11480 = vrcp.f32 %v3865_v51  ;;  %v9806_v51 = vmul.f32 -1.442695, %v13616_v38 }
 0x36a   : > { %16811 = vst [vmem:[#allocation22_spill] sm:$0xff] %v13796_v27  ;;  %4958 = vrot.lane.b32.xlu0 %v13796_v27, %s11768_s26  ;;  %v13809_v62 = vpop.eup %11462  ;;  %v3866_v49 = vadd.f32 1.0, %v11461_v23  ;;  %11482 = vpow2.f32 %v9803_v30  ;;  %v9805_v23 = vmul.f32 -1.442695, %v13622_v12  ;;  %v9807_v12 = vmul.f32 -1.442695, %v13636_v54 }
 0x36b   : > { %16813 = vst [vmem:[#allocation24_spill] sm:$0xff] %v13804_v40  ;;  %4956 = vrot.lane.b32.xlu1 %v13804_v40, %s11768_s26  ;;  %16814 = vst [vmem:[#allocation34_spill] sm:$0xff] %v13809_v62  ;;  %v11465_v52 = vpop.eup %11464  ;;  %v4514_v33 = vpop.permute.xlu0 %4513  ;;  %11484 = vrcp.f32 %v3867_v8 }
 0x36c   : > { %v4512_v19 = vpop.permute.xlu1 %4511  ;;  %v13815_v47 = vpop.eup %11466  ;;  %11486 = vpow2.f32 %v9804_v4  ;;  %v3868_v45 = vadd.f32 1.0, %v11465_v52 }
 0x36d   : > { %v13813_v14 = vmul.f32 %v13809_v62, %v4512_v19  ;;  %16816 = vst [vmem:[#allocation39_spill] sm:$0xff] %v13815_v47  ;;  %v13820_v43 = vmul.f32 %v13815_v47, %v4514_v33  ;;  %v11469_v44 = vpop.eup %11468  ;;  %11488 = vrcp.f32 %v3866_v49 }
 0x36e   : > { %v13825_v30 = vpop.eup %11470  ;;  %v3869_v38 = vadd.f32 1.0, %v11469_v44  ;;  %11490 = vpow2.f32 %v9806_v51  ;;  %v9808_v51 = vmul.f32 -1.442695, %v13644_v3 }
 0x36f   : > { %16815 = vst [vmem:[#allocation33_spill] sm:$0xff] %v13813_v14  ;;  %4960 = vrot.lane.b32.xlu1 %v13813_v14, %s11768_s26  ;;  %16817 = vst [vmem:[#allocation40_spill] sm:$0xff] %v13820_v43  ;;  %4962 = vrot.lane.b32.xlu0 %v13820_v43, %s11768_s26  ;;  %v4518_v19 = vpop.permute.xlu0 %4517  ;;  %11492 = vrcp.f32 %v3868_v45 }
 0x370   : > { %16818 = vst [vmem:[#allocation41_spill] sm:$0xff] %v13825_v30  ;;  %v13831_v8 = vmul.f32 %v13825_v30, %v4518_v19  ;;  %11494 = vpow2.f32 %v9805_v23 }
 0x371   : > { %v13828_v40 = vpop.eup %11472  ;;  %v4516_v33 = vpop.permute.xlu1 %4515  ;;  %11496 = vrcp.f32 %v3869_v38 }
 0x372   : > { %16819 = vst [vmem:[#allocation42_spill] sm:$0xff] %v13828_v40  ;;  %16820 = vst [vmem:[#allocation43_spill] sm:$0xff] %v13831_v8  ;;  %v11475_v14 = vpop.eup %11474  ;;  %v13834_v4 = vmul.f32 %v13828_v40, %v4516_v33  ;;  %11498 = vpow2.f32 %v9807_v12  ;;  %v9809_v12 = vmul.f32 -1.442695, %v13657_v2 }
 0x373   : > { %4966 = vrot.lane.b32.xlu0 %v13831_v8, %s11768_s26  ;;  %v3871_v19 = vadd.f32 1.0, %v11475_v14 }
 0x374   : > { %16821 = vst [vmem:[#allocation44_spill] sm:$0xff] %v13834_v4  ;;  %v13838_v52 = vpop.eup %11476  ;;  %4964 = vrot.lane.b32.xlu1 %v13834_v4, %s11768_s26 }
 0x375   : > { %16822 = vst [vmem:[#allocation45_spill] sm:$0xff] %v13838_v52  ;;  %v11479_v49 = vpop.eup %11478  ;;  %v4520_v43 = vpop.permute.xlu1 %4519  ;;  %11500 = vrcp.f32 %v3871_v19 }
 0x376   : > { %v13843_v44 = vpop.eup %11480  ;;  %v13847_v45 = vmul.f32 %v13838_v52, %v4520_v43  ;;  %v4522_v33 = vpop.permute.xlu0 %4521  ;;  %v3870_v23 = vadd.f32 1.0, %v11479_v49  ;;  %11502 = vpow2.f32 %v9808_v51 }
 0x377   : > { %16823 = vst [vmem:[#allocation46_spill] sm:$0xff] %v13843_v44  ;;  %v13850_v8 = vmul.f32 %v13843_v44, %v4522_v33  ;;  %v11483_v54 = vpop.eup %11482 }
 0x378   : > { %16824 = vst [vmem:[#allocation47_spill] sm:$0xff] %v13847_v45  ;;  %4968 = vrot.lane.b32.xlu1 %v13847_v45, %s11768_s26  ;;  %v13856_v14 = vpop.eup %11484  ;;  %v3872_v38 = vadd.f32 1.0, %v11483_v54  ;;  %11504 = vrcp.f32 %v3870_v23 }
 0x379   : > { %16825 = vst [vmem:[#allocation48_spill] sm:$0xff] %v13850_v8  ;;  %4970 = vrot.lane.b32.xlu0 %v13850_v8, %s11768_s26  ;;  %16826 = vst [vmem:[#allocation49_spill] sm:$0xff] %v13856_v14  ;;  %v11487_v43 = vpop.eup %11486 }
 0x37a   : > { %v13861_v33 = vpop.eup %11488  ;;  %v3873_v45 = vadd.f32 1.0, %v11487_v43  ;;  %11506 = vrcp.f32 %v3872_v38 }
 0x37b   : > { %16828 = vst [vmem:[#allocation51_spill] sm:$0xff] %v13861_v33  ;;  %v11491_v51 = vpop.eup %11490  ;;  %11508 = vpow2.f32 %v9809_v12 }
 0x37c   : > { %v13871_v54 = vpop.eup %11492  ;;  %v3875_v8 = vadd.f32 1.0, %v11491_v51  ;;  %11510 = vrcp.f32 %v3873_v45 }
 0x37d   : > { %v4526_v3 = vpop.permute.xlu0 %4525  ;;  %16830 = vst [vmem:[#allocation53_spill] sm:$0xff] %v13871_v54  ;;  %v11495_v23 = vpop.eup %11494 }
 0x37e   : > { %v13859_v4 = vmul.f32 %v13856_v14, %v4526_v3  ;;  %v4524_v49 = vpop.permute.xlu1 %4523  ;;  %v3874_v43 = vadd.f32 1.0, %v11495_v23  ;;  %11512 = vrcp.f32 %v3875_v8 }
 0x37f   : > { %v13865_v19 = vmul.f32 %v13861_v33, %v4524_v49  ;;  %v13876_v49 = vpop.eup %11496 }
 0x380   : > { %16827 = vst [vmem:[#allocation50_spill] sm:$0xff] %v13859_v4  ;;  %4974 = vrot.lane.b32.xlu0 %v13859_v4, %s11768_s26  ;;  %16832 = vst [vmem:[#allocation55_spill] sm:$0xff] %v13876_v49  ;;  %11514 = vrcp.f32 %v3874_v43 }
 0x381   : > { %16829 = vst [vmem:[#allocation52_spill] sm:$0xff] %v13865_v19  ;;  %4972 = vrot.lane.b32.xlu1 %v13865_v19, %s11768_s26  ;;  %v4530_v27 = vpop.permute.xlu0 %4529  ;;  %v11499_v19 = vpop.eup %11498 }
 0x382   : > { %v4528_v3 = vpop.permute.xlu1 %4527  ;;  %v13881_v38 = vmul.f32 %v13876_v49, %v4530_v27  ;;  %v13883_v4 = vpop.eup %11500  ;;  %v3876_v45 = vadd.f32 1.0, %v11499_v19  ;;  %v14027_v49 = vld [vmem:[%s16592_s3 + $0x98] sm:$0xff]  }
 0x383   : > { %v13874_v2 = vmul.f32 %v13871_v54, %v4528_v3  ;;  %16834 = vst [vmem:[#allocation57_spill] sm:$0xff] %v13883_v4  ;;  %v11503_v12 = vpop.eup %11502  ;;  %v11319_v54 = vld [vmem:[%s16592_s3 + $0x60] sm:$0xff]  }
 0x384   : > { %16833 = vst [vmem:[#allocation56_spill] sm:$0xff] %v13881_v38  ;;  %4978 = vrot.lane.b32.xlu0 %v13881_v38, %s11768_s26  ;;  %11516 = vrcp.f32 %v3876_v45 }
 0x385   : > { %16831 = vst [vmem:[#allocation54_spill] sm:$0xff] %v13874_v2  ;;  %4976 = vrot.lane.b32.xlu1 %v13874_v2, %s11768_s26  ;;  %v13890_v11 = vpop.eup %11504  ;;  %v3877_v2 = vadd.f32 1.0, %v11503_v12 }
 0x386   : > { %v4534_v51 = vpop.permute.xlu0 %4533  ;;  %16836 = vst [vmem:[#allocation59_spill] sm:$0xff] %v13890_v11 }
 0x387   : > { %v13888_v3 = vmul.f32 %v13883_v4, %v4534_v51  ;;  %v13897_v8 = vpop.eup %11506  ;;  %11518 = vrcp.f32 %v3877_v2  ;;  %v11318_v4 = vld [vmem:[%s16592_s3 + $0x40] sm:$0xff]  }
 0x388   : > { %16838 = vst [vmem:[#allocation61_spill] sm:$0xff] %v13897_v8  ;;  %v11509_v19 = vpop.eup %11508  ;;  %11520 = vtanh.f32 %v13542_v37 }
 0x389   : > { %16835 = vst [vmem:[#allocation58_spill] sm:$0xff] %v13888_v3  ;;  %4982 = vrot.lane.b32.xlu0 %v13888_v3, %s11768_s26  ;;  %v13904_v38 = vpop.eup %11510 }
 0x38a   : > { %16840 = vst [vmem:[#allocation63_spill] sm:$0xff] %v13904_v38 }
 0x38b   : > { %v13913_v45 = vpop.eup %11512 }
 0x38c   : > { %v4532_v23 = vpop.permute.xlu1 %4531  ;;  %16842 = vst [vmem:[#allocation65_spill] sm:$0xff] %v13913_v45 }
 0x38d   : > { %v13893_v27 = vmul.f32 %v13890_v11, %v4532_v23  ;;  %v3878_v23 = vadd.f32 1.0, %v11509_v19  ;;  %v11317_v11 = vld [vmem:[%s16592_s3 + $0x68] sm:$0xff]  }
 0x38e   : > { %v4538_v12 = vpop.permute.xlu0 %4537 }
 0x38f   : > { %16837 = vst [vmem:[#allocation60_spill] sm:$0xff] %v13893_v27  ;;  %4980 = vrot.lane.b32.xlu1 %v13893_v27, %s11768_s26  ;;  %v13907_v21 = vmul.f32 %v13904_v38, %v4538_v12  ;;  %11522 = vrcp.f32 %v3878_v23  ;;  %v13919_v27 = vpop.eup %11514  ;;  %v11313_v23 = vld [vmem:[%s16592_s3 + $0x78] sm:$0xff]   ;;  %v11316_v38 = vld [vmem:[%s16592_s3 + $0x48] sm:$0xff]  }
 0x390   : > { %v4536_v43 = vpop.permute.xlu1 %4535  ;;  %16844 = vst [vmem:[#allocation67_spill] sm:$0xff] %v13919_v27  ;;  %10939 = vmatprep.subr.bf16.mxu0 %v11313_v23  ;;  %11524 = vtanh.f32 %v13559_v36 }
 0x391   : > { %v13902_v51 = vmul.f32 %v13897_v8, %v4536_v43  ;;  %16841 = vst [vmem:[#allocation64_spill] sm:$0xff] %v13907_v21  ;;  %4986 = vrot.lane.b32.xlu0 %v13907_v21, %s11768_s26 }
 0x392   : > { %v4542_v2 = vpop.permute.xlu0 %4541 }
 0x393   : > { %16839 = vst [vmem:[#allocation62_spill] sm:$0xff] %v13902_v51  ;;  %4984 = vrot.lane.b32.xlu1 %v13902_v51, %s11768_s26  ;;  %v13917_v43 = vmul.f32 %v13913_v45, %v4542_v2  ;;  %v11312_v51 = vld [vmem:[%s16592_s3 + $0x58] sm:$0xff]   ;;  %v13934_v2 = vpop.eup %11516 }
 0x394   : > { %16846 = vst [vmem:[#allocation69_spill] sm:$0xff] %v13934_v2  ;;  %10899 = vmatprep.subr.bf16.mxu1 %v11312_v51 }
 0x395   : > { %16843 = vst [vmem:[#allocation66_spill] sm:$0xff] %v13917_v43  ;;  %4990 = vrot.lane.b32.xlu0 %v13917_v43, %s11768_s26  ;;  %v13940_v43 = vpop.eup %11518 }
 0x396   : > { %v4540_v19 = vpop.permute.xlu1 %4539  ;;  %16848 = vst [vmem:[#allocation71_spill] sm:$0xff] %v13940_v43 }
 0x397   : > { %v13922_v12 = vmul.f32 %v13919_v27, %v4540_v19 }
 0x398   : > { %v4546_v3 = vpop.permute.xlu0 %4545 }
 0x399   : > { %16845 = vst [vmem:[#allocation68_spill] sm:$0xff] %v13922_v12  ;;  %4988 = vrot.lane.b32.xlu1 %v13922_v12, %s11768_s26  ;;  %v13943_v24 = vmul.f32 %v13940_v43, %v4546_v3  ;;  %v13949_v12 = vpop.eup %11520 }
 0x39a   : > { %v4544_v21 = vpop.permute.xlu1 %4543 }
 0x39b   : > { %v13938_v19 = vmul.f32 %v13934_v2, %v4544_v21  ;;  %16849 = vst [vmem:[#allocation72_spill] sm:$0xff] %v13943_v24  ;;  %4994 = vrot.lane.b32.xlu0 %v13943_v24, %s11768_s26  ;;  %v3978_v24 = vld [vmem:[#allocation4 + $0x8] sm:$0xff] }
 0x39c   : > { %v13951_v1 = vpop.eup %11522 }
 0x39d   : > { %16847 = vst [vmem:[#allocation70_spill] sm:$0xff] %v13938_v19  ;;  %4992 = vrot.lane.b32.xlu1 %v13938_v19, %s11768_s26  ;;  %16850 = vst [vmem:[#allocation73_spill] sm:$0xff] %v13951_v1  ;;  %v13961_v3 = vpop.eup %11524  ;;  %v3979_v19 = vld [vmem:[#allocation4 + $0x10] sm:$0xff] }
 0x39e   : > { %16852 = vst [vmem:[#allocation75_spill] sm:$0xff] %v13961_v3 }
 0x39f   : > { %v4548_v29 = vpop.permute.xlu1 %4547  ;;  %4549 = vrot.lane.b32.xlu0 %v13949_v12, %s11767_s27 }
 0x3a0   : > { %v13954_v21 = vmul.f32 %v13951_v1, %v4548_v29  ;;  %v3980_v29 = vld [vmem:[#allocation4 + $0x18] sm:$0xff] }
 0x3a2   : > { %16851 = vst [vmem:[#allocation74_spill] sm:$0xff] %v13954_v21  ;;  %4996 = vrot.lane.b32.xlu1 %v13954_v21, %s11768_s26 }
 0x3a3   : > { %4041 = vrot.lane.b32.xlu0 %v3977_v56, %s11767_s27 }
 0x3a6   : > { %4551 = vrot.lane.b32.xlu1 %v13961_v3, %s11767_s27 }
 0x3a7   : > { %4045 = vrot.lane.b32.xlu0 %v3979_v19, %s11767_s27 }
 0x3aa   : > { %4043 = vrot.lane.b32.xlu1 %v3978_v24, %s11767_s27 }
 0x3ae   : > { %4047 = vrot.lane.b32.xlu1 %v3980_v29, %s11767_s27 }
 0x3c8   : > { %v4939_v1 = vpop.permute.xlu0 %4938 }
 0x3c9   : > { %5036 = vst.msk [vmem:[#allocation3 + $0x19] sm:$0xff] %vm5035_vm10, %v4939_v1 }
 0x3cc   : > { %v4943_v21 = vpop.permute.xlu0 %4942  ;;  %v4941_v56 = vpop.permute.xlu1 %4940 }
 0x3cd   : > { %5038 = vst.msk [vmem:[#allocation3 + $0x31] sm:$0xff] %vm5035_vm10, %v4943_v21  ;;  %5037 = vst.msk [vmem:[#allocation3 + $0x21] sm:$0xff] %vm5035_vm10, %v4941_v56 }
 0x3d0   : > { %v4947_v2 = vpop.permute.xlu0 %4946  ;;  %v4945_v43 = vpop.permute.xlu1 %4944  ;;  %v5126_v24 = vld [vmem:[#allocation3 + $0x19] sm:$0xff] }
 0x3d1   : > { %5040 = vst.msk [vmem:[#allocation3 + $0x49] sm:$0xff] %vm5035_vm10, %v4947_v2  ;;  %5039 = vst.msk [vmem:[#allocation3 + $0x39] sm:$0xff] %vm5035_vm10, %v4945_v43  ;;  %v5070_v45 = vld [vmem:[#allocation3 + $0x18] sm:$0xff]  ;;  %v11314_v2 = vld [vmem:[%s16592_s3 + $0x50] sm:$0xff]  }
 0x3d2   : > { %v11315_v43 = vld [vmem:[%s16592_s3 + $0x70] sm:$0xff]  }
 0x3d4   : > { %v4951_v19 = vpop.permute.xlu0 %4950  ;;  %v4949_v27 = vpop.permute.xlu1 %4948  ;;  %v5127_v29 = vld [vmem:[#allocation3 + $0x21] sm:$0xff]  ;;  %v5128_v56 = vld [vmem:[#allocation3 + $0x31] sm:$0xff] }
 0x3d5   : > { %v5071_v8 = vld [vmem:[#allocation3 + $0x20] sm:$0xff]  ;;  %5042 = vst.msk [vmem:[#allocation3 + $0x61] sm:$0xff] %vm5035_vm10, %v4951_v19  ;;  %5041 = vst.msk [vmem:[#allocation3 + $0x51] sm:$0xff] %vm5035_vm10, %v4949_v27  ;;  %v13975_v1 = vpack.c.bf16 %v5127_v29, %v5126_v24  ;;  %v5072_v19 = vld [vmem:[#allocation3 + $0x30] sm:$0xff] }
 0x3d6   : > { %v13977_v21 = vpack.c.bf16 %v5071_v8, %v5070_v45 }
 0x3d7   : > { %10828 = vmatmul.mubr.msk.bf16.vlgmr.msra.gmra.mxu1 %vm5205_vm9, %v13975_v1 }
 0x3d8   : > { %10868 = vmatmul.mubr.msk.bf16.vlgmr.msra.gmra.mxu0 %vm5205_vm9, %v13977_v21  ;;  %v4953_v27 = vpop.permute.xlu1 %4952  ;;  %v5129_v24 = vld [vmem:[#allocation3 + $0x39] sm:$0xff]  ;;  %10900 = vmatpush3.bf16.msra.mxu1 %v11312_v51  ;;  %v5130_v51 = vld [vmem:[#allocation3 + $0x49] sm:$0xff] }
 0x3d9   : > { %v5073_v8 = vld [vmem:[#allocation3 + $0x38] sm:$0xff]  ;;  %10940 = vmatpush3.bf16.msra.mxu0 %v11313_v23  ;;  %5043 = vst.msk [vmem:[#allocation3 + $0x69] sm:$0xff] %vm5035_vm10, %v4953_v27  ;;  %v13990_v45 = vpack.c.bf16 %v5129_v24, %v5128_v56  ;;  %10901 = vmatprep.subr.bf16.mxu1 %v11314_v2  ;;  %v4955_v23 = vpop.permute.xlu0 %4954  ;;  %v5074_v27 = vld [vmem:[#allocation3 + $0x48] sm:$0xff] }
 0x3da   : > { %v13992_v29 = vpack.c.bf16 %v5073_v8, %v5072_v19  ;;  %10941 = vmatprep.subr.bf16.mxu0 %v11315_v43  ;;  %5044 = vst.msk [vmem:[#allocation3 + $0x79] sm:$0xff] %vm5035_vm10, %v4955_v23 }
 0x3db   : > { %10831 = vmatprep.mubr.msk.bf16.mxu1 %vm5205_vm9, %v13990_v45 }
 0x3dc   : > { %10871 = vmatprep.mubr.msk.bf16.mxu0 %vm5205_vm9, %v13992_v29  ;;  %v5131_v56 = vld [vmem:[#allocation3 + $0x51] sm:$0xff]  ;;  %10902 = vmatpush3.bf16.msra.mxu1 %v11314_v2  ;;  %v5132_v2 = vld [vmem:[#allocation3 + $0x61] sm:$0xff] }
 0x3dd   : > { %v5075_v24 = vld [vmem:[#allocation3 + $0x50] sm:$0xff]  ;;  %10942 = vmatpush3.bf16.msra.mxu0 %v11315_v43  ;;  %v14005_v19 = vpack.c.bf16 %v5131_v56, %v5130_v51  ;;  %10903 = vmatprep.subr.bf16.mxu1 %v11316_v38  ;;  %v4959_v43 = vpop.permute.xlu0 %4958  ;;  %v5076_v23 = vld [vmem:[#allocation3 + $0x60] sm:$0xff] }
 0x3de   : > { %v14007_v8 = vpack.c.bf16 %v5075_v24, %v5074_v27  ;;  %10943 = vmatprep.subr.bf16.mxu0 %v11317_v11  ;;  %5046 = vst.msk [vmem:[#allocation3 + $0x91] sm:$0xff] %vm5035_vm10, %v4959_v43 }
 0x3df   : > { %10832 = vmatmul.mubr.msk.bf16.gmra.mxu1 %vm5205_vm9, %v14005_v19 }
 0x3e0   : > { %10872 = vmatmul.mubr.msk.bf16.gmra.mxu0 %vm5205_vm9, %v14007_v8  ;;  %v5133_v51 = vld [vmem:[#allocation3 + $0x69] sm:$0xff]  ;;  %10904 = vmatpush3.bf16.msra.mxu1 %v11316_v38 }
 0x3e1   : > { %v5077_v56 = vld [vmem:[#allocation3 + $0x68] sm:$0xff]  ;;  %10944 = vmatpush3.bf16.msra.mxu0 %v11317_v11  ;;  %v14020_v27 = vpack.c.bf16 %v5133_v51, %v5132_v2  ;;  %10905 = vmatprep.subr.bf16.mxu1 %v11318_v4  ;;  %v4957_v11 = vpop.permute.xlu1 %4956  ;;  %v4963_v2 = vpop.permute.xlu0 %4962  ;;  %v5134_v43 = vld [vmem:[#allocation3 + $0x79] sm:$0xff] }
 0x3e2   : > { %v14022_v24 = vpack.c.bf16 %v5077_v56, %v5076_v23  ;;  %10945 = vmatprep.subr.bf16.mxu0 %v11319_v54  ;;  %5045 = vst.msk [vmem:[#allocation3 + $0x81] sm:$0xff] %vm5035_vm10, %v4957_v11  ;;  %5048 = vst.msk [vmem:[#allocation3 + $0xa9] sm:$0xff] %vm5035_vm10, %v4963_v2  ;;  %v5078_v23 = vld [vmem:[#allocation3 + $0x78] sm:$0xff] }
 0x3e3   : > { %10835 = vmatprep.mubr.msk.bf16.mxu1 %vm5205_vm9, %v14020_v27 }
 0x3e4   : > { %10875 = vmatprep.mubr.msk.bf16.mxu0 %vm5205_vm9, %v14022_v24  ;;  %10906 = vmatpush3.bf16.msra.mxu1 %v11318_v4 }
 0x3e5   : > { %10946 = vmatpush3.bf16.msra.mxu0 %v11319_v54  ;;  %10979 = vmatprep.subr.bf16.mxu1 %v14027_v49  ;;  %v4961_v38 = vpop.permute.xlu1 %4960  ;;  %v4967_v4 = vpop.permute.xlu0 %4966  ;;  %v5136_v54 = vld [vmem:[#allocation3 + $0x91] sm:$0xff] }
 0x3e6   : > { %5047 = vst.msk [vmem:[#allocation3 + $0x99] sm:$0xff] %vm5035_vm10, %v4961_v38  ;;  %5050 = vst.msk [vmem:[#allocation3 + $0xc1] sm:$0xff] %vm5035_vm10, %v4967_v4  ;;  %v5080_v2 = vld [vmem:[#allocation3 + $0x90] sm:$0xff] }
 0x3e9   : > { %v5135_v51 = vld [vmem:[#allocation3 + $0x81] sm:$0xff]  ;;  %v4965_v11 = vpop.permute.xlu1 %4964  ;;  %v5138_v4 = vld [vmem:[#allocation3 + $0xa9] sm:$0xff] }
 0x3ea   : > { %v5079_v56 = vld [vmem:[#allocation3 + $0x80] sm:$0xff]  ;;  %v14037_v33 = vpack.c.bf16 %v5135_v51, %v5134_v43  ;;  %5049 = vst.msk [vmem:[#allocation3 + $0xb1] sm:$0xff] %vm5035_vm10, %v4965_v11  ;;  %v5082_v40 = vld [vmem:[#allocation3 + $0xa8] sm:$0xff] }
 0x3eb   : > { %v14039_v14 = vpack.c.bf16 %v5079_v56, %v5078_v23  ;;  %v4971_v56 = vpop.permute.xlu0 %4970 }
 0x3ec   : > { %10836 = vmatmul.mubr.msk.bf16.gmra.mxu1 %vm5205_vm9, %v14037_v33  ;;  %5052 = vst.msk [vmem:[#allocation3 + $0xd9] sm:$0xff] %vm5035_vm10, %v4971_v56 }
 0x3ed   : > { %10876 = vmatmul.mubr.msk.bf16.gmra.mxu0 %vm5205_vm9, %v14039_v14  ;;  %v5137_v38 = vld [vmem:[#allocation3 + $0x99] sm:$0xff]  ;;  %v4969_v23 = vpop.permute.xlu1 %4968 }
 0x3ee   : > { %v5081_v52 = vld [vmem:[#allocation3 + $0x98] sm:$0xff]  ;;  %v14047_v43 = vpack.c.bf16 %v5137_v38, %v5136_v54  ;;  %5051 = vst.msk [vmem:[#allocation3 + $0xc9] sm:$0xff] %vm5035_vm10, %v4969_v23  ;;  %v9810_v54 = vmul.f32 -1.442695, %v13542_v37  ;;  %v5140_v23 = vld [vmem:[#allocation3 + $0xc1] sm:$0xff] }
 0x3ef   : > { %v14049_v51 = vpack.c.bf16 %v5081_v52, %v5080_v2  ;;  %v5084_v62 = vld [vmem:[#allocation3 + $0xc0] sm:$0xff] }
 0x3f0   : > { %10839 = vmatprep.mubr.msk.bf16.mxu1 %vm5205_vm9, %v14047_v43  ;;  %11526 = vpow2.f32 %v9810_v54 }
 0x3f1   : > { %10879 = vmatprep.mubr.msk.bf16.mxu0 %vm5205_vm9, %v14049_v51  ;;  %v5139_v44 = vld [vmem:[#allocation3 + $0xb1] sm:$0xff] }
 0x3f2   : > { %v5083_v11 = vld [vmem:[#allocation3 + $0xb0] sm:$0xff]  ;;  %v4975_v52 = vpop.permute.xlu0 %4974  ;;  %v14058_v38 = vpack.c.bf16 %v5139_v44, %v5138_v4  ;;  %v9811_v4 = vmul.f32 -1.442695, %v13559_v36 }
 0x3f3   : > { %v14060_v2 = vpack.c.bf16 %v5083_v11, %v5082_v40  ;;  %5054 = vst.msk [vmem:[#allocation3 + $0xf1] sm:$0xff] %vm5035_vm10, %v4975_v52  ;;  %v4973_v30 = vpop.permute.xlu1 %4972  ;;  %v5142_v52 = vld [vmem:[#allocation3 + $0xd9] sm:$0xff] }
 0x3f4   : > { %10840 = vmatmul.mubr.msk.bf16.gmra.mxu1 %vm5205_vm9, %v14058_v38  ;;  %5053 = vst.msk [vmem:[#allocation3 + $0xe1] sm:$0xff] %vm5035_vm10, %v4973_v30  ;;  %11528 = vpow2.f32 %v9811_v4 }
 0x3f5   : > { %10880 = vmatmul.mubr.msk.bf16.gmra.mxu0 %vm5205_vm9, %v14060_v2  ;;  %v5141_v56 = vld [vmem:[#allocation3 + $0xc9] sm:$0xff] }
 0x3f6   : > { %v5085_v37 = vld [vmem:[#allocation3 + $0xc8] sm:$0xff]  ;;  %v14068_v44 = vpack.c.bf16 %v5141_v56, %v5140_v23  ;;  %v4979_v30 = vpop.permute.xlu0 %4978  ;;  %v5086_v23 = vld [vmem:[#allocation3 + $0xd8] sm:$0xff] }
 0x3f7   : > { %v14070_v40 = vpack.c.bf16 %v5085_v37, %v5084_v62  ;;  %v4977_v11 = vpop.permute.xlu1 %4976  ;;  %5056 = vst.msk [vmem:[#allocation3 + $0x109] sm:$0xff] %vm5035_vm10, %v4979_v30 }
 0x3f8   : > { %10843 = vmatprep.mubr.msk.bf16.mxu1 %vm5205_vm9, %v14068_v44  ;;  %5055 = vst.msk [vmem:[#allocation3 + $0xf9] sm:$0xff] %vm5035_vm10, %v4977_v11 }
 0x3f9   : > { %10883 = vmatprep.mubr.msk.bf16.mxu0 %vm5205_vm9, %v14070_v40 }
 0x3fa   : > { %v5144_v11 = vld [vmem:[#allocation3 + $0xf1] sm:$0xff] }
 0x3fb   : > { %v5143_v54 = vld [vmem:[#allocation3 + $0xe1] sm:$0xff]  ;;  %v4983_v37 = vpop.permute.xlu0 %4982  ;;  %v5088_v47 = vld [vmem:[#allocation3 + $0xf0] sm:$0xff] }
 0x3fc   : > { %v5087_v62 = vld [vmem:[#allocation3 + $0xe0] sm:$0xff]  ;;  %v14079_v56 = vpack.c.bf16 %v5143_v54, %v5142_v52  ;;  %5058 = vst.msk [vmem:[#allocation3 + $0x121] sm:$0xff] %vm5035_vm10, %v4983_v37 }
 0x3fd   : > { %v14081_v36 = vpack.c.bf16 %v5087_v62, %v5086_v23  ;;  %v11527_v54 = vpop.eup %11526 }
 0x3fe   : > { %10844 = vmatmul.mubr.msk.bf16.gmra.mxu1 %vm5205_vm9, %v14079_v56  ;;  %v3879_v62 = vadd.f32 1.0, %v11527_v54 }
 0x3ff   : > { %10884 = vmatmul.mubr.msk.bf16.gmra.mxu0 %vm5205_vm9, %v14081_v36  ;;  %v5145_v4 = vld [vmem:[#allocation3 + $0xf9] sm:$0xff] }
 0x400   : > { %v5089_v30 = vld [vmem:[#allocation3 + $0xf8] sm:$0xff]  ;;  %v14088_v39 = vpack.c.bf16 %v5145_v4, %v5144_v11  ;;  %v5146_v11 = vld [vmem:[#allocation3 + $0x109] sm:$0xff]  ;;  %11530 = vrcp.f32 %v3879_v62 }
 0x401   : > { %v4981_v25 = vpop.permute.xlu1 %4980  ;;  %v14090_v52 = vpack.c.bf16 %v5089_v30, %v5088_v47  ;;  %v11529_v4 = vpop.eup %11528  ;;  %v5090_v30 = vld [vmem:[#allocation3 + $0x108] sm:$0xff] }
 0x402   : > { %5057 = vst.msk [vmem:[#allocation3 + $0x111] sm:$0xff] %vm5035_vm10, %v4981_v25  ;;  %10847 = vmatprep.mubr.msk.bf16.mxu1 %vm5205_vm9, %v14088_v39  ;;  %v3880_v0 = vadd.f32 1.0, %v11529_v4 }
 0x403   : > { %10887 = vmatprep.mubr.msk.bf16.mxu0 %vm5205_vm9, %v14090_v52  ;;  %v4987_v37 = vpop.permute.xlu0 %4986  ;;  %v5148_v54 = vld [vmem:[#allocation3 + $0x121] sm:$0xff] }
 0x404   : > { %5060 = vst.msk [vmem:[#allocation3 + $0x139] sm:$0xff] %vm5035_vm10, %v4987_v37  ;;  %v5092_v42 = vld [vmem:[#allocation3 + $0x120] sm:$0xff]  ;;  %11532 = vrcp.f32 %v3880_v0 }
 0x405   : > { %v4985_v23 = vpop.permute.xlu1 %4984 }
 0x406   : > { %5059 = vst.msk [vmem:[#allocation3 + $0x129] sm:$0xff] %vm5035_vm10, %v4985_v23 }
 0x407   : > { %v4991_v17 = vpop.permute.xlu0 %4990 }
 0x408   : > { %5062 = vst.msk [vmem:[#allocation3 + $0x151] sm:$0xff] %vm5035_vm10, %v4991_v17 }
 0x409   : > { %v5147_v47 = vld [vmem:[#allocation3 + $0x111] sm:$0xff] }
 0x40a   : > { %v5091_v28 = vld [vmem:[#allocation3 + $0x110] sm:$0xff]  ;;  %v14099_v25 = vpack.c.bf16 %v5147_v47, %v5146_v11  ;;  %v14122_v47 = vld [vmem:[%s16592_s3 + $0xb8] sm:$0xff]  }
 0x40b   : > { %v14101_v13 = vpack.c.bf16 %v5091_v28, %v5090_v30  ;;  %v4989_v23 = vpop.permute.xlu1 %4988  ;;  %v5150_v4 = vld [vmem:[#allocation3 + $0x139] sm:$0xff]  ;;  %11019 = vmatprep.subr.bf16.mxu0 %v14122_v47 }
 0x40c   : > { %10848 = vmatmul.mubr.msk.bf16.gmra.mxu1 %vm5205_vm9, %v14099_v25  ;;  %5061 = vst.msk [vmem:[#allocation3 + $0x141] sm:$0xff] %vm5035_vm10, %v4989_v23 }
 0x40d   : > { %10888 = vmatmul.mubr.msk.bf16.gmra.mxu0 %vm5205_vm9, %v14101_v13  ;;  %v5149_v37 = vld [vmem:[#allocation3 + $0x129] sm:$0xff]  ;;  %v4995_v11 = vpop.permute.xlu0 %4994  ;;  %v14129_v23 = vpop.eup %11530 }
 0x40e   : > { %v5093_v20 = vld [vmem:[#allocation3 + $0x128] sm:$0xff]  ;;  %v14109_v62 = vpack.c.bf16 %v5149_v37, %v5148_v54  ;;  %5064 = vst.msk [vmem:[#allocation3 + $0x169] sm:$0xff] %vm5035_vm10, %v4995_v11  ;;  %16855 = vst [vmem:[#allocation78_spill] sm:$0xff] %v14129_v23 }
 0x40f   : > { %v14111_v28 = vpack.c.bf16 %v5093_v20, %v5092_v42  ;;  %v4993_v17 = vpop.permute.xlu1 %4992  ;;  %v5094_v20 = vld [vmem:[#allocation3 + $0x138] sm:$0xff] }
 0x410   : > { %16853 = vst [vmem:[#allocation76_spill] sm:$0xff] %v14109_v62  ;;  %10851 = vmatprep.mubr.msk.bf16.mxu1 %vm5205_vm9, %v14109_v62  ;;  %5063 = vst.msk [vmem:[#allocation3 + $0x159] sm:$0xff] %vm5035_vm10, %v4993_v17  ;;  %v5152_v11 = vld [vmem:[#allocation3 + $0x151] sm:$0xff] }
 0x411   : > { %10891 = vmatprep.mubr.msk.bf16.mxu0 %vm5205_vm9, %v14111_v28  ;;  %v4550_v37 = vpop.permute.xlu0 %4549  ;;  %v14149_v63 = vpop.eup %11532  ;;  %v3985_v62 = vld [vmem:[#allocation4 + $0x40] sm:$0xff] }
 0x412   : > { %v14132_v17 = vmul.f32 %v14129_v23, %v4550_v37  ;;  %v3981_v23 = vld [vmem:[#allocation4 + $0x20] sm:$0xff]  ;;  %16858 = vst [vmem:[#allocation81_spill] sm:$0xff] %v14149_v63 }
 0x413   : > { %v5151_v42 = vld [vmem:[#allocation3 + $0x141] sm:$0xff] }
 0x414   : > { %v5095_v0 = vld [vmem:[#allocation3 + $0x140] sm:$0xff]  ;;  %v14124_v30 = vpack.c.bf16 %v5151_v42, %v5150_v4  ;;  %16856 = vst [vmem:[#allocation79_spill] sm:$0xff] %v14132_v17  ;;  %v4997_v34 = vpop.permute.xlu1 %4996  ;;  %v5096_v42 = vld [vmem:[#allocation3 + $0x150] sm:$0xff]  ;;  %4998 = vrot.lane.b32.xlu0 %v14132_v17, %s11768_s26 }
 0x415   : > { %v14126_v54 = vpack.c.bf16 %v5095_v0, %v5094_v20  ;;  %5065 = vst.msk [vmem:[#allocation3 + $0x171] sm:$0xff] %vm5035_vm10, %v4997_v34  ;;  %v3983_v34 = vld [vmem:[#allocation4 + $0x30] sm:$0xff]  ;;  %v5098_v17 = vld [vmem:[#allocation3 + $0x168] sm:$0xff] }
 0x416   : > { %16854 = vst [vmem:[#allocation77_spill] sm:$0xff] %v14124_v30  ;;  %10852 = vmatmul.mubr.msk.bf16.gmra.mxu1 %vm5205_vm9, %v14124_v30 }
 0x417   : > { %10892 = vmatmul.mubr.msk.bf16.gmra.mxu0 %vm5205_vm9, %v14126_v54  ;;  %v5153_v4 = vld [vmem:[#allocation3 + $0x159] sm:$0xff] }
 0x418   : > { %v5097_v20 = vld [vmem:[#allocation3 + $0x158] sm:$0xff]  ;;  %v14141_v0 = vpack.c.bf16 %v5153_v4, %v5152_v11  ;;  %v4552_v6 = vpop.permute.xlu1 %4551  ;;  %4049 = vrot.lane.b32.xlu0 %v3981_v23, %s11767_s27  ;;  %v5648_v11 = vld [vmem:[#allocation3 + $0x2] sm:$0xff]  ;;  %v5649_v4 = vld [vmem:[#allocation3 + $0xa] sm:$0xff] }
 0x419   : > { %v14143_v37 = vpack.c.bf16 %v5097_v20, %v5096_v42  ;;  %v14152_v3 = vmul.f32 %v14149_v63, %v4552_v6  ;;  %v5154_v42 = vld [vmem:[#allocation3 + $0x169] sm:$0xff]  ;;  %v3982_v6 = vld [vmem:[#allocation4 + $0x28] sm:$0xff]  ;;  %v5680_v63 = vpack.c.bf16 %v5649_v4, %v5648_v11 }
 0x41a   : > { %16857 = vst [vmem:[#allocation80_spill] sm:$0xff] %v14141_v0  ;;  %10855 = vmatprep.mubr.msk.bf16.mxu1 %vm5205_vm9, %v14141_v0  ;;  %v3984_v23 = vld [vmem:[#allocation4 + $0x38] sm:$0xff]  ;;  %v5652_v11 = vld [vmem:[#allocation3 + $0x32] sm:$0xff]  ;;  %v5653_v4 = vld [vmem:[#allocation3 + $0x3a] sm:$0xff] }
 0x41b   : > { %10895 = vmatprep.mubr.msk.bf16.mxu0 %vm5205_vm9, %v14143_v37  ;;  %16859 = vst [vmem:[#allocation82_spill] sm:$0xff] %v14152_v3  ;;  %5000 = vrot.lane.b32.xlu1 %v14152_v3, %s11768_s26 }
 0x41c   : > { %v5155_v20 = vld [vmem:[#allocation3 + $0x171] sm:$0xff]  ;;  %4053 = vrot.lane.b32.xlu0 %v3983_v34, %s11767_s27  ;;  %v5651_v34 = vld [vmem:[#allocation3 + $0x22] sm:$0xff] }
 0x41d   : > { %v5099_v0 = vld [vmem:[#allocation3 + $0x170] sm:$0xff]  ;;  %v14158_v30 = vpack.c.bf16 %v5155_v20, %v5154_v42  ;;  %v3986_v20 = vld [vmem:[#allocation4 + $0x48] sm:$0xff] }
 0x41e   : > { %v14160_v31 = vpack.c.bf16 %v5099_v0, %v5098_v17  ;;  %v3987_v17 = vld [vmem:[#allocation4 + $0x50] sm:$0xff] }
 0x41f   : > { %10856 = vmatmul.mubr.msk.bf16.gmra.mxu1 %vm5205_vm9, %v14158_v30  ;;  %4051 = vrot.lane.b32.xlu1 %v3982_v6, %s11767_s27  ;;  %v5650_v0 = vld [vmem:[#allocation3 + $0x1a] sm:$0xff]  ;;  %v14175_v6 = vpack.c.bf16 %v5653_v4, %v5652_v11  ;;  %v5657_v11 = vld [vmem:[#allocation3 + $0x6a] sm:$0xff] }
 0x420   : > { %10896 = vmatmul.mubr.msk.bf16.gmra.mxu0 %vm5205_vm9, %v14160_v31  ;;  %4057 = vrot.lane.b32.xlu0 %v3985_v62, %s11767_s27  ;;  %v14173_v42 = vpack.c.bf16 %v5651_v34, %v5650_v0  ;;  %v11325_v62 = vld [vmem:[%s16592_s3 + $0xb0] sm:$0xff]   ;;  %v5655_v0 = vld [vmem:[#allocation3 + $0x52] sm:$0xff] }
 0x421   : > { %10947 = vmatprep.mubr.msk.bf16.mxu0 %vm5205_vm9, %v13977_v21  ;;  %10907 = vmatprep.mubr.msk.bf16.mxu1 %vm5205_vm9, %v5680_v63  ;;  %v3989_v21 = vld [vmem:[#allocation4 + $0x60] sm:$0xff]  ;;  %v11321_v63 = vld [vmem:[%s16592_s3 + $0x90] sm:$0xff]  }
 0x422   : > { %v5656_v34 = vld [vmem:[#allocation3 + $0x62] sm:$0xff] }
 0x423   : > { %4055 = vrot.lane.b32.xlu1 %v3984_v23, %s11767_s27  ;;  %v3988_v23 = vld [vmem:[#allocation4 + $0x58] sm:$0xff] }
 0x424   : > { %4061 = vrot.lane.b32.xlu0 %v3987_v17, %s11767_s27  ;;  %v5654_v17 = vld [vmem:[#allocation3 + $0x4a] sm:$0xff] }
 0x425   : > { %v14197_v4 = vpack.c.bf16 %v5655_v0, %v5654_v17  ;;  %v5659_v17 = vld [vmem:[#allocation3 + $0x82] sm:$0xff]  ;;  %v5660_v0 = vld [vmem:[#allocation3 + $0x92] sm:$0xff] }
 0x427   : > { %10908 = vmatmul.mubr.msk.bf16.vlgmr.msra.gmra.mxu1 %vm5205_vm9, %v14173_v42  ;;  %4059 = vrot.lane.b32.xlu1 %v3986_v20, %s11767_s27  ;;  %v14199_v20 = vpack.c.bf16 %v5657_v11, %v5656_v34  ;;  %v5661_v34 = vld [vmem:[#allocation3 + $0x9a] sm:$0xff] }
 0x428   : > { %10948 = vmatmul.mubr.msk.bf16.vlgmr.msra.gmra.mxu0 %vm5205_vm9, %v13992_v29  ;;  %10911 = vmatprep.mubr.msk.bf16.mxu1 %vm5205_vm9, %v14175_v6  ;;  %v3991_v29 = vld [vmem:[#allocation4 + $0x70] sm:$0xff]  ;;  %v3994_v11 = vld [vmem:[#allocation4 + $0x88] sm:$0xff] }
 0x429   : > { %10951 = vmatprep.mubr.msk.bf16.mxu0 %vm5205_vm9, %v14007_v8  ;;  %4065 = vrot.lane.b32.xlu0 %v3989_v21, %s11767_s27  ;;  %v3990_v8 = vld [vmem:[#allocation4 + $0x68] sm:$0xff]  ;;  %v3993_v21 = vld [vmem:[#allocation4 + $0x80] sm:$0xff] }
 0x42a   : > { %10980 = vmatpush3.bf16.msra.mxu1 %v14027_v49  ;;  %11020 = vmatpush3.bf16.msra.mxu0 %v14122_v47  ;;  %v11322_v49 = vld [vmem:[%s16592_s3 + $0x88] sm:$0xff]  }
 0x42b   : > { %10981 = vmatprep.subr.bf16.mxu1 %v11321_v63  ;;  %11021 = vmatprep.subr.bf16.mxu0 %v11325_v62  ;;  %v11327_v47 = vld [vmem:[%s16592_s3 + $0xa8] sm:$0xff]  }
 0x42c   : > { %4063 = vrot.lane.b32.xlu1 %v3988_v23, %s11767_s27  ;;  %v11329_v23 = vld [vmem:[%s16592_s3 + $0xa0] sm:$0xff]  }
 0x42d   : > { %4069 = vrot.lane.b32.xlu0 %v3991_v29, %s11767_s27  ;;  %v5658_v29 = vld [vmem:[#allocation3 + $0x7a] sm:$0xff] }
 0x42e   : > { %10982 = vmatpush3.bf16.msra.mxu1 %v11321_v63  ;;  %11022 = vmatpush3.bf16.msra.mxu0 %v11325_v62  ;;  %v11323_v63 = vld [vmem:[%s16592_s3 + $0x80] sm:$0xff]   ;;  %v3992_v62 = vld [vmem:[#allocation4 + $0x78] sm:$0xff] }
 0x42f   : > { %10912 = vmatmul.mubr.msk.bf16.gmra.mxu1 %vm5205_vm9, %v14197_v4  ;;  %10983 = vmatprep.subr.bf16.mxu1 %v11322_v49 }
 0x430   : > { %10952 = vmatmul.mubr.msk.bf16.gmra.mxu0 %vm5205_vm9, %v14022_v24  ;;  %4067 = vrot.lane.b32.xlu1 %v3990_v8, %s11767_s27  ;;  %v3995_v24 = vld [vmem:[#allocation4 + $0x90] sm:$0xff]  ;;  %v14227_v8 = vpack.c.bf16 %v5661_v34, %v5660_v0  ;;  %v3998_v34 = vld [vmem:[#allocation4 + $0xa8] sm:$0xff] }
 0x431   : > { %10915 = vmatprep.mubr.msk.bf16.mxu1 %vm5205_vm9, %v14199_v20  ;;  %10955 = vmatprep.mubr.msk.bf16.mxu0 %vm5205_vm9, %v14039_v14  ;;  %v14225_v14 = vpack.c.bf16 %v5659_v17, %v5658_v29  ;;  %v5663_v29 = vld [vmem:[#allocation3 + $0xb2] sm:$0xff]  ;;  %v5665_v17 = vld [vmem:[#allocation3 + $0xca] sm:$0xff] }
 0x432   : > { %4073 = vrot.lane.b32.xlu0 %v3993_v21, %s11767_s27  ;;  %11023 = vmatprep.subr.bf16.mxu0 %v11327_v47  ;;  %v3997_v21 = vld [vmem:[#allocation4 + $0xa0] sm:$0xff] }
 0x433   : > { %10984 = vmatpush3.bf16.msra.mxu1 %v11322_v49  ;;  %11024 = vmatpush3.bf16.msra.mxu0 %v11327_v47  ;;  %v14236_v49 = vld [vmem:[%s16592_s3 + $0xd8] sm:$0xff]  }
 0x434   : > { %4071 = vrot.lane.b32.xlu1 %v3992_v62, %s11767_s27  ;;  %10985 = vmatprep.subr.bf16.mxu1 %v11323_v63  ;;  %v3996_v47 = vld [vmem:[#allocation4 + $0x98] sm:$0xff]  ;;  %v3999_v62 = vld [vmem:[#allocation4 + $0xb0] sm:$0xff] }
 0x435   : > { %11025 = vmatprep.subr.bf16.mxu0 %v11329_v23 }
 0x436   : > { %4077 = vrot.lane.b32.xlu0 %v3995_v24, %s11767_s27  ;;  %v5662_v24 = vld [vmem:[#allocation3 + $0xaa] sm:$0xff] }
 0x437   : > { %10916 = vmatmul.mubr.msk.bf16.gmra.mxu1 %vm5205_vm9, %v14225_v14  ;;  %11026 = vmatpush3.bf16.msra.mxu0 %v11329_v23  ;;  %v14247_v0 = vpack.c.bf16 %v5663_v29, %v5662_v24  ;;  %v4003_v23 = vld [vmem:[#allocation4 + $0xd0] sm:$0xff]  ;;  %v4002_v29 = vld [vmem:[#allocation4 + $0xc8] sm:$0xff] }
 0x438   : > { %10956 = vmatmul.mubr.msk.bf16.gmra.mxu0 %vm5205_vm9, %v14049_v51  ;;  %4075 = vrot.lane.b32.xlu1 %v3994_v11, %s11767_s27  ;;  %v5664_v51 = vld [vmem:[#allocation3 + $0xc2] sm:$0xff]  ;;  %v4001_v11 = vld [vmem:[#allocation4 + $0xc0] sm:$0xff]  ;;  %v5669_v24 = vld [vmem:[#allocation3 + $0xfa] sm:$0xff] }
 0x439   : > { %10919 = vmatprep.mubr.msk.bf16.mxu1 %vm5205_vm9, %v14227_v8  ;;  %10959 = vmatprep.mubr.msk.bf16.mxu0 %vm5205_vm9, %v14060_v2  ;;  %v14249_v2 = vpack.c.bf16 %v5665_v17, %v5664_v51  ;;  %v4005_v17 = vld [vmem:[#allocation4 + $0xe0] sm:$0xff] }
 0x43a   : > { %4081 = vrot.lane.b32.xlu0 %v3997_v21, %s11767_s27  ;;  %10986 = vmatpush3.bf16.msra.mxu1 %v11323_v63  ;;  %v4000_v63 = vld [vmem:[#allocation4 + $0xb8] sm:$0xff]  ;;  %v5666_v21 = vld [vmem:[#allocation3 + $0xda] sm:$0xff] }
 0x43b   : > { %11059 = vmatprep.subr.bf16.mxu1 %v14236_v49 }
 0x43c   : > { %4079 = vrot.lane.b32.xlu1 %v3996_v47, %s11767_s27  ;;  %v5667_v47 = vld [vmem:[#allocation3 + $0xe2] sm:$0xff] }
 0x43e   : > { %4085 = vrot.lane.b32.xlu0 %v3999_v62, %s11767_s27  ;;  %v5668_v62 = vld [vmem:[#allocation3 + $0xf2] sm:$0xff] }
 0x43f   : > { %10920 = vmatmul.mubr.msk.bf16.gmra.mxu1 %vm5205_vm9, %v14247_v0  ;;  %v14265_v51 = vpack.c.bf16 %v5669_v24, %v5668_v62  ;;  %v4008_v24 = vld [vmem:[#allocation4 + $0xf8] sm:$0xff] }
 0x440   : > { %10960 = vmatmul.mubr.msk.bf16.gmra.mxu0 %vm5205_vm9, %v14070_v40  ;;  %4083 = vrot.lane.b32.xlu1 %v3998_v34, %s11767_s27  ;;  %v14263_v40 = vpack.c.bf16 %v5667_v47, %v5666_v21  ;;  %v4007_v34 = vld [vmem:[#allocation4 + $0xf0] sm:$0xff]  ;;  %v5673_v21 = vld [vmem:[#allocation3 + $0x12a] sm:$0xff]  ;;  %v4006_v47 = vld [vmem:[#allocation4 + $0xe8] sm:$0xff] }
 0x441   : > { %10923 = vmatprep.mubr.msk.bf16.mxu1 %vm5205_vm9, %v14249_v2  ;;  %10963 = vmatprep.mubr.msk.bf16.mxu0 %vm5205_vm9, %v14081_v36  ;;  %v4004_v36 = vld [vmem:[#allocation4 + $0xd8] sm:$0xff] }
 0x442   : > { %4089 = vrot.lane.b32.xlu0 %v4001_v11, %s11767_s27  ;;  %v5670_v11 = vld [vmem:[#allocation3 + $0x10a] sm:$0xff] }
 0x444   : > { %4087 = vrot.lane.b32.xlu1 %v4000_v63, %s11767_s27  ;;  %v5671_v63 = vld [vmem:[#allocation3 + $0x112] sm:$0xff] }
 0x446   : > { %4093 = vrot.lane.b32.xlu0 %v4003_v23, %s11767_s27  ;;  %v5672_v23 = vld [vmem:[#allocation3 + $0x122] sm:$0xff] }
 0x447   : > { %10924 = vmatmul.mubr.msk.bf16.gmra.mxu1 %vm5205_vm9, %v14263_v40  ;;  %v14281_v62 = vpack.c.bf16 %v5673_v21, %v5672_v23  ;;  %v16865_v23 = vld [vmem:[#allocation17_spill] sm:$0xff] }
 0x448   : > { %10964 = vmatmul.mubr.msk.bf16.gmra.mxu0 %vm5205_vm9, %v14090_v52  ;;  %4091 = vrot.lane.b32.xlu1 %v4002_v29, %s11767_s27  ;;  %v14279_v52 = vpack.c.bf16 %v5671_v63, %v5670_v11  ;;  %v5674_v29 = vld [vmem:[#allocation3 + $0x13a] sm:$0xff] }
 0x449   : > { %10927 = vmatprep.mubr.msk.bf16.mxu1 %vm5205_vm9, %v14265_v51  ;;  %10967 = vmatprep.mubr.msk.bf16.mxu0 %vm5205_vm9, %v14101_v13  ;;  %v14290_v13 = vld [vmem:[%s16592_s3 + $0xf8] sm:$0xff]   ;;  %v11328_v63 = vld [vmem:[%s16592_s3 + $0xd0] sm:$0xff]  }
 0x44a   : > { %4097 = vrot.lane.b32.xlu0 %v4005_v17, %s11767_s27  ;;  %v5675_v17 = vld [vmem:[#allocation3 + $0x142] sm:$0xff]  ;;  %11099 = vmatprep.subr.bf16.mxu0 %v14290_v13 }
 0x44b   : > { %v16866_v21 = vld [vmem:[#allocation25_spill] sm:$0xff] }
 0x44c   : > { %4095 = vrot.lane.b32.xlu1 %v4004_v36, %s11767_s27  ;;  %v5677_v36 = vld [vmem:[#allocation3 + $0x15a] sm:$0xff] }
 0x44e   : > { %4101 = vrot.lane.b32.xlu0 %v4007_v34, %s11767_s27  ;;  %v14303_v34 = vpack.c.bf16 %v5675_v17, %v5674_v29 }
 0x44f   : > { %10928 = vmatmul.mubr.msk.bf16.gmra.mxu1 %vm5205_vm9, %v14279_v52 }
 0x450   : > { %10968 = vmatmul.mubr.msk.bf16.gmra.mxu0 %vm5205_vm9, %v14111_v28  ;;  %4099 = vrot.lane.b32.xlu1 %v4006_v47, %s11767_s27  ;;  %v5676_v28 = vld [vmem:[#allocation3 + $0x152] sm:$0xff] }
 0x451   : > { %10931 = vmatprep.mubr.msk.bf16.mxu1 %vm5205_vm9, %v14281_v62  ;;  %10971 = vmatprep.mubr.msk.bf16.mxu0 %vm5205_vm9, %v14126_v54  ;;  %v14305_v11 = vpack.c.bf16 %v5677_v36, %v5676_v28  ;;  %v16860_v54 = vld [vmem:[#allocation35_spill] sm:$0xff] }
 0x452   : > { %4201 = vrot.lane.b32.xlu0 %v13383_v22, %s11768_s26  ;;  %v5678_v22 = vld [vmem:[#allocation3 + $0x16a] sm:$0xff] }
 0x454   : > { %4103 = vrot.lane.b32.xlu1 %v4008_v24, %s11767_s27 }
 0x456   : > { %4205 = vrot.lane.b32.xlu0 %v13392_v41, %s11768_s26  ;;  %v5679_v41 = vld [vmem:[#allocation3 + $0x172] sm:$0xff] }
 0x457   : > { %10932 = vmatmul.mubr.msk.bf16.gmra.mxu1 %vm5205_vm9, %v14303_v34 }
 0x458   : > { %10972 = vmatmul.mubr.msk.bf16.gmra.mxu0 %vm5205_vm9, %v14143_v37  ;;  %4203 = vrot.lane.b32.xlu1 %v13398_v46, %s11768_s26  ;;  %v14323_v37 = vpack.c.bf16 %v5679_v41, %v5678_v22  ;;  %v16861_v46 = vld [vmem:[#allocation36_spill] sm:$0xff] }
 0x459   : > { %10935 = vmatprep.mubr.msk.bf16.mxu1 %vm5205_vm9, %v14305_v11  ;;  %10975 = vmatprep.mubr.msk.bf16.mxu0 %vm5205_vm9, %v14160_v31  ;;  %v16863_v31 = vld [vmem:[#allocation37_spill] sm:$0xff]  ;;  %v16880_v41 = vld [vmem:[#allocation80_spill] sm:$0xff] }
 0x45a   : > { %4209 = vrot.lane.b32.xlu0 %v13414_v48, %s11768_s26  ;;  %v16862_v48 = vld [vmem:[#allocation38_spill] sm:$0xff] }
 0x45c   : > { %4207 = vrot.lane.b32.xlu1 %v13408_v26, %s11768_s26  ;;  %v16864_v26 = vld [vmem:[#allocation11_spill] sm:$0xff] }
 0x45e   : > { %4213 = vrot.lane.b32.xlu0 %v16860_v54, %s11768_s26 }
 0x45f   : > { %10936 = vmatmul.mubr.msk.bf16.gmra.mxu1 %vm5205_vm9, %v14323_v37 }
 0x460   : > { %4211 = vrot.lane.b32.xlu1 %v16861_v46, %s11768_s26  ;;  %10987 = vmatprep.mubr.msk.bf16.mxu1 %vm5205_vm9, %v13975_v1  ;;  %v11330_v1 = vld [vmem:[%s16592_s3 + $0xc8] sm:$0xff]  }
 0x462   : > { %4217 = vrot.lane.b32.xlu0 %v16862_v48, %s11768_s26 }
 0x464   : > { %4215 = vrot.lane.b32.xlu1 %v16863_v31, %s11768_s26 }
 0x466   : > { %4221 = vrot.lane.b32.xlu0 %v16864_v26, %s11768_s26 }
 0x467   : > { %10988 = vmatmul.mubr.msk.bf16.vlgmr.msra.gmra.mxu1 %vm5205_vm9, %v13990_v45  ;;  %v11331_v45 = vld [vmem:[%s16592_s3 + $0xc0] sm:$0xff]  }
 0x468   : > { %4219 = vrot.lane.b32.xlu1 %v16865_v23, %s11768_s26  ;;  %10991 = vmatprep.mubr.msk.bf16.mxu1 %vm5205_vm9, %v14005_v19 }
 0x469   : > { %11060 = vmatpush3.bf16.msra.mxu1 %v14236_v49 }
 0x46a   : > { %4225 = vrot.lane.b32.xlu0 %v13530_v35, %s11768_s26  ;;  %11061 = vmatprep.subr.bf16.mxu1 %v11328_v63  ;;  %v14370_v35 = vld [vmem:[%s16592_s3 + $0x118] sm:$0xff]  }
 0x46c   : > { %4223 = vrot.lane.b32.xlu1 %v16866_v21, %s11768_s26  ;;  %v6938_v21 = vld [vmem:[#allocation3 + $0x38] sm:$0xff] }
 0x46d   : > { %11062 = vmatpush3.bf16.msra.mxu1 %v11328_v63 }
 0x46e   : > { %4229 = vrot.lane.b32.xlu0 %v13544_v55, %s11768_s26  ;;  %11063 = vmatprep.subr.bf16.mxu1 %v11330_v1  ;;  %v14387_v55 = vpop.permute.xlu0 %4041 }
 0x46f   : > { %10992 = vmatmul.mubr.msk.bf16.gmra.mxu1 %vm5205_vm9, %v14020_v27  ;;  %16867 = vst [vmem:[#allocation35_spill] sm:$0xff] %v14387_v55 }
 0x470   : > { %4227 = vrot.lane.b32.xlu1 %v13549_v32, %s11768_s26  ;;  %10995 = vmatprep.mubr.msk.bf16.mxu1 %vm5205_vm9, %v14037_v33  ;;  %v16875_v33 = vld [vmem:[#allocation77_spill] sm:$0xff] }
 0x471   : > { %11064 = vmatpush3.bf16.msra.mxu1 %v11330_v1 }
 0x472   : > { %4233 = vrot.lane.b32.xlu0 %v13566_v60, %s11768_s26  ;;  %11065 = vmatprep.subr.bf16.mxu1 %v11331_v45  ;;  %v14399_v32 = vpop.permute.xlu0 %4045 }
 0x473   : > { %16868 = vst [vmem:[#allocation36_spill] sm:$0xff] %v14399_v32 }
 0x474   : > { %4231 = vrot.lane.b32.xlu1 %v13564_v15, %s11768_s26  ;;  %v14401_v15 = vpop.permute.xlu1 %4043 }
 0x475   : > { %11066 = vmatpush3.bf16.msra.mxu1 %v11331_v45  ;;  %16869 = vst [vmem:[#allocation38_spill] sm:$0xff] %v14401_v15  ;;  %v7264_v15 = vld [vmem:[#allocation3 + $0x69] sm:$0xff] }
 0x476   : > { %4237 = vrot.lane.b32.xlu0 %v13582_v53, %s11768_s26  ;;  %11139 = vmatprep.subr.bf16.mxu1 %v14370_v35 }
 0x477   : > { %10996 = vmatmul.mubr.msk.bf16.gmra.mxu1 %vm5205_vm9, %v14047_v43 }
 0x478   : > { %4235 = vrot.lane.b32.xlu1 %v13590_v59, %s11768_s26  ;;  %10999 = vmatprep.mubr.msk.bf16.mxu1 %vm5205_vm9, %v14058_v38  ;;  %v14414_v53 = vpop.permute.xlu1 %4047 }
 0x479   : > { %16870 = vst [vmem:[#allocation37_spill] sm:$0xff] %v14414_v53 }
 0x47a   : > { %4241 = vrot.lane.b32.xlu0 %v13619_v7, %s11768_s26 }
 0x47c   : > { %4239 = vrot.lane.b32.xlu1 %v13604_v16, %s11768_s26 }
 0x47e   : > { %4245 = vrot.lane.b32.xlu0 %v13630_v9, %s11768_s26 }
 0x47f   : > { %11000 = vmatmul.mubr.msk.bf16.gmra.mxu1 %vm5205_vm9, %v14068_v44 }
 0x480   : > { %4243 = vrot.lane.b32.xlu1 %v13641_v58, %s11768_s26  ;;  %11003 = vmatprep.mubr.msk.bf16.mxu1 %vm5205_vm9, %v14079_v56 }
 0x482   : > { %4249 = vrot.lane.b32.xlu0 %v13655_v57, %s11768_s26 }
 0x484   : > { %4247 = vrot.lane.b32.xlu1 %v13650_v5, %s11768_s26 }
 0x486   : > { %4253 = vrot.lane.b32.xlu0 %v13661_v50, %s11768_s26  ;;  %v4999_v60 = vpop.permute.xlu0 %4998  ;;  %v16872_v50 = vld [vmem:[#allocation76_spill] sm:$0xff] }
 0x487   : > { %11004 = vmatmul.mubr.msk.bf16.gmra.mxu1 %vm5205_vm9, %v14088_v39  ;;  %5066 = vst.msk [vmem:[#allocation3 + $0x181] sm:$0xff] %vm5035_vm10, %v4999_v60 }
 0x488   : > { %4251 = vrot.lane.b32.xlu1 %v13666_v18, %s11768_s26  ;;  %11007 = vmatprep.mubr.msk.bf16.mxu1 %vm5205_vm9, %v14099_v25  ;;  %v16878_v25 = vld [vmem:[#allocation75_spill] sm:$0xff] }
 0x48a   : > { %4257 = vrot.lane.b32.xlu0 %v13676_v10, %s11768_s26  ;;  %v14418_v59 = vpop.permute.xlu0 %4049 }
 0x48b   : > { %16871 = vst [vmem:[#allocation11_spill] sm:$0xff] %v14418_v59 }
 0x48c   : > { %4255 = vrot.lane.b32.xlu1 %v13671_v61, %s11768_s26  ;;  %v16874_v61 = vld [vmem:[#allocation19_spill] sm:$0xff] }
 0x48d   : > { %v5001_v9 = vpop.permute.xlu1 %5000 }
 0x48e   : > { %4261 = vrot.lane.b32.xlu0 %v13949_v12, %s11768_s26  ;;  %5067 = vst.msk [vmem:[#allocation3 + $0x189] sm:$0xff] %vm5035_vm10, %v5001_v9  ;;  %v14429_v18 = vpop.permute.xlu0 %4053  ;;  %v6000_v47 = vld [vmem:[#allocation3 + $0x180] sm:$0xff] }
 0x48f   : > { %11008 = vmatmul.mubr.msk.bf16.gmra.mxu1 %vm5205_vm9, %v16872_v50  ;;  %16873 = vst [vmem:[#allocation17_spill] sm:$0xff] %v14429_v18  ;;  %v6322_v45 = vld [vmem:[#allocation3 + $0x181] sm:$0xff]  ;;  %v7267_v18 = vld [vmem:[#allocation3 + $0x91] sm:$0xff] }
 0x490   : > { %4259 = vrot.lane.b32.xlu1 %v16874_v61, %s11768_s26  ;;  %11011 = vmatprep.mubr.msk.bf16.mxu1 %vm5205_vm9, %v16875_v33  ;;  %v11335_v61 = vld [vmem:[%s16592_s3 + $0xe8] sm:$0xff]  }
 0x491   : > { %v14441_v43 = vpop.permute.xlu1 %4051 }
 0x492   : > { %16876 = vst [vmem:[#allocation25_spill] sm:$0xff] %v14441_v43  ;;  %v14445_v44 = vpop.permute.xlu0 %4057 }
 0x493   : > { %16877 = vst [vmem:[#allocation76_spill] sm:$0xff] %v14445_v44 }
 0x494   : > { %4263 = vrot.lane.b32.xlu1 %v16878_v25, %s11768_s26 }
 0x495   : > { %v6001_v24 = vld [vmem:[#allocation3 + $0x188] sm:$0xff]  ;;  %v14451_v28 = vpop.permute.xlu1 %4055 }
 0x496   : > { %16879 = vst [vmem:[#allocation19_spill] sm:$0xff] %v14451_v28  ;;  %v14453_v36 = vpack.c.bf16 %v6001_v24, %v6000_v47  ;;  %v14457_v54 = vpop.permute.xlu0 %4061  ;;  %v6323_v23 = vld [vmem:[#allocation3 + $0x189] sm:$0xff]  ;;  %v6941_v47 = vld [vmem:[#allocation3 + $0x60] sm:$0xff] }
 0x497   : > { %v10829_v16 = vpop.f32.mrf.mxu1  ;;  %11012 = vmatmul.mubr.msk.bf16.gmra.mxu1 %vm5205_vm9, %v16880_v41  ;;  %16881 = vst [vmem:[#allocation77_spill] sm:$0xff] %v14457_v54  ;;  %v6339_v60 = vpack.c.bf16 %v6323_v23, %v6322_v45  ;;  %v11336_v41 = vld [vmem:[%s16592_s3 + $0x110] sm:$0xff]   ;;  %v16912_v28 = vld [vmem:[#allocation30_spill] sm:$0xff] }
 0x498   : > { %v10869_v7 = vpop.f32.mrf.mxu0  ;;  %10976 = vmatmul.mubr.msk.bf16.gmra.mxu0 %vm5205_vm9, %v14453_v36  ;;  %11015 = vmatprep.mubr.msk.bf16.mxu1 %vm5205_vm9, %v14158_v30  ;;  %v11333_v30 = vld [vmem:[%s16592_s3 + $0xf0] sm:$0xff]  }
 0x499   : > { %v14424_v58 = vadd.f32 %v10869_v7, %v10829_v16  ;;  %v5288_v5 = vpop.f32.mrf.mxu1  ;;  %11027 = vmatprep.mubr.msk.bf16.mxu0 %vm5205_vm9, %v14173_v42  ;;  %v14469_v63 = vpop.permute.xlu1 %4059  ;;  %v6937_v16 = vld [vmem:[#allocation3 + $0x30] sm:$0xff] }
 0x49a   : > { %v5521_v57 = vpop.f32.mrf.mxu0  ;;  %16882 = vst [vmem:[#allocation75_spill] sm:$0xff] %v14469_v63  ;;  %v6969_v9 = vpack.c.bf16 %v6938_v21, %v6937_v16  ;;  %v11337_v21 = vld [vmem:[%s16592_s3 + $0xe0] sm:$0xff]  }
 0x49b   : > { %v14431_v10 = vadd.f32 %v5521_v57, %v5288_v5  ;;  %v10830_v39 = vpop.f32.mrf.mxu1  ;;  %v14471_v1 = vpop.permute.xlu0 %4065 }
 0x49c   : > { %v10870_v12 = vpop.f32.mrf.mxu0  ;;  %16883 = vst [vmem:[#allocation80_spill] sm:$0xff] %v14471_v1 }
 0x49d   : > { %v14437_v19 = vadd.f32 %v10870_v12, %v10830_v39  ;;  %v14439_v27 = vpop.f32.mrf.mxu1  ;;  %v6940_v39 = vld [vmem:[#allocation3 + $0x50] sm:$0xff] }
 0x49e   : > { %v14443_v38 = vpop.f32.mrf.mxu0  ;;  %v14473_v7 = vpop.permute.xlu1 %4063 }
 0x49f   : > { %v10833_v56 = vpop.f32.mrf.mxu1  ;;  %16884 = vst [vmem:[#allocation83_spill] sm:$0xff] %v14473_v7  ;;  %11016 = vmatmul.mubr.msk.bf16.gmra.mxu1 %vm5205_vm9, %v6339_v60  ;;  %v14479_v42 = vpop.permute.xlu0 %4069  ;;  %v6963_v7 = vld [vmem:[#allocation3 + $0x168] sm:$0xff] }
 0x4a0   : > { %v10873_v49 = vpop.f32.mrf.mxu0  ;;  %16885 = vst [vmem:[#allocation84_spill] sm:$0xff] %v14479_v42  ;;  %11028 = vmatmul.mubr.msk.bf16.vlgmr.msra.gmra.mxu0 %vm5205_vm9, %v14175_v6  ;;  %11067 = vmatprep.mubr.msk.bf16.mxu1 %vm5205_vm9, %v6969_v9  ;;  %v6942_v6 = vld [vmem:[#allocation3 + $0x68] sm:$0xff]  ;;  %v6944_v9 = vld [vmem:[#allocation3 + $0x80] sm:$0xff] }
 0x4a1   : > { %v14449_v29 = vadd.f32 %v10873_v49, %v10833_v56  ;;  %v5304_v17 = vpop.f32.mrf.mxu1  ;;  %11031 = vmatprep.mubr.msk.bf16.mxu0 %vm5205_vm9, %v14197_v4  ;;  %11100 = vmatpush3.bf16.msra.mxu0 %v14290_v13  ;;  %v6939_v56 = vld [vmem:[#allocation3 + $0x48] sm:$0xff]  ;;  %v7260_v42 = vld [vmem:[#allocation3 + $0x39] sm:$0xff] }
 0x4a2   : > { %v5537_v22 = vpop.f32.mrf.mxu0  ;;  %v14491_v50 = vpop.permute.xlu1 %4067  ;;  %11101 = vmatprep.subr.bf16.mxu0 %v11333_v30  ;;  %v6970_v49 = vpack.c.bf16 %v6940_v39, %v6939_v56  ;;  %v6946_v39 = vld [vmem:[#allocation3 + $0x98] sm:$0xff] }
 0x4a3   : > { %v14459_v46 = vadd.f32 %v5537_v22, %v5304_v17  ;;  %v10834_v48 = vpop.f32.mrf.mxu1  ;;  %16886 = vst [vmem:[#allocation85_spill] sm:$0xff] %v14491_v50  ;;  %v6971_v17 = vpack.c.bf16 %v6942_v6, %v6941_v47 }
 0x4a4   : > { %v10874_v31 = vpop.f32.mrf.mxu0  ;;  %v14496_v33 = vpop.permute.xlu0 %4073 }
 0x4a5   : > { %v14467_v26 = vadd.f32 %v10874_v31, %v10834_v48  ;;  %v14481_v5 = vpop.f32.mrf.mxu1  ;;  %16887 = vst [vmem:[#allocation86_spill] sm:$0xff] %v14496_v33  ;;  %11102 = vmatpush3.bf16.msra.mxu0 %v11333_v30  ;;  %v11338_v30 = vld [vmem:[%s16592_s3 + $0x108] sm:$0xff]  }
 0x4a6   : > { %v14486_v57 = vpop.f32.mrf.mxu0  ;;  %v14500_v13 = vpop.permute.xlu1 %4071  ;;  %11103 = vmatprep.subr.bf16.mxu0 %v11335_v61 }
 0x4a7   : > { %16888 = vst [vmem:[#allocation87_spill] sm:$0xff] %v14500_v13  ;;  %11068 = vmatmul.mubr.msk.bf16.vlgmr.msra.gmra.mxu1 %vm5205_vm9, %v6970_v49  ;;  %v11339_v49 = vld [vmem:[%s16592_s3 + $0x100] sm:$0xff]   ;;  %v6959_v13 = vld [vmem:[#allocation3 + $0x138] sm:$0xff] }
 0x4a8   : > { %v14506_v48 = vpop.permute.xlu0 %4077  ;;  %11032 = vmatmul.mubr.msk.bf16.gmra.mxu0 %vm5205_vm9, %v14199_v20  ;;  %11071 = vmatprep.mubr.msk.bf16.mxu1 %vm5205_vm9, %v6971_v17 }
 0x4a9   : > { %16889 = vst [vmem:[#allocation88_spill] sm:$0xff] %v14506_v48  ;;  %11035 = vmatprep.mubr.msk.bf16.mxu0 %vm5205_vm9, %v14225_v14  ;;  %11140 = vmatpush3.bf16.msra.mxu1 %v14370_v35  ;;  %v6943_v14 = vld [vmem:[#allocation3 + $0x78] sm:$0xff]  ;;  %v6945_v35 = vld [vmem:[#allocation3 + $0x90] sm:$0xff] }
 0x4aa   : > { %v14521_v16 = vpop.permute.xlu1 %4075  ;;  %11104 = vmatpush3.bf16.msra.mxu0 %v11335_v61  ;;  %11141 = vmatprep.subr.bf16.mxu1 %v11336_v41  ;;  %v6972_v56 = vpack.c.bf16 %v6944_v9, %v6943_v14  ;;  %v6973_v61 = vpack.c.bf16 %v6946_v39, %v6945_v35  ;;  %v6950_v39 = vld [vmem:[#allocation3 + $0xc8] sm:$0xff] }
 0x4ab   : > { %16890 = vst [vmem:[#allocation89_spill] sm:$0xff] %v14521_v16  ;;  %11105 = vmatprep.subr.bf16.mxu0 %v11337_v21  ;;  %v6949_v16 = vld [vmem:[#allocation3 + $0xc0] sm:$0xff] }
 0x4ac   : > { %v10837_v12 = vpop.f32.mrf.mxu1  ;;  %v14526_v20 = vpop.permute.xlu0 %4081 }
 0x4ad   : > { %v10877_v25 = vpop.f32.mrf.mxu0  ;;  %16891 = vst [vmem:[#allocation90_spill] sm:$0xff] %v14526_v20  ;;  %11142 = vmatpush3.bf16.msra.mxu1 %v11336_v41 }
 0x4ae   : > { %v14498_v24 = vadd.f32 %v10877_v25, %v10837_v12  ;;  %v5320_v4 = vpop.f32.mrf.mxu1  ;;  %v14532_v25 = vpop.permute.xlu1 %4079  ;;  %11106 = vmatpush3.bf16.msra.mxu0 %v11337_v21  ;;  %11143 = vmatprep.subr.bf16.mxu1 %v11338_v30  ;;  %v6948_v21 = vld [vmem:[#allocation3 + $0xb0] sm:$0xff] }
 0x4af   : > { %v5553_v22 = vpop.f32.mrf.mxu0  ;;  %16892 = vst [vmem:[#allocation91_spill] sm:$0xff] %v14532_v25  ;;  %11072 = vmatmul.mubr.msk.bf16.gmra.mxu1 %vm5205_vm9, %v6972_v56  ;;  %v6947_v56 = vld [vmem:[#allocation3 + $0xa8] sm:$0xff] }
 0x4b0   : > { %v14508_v31 = vadd.f32 %v5553_v22, %v5320_v4  ;;  %v10838_v23 = vpop.f32.mrf.mxu1  ;;  %v14538_v47 = vpop.permute.xlu0 %4085  ;;  %11036 = vmatmul.mubr.msk.bf16.gmra.mxu0 %vm5205_vm9, %v14227_v8  ;;  %11075 = vmatprep.mubr.msk.bf16.mxu1 %vm5205_vm9, %v6973_v61  ;;  %v6974_v61 = vpack.c.bf16 %v6948_v21, %v6947_v56 }
 0x4b1   : > { %v10878_v45 = vpop.f32.mrf.mxu0  ;;  %16893 = vst [vmem:[#allocation92_spill] sm:$0xff] %v14538_v47  ;;  %11039 = vmatprep.mubr.msk.bf16.mxu0 %vm5205_vm9, %v14247_v0  ;;  %11144 = vmatpush3.bf16.msra.mxu1 %v11338_v30  ;;  %v6975_v30 = vpack.c.bf16 %v6950_v39, %v6949_v16 }
 0x4b2   : > { %v14518_v60 = vadd.f32 %v10878_v45, %v10838_v23  ;;  %v14528_v6 = vpop.f32.mrf.mxu1  ;;  %v14547_v23 = vpop.permute.xlu1 %4083  ;;  %11145 = vmatprep.subr.bf16.mxu1 %v11339_v49 }
 0x4b3   : > { %v14530_v12 = vpop.f32.mrf.mxu0  ;;  %16894 = vst [vmem:[#allocation93_spill] sm:$0xff] %v14547_v23 }
 0x4b4   : > { %v10841_v4 = vpop.f32.mrf.mxu1  ;;  %v14549_v9 = vpop.permute.xlu0 %4089 }
 0x4b5   : > { %v10881_v17 = vpop.f32.mrf.mxu0  ;;  %16895 = vst [vmem:[#allocation94_spill] sm:$0xff] %v14549_v9  ;;  %11146 = vmatpush3.bf16.msra.mxu1 %v11339_v49 }
 0x4b6   : > { %v14545_v22 = vadd.f32 %v10881_v17, %v10841_v4  ;;  %v5336_v41 = vpop.f32.mrf.mxu1  ;;  %v14555_v4 = vpop.permute.xlu1 %4087 }
 0x4b7   : > { %v5569_v45 = vpop.f32.mrf.mxu0  ;;  %16896 = vst [vmem:[#allocation95_spill] sm:$0xff] %v14555_v4  ;;  %11076 = vmatmul.mubr.msk.bf16.gmra.mxu1 %vm5205_vm9, %v6974_v61  ;;  %v6953_v4 = vld [vmem:[#allocation3 + $0xf0] sm:$0xff] }
 0x4b8   : > { %v14551_v14 = vadd.f32 %v5569_v45, %v5336_v41  ;;  %v10842_v8 = vpop.f32.mrf.mxu1  ;;  %v14560_v23 = vpop.permute.xlu0 %4093  ;;  %11040 = vmatmul.mubr.msk.bf16.gmra.mxu0 %vm5205_vm9, %v14249_v2  ;;  %11079 = vmatprep.mubr.msk.bf16.mxu1 %vm5205_vm9, %v6975_v30  ;;  %v6952_v41 = vld [vmem:[#allocation3 + $0xe0] sm:$0xff]  ;;  %v6954_v45 = vld [vmem:[#allocation3 + $0xf8] sm:$0xff] }
 0x4b9   : > { %v10882_v35 = vpop.f32.mrf.mxu0  ;;  %16897 = vst [vmem:[#allocation96_spill] sm:$0xff] %v14560_v23  ;;  %11043 = vmatprep.mubr.msk.bf16.mxu0 %vm5205_vm9, %v14263_v40  ;;  %v6977_v30 = vpack.c.bf16 %v6954_v45, %v6953_v4  ;;  %v6956_v4 = vld [vmem:[#allocation3 + $0x110] sm:$0xff] }
 0x4ba   : > { %v14553_v0 = vadd.f32 %v10882_v35, %v10842_v8  ;;  %v14557_v17 = vpop.f32.mrf.mxu1  ;;  %v14569_v49 = vpop.permute.xlu1 %4091  ;;  %v6951_v8 = vld [vmem:[#allocation3 + $0xd8] sm:$0xff] }
 0x4bb   : > { %v14562_v9 = vpop.f32.mrf.mxu0  ;;  %16898 = vst [vmem:[#allocation97_spill] sm:$0xff] %v14569_v49  ;;  %v6976_v61 = vpack.c.bf16 %v6952_v41, %v6951_v8 }
 0x4bc   : > { %v14571_v21 = vpop.permute.xlu0 %4097 }
 0x4bd   : > { %16899 = vst [vmem:[#allocation98_spill] sm:$0xff] %v14571_v21 }
 0x4be   : > { %v10845_v16 = vpop.f32.mrf.mxu1  ;;  %v14575_v23 = vpop.permute.xlu1 %4095 }
 0x4bf   : > { %v10885_v39 = vpop.f32.mrf.mxu0  ;;  %16900 = vst [vmem:[#allocation99_spill] sm:$0xff] %v14575_v23  ;;  %11080 = vmatmul.mubr.msk.bf16.gmra.mxu1 %vm5205_vm9, %v6976_v61 }
 0x4c0   : > { %v14573_v56 = vadd.f32 %v10885_v39, %v10845_v16  ;;  %v5352_v35 = vpop.f32.mrf.mxu1  ;;  %v14580_v49 = vpop.permute.xlu0 %4101  ;;  %11044 = vmatmul.mubr.msk.bf16.gmra.mxu0 %vm5205_vm9, %v14265_v51  ;;  %11083 = vmatprep.mubr.msk.bf16.mxu1 %vm5205_vm9, %v6977_v30  ;;  %v6958_v39 = vld [vmem:[#allocation3 + $0x128] sm:$0xff] }
 0x4c1   : > { %v5585_v2 = vpop.f32.mrf.mxu0  ;;  %16901 = vst [vmem:[#allocation100_spill] sm:$0xff] %v14580_v49  ;;  %11047 = vmatprep.mubr.msk.bf16.mxu0 %vm5205_vm9, %v14279_v52  ;;  %v6957_v49 = vld [vmem:[#allocation3 + $0x120] sm:$0xff] }
 0x4c2   : > { %v14577_v20 = vadd.f32 %v5585_v2, %v5352_v35  ;;  %v10846_v40 = vpop.f32.mrf.mxu1  ;;  %v14589_v41 = vpop.permute.xlu1 %4099  ;;  %v16903_v35 = vld [vmem:[#allocation26_spill] sm:$0xff] }
 0x4c3   : > { %v10886_v21 = vpop.f32.mrf.mxu0  ;;  %16902 = vst [vmem:[#allocation101_spill] sm:$0xff] %v14589_v41  ;;  %v6955_v2 = vld [vmem:[#allocation3 + $0x108] sm:$0xff] }
 0x4c4   : > { %v14585_v16 = vadd.f32 %v10886_v21, %v10846_v40  ;;  %v4202_v45 = vpop.permute.xlu0 %4201  ;;  %v14591_v8 = vpop.f32.mrf.mxu1  ;;  %v6978_v51 = vpack.c.bf16 %v6956_v4, %v6955_v2  ;;  %v6979_v21 = vpack.c.bf16 %v6958_v39, %v6957_v49  ;;  %v6960_v49 = vld [vmem:[#allocation3 + $0x140] sm:$0xff] }
 0x4c5   : > { %v4297_v61 = vmul.f32 %v16903_v35, %v4202_v45  ;;  %v14594_v23 = vpop.f32.mrf.mxu0  ;;  %v16905_v45 = vld [vmem:[#allocation10_spill] sm:$0xff]  ;;  %v16920_v35 = vld [vmem:[#allocation45_spill] sm:$0xff] }
 0x4c6   : > { %v14596_v30 = vpop.permute.xlu1 %4103 }
 0x4c7   : > { %16904 = vst [vmem:[#allocation102_spill] sm:$0xff] %v14596_v30  ;;  %4361 = vrot.lane.b32.xlu0 %v4297_v61, %s11767_s27  ;;  %11084 = vmatmul.mubr.msk.bf16.gmra.mxu1 %vm5205_vm9, %v6978_v51  ;;  %v16906_v51 = vld [vmem:[#allocation13_spill] sm:$0xff] }
 0x4c8   : > { %v4206_v52 = vpop.permute.xlu0 %4205  ;;  %11048 = vmatmul.mubr.msk.bf16.gmra.mxu0 %vm5205_vm9, %v14281_v62  ;;  %11087 = vmatprep.mubr.msk.bf16.mxu1 %vm5205_vm9, %v6979_v21  ;;  %v6962_v62 = vld [vmem:[#allocation3 + $0x158] sm:$0xff] }
 0x4c9   : > { %v4299_v41 = vmul.f32 %v16905_v45, %v4206_v52  ;;  %11051 = vmatprep.mubr.msk.bf16.mxu0 %vm5205_vm9, %v14303_v34  ;;  %v16907_v52 = vld [vmem:[#allocation28_spill] sm:$0xff]  ;;  %v6980_v34 = vpack.c.bf16 %v6960_v49, %v6959_v13  ;;  %v16909_v13 = vld [vmem:[#allocation15_spill] sm:$0xff] }
 0x4ca   : > { %v4204_v61 = vpop.permute.xlu1 %4203  ;;  %v16910_v49 = vld [vmem:[#allocation20_spill] sm:$0xff] }
 0x4cb   : > { %4365 = vrot.lane.b32.xlu0 %v4299_v41, %s11767_s27  ;;  %v4298_v30 = vmul.f32 %v16906_v51, %v4204_v61  ;;  %v16908_v61 = vld [vmem:[#allocation21_spill] sm:$0xff] }
 0x4cc   : > { %v10849_v40 = vpop.f32.mrf.mxu1  ;;  %v4210_v47 = vpop.permute.xlu0 %4209 }
 0x4cd   : > { %v10889_v25 = vpop.f32.mrf.mxu0  ;;  %v4301_v33 = vmul.f32 %v16907_v52, %v4210_v47  ;;  %4363 = vrot.lane.b32.xlu1 %v4298_v30, %s11767_s27  ;;  %v6964_v30 = vld [vmem:[#allocation3 + $0x170] sm:$0xff]  ;;  %v7263_v52 = vld [vmem:[#allocation3 + $0x61] sm:$0xff] }
 0x4ce   : > { %v14606_v4 = vadd.f32 %v10889_v25, %v10849_v40  ;;  %v5368_v2 = vpop.f32.mrf.mxu1  ;;  %v6961_v25 = vld [vmem:[#allocation3 + $0x150] sm:$0xff]  ;;  %v4208_v41 = vpop.permute.xlu1 %4207 }
 0x4cf   : > { %v5601_v39 = vpop.f32.mrf.mxu0  ;;  %4369 = vrot.lane.b32.xlu0 %v4301_v33, %s11767_s27  ;;  %v6981_v63 = vpack.c.bf16 %v6962_v62, %v6961_v25  ;;  %v4300_v1 = vmul.f32 %v16908_v61, %v4208_v41  ;;  %11088 = vmatmul.mubr.msk.bf16.gmra.mxu1 %vm5205_vm9, %v6980_v34  ;;  %v6645_v25 = vld [vmem:[#allocation3 + $0x18a] sm:$0xff] }
 0x4d0   : > { %v14610_v50 = vadd.f32 %v5601_v39, %v5368_v2  ;;  %v10850_v21 = vpop.f32.mrf.mxu1  ;;  %v4214_v2 = vpop.permute.xlu0 %4213  ;;  %11052 = vmatmul.mubr.msk.bf16.gmra.mxu0 %vm5205_vm9, %v14305_v11  ;;  %v6644_v11 = vld [vmem:[#allocation3 + $0x182] sm:$0xff] }
 0x4d1   : > { %v10890_v48 = vpop.f32.mrf.mxu0  ;;  %11091 = vmatprep.mubr.msk.bf16.mxu1 %vm5205_vm9, %v6981_v63  ;;  %v4303_v47 = vmul.f32 %v16909_v13, %v4214_v2  ;;  %4367 = vrot.lane.b32.xlu1 %v4300_v1, %s11767_s27  ;;  %v16911_v63 = vld [vmem:[#allocation9_spill] sm:$0xff] }
 0x4d2   : > { %v14614_v40 = vadd.f32 %v10890_v48, %v10850_v21  ;;  %v14619_v39 = vpop.f32.mrf.mxu1  ;;  %11055 = vmatprep.mubr.msk.bf16.mxu0 %vm5205_vm9, %v14323_v37  ;;  %v4212_v33 = vpop.permute.xlu1 %4211  ;;  %v6982_v37 = vpack.c.bf16 %v6964_v30, %v6963_v7  ;;  %v16913_v7 = vld [vmem:[#allocation16_spill] sm:$0xff] }
 0x4d3   : > { %v14625_v48 = vpop.f32.mrf.mxu0  ;;  %4373 = vrot.lane.b32.xlu0 %v4303_v47, %s11767_s27  ;;  %v4302_v62 = vmul.f32 %v16910_v49, %v4212_v33  ;;  %v14637_v47 = vpack.c.bf16 %v6645_v25, %v6644_v11  ;;  %v7259_v49 = vld [vmem:[#allocation3 + $0x31] sm:$0xff]  ;;  %v6968_v25 = vld [vmem:[#allocation3 + $0x1a0] sm:$0xff] }
 0x4d4   : > { %v4218_v21 = vpop.permute.xlu0 %4217  ;;  %v7291_v51 = vpack.c.bf16 %v7260_v42, %v7259_v49  ;;  %v6967_v11 = vld [vmem:[#allocation3 + $0x198] sm:$0xff] }
 0x4d5   : > { %v4305_v41 = vmul.f32 %v16911_v63, %v4218_v21  ;;  %4371 = vrot.lane.b32.xlu1 %v4302_v62, %s11767_s27  ;;  %v16914_v49 = vld [vmem:[#allocation32_spill] sm:$0xff] }
 0x4d6   : > { %v10853_v34 = vpop.f32.mrf.mxu1  ;;  %v4216_v44 = vpop.permute.xlu1 %4215 }
 0x4d7   : > { %v10893_v2 = vpop.f32.mrf.mxu0  ;;  %4377 = vrot.lane.b32.xlu0 %v4305_v41, %s11767_s27  ;;  %v4304_v54 = vmul.f32 %v16912_v28, %v4216_v44  ;;  %11092 = vmatmul.mubr.msk.bf16.gmra.mxu1 %vm5205_vm9, %v6982_v37  ;;  %v6984_v37 = vpack.c.bf16 %v6968_v25, %v6967_v11  ;;  %v7582_v28 = vld [vmem:[#allocation3 + $0x3a] sm:$0xff]  ;;  %v7293_v11 = vpack.c.bf16 %v7264_v15, %v7263_v52  ;;  %v7584_v15 = vld [vmem:[#allocation3 + $0x52] sm:$0xff] }
 0x4d8   : > { %v14634_v1 = vadd.f32 %v10893_v2, %v10853_v34  ;;  %v5384_v43 = vpop.f32.mrf.mxu1  ;;  %v4222_v21 = vpop.permute.xlu0 %4221  ;;  %11056 = vmatmul.mubr.msk.bf16.gmra.mxu0 %vm5205_vm9, %v14637_v47  ;;  %11095 = vmatprep.mubr.msk.bf16.mxu1 %vm5205_vm9, %v14453_v36 }
 0x4d9   : > { %v5617_v33 = vpop.f32.mrf.mxu0  ;;  %v4307_v30 = vmul.f32 %v16913_v7, %v4222_v21  ;;  %4375 = vrot.lane.b32.xlu1 %v4304_v54, %s11767_s27  ;;  %11107 = vmatprep.mubr.msk.bf16.mxu0 %vm5205_vm9, %v7291_v51  ;;  %v7581_v21 = vld [vmem:[#allocation3 + $0x32] sm:$0xff]  ;;  %v7261_v51 = vld [vmem:[#allocation3 + $0x49] sm:$0xff] }
 0x4da   : > { %v14641_v63 = vadd.f32 %v5617_v33, %v5384_v43  ;;  %v10854_v62 = vpop.f32.mrf.mxu1  ;;  %v4220_v43 = vpop.permute.xlu1 %4219  ;;  %v7262_v33 = vld [vmem:[#allocation3 + $0x51] sm:$0xff] }
 0x4db   : > { %v10894_v34 = vpop.f32.mrf.mxu0  ;;  %4381 = vrot.lane.b32.xlu0 %v4307_v30, %s11767_s27  ;;  %v4306_v41 = vmul.f32 %v16914_v49, %v4220_v43  ;;  %v16915_v7 = vld [vmem:[#allocation39_spill] sm:$0xff]  ;;  %v7292_v30 = vpack.c.bf16 %v7262_v33, %v7261_v51  ;;  %v16916_v43 = vld [vmem:[#allocation34_spill] sm:$0xff] }
 0x4dc   : > { %v14650_v44 = vadd.f32 %v10894_v34, %v10854_v62  ;;  %v14653_v42 = vpop.f32.mrf.mxu1  ;;  %v4226_v2 = vpop.permute.xlu0 %4225  ;;  %v7613_v34 = vpack.c.bf16 %v7582_v28, %v7581_v21 }
 0x4dd   : > { %v14656_v36 = vpop.f32.mrf.mxu0  ;;  %v4309_v54 = vmul.f32 %v16915_v7, %v4226_v2  ;;  %4379 = vrot.lane.b32.xlu1 %v4306_v41, %s11767_s27  ;;  %v16917_v2 = vld [vmem:[#allocation41_spill] sm:$0xff] }
 0x4de   : > { %v4224_v62 = vpop.permute.xlu1 %4223 }
 0x4df   : > { %4385 = vrot.lane.b32.xlu0 %v4309_v54, %s11767_s27  ;;  %v4308_v49 = vmul.f32 %v16916_v43, %v4224_v62  ;;  %v10857_v59 = vpop.f32.mrf.mxu1  ;;  %11096 = vmatmul.mubr.msk.bf16.gmra.mxu1 %vm5205_vm9, %v6984_v37  ;;  %v7583_v37 = vld [vmem:[#allocation3 + $0x4a] sm:$0xff]  ;;  %v7268_v43 = vld [vmem:[#allocation3 + $0x99] sm:$0xff] }
 0x4e0   : > { %v10897_v61 = vpop.f32.mrf.mxu0  ;;  %11108 = vmatmul.mubr.msk.bf16.vlgmr.msra.gmra.mxu0 %vm5205_vm9, %v7292_v30  ;;  %11147 = vmatprep.mubr.msk.bf16.mxu1 %vm5205_vm9, %v7613_v34  ;;  %v4230_v41 = vpop.permute.xlu0 %4229  ;;  %v7266_v30 = vld [vmem:[#allocation3 + $0x81] sm:$0xff] }
 0x4e1   : > { %v14663_v25 = vadd.f32 %v10897_v61, %v10857_v59  ;;  %4383 = vrot.lane.b32.xlu1 %v4308_v49, %s11767_s27  ;;  %v4311_v33 = vmul.f32 %v16917_v2, %v4230_v41  ;;  %v5400_v28 = vpop.f32.mrf.mxu1  ;;  %11111 = vmatprep.mubr.msk.bf16.mxu0 %vm5205_vm9, %v7293_v11  ;;  %v16918_v59 = vld [vmem:[#allocation42_spill] sm:$0xff] }
 0x4e2   : > { %v5633_v21 = vpop.f32.mrf.mxu0  ;;  %v4228_v51 = vpop.permute.xlu1 %4227  ;;  %v7585_v34 = vld [vmem:[#allocation3 + $0x62] sm:$0xff]  ;;  %v7586_v49 = vld [vmem:[#allocation3 + $0x6a] sm:$0xff] }
 0x4e3   : > { %v14670_v54 = vadd.f32 %v5633_v21, %v5400_v28  ;;  %v4310_v52 = vmul.f32 %v16918_v59, %v4228_v51  ;;  %v10858_v61 = vpop.f32.mrf.mxu1  ;;  %4389 = vrot.lane.b32.xlu0 %v4311_v33, %s11767_s27  ;;  %v16919_v11 = vld [vmem:[#allocation46_spill] sm:$0xff]  ;;  %v7614_v51 = vpack.c.bf16 %v7584_v15, %v7583_v37  ;;  %v7265_v59 = vld [vmem:[#allocation3 + $0x79] sm:$0xff]  ;;  %v7615_v33 = vpack.c.bf16 %v7586_v49, %v7585_v34 }
 0x4e4   : > { %v10898_v62 = vpop.f32.mrf.mxu0  ;;  %v4234_v41 = vpop.permute.xlu0 %4233  ;;  %v7294_v13 = vpack.c.bf16 %v7266_v30, %v7265_v59  ;;  %v16921_v15 = vld [vmem:[#allocation49_spill] sm:$0xff] }
 0x4e5   : > { %v14674_v7 = vadd.f32 %v10898_v62, %v10858_v61  ;;  %4387 = vrot.lane.b32.xlu1 %v4310_v52, %s11767_s27  ;;  %v4313_v28 = vmul.f32 %v16919_v11, %v4234_v41  ;;  %v14678_v21 = vpop.f32.mrf.mxu1  ;;  %v7295_v52 = vpack.c.bf16 %v7268_v43, %v7267_v18  ;;  %v7587_v43 = vld [vmem:[#allocation3 + $0x7a] sm:$0xff]  ;;  %v5525_v11 = vadd.f32 %v14443_v38, %v14439_v27 }
 0x4e6   : > { %v14680_v2 = vpop.f32.mrf.mxu0  ;;  %v4232_v53 = vpop.permute.xlu1 %4231 }
 0x4e7   : > { %v4312_v55 = vmul.f32 %v16920_v35, %v4232_v53  ;;  %v10909_v61 = vpop.f32.mrf.mxu1  ;;  %11148 = vmatmul.mubr.msk.bf16.vlgmr.msra.gmra.mxu1 %vm5205_vm9, %v7614_v51  ;;  %4393 = vrot.lane.b32.xlu0 %v4313_v28, %s11767_s27  ;;  %v16922_v28 = vld [vmem:[#allocation51_spill] sm:$0xff] }
 0x4e8   : > { %v10949_v62 = vpop.f32.mrf.mxu0  ;;  %v5940_v41 = vadd.f32 %v10909_v61, %v14424_v58  ;;  %11112 = vmatmul.mubr.msk.bf16.gmra.mxu0 %vm5205_vm9, %v7294_v13  ;;  %11151 = vmatprep.mubr.msk.bf16.mxu1 %vm5205_vm9, %v7615_v33  ;;  %v4238_v37 = vpop.permute.xlu0 %4237  ;;  %v7588_v58 = vld [vmem:[#allocation3 + $0x82] sm:$0xff]  ;;  %v7589_v61 = vld [vmem:[#allocation3 + $0x92] sm:$0xff] }
 0x4e9   : > { %4391 = vrot.lane.b32.xlu1 %v4312_v55, %s11767_s27  ;;  %v4315_v59 = vmul.f32 %v16921_v15, %v4238_v37  ;;  %v5811_v30 = vpop.f32.mrf.mxu1  ;;  %11115 = vmatprep.mubr.msk.bf16.mxu0 %vm5205_vm9, %v7295_v52  ;;  %v7270_v55 = vld [vmem:[#allocation3 + $0xb1] sm:$0xff]  ;;  %v7590_v37 = vld [vmem:[#allocation3 + $0x9a] sm:$0xff]  ;;  %v7269_v15 = vld [vmem:[#allocation3 + $0xa9] sm:$0xff] }
 0x4ea   : > { %v6133_v53 = vpop.f32.mrf.mxu0  ;;  %v14691_v34 = vadd.f32 %v10949_v62, %v5940_v41  ;;  %v5938_v49 = vadd.f32 %v5811_v30, %v14431_v10  ;;  %v4236_v18 = vpop.permute.xlu1 %4235  ;;  %v7272_v41 = vld [vmem:[#allocation3 + $0xc9] sm:$0xff]  ;;  %v7296_v38 = vpack.c.bf16 %v7270_v55, %v7269_v15  ;;  %v16926_v15 = vld [vmem:[#allocation57_spill] sm:$0xff] }
 0x4eb   : > { %v4314_v13 = vmul.f32 %v16922_v28, %v4236_v18  ;;  %v10910_v51 = vpop.f32.mrf.mxu1  ;;  %4397 = vrot.lane.b32.xlu0 %v4315_v59, %s11767_s27  ;;  %v16924_v30 = vld [vmem:[#allocation55_spill] sm:$0xff]  ;;  %v7616_v59 = vpack.c.bf16 %v7588_v58, %v7587_v43 }
 0x4ec   : > { %v10950_v33 = vpop.f32.mrf.mxu0  ;;  %v14698_v52 = vadd.f32 %v6133_v53, %v5938_v49  ;;  %v5941_v62 = vadd.f32 %v10910_v51, %v14437_v19  ;;  %v4242_v10 = vpop.permute.xlu0 %4241  ;;  %v7617_v53 = vpack.c.bf16 %v7590_v37, %v7589_v61  ;;  %v7271_v49 = vld [vmem:[#allocation3 + $0xc1] sm:$0xff] }
 0x4ed   : > { %4395 = vrot.lane.b32.xlu1 %v4314_v13, %s11767_s27  ;;  %v4317_v18 = vmul.f32 %v16924_v30, %v4242_v10  ;;  %v5814_v28 = vpop.f32.mrf.mxu1  ;;  %v16925_v19 = vld [vmem:[#allocation53_spill] sm:$0xff]  ;;  %v7297_v13 = vpack.c.bf16 %v7272_v41, %v7271_v49 }
 0x4ee   : > { %16923 = vst [vmem:[#allocation103_spill] sm:$0xff] %v14698_v52  ;;  %v14703_v35 = vpop.f32.mrf.mxu0  ;;  %v14705_v45 = vadd.f32 %v10950_v33, %v5941_v62  ;;  %v14707_v32 = vadd.f32 %v5814_v28, %v5525_v11  ;;  %v4240_v27 = vpop.permute.xlu1 %4239  ;;  %v7591_v62 = vld [vmem:[#allocation3 + $0xaa] sm:$0xff] }
 0x4ef   : > { %v4316_v51 = vmul.f32 %v16925_v19, %v4240_v27  ;;  %v10913_v3 = vpop.f32.mrf.mxu1  ;;  %11152 = vmatmul.mubr.msk.bf16.gmra.mxu1 %vm5205_vm9, %v7616_v59  ;;  %4401 = vrot.lane.b32.xlu0 %v4317_v18, %s11767_s27  ;;  %v7274_v59 = vld [vmem:[#allocation3 + $0xe1] sm:$0xff] }
 0x4f0   : > { %v10953_v52 = vpop.f32.mrf.mxu0  ;;  %v5944_v43 = vadd.f32 %v10913_v3, %v14449_v29  ;;  %11116 = vmatmul.mubr.msk.bf16.gmra.mxu0 %vm5205_vm9, %v7296_v38  ;;  %11155 = vmatprep.mubr.msk.bf16.mxu1 %vm5205_vm9, %v7617_v53  ;;  %v4246_v11 = vpop.permute.xlu0 %4245  ;;  %v7592_v3 = vld [vmem:[#allocation3 + $0xb2] sm:$0xff]  ;;  %v7593_v27 = vld [vmem:[#allocation3 + $0xc2] sm:$0xff]  ;;  %v7594_v38 = vld [vmem:[#allocation3 + $0xca] sm:$0xff]  ;;  %v5541_v53 = vadd.f32 %v14486_v57, %v14481_v5 }
 0x4f1   : > { %4399 = vrot.lane.b32.xlu1 %v4316_v51, %s11767_s27  ;;  %v4319_v58 = vmul.f32 %v16926_v15, %v4246_v11  ;;  %v5827_v28 = vpop.f32.mrf.mxu1  ;;  %11119 = vmatprep.mubr.msk.bf16.mxu0 %vm5205_vm9, %v7297_v13  ;;  %v16927_v29 = vld [vmem:[#allocation59_spill] sm:$0xff]  ;;  %v7276_v51 = vld [vmem:[#allocation3 + $0xf9] sm:$0xff] }
 0x4f2   : > { %v6149_v33 = vpop.f32.mrf.mxu0  ;;  %v14718_v55 = vadd.f32 %v10953_v52, %v5944_v43  ;;  %v5942_v61 = vadd.f32 %v5827_v28, %v14459_v46  ;;  %v4244_v37 = vpop.permute.xlu1 %4243  ;;  %v16928_v13 = vld [vmem:[#allocation63_spill] sm:$0xff] }
 0x4f3   : > { %v4318_v10 = vmul.f32 %v16927_v29, %v4244_v37  ;;  %v10914_v41 = vpop.f32.mrf.mxu1  ;;  %4405 = vrot.lane.b32.xlu0 %v4319_v58, %s11767_s27  ;;  %v7618_v58 = vpack.c.bf16 %v7592_v3, %v7591_v62  ;;  %v7273_v37 = vld [vmem:[#allocation3 + $0xd9] sm:$0xff] }
 0x4f4   : > { %v10954_v18 = vpop.f32.mrf.mxu0  ;;  %v14725_v49 = vadd.f32 %v6149_v33, %v5942_v61  ;;  %v5945_v52 = vadd.f32 %v10914_v41, %v14467_v26  ;;  %v4250_v46 = vpop.permute.xlu0 %4249  ;;  %v7298_v57 = vpack.c.bf16 %v7274_v59, %v7273_v37  ;;  %v7619_v33 = vpack.c.bf16 %v7594_v38, %v7593_v27  ;;  %v7275_v61 = vld [vmem:[#allocation3 + $0xf1] sm:$0xff]  ;;  %v16929_v26 = vld [vmem:[#allocation61_spill] sm:$0xff] }
 0x4f5   : > { %4403 = vrot.lane.b32.xlu1 %v4318_v10, %s11767_s27  ;;  %v4321_v43 = vmul.f32 %v16928_v13, %v4250_v46  ;;  %v5830_v11 = vpop.f32.mrf.mxu1  ;;  %v7299_v10 = vpack.c.bf16 %v7276_v51, %v7275_v61  ;;  %v7595_v51 = vld [vmem:[#allocation3 + $0xda] sm:$0xff]  ;;  %v7278_v37 = vld [vmem:[#allocation3 + $0x111] sm:$0xff] }
 0x4f6   : > { %v14730_v28 = vpop.f32.mrf.mxu0  ;;  %v14732_v29 = vadd.f32 %v10954_v18, %v5945_v52  ;;  %v14734_v30 = vadd.f32 %v5830_v11, %v5541_v53  ;;  %v4248_v5 = vpop.permute.xlu1 %4247  ;;  %v16930_v18 = vld [vmem:[#allocation65_spill] sm:$0xff] }
 0x4f7   : > { %v4320_v41 = vmul.f32 %v16929_v26, %v4248_v5  ;;  %v10917_v19 = vpop.f32.mrf.mxu1  ;;  %11156 = vmatmul.mubr.msk.bf16.gmra.mxu1 %vm5205_vm9, %v7618_v58  ;;  %4409 = vrot.lane.b32.xlu0 %v4321_v43, %s11767_s27  ;;  %v7597_v5 = vld [vmem:[#allocation3 + $0xf2] sm:$0xff] }
 0x4f8   : > { %v10957_v15 = vpop.f32.mrf.mxu0  ;;  %v5948_v62 = vadd.f32 %v10917_v19, %v14498_v24  ;;  %11120 = vmatmul.mubr.msk.bf16.gmra.mxu0 %vm5205_vm9, %v7298_v57  ;;  %11159 = vmatprep.mubr.msk.bf16.mxu1 %vm5205_vm9, %v7619_v33  ;;  %v4254_v3 = vpop.permute.xlu0 %4253  ;;  %v7596_v24 = vld [vmem:[#allocation3 + $0xe2] sm:$0xff]  ;;  %v16931_v19 = vld [vmem:[#allocation67_spill] sm:$0xff]  ;;  %v7598_v57 = vld [vmem:[#allocation3 + $0xfa] sm:$0xff]  ;;  %v5557_v33 = vadd.f32 %v14530_v12, %v14528_v6 }
 0x4f9   : > { %4407 = vrot.lane.b32.xlu1 %v4320_v41, %s11767_s27  ;;  %v4323_v59 = vmul.f32 %v16930_v18, %v4254_v3  ;;  %v5843_v27 = vpop.f32.mrf.mxu1  ;;  %11123 = vmatprep.mubr.msk.bf16.mxu0 %vm5205_vm9, %v7299_v10  ;;  %v7280_v41 = vld [vmem:[#allocation3 + $0x129] sm:$0xff] }
 0x4fa   : > { %v6165_v38 = vpop.f32.mrf.mxu0  ;;  %v14745_v53 = vadd.f32 %v10957_v15, %v5948_v62  ;;  %v5946_v52 = vadd.f32 %v5843_v27, %v14508_v31  ;;  %v4252_v46 = vpop.permute.xlu1 %4251  ;;  %v16932_v10 = vld [vmem:[#allocation71_spill] sm:$0xff] }
 0x4fb   : > { %v4322_v43 = vmul.f32 %v16931_v19, %v4252_v46  ;;  %v10918_v11 = vpop.f32.mrf.mxu1  ;;  %4413 = vrot.lane.b32.xlu0 %v4323_v59, %s11767_s27  ;;  %v7620_v59 = vpack.c.bf16 %v7596_v24, %v7595_v51  ;;  %v7277_v46 = vld [vmem:[#allocation3 + $0x109] sm:$0xff] }
 0x4fc   : > { %v10958_v58 = vpop.f32.mrf.mxu0  ;;  %v14752_v61 = vadd.f32 %v6165_v38, %v5946_v52  ;;  %v5949_v15 = vadd.f32 %v10918_v11, %v14518_v60  ;;  %v4258_v31 = vpop.permute.xlu0 %4257  ;;  %v7300_v12 = vpack.c.bf16 %v7278_v37, %v7277_v46  ;;  %v7621_v38 = vpack.c.bf16 %v7598_v57, %v7597_v5  ;;  %v7279_v52 = vld [vmem:[#allocation3 + $0x121] sm:$0xff]  ;;  %v7602_v46 = vld [vmem:[#allocation3 + $0x12a] sm:$0xff] }
 0x4fd   : > { %4411 = vrot.lane.b32.xlu1 %v4322_v43, %s11767_s27  ;;  %v4325_v62 = vmul.f32 %v16932_v10, %v4258_v31  ;;  %v5846_v3 = vpop.f32.mrf.mxu1  ;;  %v16933_v60 = vld [vmem:[#allocation69_spill] sm:$0xff]  ;;  %v7301_v43 = vpack.c.bf16 %v7280_v41, %v7279_v52 }
 0x4fe   : > { %v14757_v27 = vpop.f32.mrf.mxu0  ;;  %v14759_v19 = vadd.f32 %v10958_v58, %v5949_v15  ;;  %v14761_v13 = vadd.f32 %v5846_v3, %v5557_v33  ;;  %v4256_v6 = vpop.permute.xlu1 %4255  ;;  %v16934_v58 = vld [vmem:[#allocation78_spill] sm:$0xff] }
 0x4ff   : > { %v4324_v11 = vmul.f32 %v16933_v60, %v4256_v6  ;;  %v10921_v26 = vpop.f32.mrf.mxu1  ;;  %11160 = vmatmul.mubr.msk.bf16.gmra.mxu1 %vm5205_vm9, %v7620_v59  ;;  %4417 = vrot.lane.b32.xlu0 %v4325_v62, %s11767_s27  ;;  %v7282_v3 = vld [vmem:[#allocation3 + $0x141] sm:$0xff]  ;;  %v5573_v6 = vadd.f32 %v14562_v9, %v14557_v17  ;;  %v7283_v60 = vld [vmem:[#allocation3 + $0x151] sm:$0xff] }
 0x500   : > { %v10961_v18 = vpop.f32.mrf.mxu0  ;;  %v5952_v51 = vadd.f32 %v10921_v26, %v14545_v22  ;;  %11124 = vmatmul.mubr.msk.bf16.gmra.mxu0 %vm5205_vm9, %v7300_v12  ;;  %11163 = vmatprep.mubr.msk.bf16.mxu1 %vm5205_vm9, %v7621_v38  ;;  %v4262_v24 = vpop.permute.xlu0 %4261  ;;  %v7599_v22 = vld [vmem:[#allocation3 + $0x10a] sm:$0xff]  ;;  %v7600_v26 = vld [vmem:[#allocation3 + $0x112] sm:$0xff]  ;;  %v7601_v59 = vld [vmem:[#allocation3 + $0x122] sm:$0xff] }
 0x501   : > { %4415 = vrot.lane.b32.xlu1 %v4324_v11, %s11767_s27  ;;  %v4327_v37 = vmul.f32 %v16934_v58, %v4262_v24  ;;  %v5859_v5 = vpop.f32.mrf.mxu1  ;;  %11127 = vmatprep.mubr.msk.bf16.mxu0 %vm5205_vm9, %v7301_v43  ;;  %v7284_v38 = vld [vmem:[#allocation3 + $0x159] sm:$0xff]  ;;  %v7622_v11 = vpack.c.bf16 %v7600_v26, %v7599_v22  ;;  %v7623_v10 = vpack.c.bf16 %v7602_v46, %v7601_v59  ;;  %v7604_v46 = vld [vmem:[#allocation3 + $0x142] sm:$0xff] }
 0x502   : > { %v6181_v57 = vpop.f32.mrf.mxu0  ;;  %v14772_v33 = vadd.f32 %v10961_v18, %v5952_v51  ;;  %v5950_v15 = vadd.f32 %v5859_v5, %v14551_v14  ;;  %v14775_v31 = vpop.permute.xlu1 %4259  ;;  %v7281_v43 = vld [vmem:[#allocation3 + $0x139] sm:$0xff] }
 0x503   : > { %v10922_v41 = vpop.f32.mrf.mxu1  ;;  %4421 = vrot.lane.b32.xlu0 %v4327_v37, %s11767_s27  ;;  %v7302_v5 = vpack.c.bf16 %v7282_v3, %v7281_v43  ;;  %v16935_v58 = vld [vmem:[#allocation81_spill] sm:$0xff] }
 0x504   : > { %v10962_v62 = vpop.f32.mrf.mxu0  ;;  %v14780_v12 = vadd.f32 %v6181_v57, %v5950_v15  ;;  %v5953_v18 = vadd.f32 %v10922_v41, %v14553_v0  ;;  %v16936_v0 = vld [vmem:[#allocation7_spill] sm:$0xff]  ;;  %v7303_v15 = vpack.c.bf16 %v7284_v38, %v7283_v60  ;;  %v7603_v59 = vld [vmem:[#allocation3 + $0x13a] sm:$0xff] }
 0x505   : > { %v5862_v14 = vpop.f32.mrf.mxu1  ;;  %v7605_v38 = vld [vmem:[#allocation3 + $0x152] sm:$0xff] }
 0x506   : > { %v14783_v52 = vpop.f32.mrf.mxu0  ;;  %v14785_v51 = vadd.f32 %v10962_v62, %v5953_v18  ;;  %v14787_v24 = vadd.f32 %v5862_v14, %v5573_v6  ;;  %v4264_v37 = vpop.permute.xlu1 %4263  ;;  %v7286_v18 = vld [vmem:[#allocation3 + $0x171] sm:$0xff]  ;;  %v5589_v14 = vadd.f32 %v14594_v23, %v14591_v8 }
 0x507   : > { %v4328_v9 = vmul.f32 %v16935_v58, %v4264_v37  ;;  %v10925_v17 = vpop.f32.mrf.mxu1  ;;  %11164 = vmatmul.mubr.msk.bf16.gmra.mxu1 %vm5205_vm9, %v7622_v11  ;;  %4810 = vrot.lane.b32.xlu0 %v16936_v0, %s11767_s27  ;;  %v7288_v37 = vld [vmem:[#allocation3 + $0x189] sm:$0xff] }
 0x508   : > { %v10965_v57 = vpop.f32.mrf.mxu0  ;;  %v5956_v22 = vadd.f32 %v10925_v17, %v14573_v56  ;;  %11128 = vmatmul.mubr.msk.bf16.gmra.mxu0 %vm5205_vm9, %v7302_v5  ;;  %11167 = vmatprep.mubr.msk.bf16.mxu1 %vm5205_vm9, %v7623_v10  ;;  %v16937_v56 = vld [vmem:[#allocation27_spill] sm:$0xff]  ;;  %v7606_v10 = vld [vmem:[#allocation3 + $0x15a] sm:$0xff]  ;;  %v7624_v17 = vpack.c.bf16 %v7604_v46, %v7603_v59 }
 0x509   : > { %4423 = vrot.lane.b32.xlu1 %v4328_v9, %s11767_s27  ;;  %v5875_v26 = vpop.f32.mrf.mxu1  ;;  %11131 = vmatprep.mubr.msk.bf16.mxu0 %vm5205_vm9, %v7303_v15  ;;  %v16940_v59 = vld [vmem:[#allocation8_spill] sm:$0xff] }
 0x50a   : > { %v6197_v41 = vpop.f32.mrf.mxu0  ;;  %v14798_v62 = vadd.f32 %v10965_v57, %v5956_v22  ;;  %v5954_v3 = vadd.f32 %v5875_v26, %v14577_v20  ;;  %v16938_v20 = vld [vmem:[#allocation18_spill] sm:$0xff]  ;;  %v7625_v26 = vpack.c.bf16 %v7606_v10, %v7605_v38 }
 0x50b   : > { %v10926_v6 = vpop.f32.mrf.mxu1  ;;  %4814 = vrot.lane.b32.xlu0 %v16937_v56, %s11767_s27  ;;  %v7285_v57 = vld [vmem:[#allocation3 + $0x169] sm:$0xff]  ;;  %v7287_v56 = vld [vmem:[#allocation3 + $0x181] sm:$0xff] }
 0x50c   : > { %v10966_v60 = vpop.f32.mrf.mxu0  ;;  %v14805_v11 = vadd.f32 %v6197_v41, %v5954_v3  ;;  %v5957_v43 = vadd.f32 %v10926_v6, %v14585_v16  ;;  %v7304_v22 = vpack.c.bf16 %v7286_v18, %v7285_v57  ;;  %v16939_v16 = vld [vmem:[#allocation12_spill] sm:$0xff]  ;;  %v7305_v8 = vpack.c.bf16 %v7288_v37, %v7287_v56  ;;  %v7290_v18 = vld [vmem:[#allocation3 + $0x1a1] sm:$0xff]  ;;  %v16942_v57 = vld [vmem:[#allocation23_spill] sm:$0xff] }
 0x50d   : > { %4812 = vrot.lane.b32.xlu1 %v16938_v20, %s11767_s27  ;;  %v5878_v5 = vpop.f32.mrf.mxu1  ;;  %v16941_v37 = vld [vmem:[#allocation29_spill] sm:$0xff]  ;;  %v5605_v20 = vadd.f32 %v14625_v48, %v14619_v39  ;;  %v16943_v39 = vld [vmem:[#allocation14_spill] sm:$0xff] }
 0x50e   : > { %v6200_v9 = vpop.f32.mrf.mxu0  ;;  %v14810_v0 = vadd.f32 %v10966_v60, %v5957_v43  ;;  %v5955_v15 = vadd.f32 %v5878_v5, %v5589_v14  ;;  %v7289_v60 = vld [vmem:[#allocation3 + $0x199] sm:$0xff]  ;;  %v7607_v14 = vld [vmem:[#allocation3 + $0x16a] sm:$0xff] }
 0x50f   : > { %v10929_v58 = vpop.f32.mrf.mxu1  ;;  %11168 = vmatmul.mubr.msk.bf16.gmra.mxu1 %vm5205_vm9, %v7624_v17  ;;  %4818 = vrot.lane.b32.xlu0 %v16939_v16, %s11767_s27  ;;  %v7608_v43 = vld [vmem:[#allocation3 + $0x172] sm:$0xff]  ;;  %v7306_v17 = vpack.c.bf16 %v7290_v18, %v7289_v60 }
 0x510   : > { %v10969_v23 = vpop.f32.mrf.mxu0  ;;  %v14815_v41 = vadd.f32 %v6200_v9, %v5955_v15  ;;  %v5960_v3 = vadd.f32 %v10929_v58, %v14606_v4  ;;  %11132 = vmatmul.mubr.msk.bf16.gmra.mxu0 %vm5205_vm9, %v7304_v22  ;;  %11171 = vmatprep.mubr.msk.bf16.mxu1 %vm5205_vm9, %v7625_v26  ;;  %v7626_v22 = vpack.c.bf16 %v7608_v43, %v7607_v14 }
 0x511   : > { %4816 = vrot.lane.b32.xlu1 %v16940_v59, %s11767_s27  ;;  %v5891_v46 = vpop.f32.mrf.mxu1  ;;  %11135 = vmatprep.mubr.msk.bf16.mxu0 %vm5205_vm9, %v7305_v8  ;;  %v7611_v8 = vld [vmem:[#allocation3 + $0x19a] sm:$0xff]  ;;  %v16944_v59 = vld [vmem:[#allocation31_spill] sm:$0xff] }
 0x512   : > { %v6213_v6 = vpop.f32.mrf.mxu0  ;;  %v14823_v38 = vadd.f32 %v10969_v23, %v5960_v3  ;;  %v5958_v10 = vadd.f32 %v5891_v46, %v14610_v50  ;;  %v7612_v3 = vld [vmem:[#allocation3 + $0x1a2] sm:$0xff] }
 0x513   : > { %v10930_v4 = vpop.f32.mrf.mxu1  ;;  %4822 = vrot.lane.b32.xlu0 %v16941_v37, %s11767_s27  ;;  %v7628_v43 = vpack.c.bf16 %v7612_v3, %v7611_v8  ;;  %v16946_v37 = vld [vmem:[#allocation24_spill] sm:$0xff] }
 0x514   : > { %v10970_v58 = vpop.f32.mrf.mxu0  ;;  %v14830_v5 = vadd.f32 %v6213_v6, %v5958_v10  ;;  %v5961_v9 = vadd.f32 %v10930_v4, %v14614_v40 }
 0x515   : > { %4820 = vrot.lane.b32.xlu1 %v16942_v57, %s11767_s27  ;;  %v5894_v15 = vpop.f32.mrf.mxu1 }
 0x516   : > { %v6216_v50 = vpop.f32.mrf.mxu0  ;;  %v14835_v26 = vadd.f32 %v10970_v58, %v5961_v9  ;;  %v5959_v56 = vadd.f32 %v5894_v15, %v5605_v20  ;;  %v16947_v15 = vld [vmem:[#allocation40_spill] sm:$0xff] }
 0x517   : > { %v10933_v23 = vpop.f32.mrf.mxu1  ;;  %11172 = vmatmul.mubr.msk.bf16.gmra.mxu1 %vm5205_vm9, %v7626_v22  ;;  %4826 = vrot.lane.b32.xlu0 %v16943_v39, %s11767_s27 }
 0x518   : > { %v10973_v16 = vpop.f32.mrf.mxu0  ;;  %v14840_v48 = vadd.f32 %v6216_v50, %v5959_v56  ;;  %v5964_v40 = vadd.f32 %v10933_v23, %v14634_v1  ;;  %11136 = vmatmul.mubr.msk.bf16.gmra.mxu0 %vm5205_vm9, %v7306_v17  ;;  %11175 = vmatprep.mubr.msk.bf16.mxu1 %vm5205_vm9, %v14637_v47  ;;  %v16945_v1 = vld [vmem:[#allocation22_spill] sm:$0xff]  ;;  %v5621_v47 = vadd.f32 %v14656_v36, %v14653_v42  ;;  %v16949_v23 = vld [vmem:[#allocation43_spill] sm:$0xff] }
 0x519   : > { %4824 = vrot.lane.b32.xlu1 %v16944_v59, %s11767_s27  ;;  %v5907_v46 = vpop.f32.mrf.mxu1 }
 0x51a   : > { %v6229_v6 = vpop.f32.mrf.mxu0  ;;  %v14848_v60 = vadd.f32 %v10973_v16, %v5964_v40  ;;  %v5962_v18 = vadd.f32 %v5907_v46, %v14641_v63  ;;  %v5637_v16 = vadd.f32 %v14680_v2, %v14678_v21  ;;  %v16953_v46 = vld [vmem:[#allocation47_spill] sm:$0xff] }
 0x51b   : > { %v10934_v10 = vpop.f32.mrf.mxu1  ;;  %4830 = vrot.lane.b32.xlu0 %v16945_v1, %s11767_s27  ;;  %v16954_v21 = vld [vmem:[#allocation103_spill] sm:$0xff] }
 0x51c   : > { %v10974_v14 = vpop.f32.mrf.mxu0  ;;  %v14855_v4 = vadd.f32 %v6229_v6, %v5962_v18  ;;  %v5965_v58 = vadd.f32 %v10934_v10, %v14650_v44  ;;  %v16948_v44 = vld [vmem:[#allocation33_spill] sm:$0xff]  ;;  %v16955_v18 = vld [vmem:[#allocation50_spill] sm:$0xff]  ;;  %v6261_v10 = vadd.f32 %v14703_v35, %v14707_v32 }
 0x51d   : > { %4828 = vrot.lane.b32.xlu1 %v16946_v37, %s11767_s27  ;;  %v5910_v20 = vpop.f32.mrf.mxu1 }
 0x51e   : > { %v14860_v9 = vadd.f32 %v10974_v14, %v5965_v58  ;;  %v5963_v63 = vadd.f32 %v5910_v20, %v5621_v47  ;;  %v6232_v17 = vpop.f32.mrf.mxu0  ;;  %v16957_v58 = vld [vmem:[#allocation56_spill] sm:$0xff]  ;;  %v16958_v20 = vld [vmem:[#allocation54_spill] sm:$0xff] }
 0x51f   : > { %v10937_v57 = vpop.f32.mrf.mxu1  ;;  %11176 = vmatmul.mubr.msk.bf16.gmra.mxu1 %vm5205_vm9, %v7628_v43  ;;  %4834 = vrot.lane.b32.xlu0 %v16947_v15, %s11767_s27 }
 0x520   : > { %v14865_v50 = vadd.f32 %v6232_v17, %v5963_v63  ;;  %v14868_v42 = vadd.f32 %v10937_v57, %v14663_v25  ;;  %v16950_v25 = vld [vmem:[#allocation44_spill] sm:$0xff]  ;;  %v16959_v63 = vld [vmem:[#allocation58_spill] sm:$0xff]  ;;  %v6265_v17 = vadd.f32 %v14730_v28, %v14734_v30 }
 0x521   : > { %4832 = vrot.lane.b32.xlu1 %v16948_v44, %s11767_s27  ;;  %v5923_v36 = vpop.f32.mrf.mxu1  ;;  %v16962_v30 = vld [vmem:[#allocation62_spill] sm:$0xff] }
 0x522   : > { %v14873_v22 = vadd.f32 %v5923_v36, %v14670_v54  ;;  %v16951_v54 = vld [vmem:[#allocation48_spill] sm:$0xff] }
 0x523   : > { %v10938_v56 = vpop.f32.mrf.mxu1  ;;  %4838 = vrot.lane.b32.xlu0 %v16949_v23, %s11767_s27 }
 0x524   : > { %v14880_v39 = vadd.f32 %v10938_v56, %v14674_v7 }
 0x525   : > { %4836 = vrot.lane.b32.xlu1 %v16950_v25, %s11767_s27  ;;  %v5926_v40 = vpop.f32.mrf.mxu1  ;;  %v16963_v25 = vld [vmem:[#allocation66_spill] sm:$0xff] }
 0x526   : > { %v14884_v8 = vadd.f32 %v5926_v40, %v5637_v16  ;;  %v6269_v40 = vadd.f32 %v14757_v27, %v14761_v13 }
 0x527   : > { %v10989_v3 = vpop.f32.mrf.mxu1  ;;  %4842 = vrot.lane.b32.xlu0 %v16951_v54, %s11767_s27  ;;  %v16964_v54 = vld [vmem:[#allocation68_spill] sm:$0xff] }
 0x528   : > { %v14889_v59 = vadd.f32 %v10989_v3, %v14691_v34  ;;  %v16956_v34 = vld [vmem:[#allocation52_spill] sm:$0xff] }
 0x529   : > { %4840 = vrot.lane.b32.xlu1 %v16953_v46, %s11767_s27  ;;  %v6455_v2 = vpop.f32.mrf.mxu1 }
 0x52a   : > { %16952 = vst [vmem:[#allocation7_spill] sm:$0xff] %v14889_v59  ;;  %v14894_v7 = vadd.f32 %v6455_v2, %v16954_v21  ;;  %v8142_v59 = vld [vmem:[#allocation5 + $0x78] sm:$0xff] }
 0x52b   : > { %v10990_v6 = vpop.f32.mrf.mxu1  ;;  %4846 = vrot.lane.b32.xlu0 %v16955_v18, %s11767_s27 }
 0x52c   : > { %v14901_v14 = vadd.f32 %v10990_v6, %v14705_v45  ;;  %v16965_v6 = vld [vmem:[#allocation72_spill] sm:$0xff] }
 0x52d   : > { %4844 = vrot.lane.b32.xlu1 %v16956_v34, %s11767_s27  ;;  %v6458_v1 = vpop.f32.mrf.mxu1 }
 0x52e   : > { %v14905_v43 = vadd.f32 %v6458_v1, %v6261_v10 }
 0x52f   : > { %v10993_v47 = vpop.f32.mrf.mxu1  ;;  %4850 = vrot.lane.b32.xlu0 %v16957_v58, %s11767_s27  ;;  %v6273_v58 = vadd.f32 %v14783_v52, %v14787_v24  ;;  %v8129_v24 = vld [vmem:[#allocation5 + $0x10] sm:$0xff] }
 0x530   : > { %v14910_v37 = vadd.f32 %v10993_v47, %v14718_v55  ;;  %v16960_v55 = vld [vmem:[#allocation60_spill] sm:$0xff]  ;;  %v16967_v47 = vld [vmem:[#allocation79_spill] sm:$0xff] }
 0x531   : > { %4848 = vrot.lane.b32.xlu1 %v16958_v20, %s11767_s27  ;;  %v6471_v32 = vpop.f32.mrf.mxu1 }
 0x532   : > { %v14915_v35 = vadd.f32 %v6471_v32, %v14725_v49  ;;  %v16961_v49 = vld [vmem:[#allocation64_spill] sm:$0xff]  ;;  %v8127_v32 = vld [vmem:[#allocation5] sm:$0xff] }
 0x533   : > { %v10994_v45 = vpop.f32.mrf.mxu1  ;;  %4854 = vrot.lane.b32.xlu0 %v16959_v63, %s11767_s27 }
 0x534   : > { %v14922_v57 = vadd.f32 %v10994_v45, %v14732_v29  ;;  %v16968_v45 = vld [vmem:[#allocation82_spill] sm:$0xff] }
 0x535   : > { %4852 = vrot.lane.b32.xlu1 %v16960_v55, %s11767_s27  ;;  %v6474_v15 = vpop.f32.mrf.mxu1 }
 0x536   : > { %v14926_v44 = vadd.f32 %v6474_v15, %v6265_v17  ;;  %v8128_v17 = vld [vmem:[#allocation5 + $0x8] sm:$0xff] }
 0x537   : > { %v10997_v36 = vpop.f32.mrf.mxu1  ;;  %4858 = vrot.lane.b32.xlu0 %v16961_v49, %s11767_s27 }
 0x538   : > { %v14931_v56 = vadd.f32 %v10997_v36, %v14745_v53 }
 0x539   : > { %v14933_v23 = vpop.permute.xlu0 %4361  ;;  %4856 = vrot.lane.b32.xlu1 %v16962_v30, %s11767_s27  ;;  %v6487_v29 = vpop.f32.mrf.mxu1  ;;  %v8130_v30 = vld [vmem:[#allocation5 + $0x18] sm:$0xff] }
 0x53a   : > { %v14938_v28 = vadd.f32 %v6487_v29, %v14752_v61 }
 0x53b   : > { %v10998_v16 = vpop.f32.mrf.mxu1  ;;  %4862 = vrot.lane.b32.xlu0 %v16963_v25, %s11767_s27 }
 0x53c   : > { %v14945_v3 = vadd.f32 %v10998_v16, %v14759_v19  ;;  %v16966_v19 = vld [vmem:[#allocation70_spill] sm:$0xff] }
 0x53d   : > { %v14947_v53 = vpop.permute.xlu0 %4365  ;;  %4860 = vrot.lane.b32.xlu1 %v16964_v54, %s11767_s27  ;;  %v6490_v46 = vpop.f32.mrf.mxu1 }
 0x53e   : > { %v14951_v2 = vadd.f32 %v6490_v46, %v6269_v40  ;;  %v8131_v40 = vld [vmem:[#allocation5 + $0x20] sm:$0xff] }
 0x53f   : > { %v14953_v61 = vpop.permute.xlu1 %4363  ;;  %v11001_v21 = vpop.f32.mrf.mxu1  ;;  %4866 = vrot.lane.b32.xlu0 %v16965_v6, %s11767_s27 }
 0x540   : > { %v14958_v18 = vadd.f32 %v11001_v21, %v14772_v33 }
 0x541   : > { %v14960_v13 = vpop.permute.xlu0 %4369  ;;  %4864 = vrot.lane.b32.xlu1 %v16966_v19, %s11767_s27  ;;  %v6503_v27 = vpop.f32.mrf.mxu1 }
 0x542   : > { %v14965_v10 = vadd.f32 %v6503_v27, %v14780_v12  ;;  %v8133_v27 = vld [vmem:[#allocation5 + $0x30] sm:$0xff] }
 0x543   : > { %v14967_v34 = vpop.permute.xlu1 %4367  ;;  %v11002_v1 = vpop.f32.mrf.mxu1  ;;  %4870 = vrot.lane.b32.xlu0 %v16967_v47, %s11767_s27 }
 0x544   : > { %v14974_v33 = vadd.f32 %v11002_v1, %v14785_v51 }
 0x545   : > { %v14976_v20 = vpop.permute.xlu0 %4373  ;;  %4872 = vrot.lane.b32.xlu1 %v16968_v45, %s11767_s27  ;;  %v6506_v12 = vpop.f32.mrf.mxu1 }
 0x546   : > { %v14980_v63 = vadd.f32 %v6506_v12, %v6273_v58 }
 0x547   : > { %v14982_v55 = vpop.permute.xlu1 %4371  ;;  %v11005_v15 = vpop.f32.mrf.mxu1  ;;  %8191 = vrot.lane.b32.xlu0 %v8127_v32, %s11767_s27 }
 0x548   : > { %v14986_v52 = vadd.f32 %v11005_v15, %v14798_v62 }
 0x549   : > { %v14988_v51 = vpop.permute.xlu0 %4377  ;;  %8193 = vrot.lane.b32.xlu1 %v8128_v17, %s11767_s27  ;;  %v6519_v36 = vpop.f32.mrf.mxu1 }
 0x54a   : > { %v14992_v49 = vadd.f32 %v6519_v36, %v14805_v11  ;;  %v8132_v11 = vld [vmem:[#allocation5 + $0x28] sm:$0xff] }
 0x54b   : > { %v14994_v29 = vpop.permute.xlu1 %4375  ;;  %v11006_v16 = vpop.f32.mrf.mxu1  ;;  %8195 = vrot.lane.b32.xlu0 %v8129_v24, %s11767_s27 }
 0x54c   : > { %v14998_v25 = vadd.f32 %v11006_v16, %v14810_v0  ;;  %v8137_v16 = vld [vmem:[#allocation5 + $0x50] sm:$0xff] }
 0x54d   : > { %v15000_v62 = vpop.permute.xlu0 %4381  ;;  %8197 = vrot.lane.b32.xlu1 %v8130_v30, %s11767_s27  ;;  %v6522_v54 = vpop.f32.mrf.mxu1 }
 0x54e   : > { %v15004_v46 = vadd.f32 %v6522_v54, %v14815_v41  ;;  %v8134_v41 = vld [vmem:[#allocation5 + $0x38] sm:$0xff] }
 0x54f   : > { %v15006_v21 = vpop.permute.xlu1 %4379  ;;  %v11009_v6 = vpop.f32.mrf.mxu1  ;;  %8199 = vrot.lane.b32.xlu0 %v8131_v40, %s11767_s27 }
 0x550   : > { %v15010_v19 = vadd.f32 %v11009_v6, %v14823_v38  ;;  %v8135_v38 = vld [vmem:[#allocation5 + $0x40] sm:$0xff] }
 0x551   : > { %v15012_v0 = vpop.permute.xlu0 %4385  ;;  %8201 = vrot.lane.b32.xlu1 %v8132_v11, %s11767_s27  ;;  %v6535_v1 = vpop.f32.mrf.mxu1 }
 0x552   : > { %v15016_v47 = vadd.f32 %v6535_v1, %v14830_v5  ;;  %v8136_v5 = vld [vmem:[#allocation5 + $0x48] sm:$0xff] }
 0x553   : > { %v15018_v58 = vpop.permute.xlu1 %4383  ;;  %v11010_v32 = vpop.f32.mrf.mxu1  ;;  %8203 = vrot.lane.b32.xlu0 %v8133_v27, %s11767_s27  ;;  %v8138_v27 = vld [vmem:[#allocation5 + $0x58] sm:$0xff] }
 0x554   : > { %v15022_v45 = vadd.f32 %v11010_v32, %v14835_v26 }
 0x555   : > { %8205 = vrot.lane.b32.xlu1 %v8134_v41, %s11767_s27  ;;  %v6538_v12 = vpop.f32.mrf.mxu1  ;;  %v15025_v17 = vpop.permute.xlu0 %4389 }
 0x556   : > { %v15028_v15 = vadd.f32 %v6538_v12, %v14840_v48 }
 0x557   : > { %v15030_v24 = vpop.permute.xlu1 %4387  ;;  %v11013_v36 = vpop.f32.mrf.mxu1  ;;  %8207 = vrot.lane.b32.xlu0 %v8135_v38, %s11767_s27  ;;  %v8139_v38 = vld [vmem:[#allocation5 + $0x60] sm:$0xff] }
 0x558   : > { %v15034_v30 = vadd.f32 %v11013_v36, %v14848_v60  ;;  %v10977_v26 = vpop.f32.mrf.mxu0 }
 0x559   : > { %v6290_v40 = vadd.f32 %v10977_v26, %v14868_v42  ;;  %8209 = vrot.lane.b32.xlu1 %v8136_v5, %s11767_s27  ;;  %v6551_v54 = vpop.f32.mrf.mxu1  ;;  %v15038_v11 = vpop.permute.xlu0 %4393  ;;  %v8140_v26 = vld [vmem:[#allocation5 + $0x68] sm:$0xff] }
 0x55a   : > { %v15041_v48 = vadd.f32 %v6551_v54, %v14855_v4  ;;  %v6245_v6 = vpop.f32.mrf.mxu0 }
 0x55b   : > { %v6288_v1 = vadd.f32 %v6245_v6, %v14873_v22  ;;  %v15044_v41 = vpop.permute.xlu1 %4391  ;;  %v11014_v60 = vpop.f32.mrf.mxu1  ;;  %8211 = vrot.lane.b32.xlu0 %v8137_v16, %s11767_s27 }
 0x55c   : > { %v15048_v32 = vadd.f32 %v11014_v60, %v14860_v9  ;;  %v10978_v42 = vpop.f32.mrf.mxu0 }
 0x55d   : > { %v6291_v12 = vadd.f32 %v10978_v42, %v14880_v39  ;;  %8213 = vrot.lane.b32.xlu1 %v8138_v27, %s11767_s27  ;;  %v6554_v4 = vpop.f32.mrf.mxu1  ;;  %v15052_v5 = vpop.permute.xlu0 %4397  ;;  %v8141_v27 = vld [vmem:[#allocation5 + $0x70] sm:$0xff] }
 0x55e   : > { %v15055_v36 = vadd.f32 %v6554_v4, %v14865_v50  ;;  %v6248_v22 = vpop.f32.mrf.mxu0 }
 0x55f   : > { %v6289_v54 = vadd.f32 %v6248_v22, %v14884_v8  ;;  %v15058_v16 = vpop.permute.xlu1 %4395  ;;  %v11017_v9 = vpop.f32.mrf.mxu1  ;;  %8215 = vrot.lane.b32.xlu0 %v8139_v38, %s11767_s27 }
 0x560   : > { %16969 = vst [vmem:[#allocation27_spill] sm:$0xff] %v15058_v16  ;;  %v15061_v6 = vadd.f32 %v11017_v9, %v6290_v40  ;;  %v15063_v39 = vpop.f32.mrf.mxu0  ;;  %v8143_v9 = vld [vmem:[#allocation5 + $0x80] sm:$0xff] }
 0x561   : > { %16970 = vst [vmem:[#allocation18_spill] sm:$0xff] %v15063_v39  ;;  %8217 = vrot.lane.b32.xlu1 %v8140_v26, %s11767_s27  ;;  %v6567_v60 = vpop.f32.mrf.mxu1  ;;  %v15066_v42 = vpop.permute.xlu0 %4401 }
 0x562   : > { %16971 = vst [vmem:[#allocation12_spill] sm:$0xff] %v15066_v42  ;;  %v15068_v50 = vadd.f32 %v6567_v60, %v6288_v1  ;;  %v6777_v4 = vpop.f32.mrf.mxu0 }
 0x563   : > { %v6904_v8 = vadd.f32 %v6777_v4, %v14894_v7  ;;  %v15071_v22 = vpop.permute.xlu1 %4399  ;;  %v11018_v16 = vpop.f32.mrf.mxu1  ;;  %8219 = vrot.lane.b32.xlu0 %v8141_v27, %s11767_s27  ;;  %v8144_v7 = vld [vmem:[#allocation5 + $0x88] sm:$0xff] }
 0x564   : > { %16972 = vst [vmem:[#allocation8_spill] sm:$0xff] %v15071_v22  ;;  %v15074_v40 = vadd.f32 %v11018_v16, %v6291_v12  ;;  %v11030_v38 = vpop.f32.mrf.mxu0  ;;  %v8145_v16 = vld [vmem:[#allocation5 + $0x90] sm:$0xff] }
 0x565   : > { %v6907_v26 = vadd.f32 %v11030_v38, %v14901_v14  ;;  %8221 = vrot.lane.b32.xlu1 %v8142_v59, %s11767_s27  ;;  %v6570_v42 = vpop.f32.mrf.mxu1  ;;  %v15078_v1 = vpop.permute.xlu0 %4405 }
 0x566   : > { %16973 = vst [vmem:[#allocation29_spill] sm:$0xff] %v15078_v1  ;;  %v15080_v60 = vadd.f32 %v6570_v42, %v6289_v54  ;;  %v6780_v39 = vpop.f32.mrf.mxu0  ;;  %v8146_v1 = vld [vmem:[#allocation5 + $0x98] sm:$0xff] }
 0x567   : > { %v6905_v4 = vadd.f32 %v6780_v39, %v14905_v43  ;;  %v15083_v22 = vpop.permute.xlu1 %4403  ;;  %v15085_v27 = vpop.f32.mrf.mxu1  ;;  %8223 = vrot.lane.b32.xlu0 %v8143_v9, %s11767_s27 }
 0x568   : > { %16974 = vst [vmem:[#allocation23_spill] sm:$0xff] %v15083_v22  ;;  %16975 = vst [vmem:[#allocation14_spill] sm:$0xff] %v15085_v27  ;;  %v11033_v12 = vpop.f32.mrf.mxu0 }
 0x569   : > { %v6910_v14 = vadd.f32 %v11033_v12, %v14910_v37  ;;  %8225 = vrot.lane.b32.xlu1 %v8144_v7, %s11767_s27  ;;  %v7100_v59 = vpop.f32.mrf.mxu1  ;;  %v15090_v38 = vpop.permute.xlu0 %4409  ;;  %v8147_v37 = vld [vmem:[#allocation5 + $0xa0] sm:$0xff] }
 0x56a   : > { %16976 = vst [vmem:[#allocation31_spill] sm:$0xff] %v15090_v38  ;;  %v15092_v54 = vadd.f32 %v7100_v59, %v6904_v8  ;;  %v6793_v42 = vpop.f32.mrf.mxu0 }
 0x56b   : > { %v6908_v43 = vadd.f32 %v6793_v42, %v14915_v35  ;;  %v15095_v39 = vpop.permute.xlu1 %4407  ;;  %v11070_v22 = vpop.f32.mrf.mxu1  ;;  %8227 = vrot.lane.b32.xlu0 %v8145_v16, %s11767_s27  ;;  %v8148_v35 = vld [vmem:[#allocation5 + $0xa8] sm:$0xff] }
 0x56c   : > { %16977 = vst [vmem:[#allocation22_spill] sm:$0xff] %v15092_v54  ;;  %v15098_v9 = vadd.f32 %v11070_v22, %v6907_v26  ;;  %v11034_v27 = vpop.f32.mrf.mxu0 }
 0x56d   : > { %v6911_v7 = vadd.f32 %v11034_v27, %v14922_v57  ;;  %8229 = vrot.lane.b32.xlu1 %v8146_v1, %s11767_s27  ;;  %v7103_v12 = vpop.f32.mrf.mxu1  ;;  %v15102_v8 = vpop.permute.xlu0 %4413  ;;  %v8149_v57 = vld [vmem:[#allocation5 + $0xb0] sm:$0xff] }
 0x56e   : > { %16978 = vst [vmem:[#allocation24_spill] sm:$0xff] %v15098_v9  ;;  %v15104_v59 = vadd.f32 %v7103_v12, %v6905_v4  ;;  %v6796_v54 = vpop.f32.mrf.mxu0  ;;  %v8151_v9 = vld [vmem:[#allocation5 + $0xc0] sm:$0xff] }
 0x56f   : > { %v6909_v42 = vadd.f32 %v6796_v54, %v14926_v44  ;;  %v11073_v38 = vpop.f32.mrf.mxu1  ;;  %8231 = vrot.lane.b32.xlu0 %v8147_v37, %s11767_s27  ;;  %v15108_v22 = vpop.permute.xlu1 %4411  ;;  %v8150_v44 = vld [vmem:[#allocation5 + $0xb8] sm:$0xff] }
 0x570   : > { %16979 = vst [vmem:[#allocation40_spill] sm:$0xff] %v15104_v59  ;;  %v15110_v26 = vadd.f32 %v11073_v38, %v6910_v14  ;;  %v11037_v16 = vpop.f32.mrf.mxu0 }
 0x571   : > { %v6914_v1 = vadd.f32 %v11037_v16, %v14931_v56  ;;  %8233 = vrot.lane.b32.xlu1 %v8148_v35, %s11767_s27  ;;  %v7116_v27 = vpop.f32.mrf.mxu1  ;;  %v15114_v4 = vpop.permute.xlu0 %4417 }
 0x572   : > { %16980 = vst [vmem:[#allocation33_spill] sm:$0xff] %v15110_v26  ;;  %v15116_v12 = vadd.f32 %v7116_v27, %v6908_v43  ;;  %v6809_v59 = vpop.f32.mrf.mxu0 }
 0x573   : > { %v6912_v54 = vadd.f32 %v6809_v59, %v14938_v28  ;;  %v11074_v37 = vpop.f32.mrf.mxu1  ;;  %8235 = vrot.lane.b32.xlu0 %v8149_v57, %s11767_s27  ;;  %v15128_v26 = vpop.permute.xlu1 %4415  ;;  %v8153_v57 = vld [vmem:[#allocation5 + $0xd0] sm:$0xff] }
 0x574   : > { %16981 = vst [vmem:[#allocation43_spill] sm:$0xff] %v15116_v12  ;;  %v15120_v14 = vadd.f32 %v11074_v37, %v6911_v7  ;;  %v11038_v38 = vpop.f32.mrf.mxu0  ;;  %v8152_v12 = vld [vmem:[#allocation5 + $0xc8] sm:$0xff] }
 0x575   : > { %v6915_v56 = vadd.f32 %v11038_v38, %v14945_v3  ;;  %8237 = vrot.lane.b32.xlu1 %v8150_v44, %s11767_s27  ;;  %v7119_v35 = vpop.f32.mrf.mxu1  ;;  %v15124_v16 = vpop.permute.xlu0 %4421 }
 0x576   : > { %16982 = vst [vmem:[#allocation44_spill] sm:$0xff] %v15120_v14  ;;  %v15126_v43 = vadd.f32 %v7119_v35, %v6909_v42  ;;  %v6812_v27 = vpop.f32.mrf.mxu0 }
 0x577   : > { %v6913_v28 = vadd.f32 %v6812_v27, %v14951_v2  ;;  %v11077_v59 = vpop.f32.mrf.mxu1  ;;  %8239 = vrot.lane.b32.xlu0 %v8151_v9, %s11767_s27  ;;  %v8154_v2 = vld [vmem:[#allocation5 + $0xd8] sm:$0xff] }
 0x578   : > { %16983 = vst [vmem:[#allocation48_spill] sm:$0xff] %v15126_v43  ;;  %v15132_v7 = vadd.f32 %v11077_v59, %v6914_v1  ;;  %v11041_v3 = vpop.f32.mrf.mxu0 }
 0x579   : > { %v6918_v44 = vadd.f32 %v11041_v3, %v14958_v18  ;;  %8241 = vrot.lane.b32.xlu1 %v8152_v12, %s11767_s27  ;;  %v7132_v42 = vpop.f32.mrf.mxu1  ;;  %v4811_v37 = vpop.permute.xlu0 %4810  ;;  %v8155_v3 = vld [vmem:[#allocation5 + $0xe0] sm:$0xff] }
 0x57a   : > { %v15136_v38 = vadd.f32 %v7132_v42, %v6912_v54  ;;  %4906 = vst.msk [vmem:[#allocation2 + $0x19] sm:$0xff] %vm4745_vm11, %v4811_v37  ;;  %v6825_v35 = vpop.f32.mrf.mxu0 }
 0x57b   : > { %v6916_v27 = vadd.f32 %v6825_v35, %v14965_v10  ;;  %v15140_v9 = vpop.permute.xlu1 %4423  ;;  %v11078_v1 = vpop.f32.mrf.mxu1  ;;  %8243 = vrot.lane.b32.xlu0 %v8153_v57, %s11767_s27  ;;  %v8156_v35 = vld [vmem:[#allocation5 + $0xe8] sm:$0xff] }
 0x57c   : > { %v15143_v59 = vadd.f32 %v11078_v1, %v6915_v56  ;;  %v11042_v18 = vpop.f32.mrf.mxu0 }
 0x57d   : > { %v6919_v12 = vadd.f32 %v11042_v18, %v14974_v33  ;;  %8245 = vrot.lane.b32.xlu1 %v8154_v2, %s11767_s27  ;;  %v7135_v54 = vpop.f32.mrf.mxu1  ;;  %v4815_v42 = vpop.permute.xlu0 %4814  ;;  %v8157_v2 = vld [vmem:[#allocation5 + $0xf0] sm:$0xff] }
 0x57e   : > { %v15147_v37 = vadd.f32 %v7135_v54, %v6913_v28  ;;  %4908 = vst.msk [vmem:[#allocation2 + $0x31] sm:$0xff] %vm4745_vm11, %v4815_v42  ;;  %v6828_v10 = vpop.f32.mrf.mxu0  ;;  %v8158_v42 = vld [vmem:[#allocation5 + $0xf8] sm:$0xff] }
 0x57f   : > { %v6917_v43 = vadd.f32 %v6828_v10, %v14980_v63  ;;  %v4813_v14 = vpop.permute.xlu1 %4812  ;;  %v11081_v57 = vpop.f32.mrf.mxu1  ;;  %8247 = vrot.lane.b32.xlu0 %v8155_v3, %s11767_s27  ;;  %v16985_v10 = vld [vmem:[#allocation36_spill] sm:$0xff]  ;;  %v16986_v3 = vld [vmem:[#allocation10_spill] sm:$0xff] }
 0x580   : > { %16984 = vst [vmem:[#allocation47_spill] sm:$0xff] %v15147_v37  ;;  %4907 = vst.msk [vmem:[#allocation2 + $0x21] sm:$0xff] %vm4745_vm11, %v4813_v14  ;;  %v15153_v56 = vadd.f32 %v11081_v57, %v6918_v44  ;;  %v11045_v33 = vpop.f32.mrf.mxu0  ;;  %v4139_v37 = vmul.f32 %v16986_v3, %v16985_v10 }
 0x581   : > { %v6922_v1 = vadd.f32 %v11045_v33, %v14986_v52  ;;  %8249 = vrot.lane.b32.xlu1 %v8156_v35, %s11767_s27  ;;  %v7148_v28 = vpop.f32.mrf.mxu1  ;;  %v4819_v18 = vpop.permute.xlu0 %4818 }
 0x582   : > { %v15157_v54 = vadd.f32 %v7148_v28, %v6916_v27  ;;  %4910 = vst.msk [vmem:[#allocation2 + $0x49] sm:$0xff] %vm4745_vm11, %v4819_v18  ;;  %v6841_v63 = vpop.f32.mrf.mxu0  ;;  %v4459_v27 = vadd.f32 %v14947_v53, %v4139_v37 }
 0x583   : > { %v6920_v14 = vadd.f32 %v6841_v63, %v14992_v49  ;;  %v4817_v44 = vpop.permute.xlu1 %4816  ;;  %v11082_v57 = vpop.f32.mrf.mxu1  ;;  %8251 = vrot.lane.b32.xlu0 %v8157_v2, %s11767_s27  ;;  %v16987_v63 = vld [vmem:[#allocation35_spill] sm:$0xff]  ;;  %v16988_v2 = vld [vmem:[#allocation26_spill] sm:$0xff] }
 0x584   : > { %4909 = vst.msk [vmem:[#allocation2 + $0x39] sm:$0xff] %vm4745_vm11, %v4817_v44  ;;  %v15165_v52 = vadd.f32 %v11082_v57, %v6919_v12  ;;  %v11046_v35 = vpop.f32.mrf.mxu0  ;;  %v4137_v3 = vmul.f32 %v16988_v2, %v16987_v63  ;;  %v16989_v12 = vld [vmem:[#allocation73_spill] sm:$0xff] }
 0x585   : > { %v6923_v33 = vadd.f32 %v11046_v35, %v14998_v25  ;;  %8253 = vrot.lane.b32.xlu1 %v8158_v42, %s11767_s27  ;;  %v7151_v28 = vpop.f32.mrf.mxu1  ;;  %v4823_v18 = vpop.permute.xlu0 %4822  ;;  %v4326_v44 = vmul.f32 %v16989_v12, %v14775_v31 }
 0x586   : > { %v15170_v10 = vadd.f32 %v7151_v28, %v6917_v43  ;;  %4912 = vst.msk [vmem:[#allocation2 + $0x61] sm:$0xff] %vm4745_vm11, %v4823_v18  ;;  %v6844_v49 = vpop.f32.mrf.mxu0  ;;  %v4457_v42 = vadd.f32 %v14933_v23, %v4137_v3  ;;  %v16992_v3 = vld [vmem:[#allocation37_spill] sm:$0xff] }
 0x587   : > { %v6921_v57 = vadd.f32 %v6844_v49, %v15004_v46  ;;  %v4821_v53 = vpop.permute.xlu1 %4820  ;;  %v11085_v37 = vpop.f32.mrf.mxu1  ;;  %4653 = vrot.lane.b32.xlu0 %v4459_v27, %s11769_s7  ;;  %v16990_v49 = vld [vmem:[#allocation17_spill] sm:$0xff]  ;;  %v16991_v27 = vld [vmem:[#allocation15_spill] sm:$0xff] }
 0x588   : > { %4911 = vst.msk [vmem:[#allocation2 + $0x51] sm:$0xff] %vm4745_vm11, %v4821_v53  ;;  %v15180_v25 = vadd.f32 %v11085_v37, %v6922_v1  ;;  %v11049_v43 = vpop.f32.mrf.mxu0  ;;  %v4143_v63 = vmul.f32 %v16991_v27, %v16990_v49  ;;  %v16996_v49 = vld [vmem:[#allocation28_spill] sm:$0xff] }
 0x589   : > { %v6926_v35 = vadd.f32 %v11049_v43, %v15010_v19  ;;  %4419 = vrot.lane.b32.xlu1 %v4326_v44, %s11767_s27  ;;  %v7164_v28 = vpop.f32.mrf.mxu1  ;;  %v4827_v31 = vpop.permute.xlu0 %4826 }
 0x58a   : > { %v15185_v18 = vadd.f32 %v7164_v28, %v6920_v14  ;;  %4914 = vst.msk [vmem:[#allocation2 + $0x79] sm:$0xff] %vm4745_vm11, %v4827_v31  ;;  %v6857_v46 = vpop.f32.mrf.mxu0  ;;  %v16993_v14 = vld [vmem:[#allocation21_spill] sm:$0xff]  ;;  %v4463_v37 = vadd.f32 %v14976_v20, %v4143_v63  ;;  %v16994_v28 = vld [vmem:[#allocation74_spill] sm:$0xff] }
 0x58b   : > { %v6924_v1 = vadd.f32 %v6857_v46, %v15016_v47  ;;  %v4825_v2 = vpop.permute.xlu1 %4824  ;;  %v11086_v53 = vpop.f32.mrf.mxu1  ;;  %4649 = vrot.lane.b32.xlu0 %v4457_v42, %s11769_s7  ;;  %v4140_v44 = vmul.f32 %v16993_v14, %v16992_v3  ;;  %v16998_v3 = vld [vmem:[#allocation13_spill] sm:$0xff] }
 0x58c   : > { %4913 = vst.msk [vmem:[#allocation2 + $0x69] sm:$0xff] %vm4745_vm11, %v4825_v2  ;;  %v15193_v23 = vadd.f32 %v11086_v53, %v6923_v33  ;;  %v11050_v19 = vpop.f32.mrf.mxu0  ;;  %v16995_v33 = vld [vmem:[#allocation11_spill] sm:$0xff] }
 0x58d   : > { %v6927_v43 = vadd.f32 %v11050_v19, %v15022_v45  ;;  %4868 = vrot.lane.b32.xlu1 %v16994_v28, %s11767_s27  ;;  %v7167_v47 = vpop.f32.mrf.mxu1  ;;  %v4831_v31 = vpop.permute.xlu0 %4830  ;;  %v4141_v27 = vmul.f32 %v16996_v49, %v16995_v33  ;;  %v4460_v2 = vadd.f32 %v14967_v34, %v4140_v44  ;;  %v16997_v19 = vld [vmem:[#allocation38_spill] sm:$0xff] }
 0x58e   : > { %v15201_v46 = vadd.f32 %v7167_v47, %v6921_v57  ;;  %4916 = vst.msk [vmem:[#allocation2 + $0x91] sm:$0xff] %vm4745_vm11, %v4831_v31  ;;  %v6860_v42 = vpop.f32.mrf.mxu0  ;;  %v4138_v14 = vmul.f32 %v16998_v3, %v16997_v19  ;;  %v16999_v31 = vld [vmem:[#allocation77_spill] sm:$0xff] }
 0x58f   : > { %v6925_v53 = vadd.f32 %v6860_v42, %v15028_v15  ;;  %v4829_v20 = vpop.permute.xlu1 %4828  ;;  %v11089_v63 = vpop.f32.mrf.mxu1  ;;  %4661 = vrot.lane.b32.xlu0 %v4463_v37, %s11769_s7  ;;  %v4461_v28 = vadd.f32 %v14960_v13, %v4141_v27  ;;  %v17001_v27 = vld [vmem:[#allocation19_spill] sm:$0xff] }
 0x590   : > { %4915 = vst.msk [vmem:[#allocation2 + $0x81] sm:$0xff] %vm4745_vm11, %v4829_v20  ;;  %v15210_v45 = vadd.f32 %v11089_v63, %v6926_v35  ;;  %v11053_v57 = vpop.f32.mrf.mxu0  ;;  %v17000_v35 = vld [vmem:[#allocation16_spill] sm:$0xff]  ;;  %v4458_v33 = vadd.f32 %v14953_v61, %v4138_v14 }
 0x591   : > { %v6930_v47 = vadd.f32 %v11053_v57, %v15034_v30  ;;  %4655 = vrot.lane.b32.xlu1 %v4460_v2, %s11769_s7  ;;  %v7180_v34 = vpop.f32.mrf.mxu1  ;;  %v4835_v15 = vpop.permute.xlu0 %4834  ;;  %v4147_v42 = vmul.f32 %v17000_v35, %v16999_v31  ;;  %v17002_v2 = vld [vmem:[#allocation30_spill] sm:$0xff]  ;;  %v17005_v35 = vld [vmem:[#allocation25_spill] sm:$0xff] }
 0x592   : > { %v15217_v44 = vadd.f32 %v7180_v34, %v6924_v1  ;;  %4918 = vst.msk [vmem:[#allocation2 + $0xa9] sm:$0xff] %vm4745_vm11, %v4835_v15  ;;  %v6873_v37 = vpop.f32.mrf.mxu0  ;;  %v4144_v63 = vmul.f32 %v17002_v2, %v17001_v27  ;;  %v17007_v2 = vld [vmem:[#allocation84_spill] sm:$0xff] }
 0x593   : > { %v6928_v49 = vadd.f32 %v6873_v37, %v15041_v48  ;;  %v4833_v20 = vpop.permute.xlu1 %4832  ;;  %v11090_v13 = vpop.f32.mrf.mxu1  ;;  %4657 = vrot.lane.b32.xlu0 %v4461_v28, %s11769_s7  ;;  %v4467_v57 = vadd.f32 %v15000_v62, %v4147_v42  ;;  %v17003_v28 = vld [vmem:[#allocation76_spill] sm:$0xff] }
 0x594   : > { %4917 = vst.msk [vmem:[#allocation2 + $0x99] sm:$0xff] %vm4745_vm11, %v4833_v20  ;;  %v15226_v30 = vadd.f32 %v11090_v13, %v6927_v43  ;;  %v11054_v1 = vpop.f32.mrf.mxu0  ;;  %v17004_v43 = vld [vmem:[#allocation9_spill] sm:$0xff]  ;;  %v4464_v15 = vadd.f32 %v14994_v29, %v4144_v63  ;;  %v17006_v42 = vld [vmem:[#allocation20_spill] sm:$0xff] }
 0x595   : > { %v6931_v19 = vadd.f32 %v11054_v1, %v15048_v32  ;;  %4651 = vrot.lane.b32.xlu1 %v4458_v33, %s11769_s7  ;;  %v7183_v61 = vpop.f32.mrf.mxu1  ;;  %v4839_v48 = vpop.permute.xlu0 %4838  ;;  %v4145_v34 = vmul.f32 %v17004_v43, %v17003_v28  ;;  %v4142_v33 = vmul.f32 %v17006_v42, %v17005_v35  ;;  %v17010_v28 = vld [vmem:[#allocation34_spill] sm:$0xff] }
 0x596   : > { %v15233_v3 = vadd.f32 %v7183_v61, %v6925_v53  ;;  %4920 = vst.msk [vmem:[#allocation2 + $0xc1] sm:$0xff] %vm4745_vm11, %v4839_v48  ;;  %v6876_v14 = vpop.f32.mrf.mxu0 }
 0x597   : > { %v6929_v37 = vadd.f32 %v6876_v14, %v15055_v36  ;;  %v4837_v31 = vpop.permute.xlu1 %4836  ;;  %v11093_v62 = vpop.f32.mrf.mxu1  ;;  %4669 = vrot.lane.b32.xlu0 %v4467_v57, %s11769_s7  ;;  %v4465_v20 = vadd.f32 %v14988_v51, %v4145_v34  ;;  %v4462_v57 = vadd.f32 %v14982_v55, %v4142_v33  ;;  %v17009_v14 = vld [vmem:[#allocation83_spill] sm:$0xff] }
 0x598   : > { %4919 = vst.msk [vmem:[#allocation2 + $0xb1] sm:$0xff] %vm4745_vm11, %v4837_v31  ;;  %v15242_v32 = vadd.f32 %v11093_v62, %v6930_v47  ;;  %v11057_v53 = vpop.f32.mrf.mxu0  ;;  %v17008_v47 = vld [vmem:[#allocation41_spill] sm:$0xff]  ;;  %v4148_v43 = vmul.f32 %v17010_v28, %v17009_v14 }
 0x599   : > { %v6934_v13 = vadd.f32 %v11057_v53, %v15061_v6  ;;  %4663 = vrot.lane.b32.xlu1 %v4464_v15, %s11769_s7  ;;  %v7196_v29 = vpop.f32.mrf.mxu1  ;;  %v4843_v36 = vpop.permute.xlu0 %4842  ;;  %v4151_v63 = vmul.f32 %v17008_v47, %v17007_v2  ;;  %v17011_v53 = vld [vmem:[#allocation80_spill] sm:$0xff] }
 0x59a   : > { %v15249_v1 = vadd.f32 %v7196_v29, %v6928_v49  ;;  %4922 = vst.msk [vmem:[#allocation2 + $0xd9] sm:$0xff] %vm4745_vm11, %v4843_v36  ;;  %v6889_v27 = vpop.f32.mrf.mxu0  ;;  %v4468_v42 = vadd.f32 %v15018_v58, %v4148_v43  ;;  %v17013_v29 = vld [vmem:[#allocation75_spill] sm:$0xff]  ;;  %v17014_v36 = vld [vmem:[#allocation32_spill] sm:$0xff]  ;;  %v17018_v43 = vld [vmem:[#allocation45_spill] sm:$0xff] }
 0x59b   : > { %v6932_v61 = vadd.f32 %v6889_v27, %v15068_v50  ;;  %v4841_v48 = vpop.permute.xlu1 %4840  ;;  %v11094_v51 = vpop.f32.mrf.mxu1  ;;  %4665 = vrot.lane.b32.xlu0 %v4465_v20, %s11769_s7  ;;  %v4471_v34 = vadd.f32 %v15025_v17, %v4151_v63  ;;  %v4146_v27 = vmul.f32 %v17014_v36, %v17013_v29  ;;  %v17022_v29 = vld [vmem:[#allocation85_spill] sm:$0xff] }
 0x59c   : > { %4921 = vst.msk [vmem:[#allocation2 + $0xc9] sm:$0xff] %vm4745_vm11, %v4841_v48  ;;  %v15258_v6 = vadd.f32 %v11094_v51, %v6931_v19  ;;  %v11058_v49 = vpop.f32.mrf.mxu0  ;;  %v17012_v19 = vld [vmem:[#allocation39_spill] sm:$0xff] }
 0x59d   : > { %v6935_v15 = vadd.f32 %v11058_v49, %v15074_v40  ;;  %4659 = vrot.lane.b32.xlu1 %v4462_v57, %s11769_s7  ;;  %v7199_v55 = vpop.f32.mrf.mxu1  ;;  %v4847_v50 = vpop.permute.xlu0 %4846  ;;  %v4149_v35 = vmul.f32 %v17012_v19, %v17011_v53  ;;  %v17015_v57 = vld [vmem:[#allocation88_spill] sm:$0xff]  ;;  %v4466_v51 = vadd.f32 %v15006_v21, %v4146_v27  ;;  %v17020_v19 = vld [vmem:[#allocation86_spill] sm:$0xff] }
 0x59e   : > { %v15265_v31 = vadd.f32 %v7199_v55, %v6929_v37  ;;  %4924 = vst.msk [vmem:[#allocation2 + $0xf1] sm:$0xff] %vm4745_vm11, %v4847_v50  ;;  %v6892_v62 = vpop.f32.mrf.mxu0 }
 0x59f   : > { %v6933_v33 = vadd.f32 %v6892_v62, %v15080_v60  ;;  %v4845_v20 = vpop.permute.xlu1 %4844  ;;  %v11097_v17 = vpop.f32.mrf.mxu1  ;;  %4677 = vrot.lane.b32.xlu0 %v4471_v34, %s11769_s7  ;;  %v4469_v2 = vadd.f32 %v15012_v0, %v4149_v35 }
 0x5a0   : > { %4923 = vst.msk [vmem:[#allocation2 + $0xe1] sm:$0xff] %vm4745_vm11, %v4845_v20  ;;  %v15274_v40 = vadd.f32 %v11097_v17, %v6934_v13  ;;  %v15276_v37 = vpop.f32.mrf.mxu0  ;;  %v17016_v13 = vld [vmem:[#allocation49_spill] sm:$0xff] }
 0x5a1   : > { %4671 = vrot.lane.b32.xlu1 %v4468_v42, %s11769_s7  ;;  %v7212_v58 = vpop.f32.mrf.mxu1  ;;  %v4851_v47 = vpop.permute.xlu0 %4850  ;;  %v4155_v48 = vmul.f32 %v17016_v13, %v17015_v57  ;;  %v17025_v57 = vld [vmem:[#allocation57_spill] sm:$0xff] }
 0x5a2   : > { %v15282_v60 = vadd.f32 %v7212_v58, %v6932_v61  ;;  %4926 = vst.msk [vmem:[#allocation2 + $0x109] sm:$0xff] %vm4745_vm11, %v4851_v47  ;;  %v15285_v63 = vpop.f32.mrf.mxu0  ;;  %v17017_v61 = vld [vmem:[#allocation87_spill] sm:$0xff]  ;;  %v17024_v47 = vld [vmem:[#allocation92_spill] sm:$0xff] }
 0x5a3   : > { %v4849_v49 = vpop.permute.xlu1 %4848  ;;  %v11098_v14 = vpop.f32.mrf.mxu1  ;;  %4673 = vrot.lane.b32.xlu0 %v4469_v2, %s11769_s7  ;;  %v4152_v34 = vmul.f32 %v17018_v43, %v17017_v61  ;;  %v4475_v55 = vadd.f32 %v15052_v5, %v4155_v48  ;;  %v4159_v13 = vmul.f32 %v17025_v57, %v17024_v47  ;;  %v17027_v61 = vld [vmem:[#allocation53_spill] sm:$0xff] }
 0x5a4   : > { %4925 = vst.msk [vmem:[#allocation2 + $0xf9] sm:$0xff] %vm4745_vm11, %v4849_v49  ;;  %v15292_v0 = vadd.f32 %v11098_v14, %v6935_v15  ;;  %v15294_v28 = vpop.f32.mrf.mxu0  ;;  %v17021_v15 = vld [vmem:[#allocation46_spill] sm:$0xff]  ;;  %v17026_v14 = vld [vmem:[#allocation91_spill] sm:$0xff]  ;;  %v17034_v57 = vld [vmem:[#allocation89_spill] sm:$0xff] }
 0x5a5   : > { %4667 = vrot.lane.b32.xlu1 %v4466_v51, %s11769_s7  ;;  %v7215_v50 = vpop.f32.mrf.mxu1  ;;  %v4855_v62 = vpop.permute.xlu0 %4854  ;;  %v4153_v35 = vmul.f32 %v17021_v15, %v17020_v19  ;;  %v4472_v42 = vadd.f32 %v15044_v41, %v4152_v34  ;;  %v4156_v43 = vmul.f32 %v17027_v61, %v17026_v14  ;;  %v17028_v34 = vld [vmem:[#allocation29_spill] sm:$0xff]  ;;  %v17029_v19 = vld [vmem:[#allocation90_spill] sm:$0xff]  ;;  %v17030_v15 = vld [vmem:[#allocation55_spill] sm:$0xff] }
 0x5a6   : > { %v15300_v21 = vadd.f32 %v7215_v50, %v6933_v33  ;;  %4928 = vst.msk [vmem:[#allocation2 + $0x121] sm:$0xff] %vm4745_vm11, %v4855_v62  ;;  %v15303_v53 = vpop.f32.mrf.mxu0  ;;  %v17023_v33 = vld [vmem:[#allocation42_spill] sm:$0xff] }
 0x5a7   : > { %v4853_v20 = vpop.permute.xlu1 %4852  ;;  %v11149_v17 = vpop.f32.mrf.mxu1  ;;  %4685 = vrot.lane.b32.xlu0 %v4475_v55, %s11769_s7  ;;  %v4150_v36 = vmul.f32 %v17023_v33, %v17022_v29  ;;  %v4473_v27 = vadd.f32 %v15038_v11, %v4153_v35  ;;  %v4479_v55 = vadd.f32 %v17028_v34, %v4159_v13  ;;  %v4157_v35 = vmul.f32 %v17030_v15, %v17029_v19  ;;  %v17033_v33 = vld [vmem:[#allocation8_spill] sm:$0xff]  ;;  %v17035_v13 = vld [vmem:[#allocation51_spill] sm:$0xff]  ;;  %v17037_v61 = vld [vmem:[#allocation14_spill] sm:$0xff] }
 0x5a8   : > { %17019 = vst [vmem:[#allocation103_spill] sm:$0xff] %v15300_v21  ;;  %4927 = vst.msk [vmem:[#allocation2 + $0x111] sm:$0xff] %vm4745_vm11, %v4853_v20  ;;  %v15310_v5 = vpop.f32.mrf.mxu0  ;;  %v17032_v20 = vld [vmem:[#allocation18_spill] sm:$0xff]  ;;  %v17038_v19 = vld [vmem:[#allocation96_spill] sm:$0xff] }
 0x5a9   : > { %4679 = vrot.lane.b32.xlu1 %v4472_v42, %s11769_s7  ;;  %v15316_v2 = vpop.f32.mrf.mxu1  ;;  %v4859_v58 = vpop.permute.xlu0 %4858  ;;  %v4470_v48 = vadd.f32 %v15030_v24, %v4150_v36  ;;  %v17031_v42 = vld [vmem:[#allocation7_spill] sm:$0xff]  ;;  %v4476_v36 = vadd.f32 %v17033_v33, %v4156_v43 }
 0x5aa   : > { %4930 = vst.msk [vmem:[#allocation2 + $0x139] sm:$0xff] %vm4745_vm11, %v4859_v58  ;;  %v15319_v41 = vpop.f32.mrf.mxu0  ;;  %v6906_v29 = vadd.f32 %v17032_v20, %v17031_v42  ;;  %v17040_v42 = vld [vmem:[#allocation27_spill] sm:$0xff] }
 0x5ab   : > { %v4857_v51 = vpop.permute.xlu1 %4856  ;;  %v15324_v49 = vpop.f32.mrf.mxu1  ;;  %4681 = vrot.lane.b32.xlu0 %v4473_v27, %s11769_s7 }
 0x5ac   : > { %4929 = vst.msk [vmem:[#allocation2 + $0x129] sm:$0xff] %vm4745_vm11, %v4857_v51  ;;  %v15328_v11 = vpop.f32.mrf.mxu0  ;;  %v17036_v51 = vld [vmem:[#allocation12_spill] sm:$0xff]  ;;  %v7229_v34 = vadd.f32 %v17037_v61, %v6906_v29  ;;  %v17041_v29 = vld [vmem:[#allocation95_spill] sm:$0xff] }
 0x5ad   : > { %4675 = vrot.lane.b32.xlu1 %v4470_v48, %s11769_s7  ;;  %v15334_v50 = vpop.f32.mrf.mxu1  ;;  %v4863_v62 = vpop.permute.xlu0 %4862  ;;  %v4154_v48 = vmul.f32 %v17035_v13, %v17034_v57  ;;  %v4477_v14 = vadd.f32 %v17036_v51, %v4157_v35 }
 0x5ae   : > { %4932 = vst.msk [vmem:[#allocation2 + $0x151] sm:$0xff] %vm4745_vm11, %v4863_v62  ;;  %v15337_v24 = vpop.f32.mrf.mxu0  ;;  %v7551_v33 = vadd.f32 %v15276_v37, %v7229_v34  ;;  %v17043_v34 = vld [vmem:[#allocation94_spill] sm:$0xff] }
 0x5af   : > { %v4861_v27 = vpop.permute.xlu1 %4860  ;;  %v15344_v58 = vpop.f32.mrf.mxu1  ;;  %4693 = vrot.lane.b32.xlu0 %v4479_v55, %s11769_s7  ;;  %v17039_v55 = vld [vmem:[#allocation65_spill] sm:$0xff]  ;;  %v4474_v20 = vadd.f32 %v17040_v42, %v4154_v48 }
 0x5b0   : > { %4931 = vst.msk [vmem:[#allocation2 + $0x141] sm:$0xff] %vm4745_vm11, %v4861_v27  ;;  %v15348_v47 = vpop.f32.mrf.mxu0  ;;  %v4163_v15 = vmul.f32 %v17039_v55, %v17038_v19  ;;  %v15371_v61 = vadd.f32 %v11149_v17, %v7551_v33  ;;  %v17045_v17 = vld [vmem:[#allocation93_spill] sm:$0xff]  ;;  %v17047_v33 = vld [vmem:[#allocation31_spill] sm:$0xff] }
 0x5b1   : > { %4687 = vrot.lane.b32.xlu1 %v4476_v36, %s11769_s7  ;;  %v15355_v62 = vpop.f32.mrf.mxu1  ;;  %v4867_v43 = vpop.permute.xlu0 %4866  ;;  %v17042_v36 = vld [vmem:[#allocation61_spill] sm:$0xff] }
 0x5b2   : > { %4934 = vst.msk [vmem:[#allocation2 + $0x169] sm:$0xff] %vm4745_vm11, %v4867_v43  ;;  %v15365_v35 = vpop.f32.mrf.mxu0  ;;  %v4160_v13 = vmul.f32 %v17042_v36, %v17041_v29  ;;  %v4483_v51 = vadd.f32 %v15102_v8, %v4163_v15  ;;  %v17046_v15 = vld [vmem:[#allocation59_spill] sm:$0xff]  ;;  %11534 = vtanh.f32 %v15371_v61  ;;  %v17049_v36 = vld [vmem:[#allocation100_spill] sm:$0xff] }
 0x5b3   : > { %v4865_v27 = vpop.permute.xlu1 %4864  ;;  %v15362_v57 = vpop.f32.mrf.mxu1  ;;  %4689 = vrot.lane.b32.xlu0 %v4477_v14, %s11769_s7  ;;  %v17044_v14 = vld [vmem:[#allocation63_spill] sm:$0xff] }
 0x5b4   : > { %4933 = vst.msk [vmem:[#allocation2 + $0x159] sm:$0xff] %vm4745_vm11, %v4865_v27  ;;  %v4161_v43 = vmul.f32 %v17044_v14, %v17043_v34  ;;  %v4480_v19 = vadd.f32 %v15095_v39, %v4160_v13  ;;  %v15383_v8 = vpop.f32.mrf.mxu0  ;;  %v17050_v13 = vld [vmem:[#allocation78_spill] sm:$0xff] }
 0x5b5   : > { %4683 = vrot.lane.b32.xlu1 %v4474_v20, %s11769_s7  ;;  %v15374_v48 = vpop.f32.mrf.mxu1  ;;  %v4871_v37 = vpop.permute.xlu0 %4870  ;;  %v4158_v20 = vmul.f32 %v17046_v15, %v17045_v17  ;;  %v17052_v14 = vld [vmem:[#allocation22_spill] sm:$0xff]  ;;  %v17055_v15 = vld [vmem:[#allocation69_spill] sm:$0xff] }
 0x5b6   : > { %4936 = vst.msk [vmem:[#allocation2 + $0x181] sm:$0xff] %vm4745_vm11, %v4871_v37  ;;  %v4481_v27 = vadd.f32 %v17047_v33, %v4161_v43  ;;  %v17051_v37 = vld [vmem:[#allocation23_spill] sm:$0xff]  ;;  %v15405_v43 = vpop.f32.mrf.mxu0 }
 0x5b7   : > { %v4873_v55 = vpop.permute.xlu1 %4872  ;;  %v15380_v42 = vpop.f32.mrf.mxu1  ;;  %4701 = vrot.lane.b32.xlu0 %v4483_v51, %s11769_s7  ;;  %v4167_v51 = vmul.f32 %v17050_v13, %v17049_v36  ;;  %v4478_v34 = vadd.f32 %v17051_v37, %v4158_v20  ;;  %v17057_v13 = vld [vmem:[#allocation98_spill] sm:$0xff]  ;;  %v17058_v37 = vld [vmem:[#allocation71_spill] sm:$0xff] }
 0x5b8   : > { %4937 = vst.msk [vmem:[#allocation2 + $0x189] sm:$0xff] %vm4745_vm11, %v4873_v55  ;;  %v7549_v55 = vadd.f32 %v15285_v63, %v17052_v14  ;;  %v4165_v14 = vmul.f32 %v17058_v37, %v17057_v13 }
 0x5b9   : > { %4695 = vrot.lane.b32.xlu1 %v4480_v19, %s11769_s7  ;;  %v15391_v29 = vpop.f32.mrf.mxu1  ;;  %v15393_v39 = vpop.permute.xlu0 %8191  ;;  %v17054_v19 = vld [vmem:[#allocation99_spill] sm:$0xff] }
 0x5ba   : > { %17048 = vst [vmem:[#allocation50_spill] sm:$0xff] %v15393_v39  ;;  %v4164_v33 = vmul.f32 %v17055_v15, %v17054_v19  ;;  %v4487_v39 = vadd.f32 %v15124_v16, %v4167_v51  ;;  %v15411_v36 = vadd.f32 %v15316_v2, %v7549_v55  ;;  %v15424_v19 = vpop.f32.mrf.mxu0  ;;  %v17060_v16 = vld [vmem:[#allocation97_spill] sm:$0xff]  ;;  %v17061_v2 = vld [vmem:[#allocation67_spill] sm:$0xff] }
 0x5bb   : > { %v15400_v21 = vpop.permute.xlu1 %8193  ;;  %v15402_v17 = vpop.f32.mrf.mxu1  ;;  %4697 = vrot.lane.b32.xlu0 %v4481_v27, %s11769_s7  ;;  %v4162_v51 = vmul.f32 %v17061_v2, %v17060_v16 }
 0x5bc   : > { %17053 = vst [vmem:[#allocation52_spill] sm:$0xff] %v15400_v21  ;;  %v4484_v27 = vadd.f32 %v15128_v26, %v4164_v33  ;;  %11536 = vtanh.f32 %v15411_v36  ;;  %v17063_v33 = vld [vmem:[#allocation33_spill] sm:$0xff]  ;;  %v15441_v37 = vpop.f32.mrf.mxu0 }
 0x5bd   : > { %4691 = vrot.lane.b32.xlu1 %v4478_v34, %s11769_s7  ;;  %v15414_v20 = vpop.permute.xlu0 %8195  ;;  %v15416_v63 = vpop.f32.mrf.mxu1  ;;  %v4485_v34 = vadd.f32 %v15114_v4, %v4165_v14  ;;  %v4482_v26 = vadd.f32 %v15108_v22, %v4162_v51  ;;  %v17065_v4 = vld [vmem:[#allocation102_spill] sm:$0xff]  ;;  %v17066_v14 = vld [vmem:[#allocation81_spill] sm:$0xff] }
 0x5be   : > { %17056 = vst [vmem:[#allocation56_spill] sm:$0xff] %v15414_v20  ;;  %v4168_v16 = vmul.f32 %v17066_v14, %v17065_v4 }
 0x5bf   : > { %v15421_v21 = vpop.permute.xlu1 %8197  ;;  %4709 = vrot.lane.b32.xlu0 %v4487_v39, %s11769_s7  ;;  %v15433_v15 = vpop.f32.mrf.mxu1  ;;  %v7555_v39 = vadd.f32 %v15310_v5, %v17063_v33 }
 0x5c0   : > { %17059 = vst [vmem:[#allocation54_spill] sm:$0xff] %v15421_v21  ;;  %v11535_v22 = vpop.eup %11534  ;;  %v4488_v5 = vadd.f32 %v15140_v9, %v4168_v16 }
 0x5c1   : > { %4703 = vrot.lane.b32.xlu1 %v4484_v27, %s11769_s7  ;;  %v15431_v55 = vpop.permute.xlu0 %8199  ;;  %v15446_v27 = vadd.f32 %v15344_v58, %v7555_v39  ;;  %v15451_v51 = vpop.f32.mrf.mxu1  ;;  %v17070_v39 = vld [vmem:[#allocation43_spill] sm:$0xff] }
 0x5c2   : > { %17062 = vst [vmem:[#allocation58_spill] sm:$0xff] %v15431_v55  ;;  %v7553_v4 = vadd.f32 %v15319_v41, %v17070_v39  ;;  %v7559_v39 = vadd.f32 %v15348_v47, %v15132_v7 }
 0x5c3   : > { %v15438_v13 = vpop.permute.xlu1 %8201  ;;  %4705 = vrot.lane.b32.xlu0 %v4485_v34, %s11769_s7  ;;  %v15457_v34 = vpop.f32.mrf.mxu0  ;;  %11538 = vtanh.f32 %v15446_v27 }
 0x5c4   : > { %17064 = vst [vmem:[#allocation60_spill] sm:$0xff] %v15438_v13  ;;  %v15473_v16 = vadd.f32 %v15355_v62, %v7553_v4 }
 0x5c5   : > { %4699 = vrot.lane.b32.xlu1 %v4482_v26, %s11769_s7  ;;  %v15449_v2 = vpop.permute.xlu0 %8203  ;;  %v15463_v26 = vpop.f32.mrf.mxu1 }
 0x5c6   : > { %17067 = vst [vmem:[#allocation64_spill] sm:$0xff] %v15449_v2  ;;  %v15470_v9 = vpop.f32.mrf.mxu0  ;;  %17072 = vst [vmem:[#allocation72_spill] sm:$0xff] %v15473_v16  ;;  %11540 = vtanh.f32 %v15473_v16 }
 0x5c7   : > { %v15454_v33 = vpop.permute.xlu1 %8205  ;;  %8643 = vrot.lane.b32.xlu0 %v11535_v22, %s11767_s27 }
 0x5c8   : > { %17068 = vst [vmem:[#allocation62_spill] sm:$0xff] %v15454_v33  ;;  %v11125_v55 = vpop.f32.mrf.mxu0 }
 0x5c9   : > { %4711 = vrot.lane.b32.xlu1 %v4488_v5, %s11769_s7  ;;  %v15461_v58 = vpop.permute.xlu0 %8207  ;;  %v11537_v33 = vpop.eup %11536 }
 0x5ca   : > { %17069 = vst [vmem:[#allocation66_spill] sm:$0xff] %v15461_v58  ;;  %v15477_v5 = vpop.f32.mrf.mxu1  ;;  %v7486_v4 = vpop.f32.mrf.mxu0 }
 0x5cb   : > { %v15467_v14 = vpop.permute.xlu1 %8209  ;;  %8355 = vrot.lane.b32.xlu0 %v11535_v22, %s11768_s26 }
 0x5cc   : > { %17071 = vst [vmem:[#allocation68_spill] sm:$0xff] %v15467_v14  ;;  %v11165_v22 = vpop.f32.mrf.mxu1  ;;  %v15491_v14 = vadd.f32 %v15380_v42, %v7559_v39  ;;  %v7557_v42 = vadd.f32 %v15365_v35, %v15136_v38 }
 0x5cd   : > { %v15475_v13 = vpop.permute.xlu0 %8211 }
 0x5ce   : > { %17073 = vst [vmem:[#allocation70_spill] sm:$0xff] %v15475_v13  ;;  %17077 = vst [vmem:[#allocation10_spill] sm:$0xff] %v15491_v14  ;;  %v7808_v2 = vpop.f32.mrf.mxu1  ;;  %11542 = vtanh.f32 %v15491_v14 }
 0x5cf   : > { %v15479_v58 = vpop.permute.xlu1 %8213  ;;  %8639 = vrot.lane.b32.xlu0 %v11537_v33, %s11767_s27 }
 0x5d0   : > { %17074 = vst [vmem:[#allocation79_spill] sm:$0xff] %v15479_v58  ;;  %v11539_v13 = vpop.eup %11538  ;;  %v15503_v47 = vpop.f32.mrf.mxu1 }
 0x5d1   : > { %v15483_v41 = vpop.permute.xlu0 %8215 }
 0x5d2   : > { %17075 = vst [vmem:[#allocation82_spill] sm:$0xff] %v15483_v41  ;;  %v15498_v41 = vpop.f32.mrf.mxu0  ;;  %v15517_v20 = vpop.f32.mrf.mxu1 }
 0x5d3   : > { %v15487_v62 = vpop.permute.xlu1 %8217  ;;  %8351 = vrot.lane.b32.xlu0 %v11537_v33, %s11768_s26 }
 0x5d4   : > { %17076 = vst [vmem:[#allocation36_spill] sm:$0xff] %v15487_v62  ;;  %v15510_v39 = vpop.f32.mrf.mxu0  ;;  %v15513_v62 = vadd.f32 %v15391_v29, %v7557_v42  ;;  %v11169_v35 = vpop.f32.mrf.mxu1 }
 0x5d5   : > { %v15493_v58 = vpop.permute.xlu0 %8219 }
 0x5d6   : > { %17078 = vst [vmem:[#allocation35_spill] sm:$0xff] %v15493_v58  ;;  %17082 = vst [vmem:[#allocation15_spill] sm:$0xff] %v15513_v62  ;;  %v11541_v58 = vpop.eup %11540  ;;  %v11129_v14 = vpop.f32.mrf.mxu0  ;;  %11544 = vtanh.f32 %v15513_v62  ;;  %v7561_v62 = vadd.f32 %v15441_v37, %v15157_v54 }
 0x5d7   : > { %v15495_v21 = vpop.permute.xlu1 %8221  ;;  %8651 = vrot.lane.b32.xlu0 %v11539_v13, %s11767_s27  ;;  %v7824_v16 = vpop.f32.mrf.mxu1 }
 0x5d8   : > { %17079 = vst [vmem:[#allocation26_spill] sm:$0xff] %v15495_v21  ;;  %v7502_v42 = vpop.f32.mrf.mxu0 }
 0x5d9   : > { %v15501_v7 = vpop.permute.xlu0 %8223 }
 0x5da   : > { %17080 = vst [vmem:[#allocation73_spill] sm:$0xff] %v15501_v7 }
 0x5db   : > { %v15507_v33 = vpop.permute.xlu1 %8225  ;;  %8363 = vrot.lane.b32.xlu0 %v11539_v13, %s11768_s26  ;;  %v7563_v13 = vadd.f32 %v15424_v19, %v15153_v56  ;;  %v15540_v56 = vpop.f32.mrf.mxu0  ;;  %v15544_v19 = vadd.f32 %v15451_v51, %v7561_v62  ;;  %v17092_v62 = vld [vmem:[#allocation24_spill] sm:$0xff] }
 0x5dc   : > { %17081 = vst [vmem:[#allocation17_spill] sm:$0xff] %v15507_v33 }
 0x5dd   : > { %v15515_v21 = vpop.permute.xlu0 %8227  ;;  %v15531_v33 = vadd.f32 %v15433_v15, %v7563_v13  ;;  %v7567_v13 = vadd.f32 %v11125_v55, %v15180_v25  ;;  %v15554_v54 = vpop.f32.mrf.mxu0  ;;  %v7565_v25 = vadd.f32 %v7486_v4, %v15185_v18 }
 0x5de   : > { %17083 = vst [vmem:[#allocation37_spill] sm:$0xff] %v15515_v21  ;;  %v11543_v21 = vpop.eup %11542 }
 0x5df   : > { %v15519_v7 = vpop.permute.xlu1 %8229  ;;  %8647 = vrot.lane.b32.xlu0 %v11541_v58, %s11767_s27  ;;  %11546 = vtanh.f32 %v15531_v33  ;;  %v15557_v37 = vadd.f32 %v11165_v22, %v7567_v13  ;;  %v15573_v22 = vadd.f32 %v7808_v2, %v7565_v25 }
 0x5e0   : > { %17084 = vst [vmem:[#allocation21_spill] sm:$0xff] %v15519_v7  ;;  %11548 = vtanh.f32 %v15544_v19 }
 0x5e1   : > { %v15523_v38 = vpop.permute.xlu0 %8231  ;;  %11550 = vtanh.f32 %v15557_v37 }
 0x5e2   : > { %17085 = vst [vmem:[#allocation74_spill] sm:$0xff] %v15523_v38 }
 0x5e3   : > { %v15527_v29 = vpop.permute.xlu1 %8233  ;;  %8359 = vrot.lane.b32.xlu0 %v11541_v58, %s11768_s26  ;;  %v15548_v58 = vpop.f32.mrf.mxu1 }
 0x5e4   : > { %17086 = vst [vmem:[#allocation11_spill] sm:$0xff] %v15527_v29  ;;  %v11545_v51 = vpop.eup %11544 }
 0x5e5   : > { %v15533_v7 = vpop.permute.xlu0 %8235 }
 0x5e6   : > { %17087 = vst [vmem:[#allocation28_spill] sm:$0xff] %v15533_v7  ;;  %v15563_v7 = vpop.f32.mrf.mxu1 }
 0x5e7   : > { %v15537_v38 = vpop.permute.xlu1 %8237  ;;  %8659 = vrot.lane.b32.xlu0 %v11543_v21, %s11767_s27 }
 0x5e8   : > { %17088 = vst [vmem:[#allocation38_spill] sm:$0xff] %v15537_v38 }
 0x5e9   : > { %v15546_v15 = vpop.permute.xlu0 %8239 }
 0x5ea   : > { %17089 = vst [vmem:[#allocation13_spill] sm:$0xff] %v15546_v15  ;;  %v7552_v15 = vadd.f32 %v15294_v28, %v17092_v62  ;;  %v7571_v28 = vadd.f32 %v11129_v14, %v15210_v45  ;;  %v7569_v45 = vadd.f32 %v7502_v42, %v15217_v44 }
 0x5eb   : > { %v15551_v29 = vpop.permute.xlu1 %8241  ;;  %8371 = vrot.lane.b32.xlu0 %v11543_v21, %s11768_s26 }
 0x5ec   : > { %17090 = vst [vmem:[#allocation77_spill] sm:$0xff] %v15551_v29  ;;  %v15570_v21 = vadd.f32 %v15324_v49, %v7552_v15  ;;  %v11133_v29 = vpop.f32.mrf.mxu0  ;;  %v15583_v49 = vadd.f32 %v11169_v35, %v7571_v28  ;;  %v15587_v2 = vpop.eup %11546  ;;  %v17097_v15 = vld [vmem:[#allocation40_spill] sm:$0xff]  ;;  %v15602_v28 = vadd.f32 %v7824_v16, %v7569_v45 }
 0x5ed   : > { %v15559_v38 = vpop.permute.xlu0 %8243  ;;  %v7550_v25 = vadd.f32 %v15303_v53, %v17097_v15  ;;  %v17099_v53 = vld [vmem:[#allocation101_spill] sm:$0xff]  ;;  %v7575_v15 = vadd.f32 %v11133_v29, %v15242_v32 }
 0x5ee   : > { %17091 = vst [vmem:[#allocation16_spill] sm:$0xff] %v15559_v38  ;;  %v11173_v38 = vpop.f32.mrf.mxu1  ;;  %11552 = vtanh.f32 %v15570_v21  ;;  %v7518_v18 = vpop.f32.mrf.mxu0  ;;  %v4166_v44 = vmul.f32 %v16989_v12, %v17099_v53 }
 0x5ef   : > { %v15566_v55 = vpop.permute.xlu1 %8245  ;;  %8655 = vrot.lane.b32.xlu0 %v11545_v51, %s11767_s27  ;;  %11554 = vtanh.f32 %v15573_v22  ;;  %v15618_v45 = vadd.f32 %v11173_v38, %v7575_v15  ;;  %v7573_v29 = vadd.f32 %v7518_v18, %v15249_v1 }
 0x5f0   : > { %17093 = vst [vmem:[#allocation19_spill] sm:$0xff] %v15566_v55  ;;  %v15599_v35 = vpop.f32.mrf.mxu0  ;;  %11556 = vtanh.f32 %v15583_v49 }
 0x5f1   : > { %v15575_v13 = vpop.permute.xlu0 %8247 }
 0x5f2   : > { %17094 = vst [vmem:[#allocation30_spill] sm:$0xff] %v15575_v13  ;;  %v7840_v13 = vpop.f32.mrf.mxu1  ;;  %v15615_v16 = vpop.f32.mrf.mxu0 }
 0x5f3   : > { %v15578_v62 = vpop.permute.xlu1 %8249  ;;  %8367 = vrot.lane.b32.xlu0 %v11545_v51, %s11768_s26  ;;  %v15597_v51 = vadd.f32 %v15334_v50, %v7550_v25 }
 0x5f4   : > { %17095 = vst [vmem:[#allocation76_spill] sm:$0xff] %v15578_v62  ;;  %v15608_v42 = vpop.f32.mrf.mxu1 }
 0x5f5   : > { %v15585_v4 = vpop.permute.xlu0 %8251  ;;  %11558 = vtanh.f32 %v15597_v51 }
 0x5f6   : > { %17096 = vst [vmem:[#allocation9_spill] sm:$0xff] %v15585_v4  ;;  %v15604_v4 = vpop.eup %11548  ;;  %11560 = vtanh.f32 %v15602_v28  ;;  %v15624_v32 = vpop.f32.mrf.mxu1 }
 0x5f7   : > { %v15592_v14 = vpop.permute.xlu1 %8253  ;;  %8667 = vrot.lane.b32.xlu0 %v15587_v2, %s11767_s27  ;;  %v15620_v53 = vpop.eup %11550  ;;  %11562 = vtanh.f32 %v15618_v45 }
 0x5f8   : > { %17098 = vst [vmem:[#allocation25_spill] sm:$0xff] %v15592_v14  ;;  %v17100_v14 = vld [vmem:[#allocation44_spill] sm:$0xff] }
 0x5f9   : > { %v4654_v62 = vpop.permute.xlu0 %4653 }
 0x5fa   : > { %4748 = vst.msk [vmem:[#allocation4 + $0x10] sm:$0xff] %vm4745_vm11, %v4654_v62  ;;  %v7556_v62 = vadd.f32 %v15328_v11, %v17100_v14  ;;  %v15636_v11 = vadd.f32 %v7840_v13, %v7573_v29 }
 0x5fb   : > { %v4420_v50 = vpop.permute.xlu1 %4419  ;;  %8663 = vrot.lane.b32.xlu0 %v15604_v4, %s11767_s27  ;;  %v11553_v15 = vpop.eup %11552 }
 0x5fc   : > { %v4486_v25 = vadd.f32 %v4420_v50, %v4166_v44  ;;  %v15632_v38 = vadd.f32 %v15362_v57, %v7556_v62  ;;  %v11137_v44 = vpop.f32.mrf.mxu0  ;;  %v15638_v50 = vpop.eup %11554  ;;  %v17101_v62 = vld [vmem:[#allocation48_spill] sm:$0xff] }
 0x5fd   : > { %v4650_v12 = vpop.permute.xlu0 %4649  ;;  %v7579_v1 = vadd.f32 %v11137_v44, %v15274_v40  ;;  %v7554_v29 = vadd.f32 %v15337_v24, %v17101_v62 }
 0x5fe   : > { %4707 = vrot.lane.b32.xlu1 %v4486_v25, %s11769_s7  ;;  %4746 = vst.msk [vmem:[#allocation4] sm:$0xff] %vm4745_vm11, %v4650_v12  ;;  %v11177_v25 = vpop.f32.mrf.mxu1  ;;  %11564 = vtanh.f32 %v15632_v38  ;;  %v15650_v12 = vpop.eup %11556 }
 0x5ff   : > { %v4869_v55 = vpop.permute.xlu1 %4868  ;;  %8675 = vrot.lane.b32.xlu0 %v15620_v53, %s11767_s27  ;;  %11566 = vtanh.f32 %v15636_v11  ;;  %v15648_v13 = vadd.f32 %v11177_v25, %v7579_v1  ;;  %v15660_v25 = vadd.f32 %v15374_v48, %v7554_v29 }
 0x600   : > { %4935 = vst.msk [vmem:[#allocation2 + $0x171] sm:$0xff] %vm4745_vm11, %v4869_v55  ;;  %v7534_v55 = vpop.f32.mrf.mxu0  ;;  %v7856_v40 = vpop.f32.mrf.mxu1 }
 0x601   : > { %v4662_v14 = vpop.permute.xlu0 %4661  ;;  %v7577_v44 = vadd.f32 %v7534_v55, %v15282_v60  ;;  %11568 = vtanh.f32 %v15648_v13 }
 0x602   : > { %8645 = vrot.lane.b32.xlu1 %v11553_v15, %s11767_s27  ;;  %4752 = vst.msk [vmem:[#allocation4 + $0x30] sm:$0xff] %vm4745_vm11, %v4662_v14  ;;  %v11559_v1 = vpop.eup %11558  ;;  %11570 = vtanh.f32 %v15660_v25 }
 0x603   : > { %v4656_v57 = vpop.permute.xlu1 %4655  ;;  %8671 = vrot.lane.b32.xlu0 %v15638_v50, %s11767_s27  ;;  %v15664_v24 = vadd.f32 %v7856_v40, %v7577_v44 }
 0x604   : > { %4749 = vst.msk [vmem:[#allocation4 + $0x18] sm:$0xff] %vm4745_vm11, %v4656_v57 }
 0x605   : > { %v4658_v18 = vpop.permute.xlu0 %4657  ;;  %11572 = vtanh.f32 %v15664_v24 }
 0x606   : > { %8357 = vrot.lane.b32.xlu1 %v11553_v15, %s11768_s26  ;;  %4750 = vst.msk [vmem:[#allocation4 + $0x20] sm:$0xff] %vm4745_vm11, %v4658_v18  ;;  %v15666_v15 = vpop.eup %11560  ;;  %v7560_v18 = vadd.f32 %v15383_v8, %v15143_v59 }
 0x607   : > { %v4652_v14 = vpop.permute.xlu1 %4651  ;;  %8683 = vrot.lane.b32.xlu0 %v15650_v12, %s11767_s27  ;;  %v15675_v55 = vpop.eup %11562 }
 0x608   : > { %4747 = vst.msk [vmem:[#allocation4 + $0x8] sm:$0xff] %vm4745_vm11, %v4652_v14  ;;  %v15684_v29 = vadd.f32 %v15402_v17, %v7560_v18 }
 0x609   : > { %v4670_v57 = vpop.permute.xlu0 %4669 }
 0x60a   : > { %8641 = vrot.lane.b32.xlu1 %v11559_v1, %s11767_s27  ;;  %4756 = vst.msk [vmem:[#allocation4 + $0x50] sm:$0xff] %vm4745_vm11, %v4670_v57  ;;  %11574 = vtanh.f32 %v15684_v29 }
 0x60b   : > { %v4664_v60 = vpop.permute.xlu1 %4663  ;;  %8679 = vrot.lane.b32.xlu0 %v15666_v15, %s11767_s27  ;;  %v11565_v40 = vpop.eup %11564 }
 0x60c   : > { %4753 = vst.msk [vmem:[#allocation4 + $0x38] sm:$0xff] %vm4745_vm11, %v4664_v60  ;;  %v15687_v14 = vpop.eup %11566 }
 0x60d   : > { %v4666_v48 = vpop.permute.xlu0 %4665 }
 0x60e   : > { %8353 = vrot.lane.b32.xlu1 %v11559_v1, %s11768_s26  ;;  %4754 = vst.msk [vmem:[#allocation4 + $0x40] sm:$0xff] %vm4745_vm11, %v4666_v48  ;;  %v15695_v17 = vpop.eup %11568  ;;  %v17102_v1 = vld [vmem:[#allocation47_spill] sm:$0xff] }
 0x60f   : > { %v4660_v62 = vpop.permute.xlu1 %4659  ;;  %8691 = vrot.lane.b32.xlu0 %v15675_v55, %s11767_s27  ;;  %v7558_v57 = vadd.f32 %v15405_v43, %v17102_v1  ;;  %v11571_v18 = vpop.eup %11570 }
 0x610   : > { %4751 = vst.msk [vmem:[#allocation4 + $0x28] sm:$0xff] %vm4745_vm11, %v4660_v62 }
 0x611   : > { %v4678_v44 = vpop.permute.xlu0 %4677  ;;  %v15704_v48 = vadd.f32 %v15416_v63, %v7558_v57 }
 0x612   : > { %8653 = vrot.lane.b32.xlu1 %v11565_v40, %s11767_s27  ;;  %4760 = vst.msk [vmem:[#allocation4 + $0x70] sm:$0xff] %vm4745_vm11, %v4678_v44  ;;  %v15707_v44 = vpop.eup %11572 }
 0x613   : > { %v4672_v59 = vpop.permute.xlu1 %4671  ;;  %8687 = vrot.lane.b32.xlu0 %v15687_v14, %s11767_s27  ;;  %11576 = vtanh.f32 %v15704_v48 }
 0x614   : > { %4757 = vst.msk [vmem:[#allocation4 + $0x58] sm:$0xff] %vm4745_vm11, %v4672_v59 }
 0x615   : > { %v4674_v8 = vpop.permute.xlu0 %4673 }
 0x616   : > { %8365 = vrot.lane.b32.xlu1 %v11565_v40, %s11768_s26  ;;  %4758 = vst.msk [vmem:[#allocation4 + $0x60] sm:$0xff] %vm4745_vm11, %v4674_v8  ;;  %v7564_v40 = vadd.f32 %v15457_v34, %v15165_v52 }
 0x617   : > { %v4668_v60 = vpop.permute.xlu1 %4667  ;;  %8699 = vrot.lane.b32.xlu0 %v15695_v17, %s11767_s27  ;;  %v11575_v1 = vpop.eup %11574 }
 0x618   : > { %4755 = vst.msk [vmem:[#allocation4 + $0x48] sm:$0xff] %vm4745_vm11, %v4668_v60  ;;  %v15722_v8 = vadd.f32 %v15463_v26, %v7564_v40  ;;  %v7562_v60 = vadd.f32 %v15470_v9, %v15170_v10  ;;  %v7570_v40 = vadd.f32 %v15554_v54, %v15233_v3 }
 0x619   : > { %v4686_v62 = vpop.permute.xlu0 %4685 }
 0x61a   : > { %8649 = vrot.lane.b32.xlu1 %v11571_v18, %s11767_s27  ;;  %4764 = vst.msk [vmem:[#allocation4 + $0x90] sm:$0xff] %vm4745_vm11, %v4686_v62  ;;  %11578 = vtanh.f32 %v15722_v8  ;;  %v15731_v34 = vadd.f32 %v15477_v5, %v7562_v60  ;;  %v7566_v62 = vadd.f32 %v15510_v39, %v15201_v46 }
 0x61b   : > { %v4680_v43 = vpop.permute.xlu1 %4679  ;;  %8695 = vrot.lane.b32.xlu0 %v15707_v44, %s11767_s27 }
 0x61c   : > { %4761 = vst.msk [vmem:[#allocation4 + $0x78] sm:$0xff] %vm4745_vm11, %v4680_v43  ;;  %11580 = vtanh.f32 %v15731_v34  ;;  %v7572_v43 = vadd.f32 %v15540_v56, %v15226_v30  ;;  %v15770_v56 = vadd.f32 %v15563_v7, %v7570_v40 }
 0x61d   : > { %v4682_v63 = vpop.permute.xlu0 %4681 }
 0x61e   : > { %8361 = vrot.lane.b32.xlu1 %v11571_v18, %s11768_s26  ;;  %4762 = vst.msk [vmem:[#allocation4 + $0x80] sm:$0xff] %vm4745_vm11, %v4682_v63  ;;  %v15758_v39 = vadd.f32 %v15548_v58, %v7572_v43  ;;  %v10058_v43 = vmul.f32 -1.442695, %v15371_v61  ;;  %v10056_v61 = vmul.f32 -1.442695, %v15411_v36 }
 0x61f   : > { %v4676_v59 = vpop.permute.xlu1 %4675  ;;  %8375 = vrot.lane.b32.xlu0 %v15604_v4, %s11768_s26  ;;  %v7568_v4 = vadd.f32 %v15498_v41, %v15193_v23  ;;  %v15749_v41 = vadd.f32 %v15517_v20, %v7566_v62 }
 0x620   : > { %4759 = vst.msk [vmem:[#allocation4 + $0x68] sm:$0xff] %vm4745_vm11, %v4676_v59  ;;  %v11577_v5 = vpop.eup %11576 }
 0x621   : > { %v4694_v57 = vpop.permute.xlu0 %4693  ;;  %v15740_v9 = vadd.f32 %v15503_v47, %v7568_v4 }
 0x622   : > { %8661 = vrot.lane.b32.xlu1 %v11575_v1, %s11767_s27  ;;  %4768 = vst.msk [vmem:[#allocation4 + $0xb0] sm:$0xff] %vm4745_vm11, %v4694_v57  ;;  %v7574_v57 = vadd.f32 %v15615_v16, %v15265_v31 }
 0x623   : > { %v4688_v52 = vpop.permute.xlu1 %4687  ;;  %11582 = vtanh.f32 %v15740_v9 }
 0x624   : > { %4765 = vst.msk [vmem:[#allocation4 + $0x98] sm:$0xff] %vm4745_vm11, %v4688_v52  ;;  %11584 = vtanh.f32 %v15749_v41  ;;  %v15790_v60 = vadd.f32 %v15624_v32, %v7574_v57  ;;  %v11178_v52 = vpop.f32.mrf.mxu1  ;;  %v17103_v32 = vld [vmem:[#allocation103_spill] sm:$0xff] }
 0x625   : > { %v4690_v26 = vpop.permute.xlu0 %4689  ;;  %11586 = vtanh.f32 %v15758_v39 }
 0x626   : > { %8373 = vrot.lane.b32.xlu1 %v11575_v1, %s11768_s26  ;;  %4766 = vst.msk [vmem:[#allocation4 + $0xa0] sm:$0xff] %vm4745_vm11, %v4690_v26  ;;  %v7576_v1 = vadd.f32 %v15599_v35, %v15258_v6  ;;  %11588 = vtanh.f32 %v15770_v56  ;;  %v11138_v6 = vpop.f32.mrf.mxu0 }
 0x627   : > { %v4684_v10 = vpop.permute.xlu1 %4683  ;;  %v15761_v20 = vpop.eup %11578  ;;  %v7580_v26 = vadd.f32 %v11138_v6, %v15292_v0  ;;  %v10063_v6 = vmul.f32 -1.442695, %v15632_v38 }
 0x628   : > { %4763 = vst.msk [vmem:[#allocation4 + $0x88] sm:$0xff] %vm4745_vm11, %v4684_v10  ;;  %v15779_v54 = vadd.f32 %v15608_v42, %v7576_v1  ;;  %v7537_v31 = vpop.f32.mrf.mxu0  ;;  %v7859_v10 = vpop.f32.mrf.mxu1  ;;  %v10057_v1 = vmul.f32 -1.442695, %v15597_v51  ;;  %v17104_v51 = vld [vmem:[#allocation72_spill] sm:$0xff] }
 0x629   : > { %v4702_v18 = vpop.permute.xlu0 %4701  ;;  %v11581_v58 = vpop.eup %11580  ;;  %v15799_v16 = vadd.f32 %v11178_v52, %v7580_v26 }
 0x62a   : > { %8657 = vrot.lane.b32.xlu1 %v11577_v5, %s11767_s27  ;;  %4772 = vst.msk [vmem:[#allocation4 + $0xd0] sm:$0xff] %vm4745_vm11, %v4702_v18  ;;  %11590 = vtanh.f32 %v15779_v54 }
 0x62b   : > { %v4696_v23 = vpop.permute.xlu1 %4695  ;;  %11592 = vtanh.f32 %v15790_v60 }
 0x62c   : > { %4769 = vst.msk [vmem:[#allocation4 + $0xb8] sm:$0xff] %vm4745_vm11, %v4696_v23  ;;  %11594 = vtanh.f32 %v15799_v16 }
 0x62d   : > { %v4698_v47 = vpop.permute.xlu0 %4697 }
 0x62e   : > { %8369 = vrot.lane.b32.xlu1 %v11577_v5, %s11768_s26  ;;  %4770 = vst.msk [vmem:[#allocation4 + $0xc0] sm:$0xff] %vm4745_vm11, %v4698_v47  ;;  %v7578_v5 = vadd.f32 %v7537_v31, %v17103_v32  ;;  %v10060_v31 = vmul.f32 -1.442695, %v17104_v51 }
 0x62f   : > { %v4692_v46 = vpop.permute.xlu1 %4691 }
 0x630   : > { %4767 = vst.msk [vmem:[#allocation4 + $0xa8] sm:$0xff] %vm4745_vm11, %v4692_v46  ;;  %v15782_v7 = vpop.eup %11582  ;;  %v15807_v18 = vadd.f32 %v7859_v10, %v7578_v5 }
 0x631   : > { %v4710_v63 = vpop.permute.xlu0 %4709  ;;  %v15793_v42 = vpop.eup %11584 }
 0x632   : > { %8669 = vrot.lane.b32.xlu1 %v15761_v20, %s11767_s27  ;;  %4776 = vst.msk [vmem:[#allocation4 + $0xf0] sm:$0xff] %vm4745_vm11, %v4710_v63  ;;  %v15801_v4 = vpop.eup %11586  ;;  %11596 = vtanh.f32 %v15807_v18  ;;  %v10059_v63 = vmul.f32 -1.442695, %v15570_v21 }
 0x633   : > { %v4704_v30 = vpop.permute.xlu1 %4703  ;;  %v15809_v0 = vpop.eup %11588  ;;  %11598 = vpow2.f32 %v10058_v43  ;;  %v11340_v43 = vld [vmem:[%s16593_s4 + $0x8] sm:$0xff]  }
 0x634   : > { %4773 = vst.msk [vmem:[#allocation4 + $0xd8] sm:$0xff] %vm4745_vm11, %v4704_v30  ;;  %11600 = vpow2.f32 %v10059_v63  ;;  %11179 = vmatprep.subr.bf16.mxu0 %v11340_v43 }
 0x635   : > { %v4706_v59 = vpop.permute.xlu0 %4705  ;;  %11602 = vpow2.f32 %v10056_v61  ;;  %v17105_v61 = vld [vmem:[#allocation10_spill] sm:$0xff]  ;;  %11180 = vmatpush3.bf16.msra.mxu0 %v11340_v43 }
 0x636   : > { %8665 = vrot.lane.b32.xlu1 %v11581_v58, %s11767_s27  ;;  %4774 = vst.msk [vmem:[#allocation4 + $0xe0] sm:$0xff] %vm4745_vm11, %v4706_v59  ;;  %11604 = vpow2.f32 %v10057_v1  ;;  %v10066_v1 = vmul.f32 -1.442695, %v17105_v61  ;;  %v10065_v61 = vmul.f32 -1.442695, %v15704_v48 }
 0x637   : > { %v4700_v3 = vpop.permute.xlu1 %4699  ;;  %v15816_v23 = vpop.eup %11590  ;;  %v10070_v48 = vmul.f32 -1.442695, %v15531_v33 }
 0x638   : > { %4771 = vst.msk [vmem:[#allocation4 + $0xc8] sm:$0xff] %vm4745_vm11, %v4700_v3  ;;  %v15820_v47 = vpop.eup %11592  ;;  %v10062_v3 = vmul.f32 -1.442695, %v15446_v27 }
 0x639   : > { %v15814_v62 = vpop.permute.xlu0 %8643  ;;  %v15828_v40 = vpop.eup %11594 }
 0x63a   : > { %8677 = vrot.lane.b32.xlu1 %v15782_v7, %s11767_s27  ;;  %11606 = vpow2.f32 %v10062_v3 }
 0x63b   : > { %v4712_v35 = vpop.permute.xlu1 %4711  ;;  %11608 = vpow2.f32 %v10063_v6 }
 0x63c   : > { %4777 = vst.msk [vmem:[#allocation4 + $0xf8] sm:$0xff] %vm4745_vm11, %v4712_v35 }
 0x63d   : > { %v15823_v46 = vpop.permute.xlu0 %8355 }
 0x63e   : > { %8673 = vrot.lane.b32.xlu1 %v15793_v42, %s11767_s27 }
 0x63f   : > { %v15834_v59 = vpop.eup %11596 }
 0x640   : > { %v11599_v57 = vpop.eup %11598 }
 0x641   : > { %v15832_v30 = vpop.permute.xlu0 %8639  ;;  %v11601_v35 = vpop.eup %11600  ;;  %v8001_v36 = vadd.f32 1.0, %v11599_v57 }
 0x642   : > { %8685 = vrot.lane.b32.xlu1 %v15801_v4, %s11767_s27  ;;  %v8002_v26 = vadd.f32 1.0, %v11601_v35  ;;  %v11603_v32 = vpop.eup %11602  ;;  %v11341_v35 = vld [vmem:[%s16593_s4] sm:$0xff]  }
 0x643   : > { %11610 = vrcp.f32 %v8001_v36  ;;  %v11605_v27 = vpop.eup %11604  ;;  %v7999_v5 = vadd.f32 1.0, %v11603_v32  ;;  %11181 = vmatprep.subr.bf16.mxu0 %v11341_v35 }
 0x644   : > { %11612 = vrcp.f32 %v8002_v26  ;;  %v8000_v38 = vadd.f32 1.0, %v11605_v27  ;;  %11182 = vmatpush3.bf16.msra.mxu0 %v11341_v35 }
 0x645   : > { %v15840_v21 = vpop.permute.xlu0 %8351  ;;  %11614 = vpow2.f32 %v10060_v31 }
 0x646   : > { %8681 = vrot.lane.b32.xlu1 %v15809_v0, %s11767_s27 }
 0x647   : > { %v11607_v3 = vpop.eup %11606 }
 0x648   : > { %v11609_v57 = vpop.eup %11608  ;;  %v8005_v36 = vadd.f32 1.0, %v11607_v3 }
 0x649   : > { %v15845_v52 = vpop.permute.xlu0 %8651  ;;  %v8006_v31 = vadd.f32 1.0, %v11609_v57 }
 0x64a   : > { %8693 = vrot.lane.b32.xlu1 %v15816_v23, %s11767_s27 }
 0x64d   : > { %v15848_v10 = vpop.permute.xlu0 %8363 }
 0x64e   : > { %8689 = vrot.lane.b32.xlu1 %v15820_v47, %s11767_s27 }
 0x650   : > { %v15864_v51 = vpop.eup %11610 }
 0x651   : > { %v15854_v63 = vpop.permute.xlu0 %8647  ;;  %v15866_v32 = vpop.eup %11612 }
 0x652   : > { %8701 = vrot.lane.b32.xlu1 %v15828_v40, %s11767_s27  ;;  %v11615_v43 = vpop.eup %11614 }
 0x655   : > { %v15862_v26 = vpop.permute.xlu0 %8359 }
 0x656   : > { %8697 = vrot.lane.b32.xlu1 %v15834_v59, %s11767_s27 }
 0x65a   : > { %8377 = vrot.lane.b32.xlu1 %v11581_v58, %s11768_s26  ;;  %v10061_v58 = vmul.f32 -1.442695, %v15660_v25  ;;  %v10067_v25 = vmul.f32 -1.442695, %v15684_v29 }
 0x65c   : > { %11616 = vpow2.f32 %v10061_v58  ;;  %v15870_v58 = vmul.f32 %v15864_v51, %v15814_v62  ;;  %v8003_v62 = vadd.f32 1.0, %v11615_v43 }
 0x65d   : > { %11618 = vrcp.f32 %v7999_v5  ;;  %v17107_v5 = vld [vmem:[#allocation15_spill] sm:$0xff] }
 0x65e   : > { %11620 = vrcp.f32 %v8000_v38  ;;  %v10064_v38 = vmul.f32 -1.442695, %v17107_v5 }
 0x65f   : > { %11622 = vpow2.f32 %v10066_v1 }
 0x660   : > { %11624 = vpow2.f32 %v10067_v25  ;;  %v15879_v25 = vpop.permute.xlu0 %8659 }
 0x661   : > { %11626 = vrcp.f32 %v8005_v36 }
 0x662   : > { %11628 = vrcp.f32 %v8006_v31 }
 0x663   : > { %11630 = vpow2.f32 %v10064_v38 }
 0x664   : > { %11632 = vpow2.f32 %v10065_v61  ;;  %v15899_v38 = vpop.permute.xlu0 %8371 }
 0x665   : > { %11634 = vrcp.f32 %v8003_v62 }
 0x669   : > { %v11617_v3 = vpop.eup %11616 }
 0x66a   : > { %v8004_v35 = vadd.f32 1.0, %v11617_v3 }
 0x66c   : > { %11636 = vrcp.f32 %v8004_v35  ;;  %v10074_v35 = vmul.f32 -1.442695, %v15557_v37 }
 0x66d   : > { %11638 = vpow2.f32 %v10070_v48 }
 0x670   : > { %v4708_v6 = vpop.permute.xlu1 %4707 }
 0x671   : > { %4775 = vst.msk [vmem:[#allocation4 + $0xe8] sm:$0xff] %vm4745_vm11, %v4708_v6  ;;  %v15884_v6 = vpop.eup %11618 }
 0x672   : > { %v15886_v36 = vpop.eup %11620  ;;  %v15892_v5 = vmul.f32 %v15884_v6, %v15832_v30 }
 0x673   : > { %v11623_v43 = vpop.eup %11622 }
 0x674   : > { %v8646_v29 = vpop.permute.xlu1 %8645  ;;  %v11625_v61 = vpop.eup %11624 }
 0x675   : > { %v15873_v27 = vmul.f32 %v15866_v32, %v8646_v29  ;;  %v10071_v29 = vmul.f32 -1.442695, %v15722_v8  ;;  %v10068_v8 = vmul.f32 -1.442695, %v15544_v19  ;;  %v15908_v3 = vpop.eup %11626  ;;  %v8010_v62 = vadd.f32 1.0, %v11625_v61 }
 0x676   : > { %v10075_v19 = vmul.f32 -1.442695, %v15740_v9  ;;  %v10072_v9 = vmul.f32 -1.442695, %v15573_v22 }
 0x677   : > { %17106 = vst [vmem:[#allocation20_spill] sm:$0xff] %v15873_v27  ;;  %v9088_v1 = vpack.c.bf16 %v15873_v27, %v15870_v58  ;;  %11640 = vpow2.f32 %v10071_v29 }
 0x678   : > { %v15881_v57 = vpop.permute.xlu1 %8357  ;;  %11642 = vpow2.f32 %v10068_v8 }
 0x679   : > { %9125 = vrot.lane.b32.xlu1 %v9088_v1, %s11767_s27  ;;  %v10069_v1 = vmul.f32 -1.442695, %v15731_v34  ;;  %v15918_v34 = vmul.f32 %v15908_v3, %v15845_v52  ;;  %v10073_v52 = vmul.f32 -1.442695, %v15749_v41 }
 0x67b   : > { %11644 = vpow2.f32 %v10069_v1  ;;  %17109 = vst [vmem:[#allocation41_spill] sm:$0xff] %v15918_v34 }
 0x67c   : > { %v8642_v31 = vpop.permute.xlu1 %8641 }
 0x67d   : > { %v15895_v27 = vmul.f32 %v15886_v36, %v8642_v31  ;;  %8381 = vrot.lane.b32.xlu1 %v15761_v20, %s11768_s26  ;;  %v8009_v20 = vadd.f32 1.0, %v11623_v43  ;;  %v15910_v31 = vpop.eup %11628 }
 0x67e   : > { %v11631_v43 = vpop.eup %11630 }
 0x67f   : > { %17108 = vst [vmem:[#allocation84_spill] sm:$0xff] %v15895_v27  ;;  %v9087_v33 = vpack.c.bf16 %v15895_v27, %v15892_v5  ;;  %v15913_v27 = vpop.permute.xlu0 %8655  ;;  %11646 = vrcp.f32 %v8009_v20  ;;  %v8007_v8 = vadd.f32 1.0, %v11631_v43 }
 0x680   : > { %v15904_v30 = vpop.permute.xlu1 %8353  ;;  %11648 = vrcp.f32 %v8010_v62 }
 0x681   : > { %9123 = vrot.lane.b32.xlu0 %v9087_v33, %s11767_s27  ;;  %v11633_v33 = vpop.eup %11632  ;;  %11650 = vpow2.f32 %v10074_v35  ;;  %v10078_v35 = vmul.f32 -1.442695, %v15583_v49 }
 0x682   : > { %11652 = vpow2.f32 %v10075_v19  ;;  %v8008_v20 = vadd.f32 1.0, %v11633_v33  ;;  %v10079_v19 = vmul.f32 -1.442695, %v15758_v39 }
 0x683   : > { %v15932_v1 = vpop.permute.xlu0 %8367  ;;  %11654 = vpow2.f32 %v10072_v9 }
 0x684   : > { %v8654_v48 = vpop.permute.xlu1 %8653  ;;  %11656 = vpow2.f32 %v10073_v52 }
 0x685   : > { %v15921_v29 = vmul.f32 %v15910_v31, %v8654_v48  ;;  %8379 = vrot.lane.b32.xlu0 %v15587_v2, %s11768_s26  ;;  %v15934_v2 = vpop.eup %11634  ;;  %11658 = vrcp.f32 %v8007_v8  ;;  %v10077_v8 = vmul.f32 -1.442695, %v15770_v56  ;;  %v10082_v56 = vmul.f32 -1.442695, %v15618_v45 }
 0x686   : > { %v15936_v62 = vpop.eup %11636  ;;  %v15942_v41 = vmul.f32 %v15934_v2, %v15854_v63  ;;  %11660 = vrcp.f32 %v8008_v20  ;;  %v10080_v45 = vmul.f32 -1.442695, %v15636_v11 }
 0x687   : > { %17110 = vst [vmem:[#allocation83_spill] sm:$0xff] %v15921_v29  ;;  %v9090_v37 = vpack.c.bf16 %v15921_v29, %v15918_v34  ;;  %v11639_v22 = vpop.eup %11638  ;;  %11662 = vpow2.f32 %v10078_v35  ;;  %v15951_v9 = vpop.permute.xlu0 %8667 }
 0x688   : > { %v15928_v61 = vpop.permute.xlu1 %8365  ;;  %17111 = vst [vmem:[#allocation34_spill] sm:$0xff] %v15942_v41  ;;  %v8013_v33 = vadd.f32 1.0, %v11639_v22  ;;  %11664 = vpow2.f32 %v10079_v19 }
 0x689   : > { %9129 = vrot.lane.b32.xlu0 %v9090_v37, %s11767_s27  ;;  %v11641_v37 = vpop.eup %11640 }
 0x68a   : > { %v11643_v63 = vpop.eup %11642  ;;  %v8014_v52 = vadd.f32 1.0, %v11641_v37  ;;  %11666 = vrcp.f32 %v8013_v33  ;;  %v10083_v33 = vmul.f32 -1.442695, %v15779_v54  ;;  %v10081_v54 = vmul.f32 -1.442695, %v15790_v60 }
 0x68b   : > { %v8011_v35 = vadd.f32 1.0, %v11643_v63 }
 0x68c   : > { %v8650_v48 = vpop.permute.xlu1 %8649  ;;  %11668 = vrcp.f32 %v8014_v52 }
 0x68d   : > { %v15945_v43 = vmul.f32 %v15936_v62, %v8650_v48  ;;  %8383 = vrot.lane.b32.xlu0 %v15638_v50, %s11768_s26  ;;  %v11645_v48 = vpop.eup %11644  ;;  %v10076_v50 = vmul.f32 -1.442695, %v15602_v28 }
 0x68e   : > { %v15957_v29 = vpop.eup %11646  ;;  %v8012_v34 = vadd.f32 1.0, %v11645_v48 }
 0x68f   : > { %17112 = vst [vmem:[#allocation80_spill] sm:$0xff] %v15945_v43  ;;  %v9089_v49 = vpack.c.bf16 %v15945_v43, %v15942_v41  ;;  %v15960_v20 = vpop.eup %11648  ;;  %v15964_v19 = vmul.f32 %v15957_v29, %v15879_v25  ;;  %11670 = vpow2.f32 %v10076_v50 }
 0x690   : > { %v15953_v39 = vpop.permute.xlu1 %8361  ;;  %v11651_v43 = vpop.eup %11650  ;;  %11672 = vpow2.f32 %v10077_v8 }
 0x691   : > { %9127 = vrot.lane.b32.xlu1 %v9089_v49, %s11767_s27  ;;  %17113 = vst [vmem:[#allocation39_spill] sm:$0xff] %v15964_v19  ;;  %v11653_v28 = vpop.eup %11652  ;;  %v15972_v49 = vpop.permute.xlu0 %8663  ;;  %11674 = vrcp.f32 %v8011_v35  ;;  %v8017_v25 = vadd.f32 1.0, %v11651_v43 }
 0x692   : > { %v11655_v48 = vpop.eup %11654  ;;  %11676 = vrcp.f32 %v8012_v34 }
 0x693   : > { %11678 = vpow2.f32 %v10082_v56  ;;  %v8015_v43 = vadd.f32 1.0, %v11655_v48  ;;  %v10086_v56 = vmul.f32 -1.442695, %v15648_v13  ;;  %v10084_v13 = vmul.f32 -1.442695, %v15664_v24 }
 0x694   : > { %v8662_v22 = vpop.permute.xlu1 %8661  ;;  %11680 = vpow2.f32 %v10083_v33  ;;  %v10087_v33 = vmul.f32 -1.442695, %v15799_v16 }
 0x695   : > { %v15967_v37 = vmul.f32 %v15960_v20, %v8662_v22  ;;  %8385 = vrot.lane.b32.xlu1 %v15793_v42, %s11768_s26  ;;  %v8018_v22 = vadd.f32 1.0, %v11653_v28  ;;  %v11657_v42 = vpop.eup %11656  ;;  %11682 = vrcp.f32 %v8017_v25  ;;  %v8676_v35 = vpop.permute.xlu0 %8675 }
 0x696   : > { %v15981_v50 = vpop.eup %11658  ;;  %v8016_v34 = vadd.f32 1.0, %v11657_v42  ;;  %v10085_v42 = vmul.f32 -1.442695, %v15807_v18 }
 0x697   : > { %17114 = vst [vmem:[#allocation75_spill] sm:$0xff] %v15967_v37  ;;  %v9092_v63 = vpack.c.bf16 %v15967_v37, %v15964_v19  ;;  %v15984_v8 = vpop.eup %11660  ;;  %11684 = vrcp.f32 %v8018_v22  ;;  %v15988_v28 = vmul.f32 %v15981_v50, %v15913_v27 }
 0x698   : > { %v15977_v52 = vpop.permute.xlu1 %8373  ;;  %v11663_v19 = vpop.eup %11662  ;;  %11686 = vpow2.f32 %v10080_v45 }
 0x699   : > { %9133 = vrot.lane.b32.xlu0 %v9092_v63, %s11767_s27  ;;  %17115 = vst [vmem:[#allocation32_spill] sm:$0xff] %v15988_v28  ;;  %v11665_v60 = vpop.eup %11664  ;;  %11688 = vpow2.f32 %v10081_v54  ;;  %v8021_v25 = vadd.f32 1.0, %v11663_v19  ;;  %v8672_v22 = vpop.permute.xlu0 %8671 }
 0x69a   : > { %11690 = vrcp.f32 %v8015_v43  ;;  %v16001_v48 = vpop.eup %11666 }
 0x69b   : > { %11692 = vrcp.f32 %v8016_v34  ;;  %v16012_v43 = vmul.f32 %v16001_v48, %v15951_v9 }
 0x69c   : > { %v8658_v37 = vpop.permute.xlu1 %8657  ;;  %11694 = vpow2.f32 %v10086_v56 }
 0x69d   : > { %v15991_v11 = vmul.f32 %v15984_v8, %v8658_v37  ;;  %8387 = vrot.lane.b32.xlu0 %v15620_v53, %s11768_s26  ;;  %v8022_v37 = vadd.f32 1.0, %v11665_v60  ;;  %v16004_v53 = vpop.eup %11668  ;;  %11696 = vpow2.f32 %v10087_v33  ;;  %17117 = vst [vmem:[#allocation49_spill] sm:$0xff] %v16012_v43 }
 0x69e   : > { %v11671_v16 = vpop.eup %11670  ;;  %11698 = vrcp.f32 %v8021_v25  ;;  %v8684_v25 = vpop.permute.xlu0 %8683 }
 0x69f   : > { %17116 = vst [vmem:[#allocation88_spill] sm:$0xff] %v15991_v11  ;;  %v9091_v63 = vpack.c.bf16 %v15991_v11, %v15988_v28  ;;  %v11673_v45 = vpop.eup %11672  ;;  %11700 = vrcp.f32 %v8022_v37  ;;  %v8019_v60 = vadd.f32 1.0, %v11671_v16 }
 0x6a0   : > { %v15999_v27 = vpop.permute.xlu1 %8369  ;;  %v16008_v54 = vpop.eup %11674  ;;  %11702 = vpow2.f32 %v10084_v13  ;;  %v8020_v56 = vadd.f32 1.0, %v11673_v45 }
 0x6a1   : > { %9131 = vrot.lane.b32.xlu1 %v9091_v63, %s11767_s27  ;;  %v16019_v24 = vpop.eup %11676  ;;  %11704 = vpow2.f32 %v10085_v42 }
 0x6a2   : > { %v11679_v18 = vpop.eup %11678  ;;  %11706 = vrcp.f32 %v8019_v60 }
 0x6a3   : > { %v11681_v63 = vpop.eup %11680  ;;  %v8025_v16 = vadd.f32 1.0, %v11679_v18  ;;  %11708 = vrcp.f32 %v8020_v56  ;;  %v8680_v56 = vpop.permute.xlu0 %8679 }
 0x6a4   : > { %v8670_v19 = vpop.permute.xlu1 %8669  ;;  %v16023_v37 = vpop.eup %11682  ;;  %v8026_v45 = vadd.f32 1.0, %v11681_v63 }
 0x6a5   : > { %v16015_v34 = vmul.f32 %v16004_v53, %v8670_v19  ;;  %8389 = vrot.lane.b32.xlu1 %v15782_v7, %s11768_s26  ;;  %v16027_v19 = vmul.f32 %v16008_v54, %v15972_v49  ;;  %v16033_v13 = vpop.eup %11684  ;;  %v16040_v49 = vmul.f32 %v16023_v37, %v8676_v35  ;;  %11710 = vrcp.f32 %v8025_v16 }
 0x6a6   : > { %v11687_v42 = vpop.eup %11686  ;;  %11712 = vrcp.f32 %v8026_v45 }
 0x6a7   : > { %17118 = vst [vmem:[#allocation87_spill] sm:$0xff] %v16015_v34  ;;  %v9094_v33 = vpack.c.bf16 %v16015_v34, %v16012_v43  ;;  %17119 = vst [vmem:[#allocation45_spill] sm:$0xff] %v16027_v19  ;;  %v11689_v43 = vpop.eup %11688  ;;  %v8023_v18 = vadd.f32 1.0, %v11687_v42 }
 0x6a8   : > { %v8666_v9 = vpop.permute.xlu1 %8665  ;;  %v16037_v28 = vpop.eup %11690  ;;  %17121 = vst [vmem:[#allocation46_spill] sm:$0xff] %v16040_v49  ;;  %v8024_v63 = vadd.f32 1.0, %v11689_v43 }
 0x6a9   : > { %v16030_v7 = vmul.f32 %v16019_v24, %v8666_v9  ;;  %9137 = vrot.lane.b32.xlu0 %v9094_v33, %s11767_s27  ;;  %v16048_v60 = vpop.eup %11692  ;;  %v16055_v41 = vmul.f32 %v16037_v28, %v8672_v22  ;;  %11714 = vrcp.f32 %v8023_v18 }
 0x6aa   : > { %v11695_v33 = vpop.eup %11694  ;;  %11716 = vrcp.f32 %v8024_v63 }
 0x6ab   : > { %17120 = vst [vmem:[#allocation86_spill] sm:$0xff] %v16030_v7  ;;  %v9093_v34 = vpack.c.bf16 %v16030_v7, %v16027_v19  ;;  %v11697_v7 = vpop.eup %11696  ;;  %v8029_v43 = vadd.f32 1.0, %v11695_v33 }
 0x6ac   : > { %v8678_v11 = vpop.permute.xlu1 %8677  ;;  %v8030_v42 = vadd.f32 1.0, %v11697_v7 }
 0x6ad   : > { %v16043_v9 = vmul.f32 %v16033_v13, %v8678_v11  ;;  %8391 = vrot.lane.b32.xlu0 %v15666_v15, %s11768_s26  ;;  %9135 = vrot.lane.b32.xlu1 %v9093_v34, %s11767_s27  ;;  %v16052_v11 = vpop.eup %11698  ;;  %11718 = vrcp.f32 %v8029_v43 }
 0x6ae   : > { %v16063_v34 = vpop.eup %11700  ;;  %11720 = vrcp.f32 %v8030_v42 }
 0x6af   : > { %17122 = vst [vmem:[#allocation85_spill] sm:$0xff] %v16043_v9  ;;  %v9096_v35 = vpack.c.bf16 %v16043_v9, %v16040_v49  ;;  %v11703_v16 = vpop.eup %11702  ;;  %v8692_v9 = vpop.permute.xlu0 %8691 }
 0x6b0   : > { %v8674_v19 = vpop.permute.xlu1 %8673  ;;  %v11705_v22 = vpop.eup %11704  ;;  %v8027_v18 = vadd.f32 1.0, %v11703_v16 }
 0x6b1   : > { %v16058_v15 = vmul.f32 %v16048_v60, %v8674_v19  ;;  %8393 = vrot.lane.b32.xlu1 %v15809_v0, %s11768_s26  ;;  %9141 = vrot.lane.b32.xlu0 %v9096_v35, %s11767_s27  ;;  %v16068_v19 = vmul.f32 %v16052_v11, %v8684_v25  ;;  %v16076_v7 = vpop.eup %11706  ;;  %v8028_v33 = vadd.f32 1.0, %v11705_v22 }
 0x6b2   : > { %v16080_v35 = vpop.eup %11708  ;;  %11722 = vrcp.f32 %v8027_v18 }
 0x6b3   : > { %17123 = vst [vmem:[#allocation42_spill] sm:$0xff] %v16058_v15  ;;  %v9095_v45 = vpack.c.bf16 %v16058_v15, %v16055_v41  ;;  %v16091_v43 = vpop.eup %11710  ;;  %11724 = vrcp.f32 %v8028_v33 }
 0x6b4   : > { %v8686_v49 = vpop.permute.xlu1 %8685  ;;  %v16095_v42 = vpop.eup %11712 }
 0x6b5   : > { %v16071_v0 = vmul.f32 %v16063_v34, %v8686_v49  ;;  %8395 = vrot.lane.b32.xlu0 %v15650_v12, %s11768_s26  ;;  %9139 = vrot.lane.b32.xlu1 %v9095_v45, %s11767_s27  ;;  %v16083_v49 = vmul.f32 %v16076_v7, %v8680_v56  ;;  %v8688_v12 = vpop.permute.xlu0 %8687  ;;  %v16098_v45 = vmul.f32 %v16091_v43, %v8692_v9 }
 0x6b7   : > { %17124 = vst [vmem:[#allocation92_spill] sm:$0xff] %v16071_v0  ;;  %v9098_v63 = vpack.c.bf16 %v16071_v0, %v16068_v19  ;;  %17125 = vst [vmem:[#allocation57_spill] sm:$0xff] %v16098_v45 }
 0x6b8   : > { %v8682_v25 = vpop.permute.xlu1 %8681 }
 0x6b9   : > { %v16086_v15 = vmul.f32 %v16080_v35, %v8682_v25  ;;  %8397 = vrot.lane.b32.xlu1 %v15801_v4, %s11768_s26  ;;  %9145 = vrot.lane.b32.xlu0 %v9098_v63, %s11767_s27  ;;  %v16106_v4 = vpop.eup %11714  ;;  %v8700_v63 = vpop.permute.xlu0 %8699 }
 0x6ba   : > { %v16110_v33 = vpop.eup %11716  ;;  %v16113_v9 = vmul.f32 %v16106_v4, %v8688_v12 }
 0x6bb   : > { %v9097_v16 = vpack.c.bf16 %v16086_v15, %v16083_v49 }
 0x6bc   : > { %v8694_v56 = vpop.permute.xlu1 %8693  ;;  %17127 = vst [vmem:[#allocation53_spill] sm:$0xff] %v16113_v9 }
 0x6bd   : > { %v16101_v22 = vmul.f32 %v16095_v42, %v8694_v56  ;;  %8399 = vrot.lane.b32.xlu0 %v15687_v14, %s11768_s26  ;;  %9143 = vrot.lane.b32.xlu1 %v9097_v16, %s11767_s27  ;;  %v16121_v14 = vpop.eup %11718 }
 0x6be   : > { %v16128_v0 = vmul.f32 %v16121_v14, %v8700_v63 }
 0x6bf   : > { %17126 = vst [vmem:[#allocation91_spill] sm:$0xff] %v16101_v22  ;;  %v9100_v18 = vpack.c.bf16 %v16101_v22, %v16098_v45  ;;  %v16125_v22 = vpop.eup %11720 }
 0x6c0   : > { %v8690_v25 = vpop.permute.xlu1 %8689 }
 0x6c1   : > { %v16116_v56 = vmul.f32 %v16110_v33, %v8690_v25  ;;  %8401 = vrot.lane.b32.xlu1 %v15820_v47, %s11768_s26  ;;  %9149 = vrot.lane.b32.xlu0 %v9100_v18, %s11767_s27  ;;  %v8696_v47 = vpop.permute.xlu0 %8695  ;;  %v16136_v18 = vpop.eup %11722 }
 0x6c2   : > { %v16143_v63 = vmul.f32 %v16136_v18, %v8696_v47 }
 0x6c3   : > { %17128 = vst [vmem:[#allocation29_spill] sm:$0xff] %v16116_v56  ;;  %v9099_v16 = vpack.c.bf16 %v16116_v56, %v16113_v9  ;;  %v16140_v56 = vpop.eup %11724 }
 0x6c4   : > { %v8702_v45 = vpop.permute.xlu1 %8701 }
 0x6c5   : > { %v16131_v12 = vmul.f32 %v16125_v22, %v8702_v45  ;;  %8403 = vrot.lane.b32.xlu0 %v15675_v55, %s11768_s26  ;;  %9147 = vrot.lane.b32.xlu1 %v9099_v16, %s11767_s27 }
 0x6c7   : > { %v9102_v25 = vpack.c.bf16 %v16131_v12, %v16128_v0 }
 0x6c8   : > { %v8698_v9 = vpop.permute.xlu1 %8697 }
 0x6c9   : > { %v16146_v45 = vmul.f32 %v16140_v56, %v8698_v9  ;;  %8405 = vrot.lane.b32.xlu1 %v15816_v23, %s11768_s26  ;;  %9153 = vrot.lane.b32.xlu0 %v9102_v25, %s11767_s27  ;;  %v8447_v9 = vmul.f32 %v15884_v6, %v15840_v21  ;;  %v8449_v23 = vmul.f32 %v15864_v51, %v15823_v46 }
 0x6ca   : > { %v8453_v46 = vmul.f32 %v15908_v3, %v15848_v10  ;;  %v8455_v21 = vmul.f32 %v15981_v50, %v15932_v1  ;;  %v8457_v10 = vmul.f32 %v15957_v29, %v15899_v38 }
 0x6cb   : > { %v9101_v55 = vpack.c.bf16 %v16146_v45, %v16143_v63 }
 0x6cd   : > { %8407 = vrot.lane.b32.xlu0 %v15707_v44, %s11768_s26  ;;  %9151 = vrot.lane.b32.xlu1 %v9101_v55, %s11767_s27  ;;  %v8448_v44 = vmul.f32 %v15886_v36, %v15904_v30  ;;  %v8378_v30 = vpop.permute.xlu1 %8377 }
 0x6ce   : > { %v8460_v38 = vmul.f32 %v16019_v24, %v8378_v30 }
 0x6d1   : > { %8411 = vrot.lane.b32.xlu0 %v15695_v17, %s11768_s26  ;;  %8409 = vrot.lane.b32.xlu1 %v15834_v59, %s11768_s26  ;;  %v8451_v17 = vmul.f32 %v15934_v2, %v15862_v26  ;;  %v8450_v59 = vmul.f32 %v15866_v32, %v15881_v57  ;;  %v8454_v26 = vmul.f32 %v15910_v31, %v15928_v61 }
 0x6d2   : > { %v8456_v57 = vmul.f32 %v15984_v8, %v15999_v27  ;;  %v8458_v61 = vmul.f32 %v15960_v20, %v15977_v52 }
 0x6d5   : > { %8511 = vrot.lane.b32.xlu0 %v8447_v9, %s11767_s27  ;;  %8413 = vrot.lane.b32.xlu1 %v15828_v40, %s11768_s26  ;;  %v8452_v40 = vmul.f32 %v15936_v62, %v15953_v39  ;;  %v8376_v39 = vpop.permute.xlu0 %8375 }
 0x6d6   : > { %v8459_v1 = vmul.f32 %v16008_v54, %v8376_v39 }
 0x6d9   : > { %8515 = vrot.lane.b32.xlu0 %v8449_v23, %s11767_s27  ;;  %8513 = vrot.lane.b32.xlu1 %v8448_v44, %s11767_s27 }
 0x6dd   : > { %8519 = vrot.lane.b32.xlu0 %v8451_v17, %s11767_s27  ;;  %8517 = vrot.lane.b32.xlu1 %v8450_v59, %s11767_s27 }
 0x6e1   : > { %8523 = vrot.lane.b32.xlu0 %v8453_v46, %s11767_s27  ;;  %8521 = vrot.lane.b32.xlu1 %v8452_v40, %s11767_s27 }
 0x6e5   : > { %8527 = vrot.lane.b32.xlu0 %v8455_v21, %s11767_s27  ;;  %8525 = vrot.lane.b32.xlu1 %v8454_v26, %s11767_s27 }
 0x6e9   : > { %8531 = vrot.lane.b32.xlu0 %v8457_v10, %s11767_s27  ;;  %8529 = vrot.lane.b32.xlu1 %v8456_v57, %s11767_s27 }
 0x6eb   : > { %v9126_v16 = vpop.permute.xlu1 %9125 }
 0x6ed   : > { %8535 = vrot.lane.b32.xlu0 %v8459_v1, %s11767_s27  ;;  %8533 = vrot.lane.b32.xlu1 %v8458_v61, %s11767_s27 }
 0x6ef   : > { %v8382_v47 = vpop.permute.xlu1 %8381 }
 0x6f0   : > { %v8462_v27 = vmul.f32 %v16004_v53, %v8382_v47 }
 0x6f1   : > { %8537 = vrot.lane.b32.xlu1 %v8460_v38, %s11767_s27 }
 0x6f3   : > { %v9124_v25 = vpop.permute.xlu0 %9123 }
 0x6f4   : > { %11183 = vmatprep.mubr.msk.bf16.mxu0 %vm4745_vm11, %v9124_v25 }
 0x6f5   : > { %11184 = vmatmul.mubr.msk.bf16.vlgmr.msra.gmra.mxu0 %vm4745_vm11, %v9126_v16  ;;  %8541 = vrot.lane.b32.xlu1 %v8462_v27, %s11767_s27 }
 0x6f7   : > { %v8380_v52 = vpop.permute.xlu0 %8379 }
 0x6f8   : > { %v8461_v55 = vmul.f32 %v16001_v48, %v8380_v52 }
 0x6fa   : > { %8539 = vrot.lane.b32.xlu0 %v8461_v55, %s11767_s27 }
 0x6fb   : > { %v9130_v9 = vpop.permute.xlu0 %9129 }
 0x6ff   : > { %v8384_v23 = vpop.permute.xlu0 %8383 }
 0x700   : > { %v8463_v44 = vmul.f32 %v16037_v28, %v8384_v23 }
 0x702   : > { %8543 = vrot.lane.b32.xlu0 %v8463_v44, %s11767_s27 }
 0x703   : > { %v9128_v17 = vpop.permute.xlu1 %9127 }
 0x704   : > { %11187 = vmatprep.mubr.msk.bf16.mxu0 %vm4745_vm11, %v9128_v17 }
 0x705   : > { %11188 = vmatmul.mubr.msk.bf16.gmra.mxu0 %vm4745_vm11, %v9130_v9 }
 0x707   : > { %v8386_v59 = vpop.permute.xlu1 %8385 }
 0x708   : > { %v8464_v46 = vmul.f32 %v16048_v60, %v8386_v59 }
 0x70a   : > { %8545 = vrot.lane.b32.xlu1 %v8464_v46, %s11767_s27 }
 0x70b   : > { %v9134_v40 = vpop.permute.xlu0 %9133 }
 0x70f   : > { %v8388_v21 = vpop.permute.xlu0 %8387 }
 0x710   : > { %v8465_v26 = vmul.f32 %v16023_v37, %v8388_v21 }
 0x712   : > { %8547 = vrot.lane.b32.xlu0 %v8465_v26, %s11767_s27 }
 0x713   : > { %v9132_v10 = vpop.permute.xlu1 %9131 }
 0x714   : > { %11191 = vmatprep.mubr.msk.bf16.mxu0 %vm4745_vm11, %v9132_v10 }
 0x715   : > { %11192 = vmatmul.mubr.msk.bf16.gmra.mxu0 %vm4745_vm11, %v9134_v40 }
 0x717   : > { %v8390_v57 = vpop.permute.xlu1 %8389 }
 0x718   : > { %v8466_v30 = vmul.f32 %v16033_v13, %v8390_v57 }
 0x71a   : > { %8549 = vrot.lane.b32.xlu1 %v8466_v30, %s11767_s27 }
 0x71b   : > { %v9138_v39 = vpop.permute.xlu0 %9137 }
 0x71f   : > { %v8392_v1 = vpop.permute.xlu0 %8391  ;;  %v9136_v61 = vpop.permute.xlu1 %9135 }
 0x720   : > { %v8467_v16 = vmul.f32 %v16076_v7, %v8392_v1  ;;  %11195 = vmatprep.mubr.msk.bf16.mxu0 %vm4745_vm11, %v9136_v61 }
 0x721   : > { %11196 = vmatmul.mubr.msk.bf16.gmra.mxu0 %vm4745_vm11, %v9138_v39 }
 0x722   : > { %8551 = vrot.lane.b32.xlu0 %v8467_v16, %s11767_s27 }
 0x723   : > { %v9142_v38 = vpop.permute.xlu0 %9141  ;;  %v8394_v47 = vpop.permute.xlu1 %8393 }
 0x724   : > { %v8468_v27 = vmul.f32 %v16080_v35, %v8394_v47 }
 0x726   : > { %8553 = vrot.lane.b32.xlu1 %v8468_v27, %s11767_s27 }
 0x727   : > { %v8396_v25 = vpop.permute.xlu0 %8395  ;;  %v9140_v52 = vpop.permute.xlu1 %9139 }
 0x728   : > { %v8469_v55 = vmul.f32 %v16052_v11, %v8396_v25  ;;  %11199 = vmatprep.mubr.msk.bf16.mxu0 %vm4745_vm11, %v9140_v52 }
 0x729   : > { %11200 = vmatmul.mubr.msk.bf16.gmra.mxu0 %vm4745_vm11, %v9142_v38 }
 0x72a   : > { %8555 = vrot.lane.b32.xlu0 %v8469_v55, %s11767_s27 }
 0x72b   : > { %v9146_v9 = vpop.permute.xlu0 %9145  ;;  %v8398_v23 = vpop.permute.xlu1 %8397 }
 0x72c   : > { %v8470_v44 = vmul.f32 %v16063_v34, %v8398_v23 }
 0x72e   : > { %8557 = vrot.lane.b32.xlu1 %v8470_v44, %s11767_s27  ;;  %v17129_v44 = vld [vmem:[#allocation84_spill] sm:$0xff] }
 0x72f   : > { %v8400_v17 = vpop.permute.xlu0 %8399  ;;  %v9144_v59 = vpop.permute.xlu1 %9143 }
 0x730   : > { %v8471_v46 = vmul.f32 %v16106_v4, %v8400_v17  ;;  %11203 = vmatprep.mubr.msk.bf16.mxu0 %vm4745_vm11, %v9144_v59  ;;  %v17130_v17 = vld [vmem:[#allocation34_spill] sm:$0xff]  ;;  %v17131_v59 = vld [vmem:[#allocation20_spill] sm:$0xff] }
 0x731   : > { %11204 = vmatmul.mubr.msk.bf16.gmra.mxu0 %vm4745_vm11, %v9146_v9 }
 0x732   : > { %8559 = vrot.lane.b32.xlu0 %v8471_v46, %s11767_s27  ;;  %v17132_v46 = vld [vmem:[#allocation41_spill] sm:$0xff] }
 0x733   : > { %v9150_v40 = vpop.permute.xlu0 %9149  ;;  %v8402_v21 = vpop.permute.xlu1 %8401 }
 0x734   : > { %v8472_v26 = vmul.f32 %v16110_v33, %v8402_v21  ;;  %v17136_v21 = vld [vmem:[#allocation39_spill] sm:$0xff] }
 0x736   : > { %8561 = vrot.lane.b32.xlu1 %v8472_v26, %s11767_s27  ;;  %v17137_v26 = vld [vmem:[#allocation88_spill] sm:$0xff] }
 0x737   : > { %v8404_v10 = vpop.permute.xlu0 %8403  ;;  %v9148_v57 = vpop.permute.xlu1 %9147 }
 0x738   : > { %v8473_v30 = vmul.f32 %v16091_v43, %v8404_v10  ;;  %11207 = vmatprep.mubr.msk.bf16.mxu0 %vm4745_vm11, %v9148_v57  ;;  %v17138_v10 = vld [vmem:[#allocation45_spill] sm:$0xff]  ;;  %v17139_v57 = vld [vmem:[#allocation75_spill] sm:$0xff] }
 0x739   : > { %11208 = vmatmul.mubr.msk.bf16.gmra.mxu0 %vm4745_vm11, %v9150_v40  ;;  %v17133_v40 = vld [vmem:[#allocation80_spill] sm:$0xff] }
 0x73a   : > { %8563 = vrot.lane.b32.xlu0 %v8473_v30, %s11767_s27  ;;  %v17140_v30 = vld [vmem:[#allocation49_spill] sm:$0xff] }
 0x73b   : > { %v9154_v39 = vpop.permute.xlu0 %9153  ;;  %v8406_v1 = vpop.permute.xlu1 %8405 }
 0x73c   : > { %v8474_v61 = vmul.f32 %v16095_v42, %v8406_v1  ;;  %v17142_v1 = vld [vmem:[#allocation87_spill] sm:$0xff] }
 0x73e   : > { %8565 = vrot.lane.b32.xlu1 %v8474_v61, %s11767_s27  ;;  %v17143_v61 = vld [vmem:[#allocation46_spill] sm:$0xff] }
 0x73f   : > { %v8408_v16 = vpop.permute.xlu0 %8407  ;;  %v9152_v38 = vpop.permute.xlu1 %9151 }
 0x740   : > { %v8475_v47 = vmul.f32 %v16136_v18, %v8408_v16  ;;  %11211 = vmatprep.mubr.msk.bf16.mxu0 %vm4745_vm11, %v9152_v38  ;;  %v17144_v16 = vld [vmem:[#allocation42_spill] sm:$0xff] }
 0x741   : > { %11212 = vmatmul.mubr.msk.bf16.gmra.mxu0 %vm4745_vm11, %v9154_v39  ;;  %v17141_v39 = vld [vmem:[#allocation86_spill] sm:$0xff] }
 0x742   : > { %8567 = vrot.lane.b32.xlu0 %v8475_v47, %s11767_s27 }
 0x743   : > { %v8412_v27 = vpop.permute.xlu0 %8411  ;;  %v8410_v25 = vpop.permute.xlu1 %8409 }
 0x744   : > { %v8477_v52 = vmul.f32 %v16121_v14, %v8412_v27  ;;  %v8476_v55 = vmul.f32 %v16140_v56, %v8410_v25  ;;  %v17145_v27 = vld [vmem:[#allocation85_spill] sm:$0xff] }
 0x746   : > { %8571 = vrot.lane.b32.xlu0 %v8477_v52, %s11767_s27  ;;  %8569 = vrot.lane.b32.xlu1 %v8476_v55, %s11767_s27  ;;  %v17146_v52 = vld [vmem:[#allocation53_spill] sm:$0xff]  ;;  %v17147_v55 = vld [vmem:[#allocation92_spill] sm:$0xff] }
 0x747   : > { %v8414_v9 = vpop.permute.xlu1 %8413  ;;  %v8512_v38 = vpop.permute.xlu0 %8511 }
 0x748   : > { %v8478_v23 = vmul.f32 %v16125_v22, %v8414_v9 }
 0x74a   : > { %8959 = vrot.lane.b32.xlu0 %v15892_v5, %s11767_s27  ;;  %8573 = vrot.lane.b32.xlu1 %v8478_v23, %s11767_s27  ;;  %v17134_v5 = vld [vmem:[#allocation32_spill] sm:$0xff] }
 0x74b   : > { %v8514_v47 = vpop.permute.xlu1 %8513  ;;  %v8516_v25 = vpop.permute.xlu0 %8515 }
 0x74e   : > { %8963 = vrot.lane.b32.xlu0 %v15870_v58, %s11767_s27  ;;  %8961 = vrot.lane.b32.xlu1 %v17129_v44, %s11767_s27  ;;  %v17135_v58 = vld [vmem:[#allocation83_spill] sm:$0xff]  ;;  %v17149_v44 = vld [vmem:[#allocation29_spill] sm:$0xff] }
 0x74f   : > { %v8520_v9 = vpop.permute.xlu0 %8519 }
 0x752   : > { %8967 = vrot.lane.b32.xlu0 %v17130_v17, %s11767_s27  ;;  %8965 = vrot.lane.b32.xlu1 %v17131_v59, %s11767_s27  ;;  %v17150_v17 = vld [vmem:[#allocation56_spill] sm:$0xff] }
 0x753   : > { %v8524_v59 = vpop.permute.xlu0 %8523 }
 0x756   : > { %8971 = vrot.lane.b32.xlu0 %v17132_v46, %s11767_s27  ;;  %8969 = vrot.lane.b32.xlu1 %v17133_v40, %s11767_s27 }
 0x75a   : > { %8975 = vrot.lane.b32.xlu0 %v17134_v5, %s11767_s27  ;;  %8973 = vrot.lane.b32.xlu1 %v17135_v58, %s11767_s27  ;;  %v17152_v5 = vld [vmem:[#allocation50_spill] sm:$0xff] }
 0x75b   : > { %v8287_v58 = vmul.f32 %v15884_v6, %v17152_v5 }
 0x75e   : > { %8979 = vrot.lane.b32.xlu0 %v17136_v21, %s11767_s27  ;;  %8977 = vrot.lane.b32.xlu1 %v17137_v26, %s11767_s27  ;;  %v17153_v21 = vld [vmem:[#allocation54_spill] sm:$0xff] }
 0x75f   : > { %v8290_v26 = vmul.f32 %v15866_v32, %v17153_v21 }
 0x762   : > { %8983 = vrot.lane.b32.xlu0 %v17138_v10, %s11767_s27  ;;  %8981 = vrot.lane.b32.xlu1 %v17139_v57, %s11767_s27  ;;  %v8528_v57 = vpop.permute.xlu0 %8527 }
 0x766   : > { %8987 = vrot.lane.b32.xlu0 %v17140_v30, %s11767_s27  ;;  %8985 = vrot.lane.b32.xlu1 %v17141_v39, %s11767_s27  ;;  %v17155_v39 = vld [vmem:[#allocation64_spill] sm:$0xff] }
 0x76a   : > { %8991 = vrot.lane.b32.xlu0 %v16055_v41, %s11767_s27  ;;  %8989 = vrot.lane.b32.xlu1 %v17142_v1, %s11767_s27  ;;  %v8518_v41 = vpop.permute.xlu1 %8517  ;;  %v8293_v1 = vmul.f32 %v15908_v3, %v17155_v39 }
 0x76b   : > { %v8610_v10 = vadd.f32 %v8518_v41, %v8290_v26 }
 0x76c   : > { %v8613_v6 = vadd.f32 %v8524_v59, %v8293_v1  ;;  %v17161_v59 = vld [vmem:[#allocation79_spill] sm:$0xff]  ;;  %v17166_v1 = vld [vmem:[#allocation36_spill] sm:$0xff] }
 0x76e   : > { %8995 = vrot.lane.b32.xlu0 %v17143_v61, %s11767_s27  ;;  %8993 = vrot.lane.b32.xlu1 %v17144_v16, %s11767_s27  ;;  %v8522_v23 = vpop.permute.xlu1 %8521  ;;  %v17156_v16 = vld [vmem:[#allocation58_spill] sm:$0xff] }
 0x772   : > { %8999 = vrot.lane.b32.xlu0 %v16083_v49, %s11767_s27  ;;  %8997 = vrot.lane.b32.xlu1 %v17145_v27, %s11767_s27  ;;  %v17148_v49 = vld [vmem:[#allocation57_spill] sm:$0xff]  ;;  %v8526_v40 = vpop.permute.xlu1 %8525  ;;  %v8291_v27 = vmul.f32 %v15934_v2, %v17156_v16 }
 0x776   : > { %9003 = vrot.lane.b32.xlu0 %v16068_v19, %s11767_s27  ;;  %9001 = vrot.lane.b32.xlu1 %v16086_v15, %s11767_s27  ;;  %v8289_v19 = vmul.f32 %v15864_v51, %v17150_v17  ;;  %v17151_v15 = vld [vmem:[#allocation91_spill] sm:$0xff]  ;;  %v8607_v51 = vadd.f32 %v8512_v38, %v8287_v58  ;;  %v8530_v61 = vpop.permute.xlu1 %8529  ;;  %v17160_v17 = vld [vmem:[#allocation66_spill] sm:$0xff] }
 0x778   : > { %v8609_v46 = vadd.f32 %v8516_v25, %v8289_v19  ;;  %v8532_v25 = vpop.permute.xlu0 %8531  ;;  %v8295_v19 = vmul.f32 %v15981_v50, %v17160_v17 }
 0x77a   : > { %9007 = vrot.lane.b32.xlu0 %v17146_v52, %s11767_s27  ;;  %9005 = vrot.lane.b32.xlu1 %v17147_v55, %s11767_s27  ;;  %v8534_v41 = vpop.permute.xlu1 %8533  ;;  %v17158_v52 = vld [vmem:[#allocation60_spill] sm:$0xff] }
 0x77b   : > { %v8292_v55 = vmul.f32 %v15936_v62, %v17158_v52  ;;  %v8615_v62 = vadd.f32 %v8528_v57, %v8295_v19  ;;  %v17165_v57 = vld [vmem:[#allocation26_spill] sm:$0xff]  ;;  %v17170_v52 = vld [vmem:[#allocation17_spill] sm:$0xff] }
 0x77c   : > { %v17173_v19 = vld [vmem:[#allocation38_spill] sm:$0xff] }
 0x77d   : > { %v8612_v2 = vadd.f32 %v8522_v23, %v8292_v55  ;;  %v17163_v23 = vld [vmem:[#allocation35_spill] sm:$0xff]  ;;  %v8304_v55 = vmul.f32 %v16048_v60, %v17170_v52 }
 0x77e   : > { %9011 = vrot.lane.b32.xlu0 %v17148_v49, %s11767_s27  ;;  %9009 = vrot.lane.b32.xlu1 %v17149_v44, %s11767_s27  ;;  %v17159_v49 = vld [vmem:[#allocation70_spill] sm:$0xff]  ;;  %v8536_v44 = vpop.permute.xlu0 %8535  ;;  %v8301_v58 = vmul.f32 %v16001_v48, %v17163_v23 }
 0x782   : > { %9015 = vrot.lane.b32.xlu0 %v16143_v63, %s11767_s27  ;;  %9013 = vrot.lane.b32.xlu1 %v17151_v15, %s11767_s27  ;;  %v17154_v63 = vld [vmem:[#allocation52_spill] sm:$0xff]  ;;  %v8538_v15 = vpop.permute.xlu1 %8537 }
 0x783   : > { %v8288_v30 = vmul.f32 %v15886_v36, %v17154_v63  ;;  %v8611_v36 = vadd.f32 %v8520_v9, %v8291_v27  ;;  %v8298_v9 = vmul.f32 %v15960_v20, %v17161_v59  ;;  %v8302_v63 = vmul.f32 %v16004_v53, %v17165_v57  ;;  %v17178_v57 = vld [vmem:[#allocation77_spill] sm:$0xff] }
 0x784   : > { %v8310_v59 = vmul.f32 %v16063_v34, %v17173_v19 }
 0x785   : > { %v8608_v32 = vadd.f32 %v8514_v47, %v8288_v30  ;;  %v8297_v47 = vmul.f32 %v15957_v29, %v17159_v49  ;;  %v8618_v29 = vadd.f32 %v8534_v41, %v8298_v9  ;;  %v17171_v49 = vld [vmem:[#allocation28_spill] sm:$0xff] }
 0x786   : > { %8803 = vrot.lane.b32.xlu0 %v8609_v46, %s11769_s7  ;;  %9017 = vrot.lane.b32.xlu1 %v16146_v45, %s11767_s27  ;;  %v17157_v45 = vld [vmem:[#allocation62_spill] sm:$0xff]  ;;  %v8540_v46 = vpop.permute.xlu0 %8539  ;;  %v8542_v20 = vpop.permute.xlu1 %8541 }
 0x787   : > { %v8294_v38 = vmul.f32 %v15910_v31, %v17157_v45  ;;  %v8617_v31 = vadd.f32 %v8532_v25, %v8297_v47  ;;  %v8621_v21 = vadd.f32 %v8540_v46, %v8301_v58  ;;  %v8622_v48 = vadd.f32 %v8542_v20, %v8302_v63  ;;  %v17168_v45 = vld [vmem:[#allocation73_spill] sm:$0xff]  ;;  %v17175_v46 = vld [vmem:[#allocation16_spill] sm:$0xff] }
 0x788   : > { %v17169_v25 = vld [vmem:[#allocation21_spill] sm:$0xff]  ;;  %v8309_v47 = vmul.f32 %v16052_v11, %v17171_v49  ;;  %v8312_v63 = vmul.f32 %v16110_v33, %v17178_v57 }
 0x789   : > { %v8614_v3 = vadd.f32 %v8526_v40, %v8294_v38  ;;  %v17162_v40 = vld [vmem:[#allocation68_spill] sm:$0xff]  ;;  %v8303_v38 = vmul.f32 %v16037_v28, %v17168_v45 }
 0x78a   : > { %8799 = vrot.lane.b32.xlu0 %v8607_v51, %s11769_s7  ;;  %8805 = vrot.lane.b32.xlu1 %v8610_v10, %s11769_s7  ;;  %v8296_v5 = vmul.f32 %v15984_v8, %v17162_v40  ;;  %v8544_v26 = vpop.permute.xlu0 %8543  ;;  %v17164_v51 = vld [vmem:[#allocation82_spill] sm:$0xff]  ;;  %v8546_v30 = vpop.permute.xlu1 %8545  ;;  %v8313_v40 = vmul.f32 %v16091_v43, %v17175_v46 }
 0x78b   : > { %v8299_v10 = vmul.f32 %v16008_v54, %v17164_v51  ;;  %v8624_v28 = vadd.f32 %v8546_v30, %v8304_v55 }
 0x78c   : > { %v8616_v50 = vadd.f32 %v8530_v61, %v8296_v5  ;;  %v8300_v61 = vmul.f32 %v16019_v24, %v17166_v1  ;;  %v8623_v24 = vadd.f32 %v8544_v26, %v8303_v38  ;;  %v17182_v38 = vld [vmem:[#allocation76_spill] sm:$0xff] }
 0x78d   : > { %v8619_v8 = vadd.f32 %v8536_v44, %v8299_v10  ;;  %v17172_v44 = vld [vmem:[#allocation74_spill] sm:$0xff] }
 0x78e   : > { %8811 = vrot.lane.b32.xlu0 %v8613_v6, %s11769_s7  ;;  %8801 = vrot.lane.b32.xlu1 %v8608_v32, %s11769_s7  ;;  %v8548_v39 = vpop.permute.xlu0 %8547  ;;  %v17167_v32 = vld [vmem:[#allocation37_spill] sm:$0xff]  ;;  %v8620_v54 = vadd.f32 %v8538_v15, %v8300_v61  ;;  %v8550_v16 = vpop.permute.xlu1 %8549  ;;  %v8307_v17 = vmul.f32 %v16076_v7, %v17172_v44 }
 0x78f   : > { %v8305_v6 = vmul.f32 %v16023_v37, %v17167_v32 }
 0x791   : > { %v8625_v53 = vadd.f32 %v8548_v39, %v8305_v6  ;;  %v17181_v6 = vld [vmem:[#allocation25_spill] sm:$0xff] }
 0x792   : > { %8807 = vrot.lane.b32.xlu0 %v8611_v36, %s11769_s7  ;;  %8813 = vrot.lane.b32.xlu1 %v8614_v3, %s11769_s7  ;;  %v8306_v36 = vmul.f32 %v16033_v13, %v17169_v25 }
 0x794   : > { %v8552_v27 = vpop.permute.xlu0 %8551  ;;  %v8626_v37 = vadd.f32 %v8550_v16, %v8306_v36 }
 0x795   : > { %v8627_v60 = vadd.f32 %v8552_v27, %v8307_v17 }
 0x796   : > { %8819 = vrot.lane.b32.xlu0 %v8617_v31, %s11769_s7  ;;  %8809 = vrot.lane.b32.xlu1 %v8612_v2, %s11769_s7 }
 0x798   : > { %v8554_v3 = vpop.permute.xlu1 %8553 }
 0x79a   : > { %8815 = vrot.lane.b32.xlu0 %v8615_v62, %s11769_s7  ;;  %8821 = vrot.lane.b32.xlu1 %v8618_v29, %s11769_s7  ;;  %v17174_v62 = vld [vmem:[#allocation11_spill] sm:$0xff] }
 0x79b   : > { %v8308_v29 = vmul.f32 %v16080_v35, %v17174_v62 }
 0x79c   : > { %v8556_v41 = vpop.permute.xlu0 %8555 }
 0x79d   : > { %v8629_v13 = vadd.f32 %v8556_v41, %v8309_v47  ;;  %v8628_v34 = vadd.f32 %v8554_v3, %v8308_v29 }
 0x79e   : > { %8827 = vrot.lane.b32.xlu0 %v8621_v21, %s11769_s7  ;;  %8817 = vrot.lane.b32.xlu1 %v8616_v50, %s11769_s7  ;;  %v17176_v50 = vld [vmem:[#allocation13_spill] sm:$0xff]  ;;  %v17177_v21 = vld [vmem:[#allocation19_spill] sm:$0xff] }
 0x79f   : > { %v8311_v20 = vmul.f32 %v16106_v4, %v17176_v50  ;;  %v8314_v35 = vmul.f32 %v16095_v42, %v17177_v21 }
 0x7a0   : > { %v8558_v2 = vpop.permute.xlu1 %8557 }
 0x7a1   : > { %v8630_v11 = vadd.f32 %v8558_v2, %v8310_v59 }
 0x7a2   : > { %8823 = vrot.lane.b32.xlu0 %v8619_v8, %s11769_s7  ;;  %8829 = vrot.lane.b32.xlu1 %v8622_v48, %s11769_s7  ;;  %v17179_v8 = vld [vmem:[#allocation9_spill] sm:$0xff] }
 0x7a3   : > { %v8317_v48 = vmul.f32 %v16121_v14, %v17179_v8  ;;  %v17180_v14 = vld [vmem:[#allocation30_spill] sm:$0xff] }
 0x7a4   : > { %v8560_v31 = vpop.permute.xlu0 %8559  ;;  %v8315_v32 = vmul.f32 %v16136_v18, %v17180_v14  ;;  %v8316_v18 = vmul.f32 %v16140_v56, %v17182_v38 }
 0x7a5   : > { %v8631_v26 = vadd.f32 %v8560_v31, %v8311_v20 }
 0x7a6   : > { %8835 = vrot.lane.b32.xlu0 %v8625_v53, %s11769_s7  ;;  %8825 = vrot.lane.b32.xlu1 %v8620_v54, %s11769_s7  ;;  %v8318_v54 = vmul.f32 %v16125_v22, %v17181_v6 }
 0x7a8   : > { %v8562_v9 = vpop.permute.xlu1 %8561 }
 0x7a9   : > { %v8632_v39 = vadd.f32 %v8562_v9, %v8312_v63 }
 0x7aa   : > { %8831 = vrot.lane.b32.xlu0 %v8623_v24, %s11769_s7  ;;  %8837 = vrot.lane.b32.xlu1 %v8626_v37, %s11769_s7 }
 0x7ac   : > { %v8564_v15 = vpop.permute.xlu0 %8563 }
 0x7ad   : > { %v8633_v7 = vadd.f32 %v8564_v15, %v8313_v40 }
 0x7ae   : > { %8843 = vrot.lane.b32.xlu0 %v8629_v13, %s11769_s7  ;;  %8833 = vrot.lane.b32.xlu1 %v8624_v28, %s11769_s7 }
 0x7b0   : > { %v8566_v5 = vpop.permute.xlu1 %8565 }
 0x7b1   : > { %v8634_v51 = vadd.f32 %v8566_v5, %v8314_v35 }
 0x7b2   : > { %8839 = vrot.lane.b32.xlu0 %v8627_v60, %s11769_s7  ;;  %8845 = vrot.lane.b32.xlu1 %v8630_v11, %s11769_s7 }
 0x7b4   : > { %v8568_v23 = vpop.permute.xlu0 %8567 }
 0x7b5   : > { %v11185_v58 = vpop.f32.mrf.mxu0  ;;  %v8635_v53 = vadd.f32 %v8568_v23, %v8315_v32 }
 0x7b6   : > { %9379 = vst.msk [vmem:[#allocation6 + $0x10] sm:$0xff] %vm9376_vm12, %v11185_v58  ;;  %9411 = vst.msk [vmem:[%s11851_s25 + $0x10] sm:$0xff] %vm9376_vm12, %v11185_v58  ;;  %8851 = vrot.lane.b32.xlu0 %v8633_v7, %s11769_s7  ;;  %8841 = vrot.lane.b32.xlu1 %v8628_v34, %s11769_s7 }
 0x7b7   : > { %v9249_v43 = vpop.f32.mrf.mxu0 }
 0x7b8   : > { %9377 = vst.msk [vmem:[#allocation6] sm:$0xff] %vm9376_vm12, %v9249_v43  ;;  %9409 = vst.msk [vmem:[%s11851_s25] sm:$0xff] %vm9376_vm12, %v9249_v43  ;;  %v8572_v4 = vpop.permute.xlu0 %8571  ;;  %v8570_v10 = vpop.permute.xlu1 %8569 }
 0x7b9   : > { %v11186_v42 = vpop.f32.mrf.mxu0  ;;  %v8637_v1 = vadd.f32 %v8572_v4, %v8317_v48  ;;  %v8636_v22 = vadd.f32 %v8570_v10, %v8316_v18 }
 0x7ba   : > { %9380 = vst.msk [vmem:[#allocation6 + $0x18] sm:$0xff] %vm9376_vm12, %v11186_v42  ;;  %9412 = vst.msk [vmem:[%s11851_s25 + $0x18] sm:$0xff] %vm9376_vm12, %v11186_v42  ;;  %8847 = vrot.lane.b32.xlu0 %v8631_v26, %s11769_s7  ;;  %8853 = vrot.lane.b32.xlu1 %v8634_v51, %s11769_s7 }
 0x7bb   : > { %v9252_v30 = vpop.f32.mrf.mxu0 }
 0x7bc   : > { %9378 = vst.msk [vmem:[#allocation6 + $0x8] sm:$0xff] %vm9376_vm12, %v9252_v30  ;;  %9410 = vst.msk [vmem:[%s11851_s25 + $0x8] sm:$0xff] %vm9376_vm12, %v9252_v30  ;;  %v8960_v61 = vpop.permute.xlu0 %8959  ;;  %v8574_v33 = vpop.permute.xlu1 %8573 }
 0x7bd   : > { %9055 = vst.msk [vmem:[#allocation3 + $0x19] sm:$0xff] %vm4745_vm11, %v8960_v61  ;;  %v8638_v16 = vadd.f32 %v8574_v33, %v8318_v54 }
 0x7be   : > { %8859 = vrot.lane.b32.xlu0 %v8637_v1, %s11769_s7  ;;  %8849 = vrot.lane.b32.xlu1 %v8632_v39, %s11769_s7 }
 0x7c0   : > { %v8964_v27 = vpop.permute.xlu0 %8963  ;;  %v8962_v45 = vpop.permute.xlu1 %8961 }
 0x7c1   : > { %9057 = vst.msk [vmem:[#allocation3 + $0x31] sm:$0xff] %vm4745_vm11, %v8964_v27  ;;  %9056 = vst.msk [vmem:[#allocation3 + $0x21] sm:$0xff] %vm4745_vm11, %v8962_v45 }
 0x7c2   : > { %8855 = vrot.lane.b32.xlu0 %v8635_v53, %s11769_s7  ;;  %8861 = vrot.lane.b32.xlu1 %v8638_v16, %s11769_s7 }
 0x7c4   : > { %v8968_v25 = vpop.permute.xlu0 %8967  ;;  %v8966_v36 = vpop.permute.xlu1 %8965 }
 0x7c5   : > { %9059 = vst.msk [vmem:[#allocation3 + $0x49] sm:$0xff] %vm4745_vm11, %v8968_v25  ;;  %9058 = vst.msk [vmem:[#allocation3 + $0x39] sm:$0xff] %vm4745_vm11, %v8966_v36  ;;  %v11189_v24 = vpop.f32.mrf.mxu0 }
 0x7c6   : > { %9383 = vst.msk [vmem:[#allocation6 + $0x30] sm:$0xff] %vm9376_vm12, %v11189_v24  ;;  %9415 = vst.msk [vmem:[%s11851_s25 + $0x30] sm:$0xff] %vm9376_vm12, %v11189_v24  ;;  %9019 = vrot.lane.b32.xlu0 %v16128_v0, %s11767_s27  ;;  %8857 = vrot.lane.b32.xlu1 %v8636_v22, %s11769_s7 }
 0x7c7   : > { %v9265_v56 = vpop.f32.mrf.mxu0 }
 0x7c8   : > { %9381 = vst.msk [vmem:[#allocation6 + $0x20] sm:$0xff] %vm9376_vm12, %v9265_v56  ;;  %9413 = vst.msk [vmem:[%s11851_s25 + $0x20] sm:$0xff] %vm9376_vm12, %v9265_v56  ;;  %v8972_v37 = vpop.permute.xlu0 %8971  ;;  %v8970_v3 = vpop.permute.xlu1 %8969 }
 0x7c9   : > { %9061 = vst.msk [vmem:[#allocation3 + $0x61] sm:$0xff] %vm4745_vm11, %v8972_v37  ;;  %9060 = vst.msk [vmem:[#allocation3 + $0x51] sm:$0xff] %vm4745_vm11, %v8970_v3  ;;  %v11190_v41 = vpop.f32.mrf.mxu0 }
 0x7ca   : > { %9384 = vst.msk [vmem:[#allocation6 + $0x38] sm:$0xff] %vm9376_vm12, %v11190_v41  ;;  %9416 = vst.msk [vmem:[%s11851_s25 + $0x38] sm:$0xff] %vm9376_vm12, %v11190_v41  ;;  %9021 = vrot.lane.b32.xlu1 %v16131_v12, %s11767_s27 }
 0x7cb   : > { %v9268_v0 = vpop.f32.mrf.mxu0 }
 0x7cc   : > { %9382 = vst.msk [vmem:[#allocation6 + $0x28] sm:$0xff] %vm9376_vm12, %v9268_v0  ;;  %9414 = vst.msk [vmem:[%s11851_s25 + $0x28] sm:$0xff] %vm9376_vm12, %v9268_v0  ;;  %v8976_v52 = vpop.permute.xlu0 %8975  ;;  %v8974_v55 = vpop.permute.xlu1 %8973 }
 0x7cd   : > { %9063 = vst.msk [vmem:[#allocation3 + $0x79] sm:$0xff] %vm4745_vm11, %v8976_v52  ;;  %9062 = vst.msk [vmem:[#allocation3 + $0x69] sm:$0xff] %vm4745_vm11, %v8974_v55 }
 0x7d0   : > { %v8980_v49 = vpop.permute.xlu0 %8979  ;;  %v8978_v47 = vpop.permute.xlu1 %8977 }
 0x7d1   : > { %9065 = vst.msk [vmem:[#allocation3 + $0x91] sm:$0xff] %vm4745_vm11, %v8980_v49  ;;  %9064 = vst.msk [vmem:[#allocation3 + $0x81] sm:$0xff] %vm4745_vm11, %v8978_v47 }
 0x7d4   : > { %v8984_v12 = vpop.permute.xlu0 %8983  ;;  %v8982_v28 = vpop.permute.xlu1 %8981 }
 0x7d5   : > { %9067 = vst.msk [vmem:[#allocation3 + $0xa9] sm:$0xff] %vm4745_vm11, %v8984_v12  ;;  %9066 = vst.msk [vmem:[#allocation3 + $0x99] sm:$0xff] %vm4745_vm11, %v8982_v28  ;;  %v11193_v13 = vpop.f32.mrf.mxu0 }
 0x7d6   : > { %9387 = vst.msk [vmem:[#allocation6 + $0x50] sm:$0xff] %vm9376_vm12, %v11193_v13  ;;  %9419 = vst.msk [vmem:[%s11851_s25 + $0x50] sm:$0xff] %vm9376_vm12, %v11193_v13 }
 0x7d7   : > { %v9281_v2 = vpop.f32.mrf.mxu0 }
 0x7d8   : > { %9385 = vst.msk [vmem:[#allocation6 + $0x40] sm:$0xff] %vm9376_vm12, %v9281_v2  ;;  %9417 = vst.msk [vmem:[%s11851_s25 + $0x40] sm:$0xff] %vm9376_vm12, %v9281_v2  ;;  %v8988_v31 = vpop.permute.xlu0 %8987  ;;  %v8986_v44 = vpop.permute.xlu1 %8985 }
 0x7d9   : > { %9069 = vst.msk [vmem:[#allocation3 + $0xc1] sm:$0xff] %vm4745_vm11, %v8988_v31  ;;  %9068 = vst.msk [vmem:[#allocation3 + $0xb1] sm:$0xff] %vm4745_vm11, %v8986_v44  ;;  %v11194_v17 = vpop.f32.mrf.mxu0 }
 0x7da   : > { %9388 = vst.msk [vmem:[#allocation6 + $0x58] sm:$0xff] %vm9376_vm12, %v11194_v17  ;;  %9420 = vst.msk [vmem:[%s11851_s25 + $0x58] sm:$0xff] %vm9376_vm12, %v11194_v17 }
 0x7db   : > { %v9284_v19 = vpop.f32.mrf.mxu0 }
 0x7dc   : > { %9386 = vst.msk [vmem:[#allocation6 + $0x48] sm:$0xff] %vm9376_vm12, %v9284_v19  ;;  %9418 = vst.msk [vmem:[%s11851_s25 + $0x48] sm:$0xff] %vm9376_vm12, %v9284_v19  ;;  %v8992_v59 = vpop.permute.xlu0 %8991  ;;  %v8990_v60 = vpop.permute.xlu1 %8989 }
 0x7dd   : > { %9071 = vst.msk [vmem:[#allocation3 + $0xd9] sm:$0xff] %vm4745_vm11, %v8992_v59  ;;  %9070 = vst.msk [vmem:[#allocation3 + $0xc9] sm:$0xff] %vm4745_vm11, %v8990_v60 }
 0x7e0   : > { %v8996_v11 = vpop.permute.xlu0 %8995  ;;  %v8994_v9 = vpop.permute.xlu1 %8993 }
 0x7e1   : > { %9073 = vst.msk [vmem:[#allocation3 + $0xf1] sm:$0xff] %vm4745_vm11, %v8996_v11  ;;  %9072 = vst.msk [vmem:[#allocation3 + $0xe1] sm:$0xff] %vm4745_vm11, %v8994_v9  ;;  %v11197_v15 = vpop.f32.mrf.mxu0 }
 0x7e2   : > { %9391 = vst.msk [vmem:[#allocation6 + $0x70] sm:$0xff] %vm9376_vm12, %v11197_v15  ;;  %9423 = vst.msk [vmem:[%s11851_s25 + $0x70] sm:$0xff] %vm9376_vm12, %v11197_v15 }
 0x7e3   : > { %v9297_v62 = vpop.f32.mrf.mxu0 }
 0x7e4   : > { %9389 = vst.msk [vmem:[#allocation6 + $0x60] sm:$0xff] %vm9376_vm12, %v9297_v62  ;;  %9421 = vst.msk [vmem:[%s11851_s25 + $0x60] sm:$0xff] %vm9376_vm12, %v9297_v62  ;;  %v9000_v29 = vpop.permute.xlu0 %8999  ;;  %v8998_v46 = vpop.permute.xlu1 %8997 }
 0x7e5   : > { %9075 = vst.msk [vmem:[#allocation3 + $0x109] sm:$0xff] %vm4745_vm11, %v9000_v29  ;;  %9074 = vst.msk [vmem:[#allocation3 + $0xf9] sm:$0xff] %vm4745_vm11, %v8998_v46  ;;  %v11198_v40 = vpop.f32.mrf.mxu0 }
 0x7e6   : > { %9392 = vst.msk [vmem:[#allocation6 + $0x78] sm:$0xff] %vm9376_vm12, %v11198_v40  ;;  %9424 = vst.msk [vmem:[%s11851_s25 + $0x78] sm:$0xff] %vm9376_vm12, %v11198_v40 }
 0x7e7   : > { %v9300_v34 = vpop.f32.mrf.mxu0 }
 0x7e8   : > { %9390 = vst.msk [vmem:[#allocation6 + $0x68] sm:$0xff] %vm9376_vm12, %v9300_v34  ;;  %9422 = vst.msk [vmem:[%s11851_s25 + $0x68] sm:$0xff] %vm9376_vm12, %v9300_v34  ;;  %v9004_v7 = vpop.permute.xlu0 %9003  ;;  %v9002_v5 = vpop.permute.xlu1 %9001 }
 0x7e9   : > { %9077 = vst.msk [vmem:[#allocation3 + $0x121] sm:$0xff] %vm4745_vm11, %v9004_v7  ;;  %9076 = vst.msk [vmem:[#allocation3 + $0x111] sm:$0xff] %vm4745_vm11, %v9002_v5  ;;  %v11201_v23 = vpop.f32.mrf.mxu0 }
 0x7ea   : > { %9395 = vst.msk [vmem:[#allocation6 + $0x90] sm:$0xff] %vm9376_vm12, %v11201_v23  ;;  %9427 = vst.msk [vmem:[%s11851_s25 + $0x90] sm:$0xff] %vm9376_vm12, %v11201_v23 }
 0x7eb   : > { %v9313_v58 = vpop.f32.mrf.mxu0 }
 0x7ec   : > { %9393 = vst.msk [vmem:[#allocation6 + $0x80] sm:$0xff] %vm9376_vm12, %v9313_v58  ;;  %9425 = vst.msk [vmem:[%s11851_s25 + $0x80] sm:$0xff] %vm9376_vm12, %v9313_v58  ;;  %v9008_v50 = vpop.permute.xlu0 %9007  ;;  %v9006_v20 = vpop.permute.xlu1 %9005 }
 0x7ed   : > { %9079 = vst.msk [vmem:[#allocation3 + $0x139] sm:$0xff] %vm4745_vm11, %v9008_v50  ;;  %9078 = vst.msk [vmem:[#allocation3 + $0x129] sm:$0xff] %vm4745_vm11, %v9006_v20  ;;  %v11202_v21 = vpop.f32.mrf.mxu0 }
 0x7ee   : > { %9396 = vst.msk [vmem:[#allocation6 + $0x98] sm:$0xff] %vm9376_vm12, %v11202_v21  ;;  %9428 = vst.msk [vmem:[%s11851_s25 + $0x98] sm:$0xff] %vm9376_vm12, %v11202_v21 }
 0x7ef   : > { %v9316_v35 = vpop.f32.mrf.mxu0 }
 0x7f0   : > { %9394 = vst.msk [vmem:[#allocation6 + $0x88] sm:$0xff] %vm9376_vm12, %v9316_v35  ;;  %9426 = vst.msk [vmem:[%s11851_s25 + $0x88] sm:$0xff] %vm9376_vm12, %v9316_v35  ;;  %v9012_v43 = vpop.permute.xlu0 %9011  ;;  %v9010_v26 = vpop.permute.xlu1 %9009 }
 0x7f1   : > { %9081 = vst.msk [vmem:[#allocation3 + $0x151] sm:$0xff] %vm4745_vm11, %v9012_v43  ;;  %9080 = vst.msk [vmem:[#allocation3 + $0x141] sm:$0xff] %vm4745_vm11, %v9010_v26  ;;  %v11205_v51 = vpop.f32.mrf.mxu0 }
 0x7f2   : > { %9399 = vst.msk [vmem:[#allocation6 + $0xb0] sm:$0xff] %vm9376_vm12, %v11205_v51  ;;  %9431 = vst.msk [vmem:[%s11851_s25 + $0xb0] sm:$0xff] %vm9376_vm12, %v11205_v51 }
 0x7f3   : > { %v9329_v4 = vpop.f32.mrf.mxu0 }
 0x7f4   : > { %9397 = vst.msk [vmem:[#allocation6 + $0xa0] sm:$0xff] %vm9376_vm12, %v9329_v4  ;;  %9429 = vst.msk [vmem:[%s11851_s25 + $0xa0] sm:$0xff] %vm9376_vm12, %v9329_v4  ;;  %v9016_v10 = vpop.permute.xlu0 %9015  ;;  %v9014_v42 = vpop.permute.xlu1 %9013 }
 0x7f5   : > { %9083 = vst.msk [vmem:[#allocation3 + $0x169] sm:$0xff] %vm4745_vm11, %v9016_v10  ;;  %9082 = vst.msk [vmem:[#allocation3 + $0x159] sm:$0xff] %vm4745_vm11, %v9014_v42  ;;  %v11206_v57 = vpop.f32.mrf.mxu0 }
 0x7f6   : > { %9400 = vst.msk [vmem:[#allocation6 + $0xb8] sm:$0xff] %vm9376_vm12, %v11206_v57  ;;  %9432 = vst.msk [vmem:[%s11851_s25 + $0xb8] sm:$0xff] %vm9376_vm12, %v11206_v57 }
 0x7f7   : > { %v9332_v63 = vpop.f32.mrf.mxu0 }
 0x7f8   : > { %9398 = vst.msk [vmem:[#allocation6 + $0xa8] sm:$0xff] %vm9376_vm12, %v9332_v63  ;;  %9430 = vst.msk [vmem:[%s11851_s25 + $0xa8] sm:$0xff] %vm9376_vm12, %v9332_v63  ;;  %v8804_v8 = vpop.permute.xlu0 %8803  ;;  %v9018_v48 = vpop.permute.xlu1 %9017 }
 0x7f9   : > { %8897 = vst.msk [vmem:[#allocation5 + $0x10] sm:$0xff] %vm4745_vm11, %v8804_v8  ;;  %9084 = vst.msk [vmem:[#allocation3 + $0x171] sm:$0xff] %vm4745_vm11, %v9018_v48  ;;  %v11209_v30 = vpop.f32.mrf.mxu0 }
 0x7fa   : > { %9403 = vst.msk [vmem:[#allocation6 + $0xd0] sm:$0xff] %vm9376_vm12, %v11209_v30  ;;  %9435 = vst.msk [vmem:[%s11851_s25 + $0xd0] sm:$0xff] %vm9376_vm12, %v11209_v30 }
 0x7fb   : > { %v9345_v39 = vpop.f32.mrf.mxu0 }
 0x7fc   : > { %9401 = vst.msk [vmem:[#allocation6 + $0xc0] sm:$0xff] %vm9376_vm12, %v9345_v39  ;;  %9433 = vst.msk [vmem:[%s11851_s25 + $0xc0] sm:$0xff] %vm9376_vm12, %v9345_v39  ;;  %v8800_v1 = vpop.permute.xlu0 %8799  ;;  %v8806_v61 = vpop.permute.xlu1 %8805 }
 0x7fd   : > { %8895 = vst.msk [vmem:[#allocation5] sm:$0xff] %vm4745_vm11, %v8800_v1  ;;  %8898 = vst.msk [vmem:[#allocation5 + $0x18] sm:$0xff] %vm4745_vm11, %v8806_v61  ;;  %v11210_v33 = vpop.f32.mrf.mxu0 }
 0x7fe   : > { %9404 = vst.msk [vmem:[#allocation6 + $0xd8] sm:$0xff] %vm9376_vm12, %v11210_v33  ;;  %9436 = vst.msk [vmem:[%s11851_s25 + $0xd8] sm:$0xff] %vm9376_vm12, %v11210_v33 }
 0x7ff   : > { %v9348_v14 = vpop.f32.mrf.mxu0 }
 0x800   : > { %9402 = vst.msk [vmem:[#allocation6 + $0xc8] sm:$0xff] %vm9376_vm12, %v9348_v14  ;;  %9434 = vst.msk [vmem:[%s11851_s25 + $0xc8] sm:$0xff] %vm9376_vm12, %v9348_v14  ;;  %v8812_v32 = vpop.permute.xlu0 %8811  ;;  %v8802_v6 = vpop.permute.xlu1 %8801 }
 0x801   : > { %8901 = vst.msk [vmem:[#allocation5 + $0x30] sm:$0xff] %vm4745_vm11, %v8812_v32  ;;  %8896 = vst.msk [vmem:[#allocation5 + $0x8] sm:$0xff] %vm4745_vm11, %v8802_v6  ;;  %v11213_v54 = vpop.f32.mrf.mxu0 }
 0x802   : > { %9407 = vst.msk [vmem:[#allocation6 + $0xf0] sm:$0xff] %vm9376_vm12, %v11213_v54  ;;  %9439 = vst.msk [vmem:[%s11851_s25 + $0xf0] sm:$0xff] %vm9376_vm12, %v11213_v54 }
 0x803   : > { %v9361_v53 = vpop.f32.mrf.mxu0 }
 0x804   : > { %9405 = vst.msk [vmem:[#allocation6 + $0xe0] sm:$0xff] %vm9376_vm12, %v9361_v53  ;;  %9437 = vst.msk [vmem:[%s11851_s25 + $0xe0] sm:$0xff] %vm9376_vm12, %v9361_v53  ;;  %v8808_v16 = vpop.permute.xlu0 %8807  ;;  %v8814_v27 = vpop.permute.xlu1 %8813 }
 0x805   : > { %8899 = vst.msk [vmem:[#allocation5 + $0x20] sm:$0xff] %vm4745_vm11, %v8808_v16  ;;  %8902 = vst.msk [vmem:[#allocation5 + $0x38] sm:$0xff] %vm4745_vm11, %v8814_v27  ;;  %v11214_v45 = vpop.f32.mrf.mxu0 }
 0x806   : > { %9408 = vst.msk [vmem:[#allocation6 + $0xf8] sm:$0xff] %vm9376_vm12, %v11214_v45  ;;  %9440 = vst.msk [vmem:[%s11851_s25 + $0xf8] sm:$0xff] %vm9376_vm12, %v11214_v45 }
 0x807   : > { %v9364_v38 = vpop.f32.mrf.mxu0 }
 0x808   : > { %9406 = vst.msk [vmem:[#allocation6 + $0xe8] sm:$0xff] %vm9376_vm12, %v9364_v38  ;;  %9438 = vst.msk [vmem:[%s11851_s25 + $0xe8] sm:$0xff] %vm9376_vm12, %v9364_v38  ;;  %v8820_v18 = vpop.permute.xlu0 %8819  ;;  %v8810_v22 = vpop.permute.xlu1 %8809 }
 0x809   : > { %8905 = vst.msk [vmem:[#allocation5 + $0x50] sm:$0xff] %vm4745_vm11, %v8820_v18  ;;  %8900 = vst.msk [vmem:[#allocation5 + $0x28] sm:$0xff] %vm4745_vm11, %v8810_v22 }
 0x80c   : > { %v8816_v25 = vpop.permute.xlu0 %8815  ;;  %v8822_v36 = vpop.permute.xlu1 %8821 }
 0x80d   : > { %8903 = vst.msk [vmem:[#allocation5 + $0x40] sm:$0xff] %vm4745_vm11, %v8816_v25  ;;  %8906 = vst.msk [vmem:[#allocation5 + $0x58] sm:$0xff] %vm4745_vm11, %v8822_v36 }
 0x810   : > { %v8828_v24 = vpop.permute.xlu0 %8827  ;;  %v8818_v56 = vpop.permute.xlu1 %8817 }
 0x811   : > { %8909 = vst.msk [vmem:[#allocation5 + $0x70] sm:$0xff] %vm4745_vm11, %v8828_v24  ;;  %8904 = vst.msk [vmem:[#allocation5 + $0x48] sm:$0xff] %vm4745_vm11, %v8818_v56 }
 0x814   : > { %v8824_v37 = vpop.permute.xlu0 %8823  ;;  %v8830_v3 = vpop.permute.xlu1 %8829 }
 0x815   : > { %8907 = vst.msk [vmem:[#allocation5 + $0x60] sm:$0xff] %vm4745_vm11, %v8824_v37  ;;  %8910 = vst.msk [vmem:[#allocation5 + $0x78] sm:$0xff] %vm4745_vm11, %v8830_v3 }
 0x818   : > { %v8836_v41 = vpop.permute.xlu0 %8835  ;;  %v8826_v0 = vpop.permute.xlu1 %8825 }
 0x819   : > { %8913 = vst.msk [vmem:[#allocation5 + $0x90] sm:$0xff] %vm4745_vm11, %v8836_v41  ;;  %8908 = vst.msk [vmem:[#allocation5 + $0x68] sm:$0xff] %vm4745_vm11, %v8826_v0 }
 0x81c   : > { %v8832_v52 = vpop.permute.xlu0 %8831  ;;  %v8838_v55 = vpop.permute.xlu1 %8837 }
 0x81d   : > { %8911 = vst.msk [vmem:[#allocation5 + $0x80] sm:$0xff] %vm4745_vm11, %v8832_v52  ;;  %8914 = vst.msk [vmem:[#allocation5 + $0x98] sm:$0xff] %vm4745_vm11, %v8838_v55 }
 0x820   : > { %v8844_v49 = vpop.permute.xlu0 %8843  ;;  %v8834_v47 = vpop.permute.xlu1 %8833 }
 0x821   : > { %8917 = vst.msk [vmem:[#allocation5 + $0xb0] sm:$0xff] %vm4745_vm11, %v8844_v49  ;;  %8912 = vst.msk [vmem:[#allocation5 + $0x88] sm:$0xff] %vm4745_vm11, %v8834_v47 }
 0x824   : > { %v8840_v12 = vpop.permute.xlu0 %8839  ;;  %v8846_v28 = vpop.permute.xlu1 %8845 }
 0x825   : > { %8915 = vst.msk [vmem:[#allocation5 + $0xa0] sm:$0xff] %vm4745_vm11, %v8840_v12  ;;  %8918 = vst.msk [vmem:[#allocation5 + $0xb8] sm:$0xff] %vm4745_vm11, %v8846_v28 }
 0x828   : > { %v8852_v13 = vpop.permute.xlu0 %8851  ;;  %v8842_v2 = vpop.permute.xlu1 %8841 }
 0x829   : > { %8921 = vst.msk [vmem:[#allocation5 + $0xd0] sm:$0xff] %vm4745_vm11, %v8852_v13  ;;  %8916 = vst.msk [vmem:[#allocation5 + $0xa8] sm:$0xff] %vm4745_vm11, %v8842_v2 }
 0x82c   : > { %v8848_v31 = vpop.permute.xlu0 %8847  ;;  %v8854_v44 = vpop.permute.xlu1 %8853 }
 0x82d   : > { %8919 = vst.msk [vmem:[#allocation5 + $0xc0] sm:$0xff] %vm4745_vm11, %v8848_v31  ;;  %8922 = vst.msk [vmem:[#allocation5 + $0xd8] sm:$0xff] %vm4745_vm11, %v8854_v44 }
 0x830   : > { %v8860_v17 = vpop.permute.xlu0 %8859  ;;  %v8850_v19 = vpop.permute.xlu1 %8849 }
 0x831   : > { %8925 = vst.msk [vmem:[#allocation5 + $0xf0] sm:$0xff] %vm4745_vm11, %v8860_v17  ;;  %8920 = vst.msk [vmem:[#allocation5 + $0xc8] sm:$0xff] %vm4745_vm11, %v8850_v19 }
 0x834   : > { %v8856_v59 = vpop.permute.xlu0 %8855  ;;  %v8862_v60 = vpop.permute.xlu1 %8861 }
 0x835   : > { %8923 = vst.msk [vmem:[#allocation5 + $0xe0] sm:$0xff] %vm4745_vm11, %v8856_v59  ;;  %8926 = vst.msk [vmem:[#allocation5 + $0xf8] sm:$0xff] %vm4745_vm11, %v8862_v60 }
 0x838   : > { %v9020_v11 = vpop.permute.xlu0 %9019  ;;  %v8858_v9 = vpop.permute.xlu1 %8857 }
 0x839   : > { %9085 = vst.msk [vmem:[#allocation3 + $0x181] sm:$0xff] %vm4745_vm11, %v9020_v11  ;;  %8924 = vst.msk [vmem:[#allocation5 + $0xe8] sm:$0xff] %vm4745_vm11, %v8858_v9 }
 0x83c   : > { %v9022_v15 = vpop.permute.xlu1 %9021 }
 0x83d   : > { %9086 = vst.msk [vmem:[#allocation3 + $0x189] sm:$0xff] %vm4745_vm11, %v9022_v15 }
 0x83e PF: > { %s15_s22 = sadd.s32 1, %s11764_s22   ;;  %s17183_s18 = smov %s11756_s20 }
 0x83f   : > { %p12_p9 = scmp.ge.s32.totalorder %s15_s22, 12   ;;  %s17184_s19 = smov %s11760_s21 }
 0x840   : > { %s17185_s20 = smov %s17188_s23  ;;  %s17186_s21 = smov %s17192_s24 }
 0x841   :  { %14 = sbr.rel (!%p12_p9) target bundleno = 3 (0x3), region = 97 }

</bundles_post_ra>
